<compile_context>
chip_gen: v5e
topology: v5e:2x2
jax: 0.10.0
libtpu: 0.0.40
codegen_flags: <defaults>
</compile_context>

<pallas_src>
import functools

import jax
import jax.numpy as jnp
from jax.experimental import pallas as pl
from jax.experimental.pallas import tpu as pltpu

_BN_EPS = 1e-5


# ---------------------------------------------------------------------------
# The fused per-image kernel
# ---------------------------------------------------------------------------
def _bottleneck_kernel(x_ref, w1_ref, w2_ref, w3_ref, off1_ref, off2_ref, off3_ref,
                       o_ref, s_ref, m_ref, y2f_ref, y2v_ref, *, H, W, P):
    """One image per grid step.

    x_ref   : (H*W, Cin)        f32  channel-last image slab (also the residual)
    w1_ref  : (Cin, P)          bf16 conv1 weight (BN1 scale folded)
    w2_ref  : (9*P, P)          bf16 conv2 weight, 3x3 taps stacked along K (BN2 scale folded)
    w3_ref  : (P, Cout)         bf16 conv3 weight (BN3 scale folded)
    off*_ref: (1, C)            f32  folded conv-bias + BN offset
    o_ref   : (H*W, Cout)       f32  output slab
    s_ref   : (Lr+2*marg, P)    bf16 scratch: zero-margined flattened padded conv1 output
    m_ref   : (Lr, 9*P)         bf16 scratch: tap-merged conv2 LHS
    y2f_ref : (Lr, P)           bf16 scratch: conv2 output on the padded grid
    y2v_ref : (H*W, P)          bf16 scratch: conv2 output, valid pixels only
    """
    Wr = W + 2                      # padded-row pitch (padded image width)
    Lr = (H + 2) * Wr               # flattened padded-grid length
    marg = Wr + 1                   # zero margin so every tap shift stays in-bounds

    # Margins must be zero for every image (scratch is per-core and not zero-initialised);
    # a ~90 KB VMEM memset is negligible next to the matmuls.
    s_ref[...] = jnp.zeros_like(s_ref)

    # ---- conv1 + bn1 + relu (1x1) -------------------------------------------------
    y1 = jnp.dot(x_ref[...].astype(jnp.bfloat16), w1_ref[...],
                 preferred_element_type=jnp.float32)
    y1 = jnp.maximum(y1 + off1_ref[...], 0.0).astype(jnp.bfloat16)

    # Scatter the valid rows into the zero-padded flattened slab (static offsets; the
    # margins / pad rows / pad columns stay zero).
    for h in range(H):
        base = marg + (h + 1) * Wr + 1
        s_ref[base:base + W, :] = y1[h * W:(h + 1) * W, :]

    # ---- conv2 + bn2 + relu (3x3, stride 1, pad 1) --------------------------------
    # Tap-merged formulation: LHS column-block t (t = kh*3+kw) is the slab row-shifted by
    # (kh-1)*Wr + (kw-1), so a single (Lr, 9P) x (9P, P) MXU matmul computes and accumulates
    # all nine taps.  Padded-grid border rows are garbage (flat-index wraparound) but are
    # cropped below; valid pixels never wrap.
    for kh in range(3):
        for kw in range(3):
            t = kh * 3 + kw
            src = marg + (kh - 1) * Wr + (kw - 1)
            m_ref[:, t * P:(t + 1) * P] = s_ref[src:src + Lr, :]

    y2 = jnp.dot(m_ref[...], w2_ref[...], preferred_element_type=jnp.float32)
    y2f_ref[...] = jnp.maximum(y2 + off2_ref[...], 0.0).astype(jnp.bfloat16)

    # Crop the padded-grid border back to the valid H*W pixels (in-VMEM, no HBM traffic).
    for h in range(H):
        r0 = (h + 1) * Wr + 1
        y2v_ref[h * W:(h + 1) * W, :] = y2f_ref[r0:r0 + W, :]

    # ---- conv3 + bn3 + residual + relu (1x1) ---------------------------------------
    y3 = jnp.dot(y2v_ref[...], w3_ref[...], preferred_element_type=jnp.float32)
    o_ref[...] = jnp.maximum(y3 + off3_ref[...] + x_ref[...], 0.0).astype(o_ref.dtype)


# ---------------------------------------------------------------------------
# JAX glue: fold conv bias + BatchNorm (inference) into (bf16 weights, f32 offset)
# ---------------------------------------------------------------------------
def _bn_fold(bias, bn):
    gamma, beta, mean, var = bn
    scale = gamma / jnp.sqrt(var + _BN_EPS)
    offset = beta + (bias - mean) * scale
    return scale, offset


def _prep_1x1(w, bias, bn):
    cout, cin = w.shape[:2]
    scale, offset = _bn_fold(bias, bn)
    wm = jnp.transpose(w.reshape(cout, cin), (1, 0)) * scale[None, :]          # (Cin, Cout)
    return wm.astype(jnp.bfloat16), offset.reshape(1, cout).astype(jnp.float32)


def _prep_3x3(w, bias, bn):
    cout, cin = w.shape[:2]
    scale, offset = _bn_fold(bias, bn)
    # (Cout, Cin, 3, 3) -> (KH, KW, Cin, Cout) -> (9*Cin, Cout), tap index t = kh*3 + kw
    wt = jnp.transpose(w, (2, 3, 1, 0)).reshape(9 * cin, cout) * scale[None, :]
    return wt.astype(jnp.bfloat16), offset.reshape(1, cout).astype(jnp.float32)


# ---------------------------------------------------------------------------
# Forward passes
# ---------------------------------------------------------------------------
def bottleneck_forward_nhwc(x_nhwc, p):
    """Fused bottleneck, NHWC in / NHWC out (preferred layout when chaining blocks)."""
    N, H, W, Cin = x_nhwc.shape
    w1, off1 = _prep_1x1(p['conv1_w'], p['conv1_b'], p['bn1'])
    w2, off2 = _prep_3x3(p['conv2_w'], p['conv2_b'], p['bn2'])
    w3, off3 = _prep_1x1(p['conv3_w'], p['conv3_b'], p['bn3'])
    P = w1.shape[1]
    Cout = w3.shape[1]
    assert Cout == Cin, "downsample=None requires matching residual channels"

    HW = H * W
    Wr = W + 2
    Lr = (H + 2) * Wr
    marg = Wr + 1
    x2 = x_nhwc.reshape(N, HW, Cin).astype(jnp.float32)

    flops = N * 2 * (HW * Cin * P + Lr * 9 * P * P + HW * P * Cout)
    bytes_accessed = (N * HW * (Cin + Cout) * 4
                      + (Cin * P + 9 * P * P + P * Cout) * 2
                      + (2 * P + Cout) * 4)

    out = pl.pallas_call(
        functools.partial(_bottleneck_kernel, H=H, W=W, P=P),
        out_shape=jax.ShapeDtypeStruct((N, HW, Cout), jnp.float32),
        grid_spec=pltpu.PrefetchScalarGridSpec(
            num_scalar_prefetch=0,
            grid=(N,),
            in_specs=[
                pl.BlockSpec((None, HW, Cin), lambda n: (n, 0, 0)),     # image slab
                pl.BlockSpec((Cin, P), lambda n: (0, 0)),               # w1
                pl.BlockSpec((9 * P, P), lambda n: (0, 0)),             # w2 (tap-merged)
                pl.BlockSpec((P, Cout), lambda n: (0, 0)),              # w3
                pl.BlockSpec((1, P), lambda n: (0, 0)),                 # off1
                pl.BlockSpec((1, P), lambda n: (0, 0)),                 # off2
                pl.BlockSpec((1, Cout), lambda n: (0, 0)),              # off3
            ],
            out_specs=pl.BlockSpec((None, HW, Cout), lambda n: (n, 0, 0)),
            scratch_shapes=[
                pltpu.VMEM((Lr + 2 * marg, P), jnp.bfloat16),   # padded conv1 slab
                pltpu.VMEM((Lr, 9 * P), jnp.bfloat16),          # tap-merged conv2 LHS
                pltpu.VMEM((Lr, P), jnp.bfloat16),              # conv2 out (padded grid)
                pltpu.VMEM((HW, P), jnp.bfloat16),              # conv2 out (valid pixels)
            ],
        ),
        compiler_params=pltpu.CompilerParams(dimension_semantics=("parallel",)),
        cost_estimate=pl.CostEstimate(flops=flops, transcendentals=0,
                                      bytes_accessed=bytes_accessed),
    )(x2, w1, w2, w3, off1, off2, off3)
    return out.reshape(N, H, W, Cout)


def bottleneck_forward(x_nchw, p, *, stride=1):
    """PyTorch-layout wrapper (NCHW in / NCHW out).  When stacking blocks, convert the layout
    once at network boundaries and call bottleneck_forward_nhwc directly instead."""
    # TODO(synk): stride > 1 / learned downsample branch not implemented (reference uses
    # stride=1, downsample=None so residual = x).
    assert stride == 1
    x = jnp.transpose(x_nchw, (0, 2, 3, 1))
    y = bottleneck_forward_nhwc(x, p)
    return jnp.transpose(y, (0, 3, 1, 2))


# ---------------------------------------------------------------------------
# Pure-JAX reference (mirrors the PyTorch forward, BN in inference mode)
# ---------------------------------------------------------------------------
def reference_forward(x, p):
    prec = jax.lax.Precision.HIGHEST

    def conv(h, w, b, pad):
        y = jax.lax.conv_general_dilated(h, w, (1, 1), [(pad, pad), (pad, pad)],
                                         dimension_numbers=('NCHW', 'OIHW', 'NCHW'),
                                         precision=prec)
        return y + b[None, :, None, None]

    def bn(h, bnp):
        g, bta, m, v = bnp
        s = g / jnp.sqrt(v + _BN_EPS)
        return (h - m[None, :, None, None]) * s[None, :, None, None] + bta[None, :, None, None]

    out = jax.nn.relu(bn(conv(x, p['conv1_w'], p['conv1_b'], 0), p['bn1']))
    out = jax.nn.relu(bn(conv(out, p['conv2_w'], p['conv2_b'], 1), p['bn2']))
    out = bn(conv(out, p['conv3_w'], p['conv3_b'], 0), p['bn3'])
    return jax.nn.relu(out + x)


# ---------------------------------------------------------------------------
# Deterministic parameter initialization (shapes per nn.Module __init__, bias=True convs)
# ---------------------------------------------------------------------------
def init_params(key, inplanes, planes):
    keys = iter(jax.random.split(key, 32))

    def nrm(shape, s=0.05):
        return s * jax.random.normal(next(keys), shape, jnp.float32)

    def bn_params(c):
        gamma = 1.0 + 0.1 * jax.random.normal(next(keys), (c,), jnp.float32)
        beta = 0.1 * jax.random.normal(next(keys), (c,), jnp.float32)
        mean = 0.1 * jax.random.normal(next(keys), (c,), jnp.float32)
        var = 1.0 + 0.1 * jnp.abs(jax.random.normal(next(keys), (c,), jnp.float32))
        return (gamma, beta, mean, var)

    p = {}
    p['conv1_w'] = nrm((planes, inplanes, 1, 1))
    p['conv1_b'] = nrm((planes,))
    p['bn1'] = bn_params(planes)
    p['conv2_w'] = nrm((planes, planes, 3, 3))
    p['conv2_b'] = nrm((planes,))
    p['bn2'] = bn_params(planes)
    p['conv3_w'] = nrm((planes * 4, planes, 1, 1))
    p['conv3_b'] = nrm((planes * 4,))
    p['bn3'] = bn_params(planes * 4)
    return p


if __name__ == "__main__":
    planes = 128                 # lane-dense channel counts (multiples of 128)
    inplanes = planes * 4        # downsample=None  =>  residual shape must match output
    N, H, W = 4, 16, 16

    key = jax.random.PRNGKey(0)
    kx, kp = jax.random.split(key)
    x = jax.random.normal(kx, (N, inplanes, H, W), jnp.float32)
    params = init_params(kp, inplanes, planes)

    fwd = jax.jit(bottleneck_forward)
    out = fwd(x, params)
    jax.block_until_ready(out)

    assert out.shape == (N, inplanes, H, W), out.shape
    assert bool(jnp.all(jnp.isfinite(out)))

    # correctness vs. an f32 reference (bf16 MXU operands => loose tolerance)
    ref = reference_forward(x, params)
    assert bool(jnp.allclose(out, ref, rtol=5e-2, atol=1e-1)), \
        float(jnp.max(jnp.abs(out - ref)))

    print("KERNEL_OK")
</pallas_src>

<mosaic_0001>
module attributes {stable_mosaic.version = 11 : i64} {
  func.func @_bottleneck_kernel(%arg0: i32, %arg1: memref<1x256x512xf32, #tpu.memory_space<vmem>>, %arg2: memref<512x128xbf16, #tpu.memory_space<vmem>>, %arg3: memref<1152x128xbf16, #tpu.memory_space<vmem>>, %arg4: memref<128x512xbf16, #tpu.memory_space<vmem>>, %arg5: memref<1x128xf32, #tpu.memory_space<vmem>>, %arg6: memref<1x128xf32, #tpu.memory_space<vmem>>, %arg7: memref<1x512xf32, #tpu.memory_space<vmem>>, %arg8: memref<1x256x512xf32, #tpu.memory_space<vmem>>, %arg9: memref<362x128xbf16, #tpu.memory_space<vmem>>, %arg10: memref<324x1152xbf16, #tpu.memory_space<vmem>>, %arg11: memref<324x128xbf16, #tpu.memory_space<vmem>>, %arg12: memref<256x128xbf16, #tpu.memory_space<vmem>>) attributes {dimension_semantics = [#tpu.dimension_semantics<parallel>], iteration_bounds = array<i64: 4>, scalar_prefetch = 0 : i64, scratch_operands = 4 : i64, tpu.core_type = #tpu.core_type<tc>, window_params = [{transform_indices = @transform_0, window_bounds = array<i64: 1, 256, 512>}, {pipeline_mode = #tpu.pipeline_mode<synchronous>, transform_indices = @transform_1, window_bounds = array<i64: 512, 128>}, {pipeline_mode = #tpu.pipeline_mode<synchronous>, transform_indices = @transform_2, window_bounds = array<i64: 1152, 128>}, {pipeline_mode = #tpu.pipeline_mode<synchronous>, transform_indices = @transform_3, window_bounds = array<i64: 128, 512>}, {pipeline_mode = #tpu.pipeline_mode<synchronous>, transform_indices = @transform_4, window_bounds = array<i64: 1, 128>}, {pipeline_mode = #tpu.pipeline_mode<synchronous>, transform_indices = @transform_5, window_bounds = array<i64: 1, 128>}, {pipeline_mode = #tpu.pipeline_mode<synchronous>, transform_indices = @transform_6, window_bounds = array<i64: 1, 512>}, {transform_indices = @transform_7, window_bounds = array<i64: 1, 256, 512>}]} {
    %cst = arith.constant 0.000000e+00 : bf16
    %0 = vector.broadcast %cst : bf16 to vector<362x128xbf16>
    %c0 = arith.constant 0 : index
    %c0_0 = arith.constant 0 : index
    %1 = vector.load %arg9[%c0, %c0_0] : memref<362x128xbf16, #tpu.memory_space<vmem>>, vector<362x128xbf16>
    tpu.vector_store %arg9[%c0, %c0_0], %0 {strides = array<i32>} : memref<362x128xbf16, #tpu.memory_space<vmem>>, vector<362x128xbf16>,
    %c0_1 = arith.constant 0 : index
    %c0_2 = arith.constant 0 : index
    %c0_3 = arith.constant 0 : index
    %2 = vector.load %arg1[%c0_1, %c0_2, %c0_3] : memref<1x256x512xf32, #tpu.memory_space<vmem>>, vector<1x256x512xf32>
    %3 = vector.shape_cast %2 : vector<1x256x512xf32> to vector<256x512xf32>
    %4 = arith.truncf %3 : vector<256x512xf32> to vector<256x512xbf16>
    %c0_4 = arith.constant 0 : index
    %c0_5 = arith.constant 0 : index
    %5 = vector.load %arg2[%c0_4, %c0_5] : memref<512x128xbf16, #tpu.memory_space<vmem>>, vector<512x128xbf16>
    %cst_6 = arith.constant dense<0.000000e+00> : vector<256x128xf32>
    %6 = tpu.matmul %4, %5, %cst_6 {dimension_numbers = #tpu.dot_dimension_numbers<[1], [0], [0], [1], [0, 0, 1, 1], [], []>} : vector<256x512xbf16>, vector<512x128xbf16>, vector<256x128xf32> -> vector<256x128xf32>
    %c0_7 = arith.constant 0 : index
    %c0_8 = arith.constant 0 : index
    %7 = vector.load %arg5[%c0_7, %c0_8] : memref<1x128xf32, #tpu.memory_space<vmem>>, vector<1x128xf32>
    %8 = vector.broadcast %7 : vector<1x128xf32> to vector<256x128xf32>
    %9 = arith.addf %6, %8 : vector<256x128xf32>
    %cst_9 = arith.constant 0.000000e+00 : f32
    %10 = vector.broadcast %cst_9 : f32 to vector<256x128xf32>
    %11 = arith.maximumf %9, %10 : vector<256x128xf32>
    %12 = arith.truncf %11 : vector<256x128xf32> to vector<256x128xbf16>
    %13 = vector.extract_strided_slice %12 {offsets = [0, 0], sizes = [16, 128], strides = [1, 1]} : vector<256x128xbf16> to vector<16x128xbf16>
    %c38 = arith.constant 38 : index
    %c0_10 = arith.constant 0 : index
    %14 = vector.load %arg9[%c38, %c0_10] : memref<362x128xbf16, #tpu.memory_space<vmem>>, vector<16x128xbf16>
    tpu.vector_store %arg9[%c38, %c0_10], %13 {strides = array<i32>} : memref<362x128xbf16, #tpu.memory_space<vmem>>, vector<16x128xbf16>,
    %15 = vector.extract_strided_slice %12 {offsets = [16, 0], sizes = [16, 128], strides = [1, 1]} : vector<256x128xbf16> to vector<16x128xbf16>
    %c56 = arith.constant 56 : index
    %c0_11 = arith.constant 0 : index
    %16 = vector.load %arg9[%c56, %c0_11] : memref<362x128xbf16, #tpu.memory_space<vmem>>, vector<16x128xbf16>
    tpu.vector_store %arg9[%c56, %c0_11], %15 {strides = array<i32>} : memref<362x128xbf16, #tpu.memory_space<vmem>>, vector<16x128xbf16>,
    %17 = vector.extract_strided_slice %12 {offsets = [32, 0], sizes = [16, 128], strides = [1, 1]} : vector<256x128xbf16> to vector<16x128xbf16>
    %c74 = arith.constant 74 : index
    %c0_12 = arith.constant 0 : index
    %18 = vector.load %arg9[%c74, %c0_12] : memref<362x128xbf16, #tpu.memory_space<vmem>>, vector<16x128xbf16>
    tpu.vector_store %arg9[%c74, %c0_12], %17 {strides = array<i32>} : memref<362x128xbf16, #tpu.memory_space<vmem>>, vector<16x128xbf16>,
    %19 = vector.extract_strided_slice %12 {offsets = [48, 0], sizes = [16, 128], strides = [1, 1]} : vector<256x128xbf16> to vector<16x128xbf16>
    %c92 = arith.constant 92 : index
    %c0_13 = arith.constant 0 : index
    %20 = vector.load %arg9[%c92, %c0_13] : memref<362x128xbf16, #tpu.memory_space<vmem>>, vector<16x128xbf16>
    tpu.vector_store %arg9[%c92, %c0_13], %19 {strides = array<i32>} : memref<362x128xbf16, #tpu.memory_space<vmem>>, vector<16x128xbf16>,
    %21 = vector.extract_strided_slice %12 {offsets = [64, 0], sizes = [16, 128], strides = [1, 1]} : vector<256x128xbf16> to vector<16x128xbf16>
    %c110 = arith.constant 110 : index
    %c0_14 = arith.constant 0 : index
    %22 = vector.load %arg9[%c110, %c0_14] : memref<362x128xbf16, #tpu.memory_space<vmem>>, vector<16x128xbf16>
    tpu.vector_store %arg9[%c110, %c0_14], %21 {strides = array<i32>} : memref<362x128xbf16, #tpu.memory_space<vmem>>, vector<16x128xbf16>,
    %23 = vector.extract_strided_slice %12 {offsets = [80, 0], sizes = [16, 128], strides = [1, 1]} : vector<256x128xbf16> to vector<16x128xbf16>
    %c128 = arith.constant 128 : index
    %c0_15 = arith.constant 0 : index
    %24 = vector.load %arg9[%c128, %c0_15] : memref<362x128xbf16, #tpu.memory_space<vmem>>, vector<16x128xbf16>
    tpu.vector_store %arg9[%c128, %c0_15], %23 {strides = array<i32>} : memref<362x128xbf16, #tpu.memory_space<vmem>>, vector<16x128xbf16>,
    %25 = vector.extract_strided_slice %12 {offsets = [96, 0], sizes = [16, 128], strides = [1, 1]} : vector<256x128xbf16> to vector<16x128xbf16>
    %c146 = arith.constant 146 : index
    %c0_16 = arith.constant 0 : index
    %26 = vector.load %arg9[%c146, %c0_16] : memref<362x128xbf16, #tpu.memory_space<vmem>>, vector<16x128xbf16>
    tpu.vector_store %arg9[%c146, %c0_16], %25 {strides = array<i32>} : memref<362x128xbf16, #tpu.memory_space<vmem>>, vector<16x128xbf16>,
    %27 = vector.extract_strided_slice %12 {offsets = [112, 0], sizes = [16, 128], strides = [1, 1]} : vector<256x128xbf16> to vector<16x128xbf16>
    %c164 = arith.constant 164 : index
    %c0_17 = arith.constant 0 : index
    %28 = vector.load %arg9[%c164, %c0_17] : memref<362x128xbf16, #tpu.memory_space<vmem>>, vector<16x128xbf16>
    tpu.vector_store %arg9[%c164, %c0_17], %27 {strides = array<i32>} : memref<362x128xbf16, #tpu.memory_space<vmem>>, vector<16x128xbf16>,
    %29 = vector.extract_strided_slice %12 {offsets = [128, 0], sizes = [16, 128], strides = [1, 1]} : vector<256x128xbf16> to vector<16x128xbf16>
    %c182 = arith.constant 182 : index
    %c0_18 = arith.constant 0 : index
    %30 = vector.load %arg9[%c182, %c0_18] : memref<362x128xbf16, #tpu.memory_space<vmem>>, vector<16x128xbf16>
    tpu.vector_store %arg9[%c182, %c0_18], %29 {strides = array<i32>} : memref<362x128xbf16, #tpu.memory_space<vmem>>, vector<16x128xbf16>,
    %31 = vector.extract_strided_slice %12 {offsets = [144, 0], sizes = [16, 128], strides = [1, 1]} : vector<256x128xbf16> to vector<16x128xbf16>
    %c200 = arith.constant 200 : index
    %c0_19 = arith.constant 0 : index
    %32 = vector.load %arg9[%c200, %c0_19] : memref<362x128xbf16, #tpu.memory_space<vmem>>, vector<16x128xbf16>
    tpu.vector_store %arg9[%c200, %c0_19], %31 {strides = array<i32>} : memref<362x128xbf16, #tpu.memory_space<vmem>>, vector<16x128xbf16>,
    %33 = vector.extract_strided_slice %12 {offsets = [160, 0], sizes = [16, 128], strides = [1, 1]} : vector<256x128xbf16> to vector<16x128xbf16>
    %c218 = arith.constant 218 : index
    %c0_20 = arith.constant 0 : index
    %34 = vector.load %arg9[%c218, %c0_20] : memref<362x128xbf16, #tpu.memory_space<vmem>>, vector<16x128xbf16>
    tpu.vector_store %arg9[%c218, %c0_20], %33 {strides = array<i32>} : memref<362x128xbf16, #tpu.memory_space<vmem>>, vector<16x128xbf16>,
    %35 = vector.extract_strided_slice %12 {offsets = [176, 0], sizes = [16, 128], strides = [1, 1]} : vector<256x128xbf16> to vector<16x128xbf16>
    %c236 = arith.constant 236 : index
    %c0_21 = arith.constant 0 : index
    %36 = vector.load %arg9[%c236, %c0_21] : memref<362x128xbf16, #tpu.memory_space<vmem>>, vector<16x128xbf16>
    tpu.vector_store %arg9[%c236, %c0_21], %35 {strides = array<i32>} : memref<362x128xbf16, #tpu.memory_space<vmem>>, vector<16x128xbf16>,
    %37 = vector.extract_strided_slice %12 {offsets = [192, 0], sizes = [16, 128], strides = [1, 1]} : vector<256x128xbf16> to vector<16x128xbf16>
    %c254 = arith.constant 254 : index
    %c0_22 = arith.constant 0 : index
    %38 = vector.load %arg9[%c254, %c0_22] : memref<362x128xbf16, #tpu.memory_space<vmem>>, vector<16x128xbf16>
    tpu.vector_store %arg9[%c254, %c0_22], %37 {strides = array<i32>} : memref<362x128xbf16, #tpu.memory_space<vmem>>, vector<16x128xbf16>,
    %39 = vector.extract_strided_slice %12 {offsets = [208, 0], sizes = [16, 128], strides = [1, 1]} : vector<256x128xbf16> to vector<16x128xbf16>
    %c272 = arith.constant 272 : index
    %c0_23 = arith.constant 0 : index
    %40 = vector.load %arg9[%c272, %c0_23] : memref<362x128xbf16, #tpu.memory_space<vmem>>, vector<16x128xbf16>
    tpu.vector_store %arg9[%c272, %c0_23], %39 {strides = array<i32>} : memref<362x128xbf16, #tpu.memory_space<vmem>>, vector<16x128xbf16>,
    %41 = vector.extract_strided_slice %12 {offsets = [224, 0], sizes = [16, 128], strides = [1, 1]} : vector<256x128xbf16> to vector<16x128xbf16>
    %c290 = arith.constant 290 : index
    %c0_24 = arith.constant 0 : index
    %42 = vector.load %arg9[%c290, %c0_24] : memref<362x128xbf16, #tpu.memory_space<vmem>>, vector<16x128xbf16>
    tpu.vector_store %arg9[%c290, %c0_24], %41 {strides = array<i32>} : memref<362x128xbf16, #tpu.memory_space<vmem>>, vector<16x128xbf16>,
    %43 = vector.extract_strided_slice %12 {offsets = [240, 0], sizes = [16, 128], strides = [1, 1]} : vector<256x128xbf16> to vector<16x128xbf16>
    %c308 = arith.constant 308 : index
    %c0_25 = arith.constant 0 : index
    %44 = vector.load %arg9[%c308, %c0_25] : memref<362x128xbf16, #tpu.memory_space<vmem>>, vector<16x128xbf16>
    tpu.vector_store %arg9[%c308, %c0_25], %43 {strides = array<i32>} : memref<362x128xbf16, #tpu.memory_space<vmem>>, vector<16x128xbf16>,
    %c0_26 = arith.constant 0 : index
    %c0_27 = arith.constant 0 : index
    %45 = vector.load %arg9[%c0_26, %c0_27] : memref<362x128xbf16, #tpu.memory_space<vmem>>, vector<324x128xbf16>
    %c0_28 = arith.constant 0 : index
    %c0_29 = arith.constant 0 : index
    %46 = vector.load %arg10[%c0_28, %c0_29] : memref<324x1152xbf16, #tpu.memory_space<vmem>>, vector<324x128xbf16>
    tpu.vector_store %arg10[%c0_28, %c0_29], %45 {strides = array<i32>} : memref<324x1152xbf16, #tpu.memory_space<vmem>>, vector<324x128xbf16>,
    %c1 = arith.constant 1 : index
    %c0_30 = arith.constant 0 : index
    %47 = vector.load %arg9[%c1, %c0_30] : memref<362x128xbf16, #tpu.memory_space<vmem>>, vector<324x128xbf16>
    %c0_31 = arith.constant 0 : index
    %c128_32 = arith.constant 128 : index
    %48 = vector.load %arg10[%c0_31, %c128_32] : memref<324x1152xbf16, #tpu.memory_space<vmem>>, vector<324x128xbf16>
    tpu.vector_store %arg10[%c0_31, %c128_32], %47 {strides = array<i32>} : memref<324x1152xbf16, #tpu.memory_space<vmem>>, vector<324x128xbf16>,
    %c2 = arith.constant 2 : index
    %c0_33 = arith.constant 0 : index
    %49 = vector.load %arg9[%c2, %c0_33] : memref<362x128xbf16, #tpu.memory_space<vmem>>, vector<324x128xbf16>
    %c0_34 = arith.constant 0 : index
    %c256 = arith.constant 256 : index
    %50 = vector.load %arg10[%c0_34, %c256] : memref<324x1152xbf16, #tpu.memory_space<vmem>>, vector<324x128xbf16>
    tpu.vector_store %arg10[%c0_34, %c256], %49 {strides = array<i32>} : memref<324x1152xbf16, #tpu.memory_space<vmem>>, vector<324x128xbf16>,
    %c18 = arith.constant 18 : index
    %c0_35 = arith.constant 0 : index
    %51 = vector.load %arg9[%c18, %c0_35] : memref<362x128xbf16, #tpu.memory_space<vmem>>, vector<324x128xbf16>
    %c0_36 = arith.constant 0 : index
    %c384 = arith.constant 384 : index
    %52 = vector.load %arg10[%c0_36, %c384] : memref<324x1152xbf16, #tpu.memory_space<vmem>>, vector<324x128xbf16>
    tpu.vector_store %arg10[%c0_36, %c384], %51 {strides = array<i32>} : memref<324x1152xbf16, #tpu.memory_space<vmem>>, vector<324x128xbf16>,
    %c19 = arith.constant 19 : index
    %c0_37 = arith.constant 0 : index
    %53 = vector.load %arg9[%c19, %c0_37] : memref<362x128xbf16, #tpu.memory_space<vmem>>, vector<324x128xbf16>
    %c0_38 = arith.constant 0 : index
    %c512 = arith.constant 512 : index
    %54 = vector.load %arg10[%c0_38, %c512] : memref<324x1152xbf16, #tpu.memory_space<vmem>>, vector<324x128xbf16>
    tpu.vector_store %arg10[%c0_38, %c512], %53 {strides = array<i32>} : memref<324x1152xbf16, #tpu.memory_space<vmem>>, vector<324x128xbf16>,
    %c20 = arith.constant 20 : index
    %c0_39 = arith.constant 0 : index
    %55 = vector.load %arg9[%c20, %c0_39] : memref<362x128xbf16, #tpu.memory_space<vmem>>, vector<324x128xbf16>
    %c0_40 = arith.constant 0 : index
    %c640 = arith.constant 640 : index
    %56 = vector.load %arg10[%c0_40, %c640] : memref<324x1152xbf16, #tpu.memory_space<vmem>>, vector<324x128xbf16>
    tpu.vector_store %arg10[%c0_40, %c640], %55 {strides = array<i32>} : memref<324x1152xbf16, #tpu.memory_space<vmem>>, vector<324x128xbf16>,
    %c36 = arith.constant 36 : index
    %c0_41 = arith.constant 0 : index
    %57 = vector.load %arg9[%c36, %c0_41] : memref<362x128xbf16, #tpu.memory_space<vmem>>, vector<324x128xbf16>
    %c0_42 = arith.constant 0 : index
    %c768 = arith.constant 768 : index
    %58 = vector.load %arg10[%c0_42, %c768] : memref<324x1152xbf16, #tpu.memory_space<vmem>>, vector<324x128xbf16>
    tpu.vector_store %arg10[%c0_42, %c768], %57 {strides = array<i32>} : memref<324x1152xbf16, #tpu.memory_space<vmem>>, vector<324x128xbf16>,
    %c37 = arith.constant 37 : index
    %c0_43 = arith.constant 0 : index
    %59 = vector.load %arg9[%c37, %c0_43] : memref<362x128xbf16, #tpu.memory_space<vmem>>, vector<324x128xbf16>
    %c0_44 = arith.constant 0 : index
    %c896 = arith.constant 896 : index
    %60 = vector.load %arg10[%c0_44, %c896] : memref<324x1152xbf16, #tpu.memory_space<vmem>>, vector<324x128xbf16>
    tpu.vector_store %arg10[%c0_44, %c896], %59 {strides = array<i32>} : memref<324x1152xbf16, #tpu.memory_space<vmem>>, vector<324x128xbf16>,
    %c38_45 = arith.constant 38 : index
    %c0_46 = arith.constant 0 : index
    %61 = vector.load %arg9[%c38_45, %c0_46] : memref<362x128xbf16, #tpu.memory_space<vmem>>, vector<324x128xbf16>
    %c0_47 = arith.constant 0 : index
    %c1024 = arith.constant 1024 : index
    %62 = vector.load %arg10[%c0_47, %c1024] : memref<324x1152xbf16, #tpu.memory_space<vmem>>, vector<324x128xbf16>
    tpu.vector_store %arg10[%c0_47, %c1024], %61 {strides = array<i32>} : memref<324x1152xbf16, #tpu.memory_space<vmem>>, vector<324x128xbf16>,
    %c0_48 = arith.constant 0 : index
    %c0_49 = arith.constant 0 : index
    %63 = vector.load %arg10[%c0_48, %c0_49] : memref<324x1152xbf16, #tpu.memory_space<vmem>>, vector<324x1152xbf16>
    %c0_50 = arith.constant 0 : index
    %c0_51 = arith.constant 0 : index
    %64 = vector.load %arg3[%c0_50, %c0_51] : memref<1152x128xbf16, #tpu.memory_space<vmem>>, vector<1152x128xbf16>
    %cst_52 = arith.constant dense<0.000000e+00> : vector<324x128xf32>
    %65 = tpu.matmul %63, %64, %cst_52 {dimension_numbers = #tpu.dot_dimension_numbers<[1], [0], [0], [1], [0, 0, 1, 1], [], []>} : vector<324x1152xbf16>, vector<1152x128xbf16>, vector<324x128xf32> -> vector<324x128xf32>
    %c0_53 = arith.constant 0 : index
    %c0_54 = arith.constant 0 : index
    %66 = vector.load %arg6[%c0_53, %c0_54] : memref<1x128xf32, #tpu.memory_space<vmem>>, vector<1x128xf32>
    %67 = vector.broadcast %66 : vector<1x128xf32> to vector<324x128xf32>
    %68 = arith.addf %65, %67 : vector<324x128xf32>
    %cst_55 = arith.constant 0.000000e+00 : f32
    %69 = vector.broadcast %cst_55 : f32 to vector<324x128xf32>
    %70 = arith.maximumf %68, %69 : vector<324x128xf32>
    %71 = arith.truncf %70 : vector<324x128xf32> to vector<324x128xbf16>
    %c0_56 = arith.constant 0 : index
    %c0_57 = arith.constant 0 : index
    %72 = vector.load %arg11[%c0_56, %c0_57] : memref<324x128xbf16, #tpu.memory_space<vmem>>, vector<324x128xbf16>
    tpu.vector_store %arg11[%c0_56, %c0_57], %71 {strides = array<i32>} : memref<324x128xbf16, #tpu.memory_space<vmem>>, vector<324x128xbf16>,
    %c19_58 = arith.constant 19 : index
    %c0_59 = arith.constant 0 : index
    %73 = vector.load %arg11[%c19_58, %c0_59] : memref<324x128xbf16, #tpu.memory_space<vmem>>, vector<16x128xbf16>
    %c0_60 = arith.constant 0 : index
    %c0_61 = arith.constant 0 : index
    %74 = vector.load %arg12[%c0_60, %c0_61] : memref<256x128xbf16, #tpu.memory_space<vmem>>, vector<16x128xbf16>
    tpu.vector_store %arg12[%c0_60, %c0_61], %73 {strides = array<i32>} : memref<256x128xbf16, #tpu.memory_space<vmem>>, vector<16x128xbf16>,
    %c37_62 = arith.constant 37 : index
    %c0_63 = arith.constant 0 : index
    %75 = vector.load %arg11[%c37_62, %c0_63] : memref<324x128xbf16, #tpu.memory_space<vmem>>, vector<16x128xbf16>
    %c16 = arith.constant 16 : index
    %c0_64 = arith.constant 0 : index
    %76 = vector.load %arg12[%c16, %c0_64] : memref<256x128xbf16, #tpu.memory_space<vmem>>, vector<16x128xbf16>
    tpu.vector_store %arg12[%c16, %c0_64], %75 {strides = array<i32>} : memref<256x128xbf16, #tpu.memory_space<vmem>>, vector<16x128xbf16>,
    %c55 = arith.constant 55 : index
    %c0_65 = arith.constant 0 : index
    %77 = vector.load %arg11[%c55, %c0_65] : memref<324x128xbf16, #tpu.memory_space<vmem>>, vector<16x128xbf16>
    %c32 = arith.constant 32 : index
    %c0_66 = arith.constant 0 : index
    %78 = vector.load %arg12[%c32, %c0_66] : memref<256x128xbf16, #tpu.memory_space<vmem>>, vector<16x128xbf16>
    tpu.vector_store %arg12[%c32, %c0_66], %77 {strides = array<i32>} : memref<256x128xbf16, #tpu.memory_space<vmem>>, vector<16x128xbf16>,
    %c73 = arith.constant 73 : index
    %c0_67 = arith.constant 0 : index
    %79 = vector.load %arg11[%c73, %c0_67] : memref<324x128xbf16, #tpu.memory_space<vmem>>, vector<16x128xbf16>
    %c48 = arith.constant 48 : index
    %c0_68 = arith.constant 0 : index
    %80 = vector.load %arg12[%c48, %c0_68] : memref<256x128xbf16, #tpu.memory_space<vmem>>, vector<16x128xbf16>
    tpu.vector_store %arg12[%c48, %c0_68], %79 {strides = array<i32>} : memref<256x128xbf16, #tpu.memory_space<vmem>>, vector<16x128xbf16>,
    %c91 = arith.constant 91 : index
    %c0_69 = arith.constant 0 : index
    %81 = vector.load %arg11[%c91, %c0_69] : memref<324x128xbf16, #tpu.memory_space<vmem>>, vector<16x128xbf16>
    %c64 = arith.constant 64 : index
    %c0_70 = arith.constant 0 : index
    %82 = vector.load %arg12[%c64, %c0_70] : memref<256x128xbf16, #tpu.memory_space<vmem>>, vector<16x128xbf16>
    tpu.vector_store %arg12[%c64, %c0_70], %81 {strides = array<i32>} : memref<256x128xbf16, #tpu.memory_space<vmem>>, vector<16x128xbf16>,
    %c109 = arith.constant 109 : index
    %c0_71 = arith.constant 0 : index
    %83 = vector.load %arg11[%c109, %c0_71] : memref<324x128xbf16, #tpu.memory_space<vmem>>, vector<16x128xbf16>
    %c80 = arith.constant 80 : index
    %c0_72 = arith.constant 0 : index
    %84 = vector.load %arg12[%c80, %c0_72] : memref<256x128xbf16, #tpu.memory_space<vmem>>, vector<16x128xbf16>
    tpu.vector_store %arg12[%c80, %c0_72], %83 {strides = array<i32>} : memref<256x128xbf16, #tpu.memory_space<vmem>>, vector<16x128xbf16>,
    %c127 = arith.constant 127 : index
    %c0_73 = arith.constant 0 : index
    %85 = vector.load %arg11[%c127, %c0_73] : memref<324x128xbf16, #tpu.memory_space<vmem>>, vector<16x128xbf16>
    %c96 = arith.constant 96 : index
    %c0_74 = arith.constant 0 : index
    %86 = vector.load %arg12[%c96, %c0_74] : memref<256x128xbf16, #tpu.memory_space<vmem>>, vector<16x128xbf16>
    tpu.vector_store %arg12[%c96, %c0_74], %85 {strides = array<i32>} : memref<256x128xbf16, #tpu.memory_space<vmem>>, vector<16x128xbf16>,
    %c145 = arith.constant 145 : index
    %c0_75 = arith.constant 0 : index
    %87 = vector.load %arg11[%c145, %c0_75] : memref<324x128xbf16, #tpu.memory_space<vmem>>, vector<16x128xbf16>
    %c112 = arith.constant 112 : index
    %c0_76 = arith.constant 0 : index
    %88 = vector.load %arg12[%c112, %c0_76] : memref<256x128xbf16, #tpu.memory_space<vmem>>, vector<16x128xbf16>
    tpu.vector_store %arg12[%c112, %c0_76], %87 {strides = array<i32>} : memref<256x128xbf16, #tpu.memory_space<vmem>>, vector<16x128xbf16>,
    %c163 = arith.constant 163 : index
    %c0_77 = arith.constant 0 : index
    %89 = vector.load %arg11[%c163, %c0_77] : memref<324x128xbf16, #tpu.memory_space<vmem>>, vector<16x128xbf16>
    %c128_78 = arith.constant 128 : index
    %c0_79 = arith.constant 0 : index
    %90 = vector.load %arg12[%c128_78, %c0_79] : memref<256x128xbf16, #tpu.memory_space<vmem>>, vector<16x128xbf16>
    tpu.vector_store %arg12[%c128_78, %c0_79], %89 {strides = array<i32>} : memref<256x128xbf16, #tpu.memory_space<vmem>>, vector<16x128xbf16>,
    %c181 = arith.constant 181 : index
    %c0_80 = arith.constant 0 : index
    %91 = vector.load %arg11[%c181, %c0_80] : memref<324x128xbf16, #tpu.memory_space<vmem>>, vector<16x128xbf16>
    %c144 = arith.constant 144 : index
    %c0_81 = arith.constant 0 : index
    %92 = vector.load %arg12[%c144, %c0_81] : memref<256x128xbf16, #tpu.memory_space<vmem>>, vector<16x128xbf16>
    tpu.vector_store %arg12[%c144, %c0_81], %91 {strides = array<i32>} : memref<256x128xbf16, #tpu.memory_space<vmem>>, vector<16x128xbf16>,
    %c199 = arith.constant 199 : index
    %c0_82 = arith.constant 0 : index
    %93 = vector.load %arg11[%c199, %c0_82] : memref<324x128xbf16, #tpu.memory_space<vmem>>, vector<16x128xbf16>
    %c160 = arith.constant 160 : index
    %c0_83 = arith.constant 0 : index
    %94 = vector.load %arg12[%c160, %c0_83] : memref<256x128xbf16, #tpu.memory_space<vmem>>, vector<16x128xbf16>
    tpu.vector_store %arg12[%c160, %c0_83], %93 {strides = array<i32>} : memref<256x128xbf16, #tpu.memory_space<vmem>>, vector<16x128xbf16>,
    %c217 = arith.constant 217 : index
    %c0_84 = arith.constant 0 : index
    %95 = vector.load %arg11[%c217, %c0_84] : memref<324x128xbf16, #tpu.memory_space<vmem>>, vector<16x128xbf16>
    %c176 = arith.constant 176 : index
    %c0_85 = arith.constant 0 : index
    %96 = vector.load %arg12[%c176, %c0_85] : memref<256x128xbf16, #tpu.memory_space<vmem>>, vector<16x128xbf16>
    tpu.vector_store %arg12[%c176, %c0_85], %95 {strides = array<i32>} : memref<256x128xbf16, #tpu.memory_space<vmem>>, vector<16x128xbf16>,
    %c235 = arith.constant 235 : index
    %c0_86 = arith.constant 0 : index
    %97 = vector.load %arg11[%c235, %c0_86] : memref<324x128xbf16, #tpu.memory_space<vmem>>, vector<16x128xbf16>
    %c192 = arith.constant 192 : index
    %c0_87 = arith.constant 0 : index
    %98 = vector.load %arg12[%c192, %c0_87] : memref<256x128xbf16, #tpu.memory_space<vmem>>, vector<16x128xbf16>
    tpu.vector_store %arg12[%c192, %c0_87], %97 {strides = array<i32>} : memref<256x128xbf16, #tpu.memory_space<vmem>>, vector<16x128xbf16>,
    %c253 = arith.constant 253 : index
    %c0_88 = arith.constant 0 : index
    %99 = vector.load %arg11[%c253, %c0_88] : memref<324x128xbf16, #tpu.memory_space<vmem>>, vector<16x128xbf16>
    %c208 = arith.constant 208 : index
    %c0_89 = arith.constant 0 : index
    %100 = vector.load %arg12[%c208, %c0_89] : memref<256x128xbf16, #tpu.memory_space<vmem>>, vector<16x128xbf16>
    tpu.vector_store %arg12[%c208, %c0_89], %99 {strides = array<i32>} : memref<256x128xbf16, #tpu.memory_space<vmem>>, vector<16x128xbf16>,
    %c271 = arith.constant 271 : index
    %c0_90 = arith.constant 0 : index
    %101 = vector.load %arg11[%c271, %c0_90] : memref<324x128xbf16, #tpu.memory_space<vmem>>, vector<16x128xbf16>
    %c224 = arith.constant 224 : index
    %c0_91 = arith.constant 0 : index
    %102 = vector.load %arg12[%c224, %c0_91] : memref<256x128xbf16, #tpu.memory_space<vmem>>, vector<16x128xbf16>
    tpu.vector_store %arg12[%c224, %c0_91], %101 {strides = array<i32>} : memref<256x128xbf16, #tpu.memory_space<vmem>>, vector<16x128xbf16>,
    %c289 = arith.constant 289 : index
    %c0_92 = arith.constant 0 : index
    %103 = vector.load %arg11[%c289, %c0_92] : memref<324x128xbf16, #tpu.memory_space<vmem>>, vector<16x128xbf16>
    %c240 = arith.constant 240 : index
    %c0_93 = arith.constant 0 : index
    %104 = vector.load %arg12[%c240, %c0_93] : memref<256x128xbf16, #tpu.memory_space<vmem>>, vector<16x128xbf16>
    tpu.vector_store %arg12[%c240, %c0_93], %103 {strides = array<i32>} : memref<256x128xbf16, #tpu.memory_space<vmem>>, vector<16x128xbf16>,
    %c0_94 = arith.constant 0 : index
    %c0_95 = arith.constant 0 : index
    %105 = vector.load %arg12[%c0_94, %c0_95] : memref<256x128xbf16, #tpu.memory_space<vmem>>, vector<256x128xbf16>
    %c0_96 = arith.constant 0 : index
    %c0_97 = arith.constant 0 : index
    %106 = vector.load %arg4[%c0_96, %c0_97] : memref<128x512xbf16, #tpu.memory_space<vmem>>, vector<128x512xbf16>
    %cst_98 = arith.constant dense<0.000000e+00> : vector<256x512xf32>
    %107 = tpu.matmul %105, %106, %cst_98 {dimension_numbers = #tpu.dot_dimension_numbers<[1], [0], [0], [1], [0, 0, 1, 1], [], []>} : vector<256x128xbf16>, vector<128x512xbf16>, vector<256x512xf32> -> vector<256x512xf32>
    %c0_99 = arith.constant 0 : index
    %c0_100 = arith.constant 0 : index
    %108 = vector.load %arg7[%c0_99, %c0_100] : memref<1x512xf32, #tpu.memory_space<vmem>>, vector<1x512xf32>
    %109 = vector.broadcast %108 : vector<1x512xf32> to vector<256x512xf32>
    %110 = arith.addf %107, %109 : vector<256x512xf32>
    %c0_101 = arith.constant 0 : index
    %c0_102 = arith.constant 0 : index
    %c0_103 = arith.constant 0 : index
    %111 = vector.load %arg1[%c0_101, %c0_102, %c0_103] : memref<1x256x512xf32, #tpu.memory_space<vmem>>, vector<1x256x512xf32>
    %112 = vector.shape_cast %111 : vector<1x256x512xf32> to vector<256x512xf32>
    %113 = arith.addf %110, %112 : vector<256x512xf32>
    %cst_104 = arith.constant 0.000000e+00 : f32
    %114 = vector.broadcast %cst_104 : f32 to vector<256x512xf32>
    %115 = arith.maximumf %113, %114 : vector<256x512xf32>
    %c0_105 = arith.constant 0 : index
    %c0_106 = arith.constant 0 : index
    %c0_107 = arith.constant 0 : index
    %116 = vector.load %arg8[%c0_105, %c0_106, %c0_107] : memref<1x256x512xf32, #tpu.memory_space<vmem>>, vector<1x256x512xf32>
    %117 = vector.shape_cast %116 : vector<1x256x512xf32> to vector<256x512xf32>
    %118 = vector.shape_cast %115 : vector<256x512xf32> to vector<1x256x512xf32>
    tpu.vector_store %arg8[%c0_105, %c0_106, %c0_107], %118 {strides = array<i32>} : memref<1x256x512xf32, #tpu.memory_space<vmem>>, vector<1x256x512xf32>,
    return
  }
  func.func @transform_0(%arg0: i32) -> (i32, i32, i32) {
    %c0_i32 = arith.constant 0 : i32
    %c0_i32_0 = arith.constant 0 : i32
    %c0_i32_1 = arith.constant 0 : i32
    return %arg0, %c0_i32, %c0_i32_0 : i32, i32, i32
  }
  func.func @transform_1(%arg0: i32) -> (i32, i32) {
    %c0_i32 = arith.constant 0 : i32
    %c0_i32_0 = arith.constant 0 : i32
    %c0_i32_1 = arith.constant 0 : i32
    return %c0_i32, %c0_i32_0 : i32, i32
  }
  func.func @transform_2(%arg0: i32) -> (i32, i32) {
    %c0_i32 = arith.constant 0 : i32
    %c0_i32_0 = arith.constant 0 : i32
    %c0_i32_1 = arith.constant 0 : i32
    return %c0_i32, %c0_i32_0 : i32, i32
  }
  func.func @transform_3(%arg0: i32) -> (i32, i32) {
    %c0_i32 = arith.constant 0 : i32
    %c0_i32_0 = arith.constant 0 : i32
    %c0_i32_1 = arith.constant 0 : i32
    return %c0_i32, %c0_i32_0 : i32, i32
  }
  func.func @transform_4(%arg0: i32) -> (i32, i32) {
    %c0_i32 = arith.constant 0 : i32
    %c0_i32_0 = arith.constant 0 : i32
    %c0_i32_1 = arith.constant 0 : i32
    return %c0_i32, %c0_i32_0 : i32, i32
  }
  func.func @transform_5(%arg0: i32) -> (i32, i32) {
    %c0_i32 = arith.constant 0 : i32
    %c0_i32_0 = arith.constant 0 : i32
    %c0_i32_1 = arith.constant 0 : i32
    return %c0_i32, %c0_i32_0 : i32, i32
  }
  func.func @transform_6(%arg0: i32) -> (i32, i32) {
    %c0_i32 = arith.constant 0 : i32
    %c0_i32_0 = arith.constant 0 : i32
    %c0_i32_1 = arith.constant 0 : i32
    return %c0_i32, %c0_i32_0 : i32, i32
  }
  func.func @transform_7(%arg0: i32) -> (i32, i32, i32) {
    %c0_i32 = arith.constant 0 : i32
    %c0_i32_0 = arith.constant 0 : i32
    %c0_i32_1 = arith.constant 0 : i32
    return %arg0, %c0_i32, %c0_i32_0 : i32, i32, i32
  }
}

</mosaic_0001>

<bundles_post_ra>
// kernel: bottleneck_forward.1
= control target key start
LH: loop header
LB: loop body
LE: loop exit
PB: predicated region body
PF: predicated region fallthrough
CT: control target
= control target key end

     0   :  { %12 = vsyncpa [#allocation7], 0  ;;  %s16319_s0 = inlined_call_operand.vmem [shape: f32[4,256,512], index: 0, kind: input, shape index: {}]   ;;  %s16320_s1 = inlined_call_operand.vmem [shape: bf16[512,128], index: 1, kind: input, shape index: {}]   ;;  %s16321_s2 = inlined_call_operand.vmem [shape: bf16[1152,128], index: 2, kind: input, shape index: {}]   ;;  %s16322_s3 = inlined_call_operand.vmem [shape: bf16[128,512], index: 3, kind: input, shape index: {}]   ;;  %s16323_s4 = inlined_call_operand.vmem [shape: f32[1,128], index: 4, kind: input, shape index: {}]   ;;  %s16324_s5 = inlined_call_operand.vmem [shape: f32[1,128], index: 5, kind: input, shape index: {}]   ;;  %s16325_s6 = inlined_call_operand.vmem [shape: f32[1,512], index: 6, kind: input, shape index: {}]   ;;  %s16326_s7 = inlined_call_operand.hbm [shape: f32[4,256,512], index: 7, kind: output, shape index: {}]  }
   0x1   :  { %14 = vsyncpa [#allocation7 + $0x1], 0  ;;  %s11173_s24 = smov 0   ;;  %s11175_s25 = smov 0  }
   0x2   :  { %s11177_s26 = smov 0   ;;  %s11179_s27 = smov 0  }
   0x3 LB: > { %s11194_s28 = sadd.s32 4294967295, %s11128_s27   ;;  %s9172_s29 = sadd.s32 4294967294, %s11128_s27   ;;  %s11128_s27 = sphi %s11179_s27, %s17313_s27   ;;  %s11124_s26 = sphi %s11177_s26, %s17312_s26   ;;  %s11120_s25 = sphi %s11175_s25, %s17311_s25   ;;  %s11116_s24 = sphi %s11173_s24, %s17310_s24  }
   0x4   : > { %s11198_s30 = sadd.s32 1, %s11128_s27   ;;  %s179_s8 = sadd.s32 1, %s11124_s26 }
   0x5   : > { %s176_s9 = ssub.s32 %s11128_s27, %s11198_s30  ;;  %p189_p0 = scmp.ne.s32.totalorder %s11124_s26, %s11120_s25 }
   0x6   : > { %p177_p1 = scmp.eq.s32.totalorder %s176_s9, 0  ;;  %p190_p2 = scmp.eq.s32.totalorder %s11194_s28, 3 }
   0x7   : > { %p195_p3 = scmp.ne.s32.totalorder %s11120_s25, %s11116_s24  ;;  %p196_p4 = scmp.eq.s32.totalorder %s9172_s29, 3 }
   0x8   : > { %s11209_s10 = scalar_select %p177_p1, %s11124_s26, %s179_s8  }
   0x9   : > { %p11211_p5 = por %p190_p2, %p189_p0  ;;  %p11215_p6 = por %p196_p4, %p195_p3 }
   0xa   : > { %p9175_p7 = scmp.ge.s32.totalorder %s11128_s27, 1  ;;  %p240_p8 = scmp.lt.s32.totalorder %s11128_s27, 5 }
   0xc   : > { %p241_p9 = pnand %p9175_p7, %p240_p8 }
   0xe   : > { %244 = sbr.rel (%p241_p9) target bundleno = 2005 (0x7d5), region = 48 }
  0x13   : > { %v10529_v0 = vld [vmem:[%s16320_s1 + $0x38] sm:$0xff]  ;;  %v10528_v2 = vld [vmem:[%s16320_s1 + $0x30] sm:$0xff]  ;;  %v10527_v4 = vld [vmem:[%s16320_s1 + $0x28] sm:$0xff]  ;;  %p272_p10 = scmp.lt.s32.totalorder %s11194_s28, 3  ;;  %vm1492_vm0 = vsmask.f32 3328 }
  0x14   : > { %v10537_v1 = vld [vmem:[%s16320_s1 + $0x78] sm:$0xff]  ;;  %776 = vmatpush.bf16.msra.mxu0 %v10529_v0  ;;  %v10536_v3 = vld [vmem:[%s16320_s1 + $0x70] sm:$0xff]  ;;  %v10535_v5 = vld [vmem:[%s16320_s1 + $0x68] sm:$0xff]  ;;  %vm1493_vm1 = vsmask.f32 7440  ;;  %vm1198_vm3 = vcmask 1042432  }
  0x15   : > { %10986 = vmatpush.bf16.msra.mxu2 %v10537_v1  ;;  %10987 = vmatpush.bf16.msra.mxu3 %v10537_v1  ;;  %v10526_v6 = vld [vmem:[%s16320_s1 + $0x20] sm:$0xff]  ;;  %v10525_v8 = vld [vmem:[%s16320_s1 + $0x18] sm:$0xff]  ;;  %s273_s19 = scalar_select %p272_p10, %s11194_s28, 3  ;;  %v10524_v10 = vld [vmem:[%s16320_s1 + $0x10] sm:$0xff]  ;;  %vm1199_vm4 = vcmask 1046532   ;;  %vm1232_vm5 = vcmask 1041408  }
  0x16   : > { %865 = vmatpush.bf16.msra.mxu1 %v10537_v1  ;;  %v10534_v7 = vld [vmem:[%s16320_s1 + $0x60] sm:$0xff]  ;;  %v10533_v9 = vld [vmem:[%s16320_s1 + $0x58] sm:$0xff]  ;;  %v10532_v11 = vld [vmem:[%s16320_s1 + $0x50] sm:$0xff]  ;;  %vm1233_vm6 = vcmask 1045508   ;;  %vm1216_vm9 = vcmask 1040384   ;;  %vm1217_vm10 = vcmask 1044484  }
  0x17   : > { %s10521_s29 = sshll.u32 %s273_s19, 10  ;;  %v10523_v12 = vld [vmem:[%s16320_s1 + $0x8] sm:$0xff]  ;;  %v10522_v14 = vld [vmem:[%s16320_s1] sm:$0xff]  ;;  %v10741_v24 = vld [vmem:[%s16321_s2 + $0x38] sm:$0xff]  ;;  %vm2599_vm12 = vsmask.f32 2304 }
  0x18   : > { %777 = vmatpush.bf16.msra.mxu0 %v10528_v2  ;;  %v10531_v13 = vld [vmem:[%s16320_s1 + $0x48] sm:$0xff]  ;;  %s11268_s17 = scalar_lea.vmem %s16319_s0, %s10521_s29  ;;  %v10530_v15 = vld [vmem:[%s16320_s1 + $0x40] sm:$0xff]  ;;  %v10545_v25 = vld [vmem:[%s16320_s1 + $0xb8] sm:$0xff]  ;;  %vm2600_vm13 = vsmask.f32 6416  ;;  %s269_s15 = sand.u32 1, %s11120_s25  }
  0x19   : > { %10988 = vmatpush.bf16.msra.mxu2 %v10536_v3  ;;  %10989 = vmatpush.bf16.msra.mxu3 %v10536_v3  ;;  %v324_v16 = vld [vmem:[%s11268_s17] sm:$0xff]  ;;  %v373_v18 = vld [vmem:[%s11268_s17 + $0x188] sm:$0xff]  ;;  %v10553_v30 = vld [vmem:[%s16320_s1 + $0xf8] sm:$0xff]  ;;  %vm3707_vm15 = vsmask.f32 1280  ;;  %s9176_s16 = sshll.u32 %s269_s15, 10 }
  0x1a   : > { %866 = vmatpush.bf16.msra.mxu1 %v10536_v3  ;;  %v328_v17 = vld [vmem:[%s11268_s17 + $0x20] sm:$0xff]  ;;  %v377_v19 = vld [vmem:[%s11268_s17 + $0x1a8] sm:$0xff]  ;;  %v10740_v31 = vld [vmem:[%s16321_s2 + $0x30] sm:$0xff]  ;;  %s15784_s18 = scalar_lea.vmem [#allocation6], %s9176_s16  ;;  %s10854_s9 = sshll.u32 %s11194_s28, 10 }
  0x1b   : > { %v421_v20 = vld [vmem:[%s11268_s17 + $0x308] sm:$0xff]  ;;  %v452_v26 = vpack.c.bf16 %v328_v17, %v324_v16  ;;  %v477_v27 = vpack.c.bf16 %v377_v19, %v373_v18  ;;  %v10544_v32 = vld [vmem:[%s16320_s1 + $0xb0] sm:$0xff]  ;;  %v332_v36 = vld [vmem:[%s11268_s17 + $0x40] sm:$0xff]  ;;  %s9106_s16 = scalar_lea.hbm %s16326_s7, %s10854_s9  ;;  %s9107_s19 = sshll.u32 %s15784_s18, 4  ;;  %s9108_s19 = int_to_ptr.vmem [resolvable:$true] %s9107_s19 }
  0x1c   : > { %778 = vmatpush.bf16.msra.mxu0 %v10527_v4  ;;  %v425_v21 = vld [vmem:[%s11268_s17 + $0x328] sm:$0xff]  ;;  %v10552_v33 = vld [vmem:[%s16320_s1 + $0xf0] sm:$0xff]  ;;  %v336_v37 = vld [vmem:[%s11268_s17 + $0x60] sm:$0xff]  ;;  %s9109_s20 = sshll.u32 %s9106_s16, 4  ;;  %s9095_s28 = scalar_lea.sflag [#allocation7], %s269_s15  ;;  %s9110_s20 = int_to_ptr.hbm [resolvable:$true] %s9109_s20 }
  0x1d   : > { %10990 = vmatpush.bf16.msra.mxu2 %v10535_v5  ;;  %10991 = vmatpush.bf16.msra.mxu3 %v10535_v5  ;;  %v325_v22 = vld [vmem:[%s11268_s17 + $0x8] sm:$0xff]  ;;  %v501_v28 = vpack.c.bf16 %v425_v21, %v421_v20  ;;  %v10550_v44 = vld [vmem:[%s16320_s1 + $0xe0] sm:$0xff]  ;;  %v456_v45 = vpack.c.bf16 %v336_v37, %v332_v36  ;;  %v10549_v49 = vld [vmem:[%s16320_s1 + $0xd8] sm:$0xff]  ;;  %s11080_s21 = sshra.s32 %s9110_s20, 4  ;;  %s11086_s29 = scalar_lea.hbm %s16326_s7, 4096  ;;  %s11081_s21 = int_to_ptr.hbm [resolvable:$true] %s11080_s21 }
  0x1e   : > { %867 = vmatpush.bf16.msra.mxu1 %v10535_v5  ;;  %v329_v23 = vld [vmem:[%s11268_s17 + $0x28] sm:$0xff]  ;;  %v10542_v50 = vld [vmem:[%s16320_s1 + $0xa0] sm:$0xff]  ;;  %v10548_v51 = vld [vmem:[%s16320_s1 + $0xd0] sm:$0xff]  ;;  %s11082_s22 = scalar_lea.hbm %s11081_s21, 1024  ;;  %p11087_p0 = scmp.lt.s32.totalorder %s11081_s21, %s16326_s7 }
  0x1f   : > { %v453_v29 = vpack.c.bf16 %v329_v23, %v325_v22  ;;  %v10543_v34 = vld [vmem:[%s16320_s1 + $0xa8] sm:$0xff]  ;;  %v340_v53 = vld [vmem:[%s11268_s17 + $0x80] sm:$0xff]  ;;  %v10541_v3 = vld [vmem:[%s16320_s1 + $0x98] sm:$0xff]  ;;  %p11083_p11 = scmp.ne.s32.totalorder %s11081_s21, %s11082_s22  ;;  %p11088_p1 = scmp.lt.s32.totalorder %s11086_s29, %s11082_s22 }
  0x20   : > { %779 = vmatpush.bf16.msra.mxu0 %v10526_v6  ;;  %v10551_v35 = vld [vmem:[%s16320_s1 + $0xe8] sm:$0xff]  ;;  %v344_v54 = vld [vmem:[%s11268_s17 + $0xa0] sm:$0xff]  ;;  %v10540_v16 = vld [vmem:[%s16320_s1 + $0x90] sm:$0xff] }
  0x21   : > { %10992 = vmatpush.bf16.msra.mxu2 %v10534_v7  ;;  %10993 = vmatpush.bf16.msra.mxu3 %v10534_v7  ;;  %v381_v38 = vld [vmem:[%s11268_s17 + $0x1c8] sm:$0xff]  ;;  %v10546_v61 = vld [vmem:[%s16320_s1 + $0xc0] sm:$0xff]  ;;  %v460_v62 = vpack.c.bf16 %v344_v54, %v340_v53  ;;  %v327_v23 = vld [vmem:[%s11268_s17 + $0x18] sm:$0xff]  ;;  %p11084_p12 = pnand %p11083_p11, %p11211_p5  ;;  %p11089_p2 = por %p11088_p1, %p11087_p0 }
  0x22   : > { %868 = vmatpush.bf16.msra.mxu1 %v10534_v7  ;;  %v385_v39 = vld [vmem:[%s11268_s17 + $0x1e8] sm:$0xff]  ;;  %v348_v4 = vld [vmem:[%s11268_s17 + $0xc0] sm:$0xff]  ;;  %v335_v36 = vld [vmem:[%s11268_s17 + $0x58] sm:$0xff] }
  0x23   : > { %v429_v40 = vld [vmem:[%s11268_s17 + $0x348] sm:$0xff]  ;;  %v481_v46 = vpack.c.bf16 %v385_v39, %v381_v38  ;;  %v352_v5 = vld [vmem:[%s11268_s17 + $0xe0] sm:$0xff]  ;;  %v339_v37 = vld [vmem:[%s11268_s17 + $0x78] sm:$0xff]  ;;  %p11085_p13 = pneg %p11084_p12 }
  0x24   : > { %780 = vmatpush.bf16.msra.mxu0 %v10525_v8  ;;  %v433_v41 = vld [vmem:[%s11268_s17 + $0x368] sm:$0xff]  ;;  %v10538_v18 = vld [vmem:[%s16320_s1 + $0x80] sm:$0xff]  ;;  %v10737_v53 = vld [vmem:[%s16321_s2 + $0x18] sm:$0xff] }
  0x25   : > { %10994 = vmatpush.bf16.msra.mxu2 %v10533_v9  ;;  %10995 = vmatpush.bf16.msra.mxu3 %v10533_v9  ;;  %v333_v42 = vld [vmem:[%s11268_s17 + $0x48] sm:$0xff]  ;;  %v505_v47 = vpack.c.bf16 %v433_v41, %v429_v40  ;;  %v356_v19 = vld [vmem:[%s11268_s17 + $0x100] sm:$0xff]  ;;  %vm11605_vm2 = vmor %vm1492_vm0, %vm1493_vm1  ;;  %vm3708_vm0 = vsmask.f32 5392  ;;  %p11090_p3 = pnand %p11089_p2, %p11085_p13 }
  0x26   : > { %869 = vmatpush.bf16.msra.mxu1 %v10533_v9  ;;  %v337_v43 = vld [vmem:[%s11268_s17 + $0x68] sm:$0xff]  ;;  %v360_v20 = vld [vmem:[%s11268_s17 + $0x120] sm:$0xff]  ;;  %vm11662_vm7 = vmor %vm1198_vm3, %vm1199_vm4  ;;  %vm7446_vm3 = vsmask.f32 256  ;;  %vm7447_vm4 = vsmask.f32 4368 }
  0x27   : > { %v457_v48 = vpack.c.bf16 %v337_v43, %v333_v42  ;;  %v10547_v52 = vld [vmem:[%s16320_s1 + $0xc8] sm:$0xff]  ;;  %v459_v42 = vpack.c.bf16 %v339_v37, %v335_v36  ;;  %v380_v54 = vld [vmem:[%s11268_s17 + $0x1c0] sm:$0xff]  ;;  %vm11674_vm8 = vmor %vm1232_vm5, %vm1233_vm6 }
  0x28   : > { %781 = vmatpush.bf16.msra.mxu0 %v10524_v10  ;;  %v389_v55 = vld [vmem:[%s11268_s17 + $0x208] sm:$0xff]  ;;  %vm11747_vm11 = vmor %vm1216_vm9, %vm1217_vm10 }
  0x29   : > { %10996 = vmatpush.bf16.msra.mxu2 %v10532_v11  ;;  %10997 = vmatpush.bf16.msra.mxu3 %v10532_v11  ;;  %v393_v56 = vld [vmem:[%s11268_s17 + $0x228] sm:$0xff]  ;;  %vm13058_vm14 = vmor %vm2599_vm12, %vm2600_vm13 }
  0x2a   : > { %870 = vmatpush.bf16.msra.mxu1 %v10532_v11  ;;  %v437_v57 = vld [vmem:[%s11268_s17 + $0x388] sm:$0xff]  ;;  %v485_v63 = vpack.c.bf16 %v393_v56, %v389_v55  ;;  %v384_v55 = vld [vmem:[%s11268_s17 + $0x1e0] sm:$0xff]  ;;  %v334_v56 = vld [vmem:[%s11268_s17 + $0x50] sm:$0xff] }
  0x2b   : > { %v441_v58 = vld [vmem:[%s11268_s17 + $0x3a8] sm:$0xff]  ;;  %vm13307_vm1 = vmor %vm3707_vm15, %vm3708_vm0 }
  0x2c   : > { %782 = vmatpush.bf16.msra.mxu0 %v10523_v12  ;;  %v341_v59 = vld [vmem:[%s11268_s17 + $0x88] sm:$0xff]  ;;  %v509_v0 = vpack.c.bf16 %v441_v58, %v437_v57  ;;  %v464_v12 = vpack.c.bf16 %v352_v5, %v348_v4  ;;  %v338_v57 = vld [vmem:[%s11268_s17 + $0x70] sm:$0xff]  ;;  %v351_v58 = vld [vmem:[%s11268_s17 + $0xd8] sm:$0xff] }
  0x2d   : > { %10998 = vmatpush.bf16.msra.mxu2 %v10531_v13  ;;  %10999 = vmatpush.bf16.msra.mxu3 %v10531_v13  ;;  %v345_v60 = vld [vmem:[%s11268_s17 + $0xa8] sm:$0xff]  ;;  %v363_v4 = vld [vmem:[%s11268_s17 + $0x138] sm:$0xff]  ;;  %vm15677_vm5 = vmor %vm7446_vm3, %vm7447_vm4 }
  0x2e   : > { %871 = vmatpush.bf16.msra.mxu1 %v10531_v13  ;;  %v461_v1 = vpack.c.bf16 %v345_v60, %v341_v59  ;;  %v10739_v2 = vld [vmem:[%s16321_s2 + $0x28] sm:$0xff]  ;;  %v355_v59 = vld [vmem:[%s11268_s17 + $0xf8] sm:$0xff]  ;;  %v480_v60 = vpack.c.bf16 %v384_v55, %v380_v54 }
  0x2f   : > { %v397_v6 = vld [vmem:[%s11268_s17 + $0x248] sm:$0xff] }
  0x30   : > { %783 = vmatpush.bf16.msra.mxu0 %v10522_v14  ;;  %v401_v7 = vld [vmem:[%s11268_s17 + $0x268] sm:$0xff] }
  0x31   : > { %11000 = vmatpush.bf16.msra.mxu2 %v10530_v15  ;;  %11001 = vmatpush.bf16.msra.mxu3 %v10530_v15  ;;  %v445_v8 = vld [vmem:[%s11268_s17 + $0x3c8] sm:$0xff]  ;;  %v489_v13 = vpack.c.bf16 %v401_v7, %v397_v6 }
  0x32   : > { %872 = vmatpush.bf16.msra.mxu1 %v10530_v15  ;;  %v449_v9 = vld [vmem:[%s11268_s17 + $0x3e8] sm:$0xff] }
  0x33   : > { %784 = vmatmul.bf16.vlgmr.msra.gmra.mxu0 %v452_v26  ;;  %v349_v10 = vld [vmem:[%s11268_s17 + $0xc8] sm:$0xff]  ;;  %v513_v14 = vpack.c.bf16 %v449_v9, %v445_v8  ;;  %v10736_v9 = vld [vmem:[%s16321_s2 + $0x10] sm:$0xff] }
  0x34   : > { %6233 = vmatpush.bf16.msrb.mxu0 %v10741_v24  ;;  %903 = vmatmul.bf16.vlgmr.msra.gmra.mxu2 %v477_v27  ;;  %v353_v11 = vld [vmem:[%s11268_s17 + $0xe8] sm:$0xff]  ;;  %v331_v24 = vld [vmem:[%s11268_s17 + $0x38] sm:$0xff]  ;;  %v468_v27 = vpack.c.bf16 %v360_v20, %v356_v19 }
  0x35   : > { %954 = vmatpush.bf16.msrb.mxu2 %v10545_v25  ;;  %933 = vmatmul.bf16.vlgmr.msra.gmra.mxu3 %v501_v28  ;;  %v465_v15 = vpack.c.bf16 %v353_v11, %v349_v10  ;;  %v10539_v17 = vld [vmem:[%s16320_s1 + $0x88] sm:$0xff] }
  0x36   : > { %873 = vmatmul.bf16.vlgmr.msra.gmra.mxu1 %v453_v29  ;;  %1043 = vmatpush.bf16.msrb.mxu3 %v10553_v30  ;;  %v405_v21 = vld [vmem:[%s11268_s17 + $0x288] sm:$0xff]  ;;  %v455_v29 = vpack.c.bf16 %v331_v24, %v327_v23 }
  0x37   : > { %v409_v22 = vld [vmem:[%s11268_s17 + $0x2a8] sm:$0xff] }
  0x38   : > { %6234 = vmatpush.bf16.msrb.mxu0 %v10740_v31  ;;  %v357_v25 = vld [vmem:[%s11268_s17 + $0x108] sm:$0xff]  ;;  %v493_v28 = vpack.c.bf16 %v409_v22, %v405_v21  ;;  %v10738_v31 = vld [vmem:[%s16321_s2 + $0x20] sm:$0xff] }
  0x39   : > { %955 = vmatpush.bf16.msrb.mxu2 %v10544_v32  ;;  %v361_v26 = vld [vmem:[%s11268_s17 + $0x128] sm:$0xff]  ;;  %v364_v32 = vld [vmem:[%s11268_s17 + $0x140] sm:$0xff] }
  0x3a   : > { %1044 = vmatpush.bf16.msrb.mxu3 %v10552_v33  ;;  %v469_v30 = vpack.c.bf16 %v361_v26, %v357_v25  ;;  %v368_v33 = vld [vmem:[%s11268_s17 + $0x160] sm:$0xff]  ;;  %v365_v38 = vld [vmem:[%s11268_s17 + $0x148] sm:$0xff] }
  0x3b   : > { %v369_v39 = vld [vmem:[%s11268_s17 + $0x168] sm:$0xff]  ;;  %v472_v40 = vpack.c.bf16 %v368_v33, %v364_v32  ;;  %v375_v32 = vld [vmem:[%s11268_s17 + $0x198] sm:$0xff] }
  0x3c   : > { %6235 = vmatpush.bf16.msrb.mxu0 %v10739_v2  ;;  %v473_v43 = vpack.c.bf16 %v369_v39, %v365_v38  ;;  %v346_v2 = vld [vmem:[%s11268_s17 + $0xb0] sm:$0xff]  ;;  %v379_v33 = vld [vmem:[%s11268_s17 + $0x1b8] sm:$0xff] }
  0x3d   : > { %956 = vmatpush.bf16.msrb.mxu2 %v10543_v34  ;;  %v413_v34 = vld [vmem:[%s11268_s17 + $0x2c8] sm:$0xff]  ;;  %v479_v39 = vpack.c.bf16 %v379_v33, %v375_v32  ;;  %v403_v32 = vld [vmem:[%s11268_s17 + $0x278] sm:$0xff] }
  0x3e   : > { %1045 = vmatpush.bf16.msrb.mxu3 %v10551_v35  ;;  %v417_v35 = vld [vmem:[%s11268_s17 + $0x2e8] sm:$0xff] }
  0x3f   : > { %v497_v41 = vpack.c.bf16 %v417_v35, %v413_v34 }
  0x40   : > { %6236 = vmatpush.bf16.msrb.mxu0 %v10738_v31  ;;  %v362_v31 = vld [vmem:[%s11268_s17 + $0x130] sm:$0xff] }
  0x41   : > { %957 = vmatpush.bf16.msrb.mxu2 %v10542_v50 }
  0x42   : > { %1046 = vmatpush.bf16.msrb.mxu3 %v10550_v44  ;;  %v372_v44 = vld [vmem:[%s11268_s17 + $0x180] sm:$0xff] }
  0x43   : > { %789 = vmatmul.bf16.gmra.mxu0 %v456_v45  ;;  %v376_v45 = vld [vmem:[%s11268_s17 + $0x1a0] sm:$0xff] }
  0x44   : > { %908 = vmatmul.bf16.gmra.mxu2 %v481_v46  ;;  %v326_v46 = vld [vmem:[%s11268_s17 + $0x10] sm:$0xff]  ;;  %v476_v50 = vpack.c.bf16 %v376_v45, %v372_v44  ;;  %6237 = vmatpush.bf16.msrb.mxu0 %v10737_v53  ;;  %v412_v44 = vld [vmem:[%s11268_s17 + $0x2c0] sm:$0xff] }
  0x45   : > { %938 = vmatmul.bf16.gmra.mxu3 %v505_v47  ;;  %958 = vmatpush.bf16.msrb.mxu2 %v10541_v3  ;;  %v330_v47 = vld [vmem:[%s11268_s17 + $0x30] sm:$0xff]  ;;  %v359_v3 = vld [vmem:[%s11268_s17 + $0x118] sm:$0xff]  ;;  %v416_v45 = vld [vmem:[%s11268_s17 + $0x2e0] sm:$0xff] }
  0x46   : > { %878 = vmatmul.bf16.gmra.mxu1 %v457_v48  ;;  %1047 = vmatpush.bf16.msrb.mxu3 %v10549_v49  ;;  %v343_v48 = vld [vmem:[%s11268_s17 + $0x98] sm:$0xff]  ;;  %v471_v8 = vpack.c.bf16 %v363_v4, %v359_v3  ;;  %v11130_v4 = vmov 0  }
  0x47   : > { %v347_v49 = vld [vmem:[%s11268_s17 + $0xb8] sm:$0xff]  ;;  %281 = vst [vmem:[#allocation2 + $0xc] sm:$0xf] %v11130_v4 }
  0x48   : > { %6238 = vmatpush.bf16.msrb.mxu0 %v10736_v9  ;;  %282 = vst [vmem:[#allocation2 + $0x10] sm:$0xf] %v11130_v4 }
  0x49   : > { %959 = vmatpush.bf16.msrb.mxu2 %v10540_v16  ;;  %v354_v16 = vld [vmem:[%s11268_s17 + $0xf0] sm:$0xff]  ;;  %278 = vst [vmem:[#allocation2] sm:$0xf] %v11130_v4 }
  0x4a   : > { %1048 = vmatpush.bf16.msrb.mxu3 %v10548_v51  ;;  %v454_v51 = vpack.c.bf16 %v330_v47, %v326_v46  ;;  %v366_v46 = vld [vmem:[%s11268_s17 + $0x150] sm:$0xff]  ;;  %279 = vst [vmem:[#allocation2 + $0x4] sm:$0xf] %v11130_v4 }
  0x4b   : > { %v370_v47 = vld [vmem:[%s11268_s17 + $0x170] sm:$0xff]  ;;  %280 = vst [vmem:[#allocation2 + $0x8] sm:$0xf] %v11130_v4 }
  0x4c   : > { %v474_v53 = vpack.c.bf16 %v370_v47, %v366_v46  ;;  %283 = vst [vmem:[#allocation2 + $0x14] sm:$0xf] %v11130_v4  ;;  %v10744_v46 = vld [vmem:[%s16321_s2 + $0x50] sm:$0xff] }
  0x4d   : > { %960 = vmatpush.bf16.msrb.mxu2 %v10539_v17  ;;  %v367_v17 = vld [vmem:[%s11268_s17 + $0x158] sm:$0xff]  ;;  %284 = vst [vmem:[#allocation2 + $0x18] sm:$0xf] %v11130_v4 }
  0x4e   : > { %1049 = vmatpush.bf16.msrb.mxu3 %v10547_v52  ;;  %v463_v52 = vpack.c.bf16 %v347_v49, %v343_v48  ;;  %v383_v48 = vld [vmem:[%s11268_s17 + $0x1d8] sm:$0xff]  ;;  %285 = vst [vmem:[#allocation2 + $0x1c] sm:$0xf] %v11130_v4 }
  0x4f   : > { %v387_v49 = vld [vmem:[%s11268_s17 + $0x1f8] sm:$0xff]  ;;  %286 = vst [vmem:[#allocation2 + $0x20] sm:$0xf] %v11130_v4 }
  0x50   : > { %v483_v55 = vpack.c.bf16 %v387_v49, %v383_v48  ;;  %287 = vst [vmem:[#allocation2 + $0x24] sm:$0xf] %v11130_v4  ;;  %v1451_v48 = vld [vmem:[#allocation2] sm:$0xf] }
  0x51   : > { %961 = vmatpush.bf16.msrb.mxu2 %v10538_v18  ;;  %v371_v18 = vld [vmem:[%s11268_s17 + $0x178] sm:$0xff]  ;;  %288 = vst [vmem:[#allocation2 + $0x28] sm:$0xf] %v11130_v4 }
  0x52   : > { %1050 = vmatpush.bf16.msrb.mxu3 %v10546_v61  ;;  %v458_v61 = vpack.c.bf16 %v338_v57, %v334_v56  ;;  %v475_v24 = vpack.c.bf16 %v371_v18, %v367_v17  ;;  %289 = vst [vmem:[#allocation2 + $0x2c] sm:$0xf] %v11130_v4 }
  0x53   : > { %794 = vmatmul.bf16.gmra.mxu0 %v460_v62  ;;  %v467_v62 = vpack.c.bf16 %v355_v59, %v351_v58  ;;  %v10749_v59 = vld [vmem:[%s16321_s2 + $0x78] sm:$0xff]  ;;  %290 = vst [vmem:[#allocation2 + $0x30] sm:$0xf] %v11130_v4 }
  0x54   : > { %913 = vmatmul.bf16.gmra.mxu2 %v485_v63  ;;  %v388_v63 = vld [vmem:[%s11268_s17 + $0x200] sm:$0xff]  ;;  %6346 = vmatpush.bf16.msrb.mxu1 %v10749_v59  ;;  %291 = vst [vmem:[#allocation2 + $0x34] sm:$0xf] %v11130_v4  ;;  %v10743_v59 = vld [vmem:[%s16321_s2 + $0x48] sm:$0xff] }
  0x55   : > { %943 = vmatmul.bf16.gmra.mxu3 %v509_v0  ;;  %v392_v0 = vld [vmem:[%s11268_s17 + $0x220] sm:$0xff]  ;;  %292 = vst [vmem:[#allocation2 + $0x38] sm:$0xf] %v11130_v4 }
  0x56   : > { %883 = vmatmul.bf16.gmra.mxu1 %v461_v1  ;;  %v342_v1 = vld [vmem:[%s11268_s17 + $0x90] sm:$0xff]  ;;  %v484_v5 = vpack.c.bf16 %v392_v0, %v388_v63  ;;  %293 = vst [vmem:[#allocation2 + $0x3c] sm:$0xf] %v11130_v4 }
  0x57   : > { %v462_v6 = vpack.c.bf16 %v346_v2, %v342_v1  ;;  %v374_v63 = vld [vmem:[%s11268_s17 + $0x190] sm:$0xff]  ;;  %v391_v1 = vld [vmem:[%s11268_s17 + $0x218] sm:$0xff]  ;;  %294 = vst [vmem:[#allocation2 + $0x40] sm:$0xf] %v11130_v4 }
  0x58   : > { %v378_v0 = vld [vmem:[%s11268_s17 + $0x1b0] sm:$0xff]  ;;  %v395_v2 = vld [vmem:[%s11268_s17 + $0x238] sm:$0xff]  ;;  %295 = vst [vmem:[#allocation2 + $0x44] sm:$0xf] %v11130_v4 }
  0x59   : > { %296 = vst [vmem:[#allocation2 + $0x48] sm:$0xf] %v11130_v4 }
  0x5a   : > { %297 = vst [vmem:[#allocation2 + $0x4c] sm:$0xf] %v11130_v4 }
  0x5b   : > { %298 = vst [vmem:[#allocation2 + $0x50] sm:$0xf] %v11130_v4 }
  0x5c   : > { %299 = vst [vmem:[#allocation2 + $0x54] sm:$0xf] %v11130_v4 }
  0x5d   : > { %300 = vst [vmem:[#allocation2 + $0x58] sm:$0xf] %v11130_v4 }
  0x5e   : > { %301 = vst [vmem:[#allocation2 + $0x5c] sm:$0xf] %v11130_v4 }
  0x5f   : > { %302 = vst [vmem:[#allocation2 + $0x60] sm:$0xf] %v11130_v4 }
  0x60   : > { %303 = vst [vmem:[#allocation2 + $0x64] sm:$0xf] %v11130_v4 }
  0x61   : > { %304 = vst [vmem:[#allocation2 + $0x68] sm:$0xf] %v11130_v4 }
  0x62   : > { %305 = vst [vmem:[#allocation2 + $0x6c] sm:$0xf] %v11130_v4 }
  0x63   : > { %799 = vmatmul.bf16.gmra.mxu0 %v464_v12  ;;  %306 = vst [vmem:[#allocation2 + $0x70] sm:$0xf] %v11130_v4 }
  0x64   : > { %918 = vmatmul.bf16.gmra.mxu2 %v489_v13  ;;  %v396_v13 = vld [vmem:[%s11268_s17 + $0x240] sm:$0xff]  ;;  %307 = vst [vmem:[#allocation2 + $0x74] sm:$0xf] %v11130_v4 }
  0x65   : > { %948 = vmatmul.bf16.gmra.mxu3 %v513_v14  ;;  %v400_v14 = vld [vmem:[%s11268_s17 + $0x260] sm:$0xff]  ;;  %308 = vst [vmem:[#allocation2 + $0x78] sm:$0xf] %v11130_v4 }
  0x66   : > { %888 = vmatmul.bf16.gmra.mxu1 %v465_v15  ;;  %v350_v15 = vld [vmem:[%s11268_s17 + $0xd0] sm:$0xff]  ;;  %v488_v21 = vpack.c.bf16 %v400_v14, %v396_v13  ;;  %v487_v13 = vpack.c.bf16 %v395_v2, %v391_v1  ;;  %v10747_v14 = vld [vmem:[%s16321_s2 + $0x68] sm:$0xff]  ;;  %v436_v1 = vld [vmem:[%s11268_s17 + $0x380] sm:$0xff]  ;;  %309 = vst [vmem:[#allocation2 + $0x7c] sm:$0xf] %v11130_v4 }
  0x67   : > { %v466_v22 = vpack.c.bf16 %v354_v16, %v350_v15  ;;  %v10734_v15 = vld [vmem:[%s16321_s2] sm:$0xff]  ;;  %310 = vst [vmem:[#allocation2 + $0x80] sm:$0xf] %v11130_v4 }
  0x68   : > { %v10746_v16 = vld [vmem:[%s16321_s2 + $0x60] sm:$0xff]  ;;  %311 = vst [vmem:[#allocation2 + $0x84] sm:$0xf] %v11130_v4 }
  0x69   : > { %v440_v2 = vld [vmem:[%s11268_s17 + $0x3a0] sm:$0xff]  ;;  %312 = vst [vmem:[#allocation2 + $0x88] sm:$0xf] %v11130_v4 }
  0x6a   : > { %313 = vst [vmem:[#allocation2 + $0x8c] sm:$0xf] %v11130_v4 }
  0x6b   : > { %314 = vst [vmem:[#allocation2 + $0x90] sm:$0xf] %v11130_v4 }
  0x6c   : > { %315 = vst [vmem:[#allocation2 + $0x94] sm:$0xf] %v11130_v4 }
  0x6d   : > { %316 = vst [vmem:[#allocation2 + $0x98] sm:$0xf] %v11130_v4 }
  0x6e   : > { %317 = vst [vmem:[#allocation2 + $0x9c] sm:$0xf] %v11130_v4 }
  0x6f   : > { %318 = vst [vmem:[#allocation2 + $0xa0] sm:$0xf] %v11130_v4 }
  0x70   : > { %319 = vst [vmem:[#allocation2 + $0xa4] sm:$0xf] %v11130_v4 }
  0x71   : > { %320 = vst [vmem:[#allocation2 + $0xa8] sm:$0xf] %v11130_v4 }
  0x72   : > { %321 = vst [vmem:[#allocation2 + $0xac] sm:$0xf] %v11130_v4 }
  0x73   : > { %804 = vmatmul.bf16.gmra.mxu0 %v468_v27  ;;  %322 = vst [vmem:[#allocation2 + $0xb0] sm:$0xf] %v11130_v4 }
  0x74   : > { %923 = vmatmul.bf16.gmra.mxu2 %v493_v28  ;;  %v404_v28 = vld [vmem:[%s11268_s17 + $0x280] sm:$0xff]  ;;  %323 = vst [vmem:[#allocation2 + $0xb4] sm:$0x1] %v11130_v4 }
  0x75   : > { %1051 = vmatmul.bf16.vlgmr.msrb.gmra.mxu3 %v455_v29  ;;  %v408_v29 = vld [vmem:[%s11268_s17 + $0x2a0] sm:$0xff] }
  0x76   : > { %893 = vmatmul.bf16.gmra.mxu1 %v469_v30  ;;  %v358_v30 = vld [vmem:[%s11268_s17 + $0x110] sm:$0xff]  ;;  %v492_v36 = vpack.c.bf16 %v408_v29, %v404_v28 }
  0x77   : > { %v470_v37 = vpack.c.bf16 %v362_v31, %v358_v30  ;;  %v382_v28 = vld [vmem:[%s11268_s17 + $0x1d0] sm:$0xff]  ;;  %v10745_v30 = vld [vmem:[%s16321_s2 + $0x58] sm:$0xff] }
  0x78   : > { %v386_v29 = vld [vmem:[%s11268_s17 + $0x1f0] sm:$0xff]  ;;  %v399_v31 = vld [vmem:[%s11268_s17 + $0x258] sm:$0xff] }
  0x83   : > { %809 = vmatmul.bf16.gmra.mxu0 %v472_v40  ;;  %v10735_v40 = vld [vmem:[%s16321_s2 + $0x8] sm:$0xff] }
  0x84   : > { %928 = vmatmul.bf16.gmra.mxu2 %v497_v41  ;;  %6239 = vmatpush.bf16.msrb.mxu0 %v10735_v40  ;;  %v482_v40 = vpack.c.bf16 %v386_v29, %v382_v28 }
  0x85   : > { %1056 = vmatmul.bf16.gmra.mxu3 %v459_v42 }
  0x86   : > { %898 = vmatmul.bf16.gmra.mxu1 %v473_v43 }
  0x88   : > { %6240 = vmatpush.bf16.msrb.mxu0 %v10734_v15  ;;  %v411_v15 = vld [vmem:[%s11268_s17 + $0x2b8] sm:$0xff] }
  0x93   : > { %814 = vmatmul.bf16.gmra.mxu0 %v476_v50 }
  0x94   : > { %962 = vmatmul.bf16.vlgmr.msrb.gmra.mxu2 %v454_v51 }
  0x95   : > { %1061 = vmatmul.bf16.gmra.mxu3 %v463_v52  ;;  %v496_v52 = vpack.c.bf16 %v416_v45, %v412_v44  ;;  %v491_v45 = vpack.c.bf16 %v403_v32, %v399_v31  ;;  %v508_v31 = vpack.c.bf16 %v440_v2, %v436_v1  ;;  %v16456_v2 = vmov 0 }
  0x96   : > { %v16457_v2 = vsel %vm11605_vm2, 4294967295, %v16456_v2 }
  0x97   : > { %16458 = vst [vmem:[#allocation18_spill] sm:$0xff] %v16457_v2 }
  0xa3   : > { %819 = vmatmul.bf16.gmra.mxu0 %v480_v60  ;;  %v420_v60 = vld [vmem:[%s11268_s17 + $0x300] sm:$0xff] }
  0xa4   : > { %967 = vmatmul.bf16.gmra.mxu2 %v458_v61  ;;  %v10748_v61 = vld [vmem:[%s16321_s2 + $0x70] sm:$0xff] }
  0xa5   : > { %1066 = vmatmul.bf16.gmra.mxu3 %v467_v62  ;;  %v424_v62 = vld [vmem:[%s11268_s17 + $0x320] sm:$0xff]  ;;  %6347 = vmatpush.bf16.msrb.mxu1 %v10748_v61  ;;  %v1499_v61 = vshll.u32 %v1451_v48, 16 }
  0xa9   : > { %6348 = vmatpush.bf16.msrb.mxu1 %v10747_v14  ;;  %v407_v14 = vld [vmem:[%s11268_s17 + $0x298] sm:$0xff] }
  0xad   : > { %6349 = vmatpush.bf16.msrb.mxu1 %v10746_v16 }
  0xb0   : > { %v11405_v7 = vpop.f32.mrf.mxu0 }
  0xb1   : > { %6350 = vmatpush.bf16.msrb.mxu1 %v10745_v30 }
  0xb3   : > { %824 = vmatmul.bf16.gmra.mxu0 %v484_v5  ;;  %v11531_v33 = vpop.f32.mrf.mxu1 }
  0xb4   : > { %972 = vmatmul.bf16.gmra.mxu2 %v462_v6  ;;  %v500_v6 = vpack.c.bf16 %v424_v62, %v420_v60  ;;  %v1496_v60 = vshrl.u32 %v1451_v48, 16 }
  0xb5   : > { %1071 = vmatmul.bf16.gmra.mxu3 %v471_v8  ;;  %v478_v8 = vpack.c.bf16 %v378_v0, %v374_v63  ;;  %6351 = vmatpush.bf16.msrb.mxu1 %v10744_v46  ;;  %v11569_v0 = vld [vmem:[%s16323_s4] ss:$0 sm:$0xff] }
  0xb6   : > { %v1498_v16 = vrot.slane %v1496_v60, 4  ;;  %v786_v46 = vadd.f32 %v11569_v0, %v11405_v7 }
  0xb7   : > { %v11410_v10 = vpop.f32.mrf.mxu2 }
  0xb8   : > { %v11412_v11 = vpop.f32.mrf.mxu3  ;;  %v11414_v12 = vpop.f32.mrf.mxu0 }
  0xb9   : > { %16447 = vst [vmem:[#allocation9_spill] sm:$0xff] %v11412_v11  ;;  %6352 = vmatpush.bf16.msrb.mxu1 %v10743_v59 }
  0xbf   : > { %v11422_v19 = vpop.f32.mrf.mxu2 }
  0xc0   : > { %v11424_v20 = vpop.f32.mrf.mxu3  ;;  %v11426_v23 = vpop.f32.mrf.mxu0 }
  0xc1   : > { %16448 = vst [vmem:[#allocation10_spill] sm:$0xff] %v11424_v20 }
  0xc3   : > { %829 = vmatmul.bf16.gmra.mxu0 %v488_v21 }
  0xc4   : > { %977 = vmatmul.bf16.gmra.mxu2 %v466_v22  ;;  %v428_v22 = vld [vmem:[%s11268_s17 + $0x340] sm:$0xff] }
  0xc5   : > { %1076 = vmatmul.bf16.gmra.mxu3 %v475_v24  ;;  %v432_v24 = vld [vmem:[%s11268_s17 + $0x360] sm:$0xff] }
  0xc7   : > { %v11428_v25 = vpop.f32.mrf.mxu2 }
  0xc8   : > { %v11430_v26 = vpop.f32.mrf.mxu3  ;;  %v11432_v27 = vpop.f32.mrf.mxu0 }
  0xc9   : > { %16449 = vst [vmem:[#allocation11_spill] sm:$0xff] %v11430_v26  ;;  %v1371_v26 = vld [vmem:[#allocation2 + $0x8] sm:$0xf] }
  0xca   : > { %1412 = vst [vmem:[#allocation3 + $0x48] sm:$0xf] %v1371_v26 }
  0xcf   : > { %v11440_v34 = vpop.f32.mrf.mxu2 }
  0xd0   : > { %v11442_v35 = vpop.f32.mrf.mxu3  ;;  %v11444_v38 = vpop.f32.mrf.mxu0 }
  0xd1   : > { %16450 = vst [vmem:[#allocation12_spill] sm:$0xff] %v11442_v35 }
  0xd3   : > { %834 = vmatmul.bf16.gmra.mxu0 %v492_v36 }
  0xd4   : > { %982 = vmatmul.bf16.gmra.mxu2 %v470_v37 }
  0xd5   : > { %1081 = vmatmul.bf16.gmra.mxu3 %v479_v39  ;;  %v504_v39 = vpack.c.bf16 %v432_v24, %v428_v22  ;;  %v1501_v22 = vrot.slane %v1499_v61, 5  ;;  %v11600_v61 = vld [vmem:[#allocation2 + $0xc] sm:$0xf] }
  0xd7   : > { %v11449_v41 = vpop.f32.mrf.mxu2  ;;  %v1502_v48 = vor.u32 %v1501_v22, %v1498_v16 }
  0xd8   : > { %v11451_v42 = vpop.f32.mrf.mxu3  ;;  %v11453_v43 = vpop.f32.mrf.mxu0 }
  0xd9   : > { %16451 = vst [vmem:[#allocation13_spill] sm:$0xff] %v11451_v42 }
  0xdf   : > { %v11461_v50 = vpop.f32.mrf.mxu2 }
  0xe0   : > { %v11463_v51 = vpop.f32.mrf.mxu3  ;;  %v11465_v54 = vpop.f32.mrf.mxu0 }
  0xe1   : > { %16452 = vst [vmem:[#allocation14_spill] sm:$0xff] %v11463_v51  ;;  %v427_v51 = vld [vmem:[%s11268_s17 + $0x338] sm:$0xff] }
  0xe3   : > { %839 = vmatmul.bf16.gmra.mxu0 %v496_v52  ;;  %v1452_v52 = vld [vmem:[#allocation2 + $0x4] sm:$0xf] }
  0xe4   : > { %987 = vmatmul.bf16.gmra.mxu2 %v474_v53  ;;  %v11556_v53 = vpop.f32.mrf.mxu1  ;;  %v1505_v62 = vshll.u32 %v1452_v52, 16  ;;  %v1509_v63 = vshrl.u32 %v1452_v52, 16 }
  0xe5   : > { %1086 = vmatmul.bf16.gmra.mxu3 %v483_v55 }
  0xe6   : > { %v1507_v28 = vrot.slane %v1505_v62, 5  ;;  %v1511_v29 = vrot.slane %v1509_v63, 4  ;;  %v875_v62 = vadd.f32 %v11531_v33, %v786_v46  ;;  %v1503_v63 = vrot.slane %v1502_v48, 4 }
  0xe7   : > { %v11467_v56 = vpop.f32.mrf.mxu2  ;;  %v1525_v33 = vshll.u32 %v11600_v61, 16 }
  0xe8   : > { %v11469_v57 = vpop.f32.mrf.mxu3  ;;  %v11471_v58 = vpop.f32.mrf.mxu0  ;;  %v1512_v59 = vor.u32 %v1511_v29, %v1507_v28  ;;  %v788_v29 = vadd.f32 %v11569_v0, %v11414_v12  ;;  %v1369_v12 = vld [vmem:[#allocation2] sm:$0xf] }
  0xe9   : > { %16453 = vst [vmem:[#allocation15_spill] sm:$0xff] %v11469_v57  ;;  %v423_v57 = vld [vmem:[%s11268_s17 + $0x318] sm:$0xff] }
  0xea   : > { %1410 = vst [vmem:[#allocation3] sm:$0xf] %v1369_v12  ;;  %v503_v11 = vpack.c.bf16 %v427_v51, %v423_v57 }
  0xec   : > { %v11595_v52 = vpop.f32.mrf.mxu1 }
  0xef   : > { %v11485_v3 = vpop.f32.mrf.mxu2 }
  0xf0   : > { %v11488_v5 = vpop.f32.mrf.mxu3  ;;  %v11491_v9 = vpop.f32.mrf.mxu0 }
  0xf1   : > { %16454 = vst [vmem:[#allocation16_spill] sm:$0xff] %v11488_v5 }
  0xf3   : > { %844 = vmatmul.bf16.gmra.mxu0 %v500_v6  ;;  %v390_v6 = vld [vmem:[%s11268_s17 + $0x210] sm:$0xff] }
  0xf4   : > { %992 = vmatmul.bf16.gmra.mxu2 %v478_v8  ;;  %v394_v8 = vld [vmem:[%s11268_s17 + $0x230] sm:$0xff] }
  0xf5   : > { %1091 = vmatmul.bf16.gmra.mxu3 %v487_v13  ;;  %v10742_v13 = vld [vmem:[%s16321_s2 + $0x40] sm:$0xff]  ;;  %v486_v32 = vpack.c.bf16 %v394_v8, %v390_v6  ;;  %v1513_v6 = vrot.slane %v1512_v59, 4 }
  0xf6   : > { %6353 = vmatpush.bf16.msrb.mxu1 %v10742_v13 }
  0xf7   : > { %v11508_v17 = vpop.f32.mrf.mxu2 }
  0xf8   : > { %v11511_v18 = vpop.f32.mrf.mxu3  ;;  %v11514_v21 = vpop.f32.mrf.mxu0 }
  0xff   : > { %v11533_v36 = vpop.f32.mrf.mxu2 }
 0x100   : > { %v11536_v37 = vpop.f32.mrf.mxu3  ;;  %v11539_v44 = vpop.f32.mrf.mxu0 }
 0x103   : > { %849 = vmatmul.bf16.gmra.mxu0 %v504_v39  ;;  %v1453_v39 = vld [vmem:[#allocation2 + $0x8] sm:$0xf] }
 0x104   : > { %997 = vmatmul.bf16.gmra.mxu2 %v482_v40  ;;  %v1515_v60 = vshll.u32 %v1453_v39, 16  ;;  %v1519_v7 = vshrl.u32 %v1453_v39, 16  ;;  %v444_v39 = vld [vmem:[%s11268_s17 + $0x3c0] sm:$0xff] }
 0x105   : > { %1096 = vmatmul.bf16.gmra.mxu3 %v491_v45  ;;  %v495_v45 = vpack.c.bf16 %v411_v15, %v407_v14 }
 0x106   : > { %v1517_v8 = vrot.slane %v1515_v60, 5  ;;  %v1521_v13 = vrot.slane %v1519_v7, 4  ;;  %v11630_v60 = vpop.f32.mrf.mxu1  ;;  %v398_v7 = vld [vmem:[%s11268_s17 + $0x250] sm:$0xff] }
 0x107   : > { %v11550_v47 = vpop.f32.mrf.mxu2 }
 0x108   : > { %v11553_v49 = vpop.f32.mrf.mxu3  ;;  %v11558_v55 = vpop.f32.mrf.mxu0  ;;  %v1522_v22 = vor.u32 %v1521_v13, %v1517_v8  ;;  %v1518_v46 = vsel %vm11605_vm2, %v1513_v6, %v1517_v8  ;;  %v415_v13 = vld [vmem:[%s11268_s17 + $0x2d8] sm:$0xff] }
 0x109   : > { %1946 = vst [vmem:[#allocation3 + $0x28] sm:$0xf] %v1518_v46 }
 0x10a   : > { %v1523_v48 = vrot.slane %v1522_v22, 4 }
 0x10f   : > { %v11583_v24 = vpop.f32.mrf.mxu2 }
 0x110   : > { %16455 = vst [vmem:[#allocation17_spill] sm:$0xff] %v11583_v24  ;;  %v11586_v30 = vpop.f32.mrf.mxu3  ;;  %v11589_v40 = vpop.f32.mrf.mxu0 }
 0x113   : > { %854 = vmatmul.bf16.gmra.mxu0 %v508_v31 }
 0x114   : > { %1002 = vmatmul.bf16.gmra.mxu2 %v486_v32  ;;  %v1508_v32 = vsel %vm11605_vm2, %v1503_v63, %v1507_v28  ;;  %v402_v28 = vld [vmem:[%s11268_s17 + $0x270] sm:$0xff]  ;;  %v877_v63 = vadd.f32 %v11556_v53, %v788_v29  ;;  %v791_v53 = vadd.f32 %v11569_v0, %v11426_v23  ;;  %v11644_v29 = vld [vmem:[#allocation2 + $0xc] sm:$0xf] }
 0x115   : > { %1101 = vmatmul.bf16.gmra.mxu3 %v495_v45  ;;  %v448_v45 = vld [vmem:[%s11268_s17 + $0x3e0] sm:$0xff]  ;;  %1945 = vst [vmem:[#allocation3 + $0x4] sm:$0xf] %v1508_v32  ;;  %v490_v5 = vpack.c.bf16 %v402_v28, %v398_v7  ;;  %v16327_v12 = vrot.slane %v11644_v29, 5 }
 0x116   : > { %v880_v23 = vadd.f32 %v11595_v52, %v791_v53  ;;  %v9316_v7 = vld [vmem:[#allocation3 + $0x24] sm:$0xf0] }
 0x117   : > { %v963_v1 = vpop.f32.mrf.mxu2 }
 0x118   : > { %v964_v14 = vadd.f32 %v963_v1, %v875_v62  ;;  %v11610_v15 = vpop.f32.mrf.mxu3  ;;  %v11614_v16 = vpop.f32.mrf.mxu0  ;;  %v1370_v62 = vld [vmem:[#allocation2 + $0x4] sm:$0xf] }
 0x119   : > { %1411 = vst [vmem:[#allocation3 + $0x24] sm:$0xf] %v1370_v62 }
 0x11a   : > { %v1053_v31 = vadd.f32 %v11511_v18, %v964_v14  ;;  %v11628_v18 = vrot.slane %v1525_v33, 5  ;;  %v419_v14 = vld [vmem:[%s11268_s17 + $0x2f8] sm:$0xff] }
 0x11b   : > { %v499_v46 = vpack.c.bf16 %v419_v14, %v415_v13 }
 0x11c   : > { %v1132_v59 = vmax.f32 %v1053_v31, 0.0  ;;  %v1528_v6 = vsel %vm11605_vm2, %v1523_v48, %v11628_v18  ;;  %v512_v31 = vpack.c.bf16 %v448_v45, %v444_v39  ;;  %v10554_v45 = vld [vmem:[#allocation3 + $0x4] sm:$0xf] }
 0x11d   : > { %1947 = vst [vmem:[#allocation3 + $0x4c] sm:$0xf] %v1528_v6  ;;  %v9319_v62 = vor.u32 %v10554_v45, %v9316_v7 }
 0x11e   : > { %v1164_v1 = vpack.c.bf16 %v1132_v59, %v1132_v59  ;;  %v1529_v59 = vshrl.u32 %v11600_v61, 16 }
 0x11f   : > { %v965_v4 = vpop.f32.mrf.mxu2  ;;  %6354 = vmatmul.bf16.vlgmr.msrb.gmra.mxu1 %v9319_v62  ;;  %v406_v62 = vld [vmem:[%s11268_s17 + $0x290] sm:$0xff] }
 0x120   : > { %v1201_v8 = vrot.slane %v1164_v1, 5  ;;  %v966_v33 = vadd.f32 %v965_v4, %v877_v63  ;;  %v11640_v22 = vpop.f32.mrf.mxu3  ;;  %v11646_v32 = vpop.f32.mrf.mxu0  ;;  %v11651_v63 = vld [vmem:[#allocation2 + $0xc] sm:$0xf]  ;;  %v1531_v13 = vrot.slane %v1529_v59, 4 }
 0x121   : > { %16459 = vst [vmem:[#allocation19_spill] sm:$0xff] %v11651_v63  ;;  %v11654_v1 = vpop.f32.mrf.mxu1 }
 0x122   : > { %1209 = vst [vmem:[#allocation2 + $0x10] sm:$0x8] %v1201_v8  ;;  %v1055_v48 = vadd.f32 %v11536_v37, %v966_v33  ;;  %v16329_v37 = vrot.slane %v11651_v63, 6  ;;  %v1202_v53 = vrot.slane %v1201_v8, 4  ;;  %v1532_v8 = vor.u32 %v1531_v13, %v11628_v18  ;;  %v10558_v18 = vld [vmem:[#allocation3 + $0x20] sm:$0xf0] }
 0x123   : > { %859 = vmatmul.bf16.gmra.mxu0 %v512_v31  ;;  %v793_v63 = vadd.f32 %v11569_v0, %v11432_v27 }
 0x124   : > { %v1133_v39 = vmax.f32 %v1055_v48, 0.0  ;;  %1007 = vmatmul.bf16.gmra.mxu2 %v490_v5  ;;  %v2358_v5 = vrot.slane %v16327_v12, 4  ;;  %v3179_v45 = vrot.slane %v16329_v37, 4  ;;  %v9314_v12 = vld [vmem:[#allocation3] sm:$0xf] }
 0x125   : > { %1106 = vmatmul.bf16.gmra.mxu3 %v499_v46  ;;  %v9315_v35 = vor.u32 %v10558_v18, %v9314_v12 }
 0x126   : > { %v1165_v28 = vpack.c.bf16 %v1133_v39, %v1133_v39 }
 0x127   : > { %v968_v61 = vpop.f32.mrf.mxu2 }
 0x128   : > { %v1203_v14 = vrot.slane %v1165_v28, 5  ;;  %v969_v6 = vadd.f32 %v968_v61, %v880_v23  ;;  %v11659_v52 = vpop.f32.mrf.mxu3  ;;  %v11668_v31 = vpop.f32.mrf.mxu0  ;;  %v410_v61 = vld [vmem:[%s11268_s17 + $0x2b0] sm:$0xff] }
 0x129   : > { %v11666_v33 = vld [vmem:[#allocation2 + $0x10] sm:$0xf] }
 0x12a   : > { %v11670_v46 = vld [vmem:[#allocation2 + $0x10] sm:$0xf]  ;;  %v16330_v48 = vrot.slane %v11666_v33, 5  ;;  %v1058_v23 = vadd.f32 %v11553_v49, %v969_v6  ;;  %v1204_v28 = vsel %vm11662_vm7, %v1202_v53, %v1203_v14  ;;  %v1205_v13 = vrot.slane %v1203_v14, 4 }
 0x12b   : > { %v11678_v39 = vld [vmem:[#allocation2 + $0x10] sm:$0xf]  ;;  %v1535_v37 = vshll.u32 %v11670_v46, 16  ;;  %1210 = vst [vmem:[#allocation2 + $0x14] sm:$0xf] %v1204_v28  ;;  %v882_v14 = vadd.f32 %v11630_v60, %v793_v63 }
 0x12c   : > { %v2360_v7 = vsel %vm11662_vm7, %v2358_v5, %v16330_v48  ;;  %v16331_v49 = vrot.slane %v11678_v39, 6  ;;  %v1134_v6 = vmax.f32 %v1058_v23, 0.0  ;;  %v1533_v48 = vrot.slane %v1532_v8, 4  ;;  %v886_v23 = vpop.f32.mrf.mxu1  ;;  %1211 = vst [vmem:[#allocation2 + $0x18] sm:$0x7] %v1205_v13  ;;  %v418_v13 = vld [vmem:[%s11268_s17 + $0x2f0] sm:$0xff] }
 0x12d   : > { %2518 = vst [vmem:[#allocation3 + $0x30] sm:$0xf] %v2360_v7  ;;  %v494_v7 = vpack.c.bf16 %v410_v61, %v406_v62  ;;  %v11710_v28 = vrot.slane %v1535_v37, 5  ;;  %v796_v8 = vadd.f32 %v11569_v0, %v11444_v38  ;;  %v1372_v62 = vld [vmem:[#allocation2 + $0xc] sm:$0xf] }
 0x12e   : > { %v3181_v5 = vsel %vm11674_vm8, %v3179_v45, %v16331_v49  ;;  %v1166_v27 = vpack.c.bf16 %v1134_v6, %v1134_v6  ;;  %v10773_v45 = vld [vmem:[%s16321_s2 + $0x138] sm:$0xff]  ;;  %1413 = vst [vmem:[#allocation3 + $0x6c] sm:$0xf] %v1372_v62  ;;  %v10563_v62 = vld [vmem:[#allocation3 + $0x4c] sm:$0xf] }
 0x12f   : > { %v970_v53 = vpop.f32.mrf.mxu2  ;;  %3339 = vst [vmem:[#allocation3 + $0x38] sm:$0xf] %v3181_v5  ;;  %6685 = vmatpush.bf16.msra.mxu0 %v10773_v45  ;;  %v1538_v60 = vsel %vm11605_vm2, %v1533_v48, %v11710_v28  ;;  %v885_v38 = vadd.f32 %v11654_v1, %v796_v8  ;;  %v431_v6 = vld [vmem:[%s11268_s17 + $0x358] sm:$0xff] }
 0x130   : > { %v11702_v42 = vpop.f32.mrf.mxu3  ;;  %v11705_v20 = vpop.f32.mrf.mxu0  ;;  %1212 = vst [vmem:[#allocation2 + $0x1c] sm:$0xf] %v1166_v27  ;;  %v971_v12 = vadd.f32 %v970_v53, %v882_v14  ;;  %v435_v5 = vld [vmem:[%s11268_s17 + $0x378] sm:$0xff] }
 0x131   : > { %1948 = vst [vmem:[#allocation3 + $0x70] sm:$0xf] %v1538_v60  ;;  %v507_v45 = vpack.c.bf16 %v435_v5, %v431_v6 }
 0x132   : > { %v1060_v51 = vadd.f32 %v11586_v30, %v971_v12  ;;  %v1374_v6 = vld [vmem:[#allocation2 + $0x14] sm:$0xf] }
 0x133   : > { %6241 = vmatmul.bf16.vlgmr.msrb.gmra.mxu0 %v9315_v35  ;;  %v414_v35 = vld [vmem:[%s11268_s17 + $0x2d0] sm:$0xff]  ;;  %1415 = vst [vmem:[#allocation3 + $0xb4] sm:$0xf] %v1374_v6 }
 0x134   : > { %1012 = vmatmul.bf16.gmra.mxu2 %v494_v7  ;;  %v889_v48 = vpop.f32.mrf.mxu1  ;;  %v1135_v26 = vmax.f32 %v1060_v51, 0.0  ;;  %v498_v7 = vpack.c.bf16 %v418_v13, %v414_v35  ;;  %v1456_v5 = vld [vmem:[#allocation2 + $0x14] sm:$0xf] }
 0x135   : > { %1111 = vmatmul.bf16.gmra.mxu3 %v503_v11  ;;  %v798_v11 = vadd.f32 %v11569_v0, %v11453_v43  ;;  %v1373_v43 = vld [vmem:[#allocation2 + $0x10] sm:$0xf] }
 0x136   : > { %v1167_v1 = vpack.c.bf16 %v1135_v26, %v1135_v26  ;;  %v10567_v26 = vld [vmem:[#allocation3 + $0x68] sm:$0xf0]  ;;  %1414 = vst [vmem:[#allocation3 + $0x90] sm:$0xf] %v1373_v43 }
 0x137   : > { %v973_v57 = vpop.f32.mrf.mxu2  ;;  %v887_v8 = vadd.f32 %v886_v23, %v798_v11 }
 0x138   : > { %v974_v63 = vadd.f32 %v973_v57, %v885_v38  ;;  %v11719_v37 = vpop.f32.mrf.mxu3  ;;  %v11721_v61 = vpop.f32.mrf.mxu0  ;;  %1213 = vst [vmem:[#allocation2 + $0x20] sm:$0xf] %v1167_v1  ;;  %v9352_v12 = vld [vmem:[#allocation3 + $0x6c] sm:$0xf0]  ;;  %v9350_v38 = vld [vmem:[#allocation3 + $0x48] sm:$0xf]  ;;  %v801_v1 = vadd.f32 %v11569_v0, %v11465_v54 }
 0x139   : > { %v1539_v57 = vshrl.u32 %v11670_v46, 16  ;;  %v9351_v13 = vor.u32 %v10567_v26, %v9350_v38 }
 0x13a   : > { %v1063_v18 = vadd.f32 %v11610_v15, %v974_v63  ;;  %v9355_v63 = vor.u32 %v10563_v62, %v9352_v12  ;;  %v803_v62 = vadd.f32 %v11569_v0, %v11471_v58 }
 0x13c   : > { %v1136_v30 = vmax.f32 %v1063_v18, 0.0  ;;  %v891_v51 = vpop.f32.mrf.mxu1  ;;  %6359 = vmatmul.bf16.gmra.mxu1 %v9355_v63 }
 0x13d   : > { %v892_v6 = vadd.f32 %v891_v51, %v803_v62 }
 0x13e   : > { %v1168_v15 = vpack.c.bf16 %v1136_v30, %v1136_v30 }
 0x13f   : > { %v975_v53 = vpop.f32.mrf.mxu2 }
 0x140   : > { %v11730_v27 = vpop.f32.mrf.mxu3  ;;  %v11732_v14 = vpop.f32.mrf.mxu0  ;;  %v976_v60 = vadd.f32 %v975_v53, %v887_v8  ;;  %v1219_v18 = vrot.slane %v1168_v15, 7  ;;  %v1541_v53 = vrot.slane %v1539_v57, 4  ;;  %v1549_v8 = vshrl.u32 %v1456_v5, 16 }
 0x141   : > { %v890_v15 = vadd.f32 %v889_v48, %v801_v1 }
 0x142   : > { %v1065_v35 = vadd.f32 %v11640_v22, %v976_v60  ;;  %1227 = vst [vmem:[#allocation2 + $0x24] sm:$0xe] %v1219_v18  ;;  %v1457_v22 = vld [vmem:[#allocation2 + $0x18] sm:$0xf]  ;;  %v1542_v12 = vor.u32 %v1541_v53, %v11710_v28  ;;  %v1458_v60 = vld [vmem:[#allocation2 + $0x1c] sm:$0xf] }
 0x143   : > { %6246 = vmatmul.bf16.gmra.mxu0 %v9351_v13  ;;  %v1555_v54 = vshll.u32 %v1457_v22, 16  ;;  %v1559_v38 = vshrl.u32 %v1457_v22, 16  ;;  %v1565_v58 = vshll.u32 %v1458_v60, 16  ;;  %v16464_v28 = vmov 0 }
 0x144   : > { %1017 = vmatmul.bf16.gmra.mxu2 %v498_v7  ;;  %v1137_v11 = vmax.f32 %v1065_v35, 0.0  ;;  %v894_v43 = vpop.f32.mrf.mxu1  ;;  %v1551_v35 = vrot.slane %v1549_v8, 4  ;;  %v16465_v28 = vsel %vm11747_vm11, 4294967295, %v16464_v28  ;;  %v1543_v48 = vrot.slane %v1542_v12, 4 }
 0x145   : > { %1116 = vmatmul.bf16.gmra.mxu3 %v507_v45  ;;  %v1545_v45 = vshll.u32 %v1456_v5, 16  ;;  %v806_v5 = vadd.f32 %v11569_v0, %v11491_v9  ;;  %16466 = vst [vmem:[#allocation20_spill] sm:$0xff] %v16465_v28  ;;  %v1569_v1 = vshrl.u32 %v1458_v60, 16  ;;  %v1561_v8 = vrot.slane %v1559_v38, 4 }
 0x146   : > { %v1169_v7 = vpack.c.bf16 %v1137_v11, %v1137_v11  ;;  %v1220_v11 = vrot.slane %v1219_v18, 4  ;;  %v1567_v60 = vrot.slane %v1565_v58, 5 }
 0x147   : > { %v978_v23 = vpop.f32.mrf.mxu2  ;;  %v1547_v26 = vrot.slane %v1545_v45, 5  ;;  %v895_v12 = vadd.f32 %v894_v43, %v806_v5  ;;  %v1459_v43 = vld [vmem:[#allocation2 + $0x20] sm:$0xf] }
 0x148   : > { %v11738_v46 = vpop.f32.mrf.mxu3  ;;  %v11740_v30 = vpop.f32.mrf.mxu0  ;;  %v1221_v57 = vrot.slane %v1169_v7, 7  ;;  %v979_v63 = vadd.f32 %v978_v23, %v890_v15  ;;  %v1557_v23 = vrot.slane %v1555_v54, 5  ;;  %v422_v15 = vld [vmem:[%s11268_s17 + $0x310] sm:$0xff] }
 0x149   : > { %v1548_v51 = vsel %vm11605_vm2, %v1543_v48, %v1547_v26  ;;  %v1552_v9 = vor.u32 %v1551_v35, %v1547_v26  ;;  %v443_v26 = vld [vmem:[%s11268_s17 + $0x3b8] sm:$0xff] }
 0x14a   : > { %v1222_v53 = vsel %vm11747_vm11, %v1220_v11, %v1221_v57  ;;  %v1068_v22 = vadd.f32 %v11659_v52, %v979_v63  ;;  %v1223_v54 = vrot.slane %v1221_v57, 4  ;;  %1949 = vst [vmem:[#allocation3 + $0x94] sm:$0xf] %v1548_v51  ;;  %v1571_v52 = vrot.slane %v1569_v1, 4  ;;  %v439_v11 = vld [vmem:[%s11268_s17 + $0x398] sm:$0xff] }
 0x14b   : > { %1228 = vst [vmem:[#allocation2 + $0x28] sm:$0xf] %v1222_v53  ;;  %v1562_v48 = vor.u32 %v1561_v8, %v1557_v23  ;;  %v511_v58 = vpack.c.bf16 %v443_v26, %v439_v11  ;;  %v9386_v1 = vld [vmem:[#allocation3 + $0x90] sm:$0xf]  ;;  %v10576_v53 = vld [vmem:[#allocation3 + $0xb0] sm:$0xf0] }
 0x14c   : > { %v1138_v63 = vmax.f32 %v1068_v22, 0.0  ;;  %1229 = vst [vmem:[#allocation2 + $0x2c] sm:$0x1] %v1223_v54  ;;  %v896_v38 = vpop.f32.mrf.mxu1  ;;  %v9387_v51 = vor.u32 %v10576_v53, %v9386_v1  ;;  %v10764_v54 = vld [vmem:[%s16321_s2 + $0xf0] sm:$0xff]  ;;  %v10763_v11 = vld [vmem:[%s16321_s2 + $0xe8] sm:$0xff] }
 0x14e   : > { %v1170_v5 = vpack.c.bf16 %v1138_v63, %v1138_v63 }
 0x14f   : > { %v980_v13 = vpop.f32.mrf.mxu2 }
 0x150   : > { %v981_v7 = vadd.f32 %v980_v13, %v892_v6  ;;  %v11756_v18 = vpop.f32.mrf.mxu3  ;;  %v11758_v45 = vpop.f32.mrf.mxu0  ;;  %v1553_v13 = vrot.slane %v1552_v9, 4  ;;  %v426_v6 = vld [vmem:[%s11268_s17 + $0x330] sm:$0xff]  ;;  %v1235_v9 = vrot.slane %v1170_v5, 6  ;;  %v1579_v5 = vshrl.u32 %v1459_v43, 16 }
 0x151   : > { %v502_v24 = vpack.c.bf16 %v426_v6, %v422_v15  ;;  %v1572_v15 = vor.u32 %v1571_v52, %v1567_v60 }
 0x152   : > { %v1070_v62 = vadd.f32 %v11702_v42, %v981_v7  ;;  %v10765_v42 = vld [vmem:[%s16321_s2 + $0xf8] sm:$0xff]  ;;  %v1558_v57 = vsel %vm11605_vm2, %v1553_v13, %v1557_v23  ;;  %v10772_v23 = vld [vmem:[%s16321_s2 + $0x130] sm:$0xff]  ;;  %1243 = vst [vmem:[#allocation2 + $0x2c] sm:$0xc] %v1235_v9  ;;  %v1236_v52 = vrot.slane %v1235_v9, 4  ;;  %v1581_v9 = vrot.slane %v1579_v5, 4 }
 0x153   : > { %1950 = vst [vmem:[#allocation3 + $0xb8] sm:$0xf] %v1558_v57  ;;  %6572 = vmatpush.bf16.msra.mxu3 %v10765_v42  ;;  %6251 = vmatmul.bf16.gmra.mxu0 %v9387_v51 }
 0x154   : > { %v1139_v49 = vmax.f32 %v1070_v62, 0.0  ;;  %1022 = vmatmul.bf16.gmra.mxu2 %v502_v24  ;;  %v1563_v62 = vrot.slane %v1562_v48, 4  ;;  %6686 = vmatpush.bf16.msra.mxu0 %v10772_v23  ;;  %v2272_v23 = vld [vmem:[#allocation2 + $0x8] sm:$0xe] }
 0x155   : > { %1121 = vmatmul.bf16.gmra.mxu3 %v511_v58  ;;  %v10572_v58 = vld [vmem:[#allocation3 + $0x94] sm:$0xf] }
 0x156   : > { %v1171_v22 = vpack.c.bf16 %v1139_v49, %v1139_v49  ;;  %v1575_v49 = vshll.u32 %v1459_v43, 16  ;;  %v1568_v6 = vsel %vm11605_vm2, %v1563_v62, %v1567_v60 }
 0x157   : > { %v983_v35 = vpop.f32.mrf.mxu2  ;;  %6573 = vmatpush.bf16.msra.mxu3 %v10764_v54  ;;  %1951 = vst [vmem:[#allocation3 + $0xdc] sm:$0xf] %v1568_v6  ;;  %v9308_v6 = vrot.slane %v2272_v23, 9 }
 0x158   : > { %v984_v7 = vadd.f32 %v983_v35, %v895_v12  ;;  %v1237_v12 = vrot.slane %v1171_v22, 6  ;;  %v11777_v24 = vpop.f32.mrf.mxu3  ;;  %v11779_v63 = vpop.f32.mrf.mxu0  ;;  %v1573_v35 = vrot.slane %v1572_v15, 4  ;;  %v1577_v48 = vrot.slane %v1575_v49, 5 }
 0x159   : > { %v899_v22 = vpop.f32.mrf.mxu1 }
 0x15a   : > { %v1073_v8 = vadd.f32 %v11719_v37, %v984_v7  ;;  %v808_v37 = vadd.f32 %v11569_v0, %v11514_v21  ;;  %v1239_v13 = vrot.slane %v1237_v12, 4  ;;  %v1238_v57 = vsel %vm11674_vm8, %v1236_v52, %v1237_v12  ;;  %v1375_v21 = vld [vmem:[#allocation2 + $0x18] sm:$0xf]  ;;  %v9388_v1 = vld [vmem:[#allocation3 + $0xb4] sm:$0xf0]  ;;  %v10762_v52 = vld [vmem:[%s16321_s2 + $0xe0] sm:$0xff] }
 0x15b   : > { %1244 = vst [vmem:[#allocation2 + $0x30] sm:$0xf] %v1238_v57  ;;  %v1578_v60 = vsel %vm11605_vm2, %v1573_v35, %v1577_v48  ;;  %v9391_v7 = vor.u32 %v10572_v58, %v9388_v1  ;;  %6574 = vmatpush.bf16.msra.mxu3 %v10763_v11  ;;  %v1582_v49 = vor.u32 %v1581_v9, %v1577_v48  ;;  %v430_v57 = vld [vmem:[%s11268_s17 + $0x350] sm:$0xff]  ;;  %v447_v58 = vld [vmem:[%s11268_s17 + $0x3d8] sm:$0xff] }
 0x15c   : > { %v1140_v26 = vmax.f32 %v1073_v8, 0.0  ;;  %1245 = vst [vmem:[#allocation2 + $0x34] sm:$0x3] %v1239_v13  ;;  %v897_v53 = vadd.f32 %v896_v38, %v808_v37  ;;  %v1460_v8 = vld [vmem:[#allocation2 + $0x24] sm:$0xf]  ;;  %v811_v11 = vadd.f32 %v11569_v0, %v11539_v44  ;;  %v451_v44 = vld [vmem:[%s11268_s17 + $0x3f8] sm:$0xff] }
 0x15d   : > { %1952 = vst [vmem:[#allocation3 + $0x100] sm:$0xf] %v1578_v60  ;;  %6364 = vmatmul.bf16.gmra.mxu1 %v9391_v7  ;;  %v1585_v37 = vshll.u32 %v1460_v8, 16  ;;  %v1376_v13 = vld [vmem:[#allocation2 + $0x1c] sm:$0xf]  ;;  %v1583_v48 = vrot.slane %v1582_v49, 4 }
 0x15e   : > { %v1172_v51 = vpack.c.bf16 %v1140_v26, %v1140_v26  ;;  %1416 = vst [vmem:[#allocation3 + $0xd8] sm:$0xf] %v1375_v21  ;;  %v1377_v26 = vld [vmem:[#allocation2 + $0x20] sm:$0xf]  ;;  %v434_v21 = vld [vmem:[%s11268_s17 + $0x370] sm:$0xff]  ;;  %v1589_v60 = vshrl.u32 %v1460_v8, 16 }
 0x15f   : > { %v985_v42 = vpop.f32.mrf.mxu2  ;;  %6575 = vmatpush.bf16.msra.mxu3 %v10762_v52  ;;  %1417 = vst [vmem:[#allocation3 + $0xfc] sm:$0xf] %v1376_v13  ;;  %v1587_v1 = vrot.slane %v1585_v37, 5  ;;  %v506_v7 = vpack.c.bf16 %v434_v21, %v430_v57 }
 0x160   : > { %v986_v43 = vadd.f32 %v985_v42, %v897_v53  ;;  %v1248_v62 = vrot.slane %v1172_v51, 5  ;;  %v11792_v15 = vpop.f32.mrf.mxu3  ;;  %v11794_v54 = vpop.f32.mrf.mxu0  ;;  %v1378_v42 = vld [vmem:[#allocation2 + $0x24] sm:$0xf]  ;;  %v10761_v51 = vld [vmem:[%s16321_s2 + $0xd8] sm:$0xff]  ;;  %1418 = vst [vmem:[#allocation3 + $0x120] sm:$0xf] %v1377_v26 }
 0x161   : > { %v901_v5 = vpop.f32.mrf.mxu1  ;;  %v1588_v8 = vsel %vm11605_vm2, %v1583_v48, %v1587_v1  ;;  %1419 = vst [vmem:[#allocation3 + $0x144] sm:$0xf] %v1378_v42  ;;  %v1591_v26 = vrot.slane %v1589_v60, 4  ;;  %v1461_v48 = vld [vmem:[#allocation2 + $0x28] sm:$0xf] }
 0x162   : > { %v1075_v12 = vadd.f32 %v11730_v27, %v986_v43  ;;  %1256 = vst [vmem:[#allocation2 + $0x34] sm:$0x8] %v1248_v62  ;;  %v813_v27 = vadd.f32 %v11569_v0, %v11558_v55  ;;  %v16467_v55 = vrot.slane %v11644_v29, 5  ;;  %v900_v43 = vadd.f32 %v899_v22, %v811_v11  ;;  %v10760_v29 = vld [vmem:[%s16321_s2 + $0xd0] sm:$0xff] }
 0x163   : > { %6576 = vmatpush.bf16.msra.mxu3 %v10761_v51  ;;  %1953 = vst [vmem:[#allocation3 + $0x124] sm:$0xf] %v1588_v8 }
 0x164   : > { %v1141_v35 = vmax.f32 %v1075_v12, 0.0  ;;  %v2357_v9 = vsel %vm11662_vm7, %v9308_v6, %v16467_v55  ;;  %v9424_v23 = vld [vmem:[#allocation3 + $0xfc] sm:$0xf0]  ;;  %v515_v12 = vpack.c.bf16 %v451_v44, %v447_v58  ;;  %v902_v52 = vadd.f32 %v901_v5, %v813_v27  ;;  %1027 = vmatmul.bf16.gmra.mxu2 %v506_v7  ;;  %v10581_v6 = vld [vmem:[#allocation3 + $0xdc] sm:$0xf]  ;;  %v10759_v5 = vld [vmem:[%s16321_s2 + $0xc8] sm:$0xff] }
 0x165   : > { %2517 = vst [vmem:[#allocation3 + $0xc] sm:$0xf] %v2357_v9  ;;  %v9427_v57 = vor.u32 %v10581_v6, %v9424_v23  ;;  %v816_v27 = vadd.f32 %v11569_v0, %v11589_v40  ;;  %v1592_v58 = vor.u32 %v1591_v26, %v1587_v1  ;;  %v10757_v40 = vld [vmem:[%s16321_s2 + $0xb8] sm:$0xff]  ;;  %v9422_v44 = vld [vmem:[#allocation3 + $0xd8] sm:$0xf]  ;;  %v1599_v26 = vshrl.u32 %v1461_v48, 16 }
 0x166   : > { %v1173_v53 = vpack.c.bf16 %v1141_v35, %v1141_v35  ;;  %1126 = vmatmul.bf16.gmra.mxu3 %v515_v12  ;;  %v1249_v35 = vrot.slane %v1248_v62, 4  ;;  %v1595_v62 = vshll.u32 %v1461_v48, 16  ;;  %v10585_v51 = vld [vmem:[#allocation3 + $0xf8] sm:$0xf0]  ;;  %6459 = vmatpush.bf16.msra.mxu2 %v10757_v40  ;;  %v1462_v6 = vld [vmem:[#allocation2 + $0x2c] sm:$0xf] }
 0x167   : > { %v988_v38 = vpop.f32.mrf.mxu2  ;;  %6577 = vmatpush.bf16.msra.mxu3 %v10760_v29  ;;  %v905_v1 = vadd.f32 %v11410_v10, %v816_v27  ;;  %v9423_v9 = vor.u32 %v10585_v51, %v9422_v44  ;;  %v438_v23 = vld [vmem:[%s11268_s17 + $0x390] sm:$0xff]  ;;  %v1593_v8 = vrot.slane %v1592_v58, 4  ;;  %v10755_v48 = vld [vmem:[%s16321_s2 + $0xa8] sm:$0xff]  ;;  %v1609_v58 = vshrl.u32 %v1462_v6, 16 }
 0x168   : > { %v11815_v49 = vpop.f32.mrf.mxu3  ;;  %v11817_v37 = vpop.f32.mrf.mxu0  ;;  %v1250_v13 = vrot.slane %v1173_v53, 5  ;;  %v989_v11 = vadd.f32 %v988_v38, %v900_v43  ;;  %v442_v12 = vld [vmem:[%s11268_s17 + $0x3b0] sm:$0xff]  ;;  %v1601_v40 = vrot.slane %v1599_v26, 4 }
 0x169   : > { %6256 = vmatmul.bf16.gmra.mxu0 %v9423_v9  ;;  %v510_v10 = vpack.c.bf16 %v442_v12, %v438_v23  ;;  %v2275_v9 = vld [vmem:[#allocation2 + $0x14] sm:$0xf]  ;;  %v11869_v23 = vld [vmem:[#allocation2 + $0x1c] sm:$0xf]  ;;  %v11871_v12 = vld [vmem:[#allocation2 + $0x30] sm:$0xf] }
 0x16a   : > { %v1251_v42 = vsel %vm11662_vm7, %v1249_v35, %v1250_v13  ;;  %v1078_v38 = vadd.f32 %v11738_v46, %v989_v11  ;;  %v1252_v7 = vrot.slane %v1250_v13, 4  ;;  %v10758_v46 = vld [vmem:[%s16321_s2 + $0xc0] sm:$0xff]  ;;  %v2362_v26 = vrot.slane %v2275_v9, 5 }
 0x16b   : > { %1257 = vst [vmem:[#allocation2 + $0x38] sm:$0xf] %v1251_v42  ;;  %6578 = vmatpush.bf16.msra.mxu3 %v10759_v5  ;;  %v1379_v42 = vld [vmem:[#allocation2 + $0x28] sm:$0xf]  ;;  %v818_v5 = vadd.f32 %v11569_v0, %v11614_v16 }
 0x16c   : > { %v1142_v43 = vmax.f32 %v1078_v38, 0.0  ;;  %1258 = vst [vmem:[#allocation2 + $0x3c] sm:$0x7] %v1252_v7  ;;  %v1605_v38 = vshll.u32 %v1462_v6, 16  ;;  %v10594_v6 = vld [vmem:[#allocation3 + $0x140] sm:$0xf0] }
 0x16d   : > { %6369 = vmatmul.bf16.gmra.mxu1 %v9427_v57  ;;  %v10555_v57 = vld [vmem:[#allocation3 + $0xc] sm:$0xf]  ;;  %1420 = vst [vmem:[#allocation3 + $0x168] sm:$0xf] %v1379_v42  ;;  %v907_v51 = vadd.f32 %v11422_v19, %v818_v5  ;;  %v1464_v42 = vld [vmem:[#allocation2 + $0x34] sm:$0xf] }
 0x16e   : > { %v9458_v5 = vld [vmem:[#allocation3 + $0x120] sm:$0xf]  ;;  %v1625_v9 = vshll.u32 %v1464_v42, 16 }
 0x16f   : > { %v990_v22 = vpop.f32.mrf.mxu2  ;;  %6579 = vmatpush.bf16.msra.mxu3 %v10758_v46  ;;  %v10754_v46 = vld [vmem:[%s16321_s2 + $0xa0] sm:$0xff] }
 0x170   : > { %v991_v21 = vadd.f32 %v990_v22, %v902_v52  ;;  %v11833_v53 = vpop.f32.mrf.mxu0  ;;  %v11838_v55 = vpop.f32.mrf.mxu3  ;;  %v1597_v52 = vrot.slane %v1595_v62, 5  ;;  %v9324_v22 = vld [vmem:[#allocation3 + $0x2c] sm:$0xf0] }
 0x171   : > { %v9327_v62 = vor.u32 %v10555_v57, %v9324_v22  ;;  %v10590_v22 = vld [vmem:[#allocation3 + $0x124] sm:$0xf] }
 0x172   : > { %v1080_v60 = vadd.f32 %v11756_v18, %v991_v21  ;;  %v1598_v11 = vsel %vm11605_vm2, %v1593_v8, %v1597_v52  ;;  %v10756_v21 = vld [vmem:[%s16321_s2 + $0xb0] sm:$0xff]  ;;  %v1602_v8 = vor.u32 %v1601_v40, %v1597_v52  ;;  %v16468_v52 = vrot.slane %v11666_v33, 5 }
 0x173   : > { %1954 = vst [vmem:[#allocation3 + $0x148] sm:$0xf] %v1598_v11  ;;  %6460 = vmatpush.bf16.msra.mxu2 %v10756_v21  ;;  %v1615_v21 = vshll.u32 %v11871_v12, 16  ;;  %v9459_v40 = vor.u32 %v10594_v6, %v9458_v5 }
 0x174   : > { %v1143_v13 = vmax.f32 %v1080_v60, 0.0  ;;  %1032 = vmatmul.bf16.gmra.mxu2 %v510_v10  ;;  %v2368_v10 = vrot.slane %v11869_v23, 5 }
 0x176   : > { %v10858_v35 = vpack.c.bf16 %v1143_v13, %v1142_v43  ;;  %6580 = vmatmul.bf16.vlgmr.msra.gmra.mxu3 %v9327_v62  ;;  %v821_v43 = vadd.f32 %v11569_v0, %v11646_v32 }
 0x177   : > { %v993_v18 = vpop.f32.mrf.mxu2  ;;  %6461 = vmatpush.bf16.msra.mxu2 %v10755_v48  ;;  %v1603_v48 = vrot.slane %v1602_v8, 4  ;;  %v11895_v8 = vrot.slane %v1615_v21, 5  ;;  %v10753_v21 = vld [vmem:[%s16321_s2 + $0x98] sm:$0xff] }
 0x178   : > { %v994_v29 = vadd.f32 %v993_v18, %v905_v1  ;;  %10965 = vst [vmem:[#allocation2 + $0x40] sm:$0xff] %v10858_v35   ;;  %v11861_v16 = vpop.f32.mrf.mxu3  ;;  %v1611_v1 = vrot.slane %v1609_v58, 4  ;;  %v1607_v18 = vrot.slane %v1605_v38, 5  ;;  %v11876_v35 = vld [vmem:[#allocation2 + $0x18] sm:$0xf]  ;;  %v910_v58 = vadd.f32 %v11428_v25, %v821_v43 }
 0x179   : > { %6261 = vmatmul.bf16.gmra.mxu0 %v9459_v40 }
 0x17a   : > { %v1083_v27 = vadd.f32 %v11777_v24, %v994_v29  ;;  %v11857_v24 = vpop.f32.mrf.mxu0  ;;  %v11873_v29 = vld [vmem:[#allocation2 + $0x20] sm:$0xf]  ;;  %v1612_v57 = vor.u32 %v1611_v1, %v1607_v18  ;;  %v1608_v33 = vsel %vm11605_vm2, %v1603_v48, %v1607_v18  ;;  %v2370_v1 = vrot.slane %v2368_v10, 4  ;;  %v450_v18 = vld [vmem:[%s11268_s17 + $0x3f0] sm:$0xff] }
 0x17b   : > { %v9460_v19 = vld [vmem:[#allocation3 + $0x144] sm:$0xf0]  ;;  %6462 = vmatpush.bf16.msra.mxu2 %v10754_v46  ;;  %v446_v46 = vld [vmem:[%s11268_s17 + $0x3d0] sm:$0xff]  ;;  %1955 = vst [vmem:[#allocation3 + $0x16c] sm:$0xf] %v1608_v33 }
 0x17c   : > { %v1144_v60 = vmax.f32 %v1083_v27, 0.0  ;;  %v9463_v32 = vor.u32 %v10590_v22, %v9460_v19  ;;  %v2361_v27 = vrot.slane %v16468_v52, 4  ;;  %v1613_v43 = vrot.slane %v1612_v57, 4 }
 0x17d   : > { %v1629_v22 = vshrl.u32 %v1464_v42, 16  ;;  %v823_v52 = vadd.f32 %v11569_v0, %v11668_v31  ;;  %v514_v57 = vpack.c.bf16 %v450_v18, %v446_v46  ;;  %v10771_v42 = vld [vmem:[%s16321_s2 + $0x128] sm:$0xff]  ;;  %v1619_v0 = vshrl.u32 %v11871_v12, 16 }
 0x17e   : > { %v11859_v44 = vpack.c.bf16 %v1144_v60, %v1144_v60  ;;  %v2371_v60 = vrot.slane %v11873_v29, 5  ;;  %6374 = vmatmul.bf16.gmra.mxu1 %v9463_v32  ;;  %v2364_v32 = vrot.slane %v2362_v26, 4  ;;  %6687 = vmatpush.bf16.msra.mxu0 %v10771_v42 }
 0x17f   : > { %v995_v7 = vpop.f32.mrf.mxu2  ;;  %6463 = vmatpush.bf16.msra.mxu2 %v10753_v21  ;;  %v1621_v33 = vrot.slane %v1619_v0, 4  ;;  %v10750_v21 = vld [vmem:[%s16321_s2 + $0x80] sm:$0xff] }
 0x180   : > { %v996_v13 = vadd.f32 %v995_v7, %v907_v51  ;;  %v1263_v11 = vrot.slane %v11859_v44, 7  ;;  %v1380_v7 = vld [vmem:[#allocation2 + $0x2c] sm:$0xf]  ;;  %v2365_v51 = vrot.slane %v11876_v35, 5  ;;  %v11899_v6 = vpop.f32.mrf.mxu3 }
 0x181   : > { %1421 = vst [vmem:[#allocation3 + $0x18c] sm:$0xf] %v1380_v7  ;;  %v912_v7 = vadd.f32 %v11440_v34, %v823_v52  ;;  %v10751_v34 = vld [vmem:[%s16321_s2 + $0x88] sm:$0xff]  ;;  %v1622_v18 = vor.u32 %v1621_v33, %v11895_v8 }
 0x182   : > { %v1085_v38 = vadd.f32 %v11792_v15, %v996_v13  ;;  %1271 = vst [vmem:[#allocation2 + $0x48] sm:$0xe] %v1263_v11  ;;  %v2363_v15 = vsel %vm11662_vm7, %v2361_v27, %v2362_v26  ;;  %v11897_v13 = vpop.f32.mrf.mxu0  ;;  %v1618_v27 = vsel %vm11605_vm2, %v1613_v43, %v11895_v8  ;;  %v2372_v26 = vsel %vm11662_vm7, %v2370_v1, %v2371_v60  ;;  %v9494_v8 = vld [vmem:[#allocation3 + $0x168] sm:$0xf] }
 0x183   : > { %2519 = vst [vmem:[#allocation3 + $0x54] sm:$0xf] %v2363_v15  ;;  %v2366_v5 = vsel %vm11662_vm7, %v2364_v32, %v2365_v51  ;;  %v1264_v1 = vrot.slane %v1263_v11, 4  ;;  %v10599_v11 = vld [vmem:[#allocation3 + $0x16c] sm:$0xf] }
 0x184   : > { %v1145_v19 = vmax.f32 %v1085_v38, 0.0  ;;  %1956 = vst [vmem:[#allocation3 + $0x190] sm:$0xf] %v1618_v27  ;;  %v10752_v38 = vld [vmem:[%s16321_s2 + $0x90] sm:$0xff]  ;;  %1037 = vmatmul.bf16.gmra.mxu2 %v514_v57 }
 0x185   : > { %2520 = vst [vmem:[#allocation3 + $0x78] sm:$0xf] %v2366_v5  ;;  %6464 = vmatpush.bf16.msra.mxu2 %v10752_v38 }
 0x186   : > { %v1177_v31 = vpack.c.bf16 %v1145_v19, %v1145_v19  ;;  %2522 = vst [vmem:[#allocation3 + $0xc0] sm:$0xf] %v2372_v26 }
 0x187   : > { %v998_v62 = vpop.f32.mrf.mxu2 }
 0x188   : > { %v999_v25 = vadd.f32 %v998_v62, %v910_v58  ;;  %v1627_v58 = vrot.slane %v1625_v9, 5  ;;  %v1631_v62 = vrot.slane %v1629_v22, 4  ;;  %v1265_v40 = vrot.slane %v1177_v31, 7  ;;  %v11946_v32 = vpop.f32.mrf.mxu3  ;;  %v10603_v5 = vld [vmem:[#allocation3 + $0x188] sm:$0xf0] }
 0x189   : > { %6465 = vmatpush.bf16.msra.mxu2 %v10751_v34  ;;  %v1382_v34 = vld [vmem:[#allocation2 + $0x34] sm:$0xf] }
 0x18a   : > { %v1088_v48 = vadd.f32 %v11815_v49, %v999_v25  ;;  %v11930_v49 = vld [vmem:[%s16323_s4] ss:$0 sm:$0xff]  ;;  %v11934_v25 = vld [vmem:[#allocation2 + $0x38] sm:$0xf]  ;;  %v1632_v43 = vor.u32 %v1631_v62, %v1627_v58  ;;  %v1266_v22 = vsel %vm11747_vm11, %v1264_v1, %v1265_v40  ;;  %v11943_v19 = vpop.f32.mrf.mxu0  ;;  %v1267_v27 = vrot.slane %v1265_v40, 4 }
 0x18b   : > { %v826_v15 = vadd.f32 %v11930_v49, %v11705_v20  ;;  %v1635_v44 = vshll.u32 %v11934_v25, 16  ;;  %v9496_v52 = vld [vmem:[#allocation3 + $0x18c] sm:$0xf0]  ;;  %1272 = vst [vmem:[#allocation2 + $0x4c] sm:$0xf] %v1266_v22  ;;  %v9495_v62 = vor.u32 %v10603_v5, %v9494_v8 }
 0x18c   : > { %v1146_v46 = vmax.f32 %v1088_v48, 0.0  ;;  %v9499_v26 = vor.u32 %v10599_v11, %v9496_v52  ;;  %v1633_v0 = vrot.slane %v1632_v43, 4  ;;  %1273 = vst [vmem:[#allocation2 + $0x50] sm:$0x1] %v1267_v27  ;;  %v10564_v48 = vld [vmem:[#allocation3 + $0x54] sm:$0xf]  ;;  %v828_v27 = vadd.f32 %v11930_v49, %v11721_v61 }
 0x18d   : > { %v915_v42 = vadd.f32 %v11449_v41, %v826_v15  ;;  %6466 = vmatpush.bf16.msra.mxu2 %v10750_v21  ;;  %v2367_v41 = vrot.slane %v2365_v51, 4  ;;  %6266 = vmatmul.bf16.gmra.mxu0 %v9495_v62  ;;  %1423 = vst [vmem:[#allocation3 + $0x1d4] sm:$0xf] %v1382_v34  ;;  %v9396_v34 = vld [vmem:[#allocation3 + $0xbc] sm:$0xf0] }
 0x18e   : > { %v1178_v20 = vpack.c.bf16 %v1146_v46, %v1146_v46  ;;  %6379 = vmatmul.bf16.gmra.mxu1 %v9499_v26  ;;  %v11954_v46 = vrot.slane %v1635_v44, 5 }
 0x18f   : > { %v1000_v12 = vpop.f32.mrf.mxu2  ;;  %v2369_v35 = vsel %vm11662_vm7, %v2367_v41, %v2368_v10  ;;  %v11977_v10 = vld [vmem:[#allocation2 + $0x8] sm:$0xf]  ;;  %v11993_v41 = vld [vmem:[#allocation2 + $0x40] sm:$0xf] }
 0x190   : > { %v1001_v9 = vadd.f32 %v1000_v12, %v912_v7  ;;  %v9360_v12 = vld [vmem:[#allocation3 + $0x74] sm:$0xf0]  ;;  %v1276_v40 = vrot.slane %v1178_v20, 6  ;;  %v1638_v22 = vsel %vm11605_vm2, %v1633_v0, %v11954_v46  ;;  %v11971_v11 = vpop.f32.mrf.mxu3  ;;  %2521 = vst [vmem:[#allocation3 + $0x9c] sm:$0xf] %v2369_v35  ;;  %v2073_v5 = vrot.slane %v11977_v10, 5 }
 0x191   : > { %v1381_v7 = vld [vmem:[#allocation2 + $0x30] sm:$0xf]  ;;  %v9363_v33 = vor.u32 %v10564_v48, %v9360_v12  ;;  %1958 = vst [vmem:[#allocation3 + $0x1d8] sm:$0xf] %v1638_v22 }
 0x192   : > { %v1090_v57 = vadd.f32 %v11838_v55, %v1001_v9  ;;  %v1623_v55 = vrot.slane %v1622_v18, 4  ;;  %1422 = vst [vmem:[#allocation3 + $0x1b0] sm:$0xf] %v1381_v7  ;;  %v1986_v9 = vld [vmem:[#allocation2] sm:$0xe]  ;;  %v1277_v8 = vrot.slane %v1276_v40, 4 }
 0x193   : > { %1284 = vst [vmem:[#allocation2 + $0x50] sm:$0xc] %v1276_v40  ;;  %6585 = vmatmul.bf16.gmra.mxu3 %v9363_v33  ;;  %v1987_v18 = vld [vmem:[#allocation2 + $0x4] sm:$0xf]  ;;  %v9307_v20 = vrot.slane %v1986_v9, 9 }
 0x194   : > { %v1147_v1 = vmax.f32 %v1090_v57, 0.0  ;;  %v1628_v15 = vsel %vm11605_vm2, %v1623_v55, %v1627_v58  ;;  %v11968_v58 = vpop.f32.mrf.mxu0  ;;  %v2070_v44 = vrot.slane %v1987_v18, 5 }
 0x195   : > { %1957 = vst [vmem:[#allocation3 + $0x1b4] sm:$0xf] %v1628_v15 }
 0x196   : > { %v1179_v51 = vpack.c.bf16 %v1147_v1, %v1147_v1  ;;  %v2071_v57 = vsel %vm11662_vm7, %v9307_v20, %v2070_v44  ;;  %v2072_v0 = vrot.slane %v2070_v44, 4  ;;  %v831_v44 = vadd.f32 %v11930_v49, %v11732_v14  ;;  %v1990_v14 = vld [vmem:[#allocation2 + $0x10] sm:$0xf] }
 0x197   : > { %v1003_v31 = vpop.f32.mrf.mxu2  ;;  %2231 = vst [vmem:[#allocation3 + $0x8] sm:$0xf] %v2071_v57  ;;  %v10573_v35 = vld [vmem:[#allocation3 + $0x9c] sm:$0xf]  ;;  %v1655_v57 = vshll.u32 %v11993_v41, 16 }
 0x198   : > { %v1004_v38 = vadd.f32 %v1003_v31, %v915_v42  ;;  %v1278_v23 = vrot.slane %v1179_v51, 6  ;;  %v917_v31 = vadd.f32 %v11461_v50, %v828_v27  ;;  %v9532_v7 = vld [vmem:[#allocation3 + $0x1d4] sm:$0xf0]  ;;  %v2074_v40 = vsel %vm11662_vm7, %v2072_v0, %v2073_v5  ;;  %v11995_v9 = vpop.f32.mrf.mxu3 }
 0x199   : > { %2232 = vst [vmem:[#allocation3 + $0x2c] sm:$0xf] %v2074_v40  ;;  %v2560_v0 = vld [vmem:[#allocation2 + $0x10] sm:$0xf]  ;;  %v2279_v40 = vld [vmem:[#allocation2 + $0x24] sm:$0xf] }
 0x19a   : > { %v1093_v43 = vadd.f32 %v11861_v16, %v1004_v38  ;;  %v1639_v16 = vshrl.u32 %v11934_v25, 16  ;;  %v1466_v25 = vld [vmem:[#allocation2 + $0x3c] sm:$0xf]  ;;  %v1279_v61 = vsel %vm11674_vm8, %v1277_v8, %v1278_v23  ;;  %v1280_v33 = vrot.slane %v1278_v23, 4  ;;  %v1383_v23 = vld [vmem:[#allocation2 + $0x38] sm:$0xf] }
 0x19b   : > { %v1649_v38 = vshrl.u32 %v1466_v25, 16  ;;  %v1645_v1 = vshll.u32 %v1466_v25, 16  ;;  %1285 = vst [vmem:[#allocation2 + $0x54] sm:$0xf] %v1279_v61  ;;  %v1989_v25 = vld [vmem:[#allocation2 + $0xc] sm:$0xf]  ;;  %v920_v61 = vadd.f32 %v11467_v56, %v831_v44 }
 0x19c   : > { %v1148_v52 = vmax.f32 %v1093_v43, 0.0  ;;  %v1641_v42 = vrot.slane %v1639_v16, 4  ;;  %v10608_v55 = vld [vmem:[#allocation3 + $0x1b4] sm:$0xf]  ;;  %v11991_v50 = vpop.f32.mrf.mxu0  ;;  %1286 = vst [vmem:[#allocation2 + $0x58] sm:$0x3] %v1280_v33  ;;  %v9399_v16 = vor.u32 %v10573_v35, %v9396_v34 }
 0x19d   : > { %v9535_v15 = vor.u32 %v10608_v55, %v9532_v7  ;;  %v10612_v43 = vld [vmem:[#allocation3 + $0x1d0] sm:$0xf0]  ;;  %v1651_v18 = vrot.slane %v1649_v38, 4  ;;  %1424 = vst [vmem:[#allocation3 + $0x1f8] sm:$0xf] %v1383_v23  ;;  %v12004_v38 = vrot.slane %v1655_v57, 5 }
 0x19e   : > { %v11979_v21 = vpack.c.bf16 %v1148_v52, %v1148_v52  ;;  %v1642_v12 = vor.u32 %v1641_v42, %v11954_v46  ;;  %v9530_v46 = vld [vmem:[#allocation3 + $0x1b0] sm:$0xf]  ;;  %v1647_v52 = vrot.slane %v1645_v1, 5  ;;  %v2076_v7 = vrot.slane %v1989_v25, 5 }
 0x19f   : > { %v1005_v26 = vpop.f32.mrf.mxu2  ;;  %6384 = vmatmul.bf16.gmra.mxu1 %v9535_v15  ;;  %v9531_v20 = vor.u32 %v10612_v43, %v9530_v46  ;;  %v2079_v43 = vrot.slane %v1990_v14, 5  ;;  %v12015_v44 = vld [vmem:[#allocation2 + $0x28] sm:$0xf]  ;;  %v2625_v57 = vshll.u32 %v2560_v0, 16 }
 0x1a0   : > { %v1006_v48 = vadd.f32 %v1005_v26, %v917_v31  ;;  %v1289_v62 = vrot.slane %v11979_v21, 5  ;;  %v1643_v51 = vrot.slane %v1642_v12, 4  ;;  %v1384_v21 = vld [vmem:[#allocation2 + $0x3c] sm:$0xf]  ;;  %v1652_v42 = vor.u32 %v1651_v18, %v1647_v52  ;;  %v9322_v31 = vld [vmem:[#allocation3 + $0x8] sm:$0xf]  ;;  %v12008_v46 = vpop.f32.mrf.mxu3 }
 0x1a1   : > { %6271 = vmatmul.bf16.gmra.mxu0 %v9531_v20  ;;  %1425 = vst [vmem:[#allocation3 + $0x21c] sm:$0xf] %v1384_v21  ;;  %v10559_v12 = vld [vmem:[#allocation3 + $0x28] sm:$0xf0]  ;;  %v12034_v29 = vrot.slane %v2625_v57, 6 }
 0x1a2   : > { %v1095_v22 = vadd.f32 %v11899_v6, %v1006_v48  ;;  %1297 = vst [vmem:[#allocation2 + $0x58] sm:$0x8] %v1289_v62  ;;  %v1648_v6 = vsel %vm11605_vm2, %v1643_v51, %v1647_v52  ;;  %v3665_v48 = vld [vmem:[#allocation2 + $0x10] sm:$0xc]  ;;  %v9323_v1 = vor.u32 %v10559_v12, %v9322_v31  ;;  %v1653_v15 = vrot.slane %v1652_v42, 4 }
 0x1a3   : > { %6590 = vmatmul.bf16.gmra.mxu3 %v9399_v16  ;;  %1959 = vst [vmem:[#allocation3 + $0x1fc] sm:$0xf] %v1648_v6  ;;  %v3711_v18 = vshrl.u32 %v3665_v48, 16  ;;  %v3714_v20 = vshll.u32 %v3665_v48, 16  ;;  %v1290_v56 = vrot.slane %v1289_v62, 4  ;;  %v2075_v51 = vrot.slane %v2073_v5, 4 }
 0x1a4   : > { %v1149_v27 = vmax.f32 %v1095_v22, 0.0  ;;  %v12006_v55 = vpop.f32.mrf.mxu0  ;;  %v2622_v22 = vshrl.u32 %v2560_v0, 16  ;;  %6467 = vmatmul.bf16.vlgmr.msra.gmra.mxu2 %v9323_v1  ;;  %v1658_v35 = vsel %vm11605_vm2, %v1653_v15, %v12004_v38  ;;  %v2374_v16 = vrot.slane %v2279_v40, 5  ;;  %v9566_v31 = vld [vmem:[#allocation3 + $0x1f8] sm:$0xf] }
 0x1a5   : > { %v2078_v52 = vrot.slane %v2076_v7, 4  ;;  %v12020_v6 = vrot.slane %v2079_v43, 4  ;;  %v3713_v21 = vrot.slane %v3711_v18, 6  ;;  %1960 = vst [vmem:[#allocation3 + $0x220] sm:$0xf] %v1658_v35  ;;  %v16333_v42 = vrot.slane %v12015_v44, 5 }
 0x1a6   : > { %v1181_v26 = vpack.c.bf16 %v1149_v27, %v1149_v27  ;;  %v12022_v62 = vrot.slane %v2622_v22, 5  ;;  %v3716_v10 = vrot.slane %v3714_v20, 7  ;;  %v2373_v5 = vrot.slane %v2371_v60, 4  ;;  %v12036_v60 = vld [vmem:[#allocation2 + $0x10] sm:$0xc] }
 0x1a7   : > { %v1008_v8 = vpop.f32.mrf.mxu2  ;;  %v2376_v25 = vrot.slane %v2374_v16, 4  ;;  %v2080_v14 = vsel %vm11662_vm7, %v2078_v52, %v2079_v43  ;;  %16469 = vst [vmem:[#allocation21_spill] sm:$0xff] %v12036_v60  ;;  %v12044_v1 = vld [vmem:[#allocation2 + $0x10] sm:$0x8]  ;;  %v12046_v15 = vld [vmem:[#allocation2 + $0x14] sm:$0xf]  ;;  %v833_v35 = vadd.f32 %v11930_v49, %v11740_v30 }
 0x1a8   : > { %v1009_v33 = vadd.f32 %v1008_v8, %v920_v61  ;;  %v1291_v34 = vrot.slane %v1181_v26, 5  ;;  %v1659_v8 = vshrl.u32 %v11993_v41, 16  ;;  %v10621_v61 = vld [vmem:[#allocation3 + $0x218] sm:$0xf0]  ;;  %v2375_v48 = vsel %vm11662_vm7, %v2373_v5, %v2374_v16  ;;  %16470 = vst [vmem:[#allocation22_spill] sm:$0xff] %v12044_v1 }
 0x1a9   : > { %v9567_v12 = vor.u32 %v10621_v61, %v9566_v31  ;;  %v2378_v41 = vsel %vm11662_vm7, %v2376_v25, %v16333_v42  ;;  %16471 = vst [vmem:[#allocation23_spill] sm:$0xff] %v12046_v15  ;;  %v3717_v43 = vor.u32 %v3716_v10, %v3713_v21  ;;  %v1468_v22 = vld [vmem:[#allocation2 + $0x44] sm:$0xf]  ;;  %v12053_v52 = vld [vmem:[#allocation2 + $0x14] sm:$0xf] }
 0x1aa   : > { %v1098_v27 = vadd.f32 %v11946_v32, %v1009_v33  ;;  %v1292_v23 = vsel %vm11662_vm7, %v1290_v56, %v1291_v34  ;;  %v1293_v26 = vrot.slane %v1291_v34, 4  ;;  %v2077_v32 = vsel %vm11662_vm7, %v2075_v51, %v2076_v7  ;;  %v6355_v7 = vpop.f32.mrf.mxu1  ;;  %2234 = vst [vmem:[#allocation3 + $0x74] sm:$0xf] %v2080_v14  ;;  %v12048_v34 = vpop.f32.mrf.mxu3  ;;  %v10617_v18 = vld [vmem:[#allocation3 + $0x1fc] sm:$0xf] }
 0x1ab   : > { %1298 = vst [vmem:[#allocation2 + $0x5c] sm:$0xf] %v1292_v23  ;;  %v1661_v16 = vrot.slane %v1659_v8, 4  ;;  %v16473_v23 = vrot.slane %v11678_v39, 6  ;;  %v12059_v10 = vld [vmem:[#allocation2 + $0x18] sm:$0xf] }
 0x1ac   : > { %v1150_v0 = vmax.f32 %v1098_v27, 0.0  ;;  %1299 = vst [vmem:[#allocation2 + $0x60] sm:$0x7] %v1293_v26  ;;  %v12042_v40 = vpop.f32.mrf.mxu0  ;;  %v9568_v51 = vld [vmem:[#allocation3 + $0x21c] sm:$0xf0]  ;;  %v16332_v26 = vrot.slane %v12046_v15, 6 }
 0x1ad   : > { %2233 = vst [vmem:[#allocation3 + $0x50] sm:$0xf] %v2077_v32  ;;  %v3666_v27 = vld [vmem:[#allocation2 + $0x14] sm:$0xf]  ;;  %v9571_v57 = vor.u32 %v10617_v18, %v9568_v51  ;;  %v12057_v21 = vrot.slane %v16473_v23, 4  ;;  %v12062_v32 = vrot.slane %v3717_v43, 4  ;;  %v1662_v61 = vor.u32 %v1661_v16, %v12004_v38 }
 0x1ae   : > { %v1182_v33 = vpack.c.bf16 %v1150_v0, %v1150_v0  ;;  %2523 = vst [vmem:[#allocation3 + $0xe4] sm:$0xf] %v2375_v48  ;;  %v2562_v5 = vld [vmem:[#allocation2 + $0x18] sm:$0xf]  ;;  %v1669_v8 = vshrl.u32 %v1468_v22, 16  ;;  %v1665_v14 = vshll.u32 %v1468_v22, 16  ;;  %v922_v48 = vadd.f32 %v11485_v3, %v833_v35 }
 0x1af   : > { %v1010_v20 = vpop.f32.mrf.mxu2  ;;  %2524 = vst [vmem:[#allocation3 + $0x108] sm:$0xf] %v2378_v41  ;;  %v12065_v25 = vld [vmem:[#allocation2 + $0x18] sm:$0xf]  ;;  %6389 = vmatmul.bf16.gmra.mxu1 %v9571_v57  ;;  %v2642_v41 = vshrl.u32 %v2562_v5, 16  ;;  %v2645_v7 = vshll.u32 %v2562_v5, 16  ;;  %v836_v51 = vadd.f32 %v11930_v49, %v11758_v45 }
 0x1b0   : > { %16472 = vst [vmem:[#allocation24_spill] sm:$0xff] %v12053_v52  ;;  %v3667_v31 = vld [vmem:[#allocation2 + $0x18] sm:$0xf]  ;;  %v12072_v43 = vld [vmem:[#allocation2 + $0x48] sm:$0xf]  ;;  %v12077_v22 = vrot.slane %v16332_v26, 4  ;;  %v1011_v57 = vadd.f32 %v1010_v20, %v922_v48 }
 0x1b1   : > { %6276 = vmatmul.bf16.gmra.mxu0 %v9567_v12  ;;  %1300 = vst [vmem:[#allocation2 + $0x64] sm:$0xf] %v1182_v33  ;;  %v3720_v33 = vshrl.u32 %v3666_v27, 16  ;;  %v3723_v38 = vshll.u32 %v3666_v27, 16  ;;  %v3730_v16 = vshrl.u32 %v3667_v31, 16  ;;  %v1667_v35 = vrot.slane %v1665_v14, 5 }
 0x1b2   : > { %16474 = vst [vmem:[#allocation25_spill] sm:$0xff] %v12057_v21  ;;  %v12081_v3 = vld [vmem:[#allocation2 + $0x14] sm:$0xf]  ;;  %v1671_v23 = vrot.slane %v1669_v8, 4  ;;  %v6357_v5 = vpop.f32.mrf.mxu1  ;;  %v1675_v56 = vshll.u32 %v12072_v43, 16  ;;  %v1663_v18 = vrot.slane %v1662_v61, 4  ;;  %v12084_v0 = vpop.f32.mrf.mxu3  ;;  %v1100_v8 = vadd.f32 %v11971_v11, %v1011_v57 }
 0x1b3   : > { %16475 = vst [vmem:[#allocation26_spill] sm:$0xff] %v12062_v32  ;;  %v1991_v26 = vld [vmem:[#allocation2 + $0x14] sm:$0xf]  ;;  %v10568_v12 = vld [vmem:[#allocation3 + $0x70] sm:$0xf0]  ;;  %v12092_v5 = vrot.slane %v2642_v41, 5 }
 0x1b4   : > { %16476 = vst [vmem:[#allocation27_spill] sm:$0xff] %v12065_v25  ;;  %v6242_v30 = vpop.f32.mrf.mxu0  ;;  %v9358_v39 = vld [vmem:[#allocation3 + $0x50] sm:$0xf]  ;;  %v12086_v20 = vld [vmem:[#allocation2 + $0x18] sm:$0xf]  ;;  %v3733_v61 = vshll.u32 %v3667_v31, 16  ;;  %v1672_v15 = vor.u32 %v1671_v23, %v1667_v35 }
 0x1b5   : > { %16477 = vst [vmem:[#allocation28_spill] sm:$0xff] %v12077_v22  ;;  %v10582_v42 = vld [vmem:[#allocation3 + $0xe4] sm:$0xf]  ;;  %v9359_v48 = vor.u32 %v10568_v12, %v9358_v39  ;;  %v925_v30 = vadd.f32 %v11508_v17, %v836_v51  ;;  %v12094_v22 = vld [vmem:[#allocation2 + $0x18] sm:$0xf]  ;;  %v16341_v60 = vrot.slane %v12081_v3, 7 }
 0x1b6   : > { %16478 = vst [vmem:[#allocation29_spill] sm:$0xff] %v12081_v3  ;;  %v9432_v1 = vld [vmem:[#allocation3 + $0x104] sm:$0xf0]  ;;  %v12088_v27 = vld [vmem:[#allocation2 + $0x1c] sm:$0xf]  ;;  %v3722_v32 = vrot.slane %v3720_v33, 6 }
 0x1b7   : > { %v1013_v45 = vpop.f32.mrf.mxu2  ;;  %16479 = vst [vmem:[#allocation30_spill] sm:$0xff] %v12086_v20  ;;  %v9435_v14 = vor.u32 %v10582_v42, %v9432_v1  ;;  %v3725_v25 = vrot.slane %v3723_v38, 7  ;;  %6472 = vmatmul.bf16.gmra.mxu2 %v9359_v48  ;;  %v2082_v52 = vrot.slane %v1991_v26, 5  ;;  %v12097_v39 = vrot.slane %v2645_v7, 6  ;;  %v2281_v42 = vld [vmem:[#allocation2 + $0x2c] sm:$0xf] }
 0x1b8   : > { %16480 = vst [vmem:[#allocation31_spill] sm:$0xff] %v12094_v22  ;;  %v1014_v21 = vadd.f32 %v1013_v45, %v925_v30  ;;  %v16342_v11 = vrot.slane %v12088_v27, 5  ;;  %v12100_v17 = vrot.slane %v1675_v56, 5  ;;  %v1668_v1 = vsel %vm11605_vm2, %v1663_v18, %v1667_v35  ;;  %v2563_v33 = vld [vmem:[#allocation2 + $0x1c] sm:$0xf]  ;;  %v10770_v18 = vld [vmem:[%s16321_s2 + $0x120] sm:$0xff] }
 0x1b9   : > { %6595 = vmatmul.bf16.gmra.mxu3 %v9435_v14  ;;  %v12105_v12 = vrot.slane %v3730_v16, 6  ;;  %v1151_v51 = vmax.f32 %v1100_v8, 0.0  ;;  %v12108_v26 = vrot.slane %v3733_v61, 7  ;;  %v12112_v7 = vrot.slane %v16341_v60, 4  ;;  %v12114_v57 = vld [vmem:[#allocation2 + $0x1c] sm:$0xf]  ;;  %6688 = vmatpush.bf16.msra.mxu0 %v10770_v18 }
 0x1ba   : > { %16484 = vst [vmem:[#allocation35_spill] sm:$0xff] %v12114_v57  ;;  %v1673_v56 = vrot.slane %v1672_v15, 4  ;;  %v12119_v38 = vor.u32 %v3725_v25, %v3722_v32  ;;  %v2380_v16 = vrot.slane %v2281_v42, 5  ;;  %v2084_v35 = vrot.slane %v2082_v52, 4  ;;  %v12126_v8 = vld [vmem:[#allocation2 + $0x1c] sm:$0xf]  ;;  %v12131_v32 = vpop.f32.mrf.mxu1 }
 0x1bb   : > { %16481 = vst [vmem:[#allocation32_spill] sm:$0xff] %v12105_v12  ;;  %v1103_v23 = vadd.f32 %v11995_v9, %v1014_v21  ;;  %v12124_v45 = vrot.slane %v16342_v11, 4  ;;  %v2652_v48 = vshrl.u32 %v2563_v33, 16  ;;  %v2655_v14 = vshll.u32 %v2563_v33, 16  ;;  %v1385_v21 = vld [vmem:[#allocation2 + $0x40] sm:$0xf] }
 0x1bc   : > { %16482 = vst [vmem:[#allocation33_spill] sm:$0xff] %v12108_v26  ;;  %v1678_v15 = vsel %vm11605_vm2, %v1673_v56, %v12100_v17  ;;  %v6244_v25 = vpop.f32.mrf.mxu0  ;;  %v1183_v9 = vpack.c.bf16 %v1151_v51, %v1151_v51  ;;  %v16487_v61 = vrot.slane %v12015_v44, 5  ;;  %v1386_v33 = vld [vmem:[#allocation2 + $0x44] sm:$0xf]  ;;  %v2083_v56 = vsel %vm11662_vm7, %v12020_v6, %v2082_v52  ;;  %v12141_v18 = vld [vmem:[#allocation2 + $0x30] sm:$0xf] }
 0x1bd   : > { %16483 = vst [vmem:[#allocation34_spill] sm:$0xff] %v12112_v7  ;;  %v2382_v41 = vrot.slane %v2380_v16, 4  ;;  %v16488_v25 = vrot.slane %v12059_v10, 5  ;;  %v16343_v44 = vrot.slane %v12141_v18, 5  ;;  %v3668_v31 = vld [vmem:[#allocation2 + $0x1c] sm:$0xf] }
 0x1be   : > { %16485 = vst [vmem:[#allocation36_spill] sm:$0xff] %v12119_v38  ;;  %v2379_v42 = vrot.slane %v16487_v61, 4  ;;  %v1470_v11 = vld [vmem:[#allocation2 + $0x4c] sm:$0xf]  ;;  %v12152_v52 = vrot.slane %v2652_v48, 5  ;;  %v1679_v48 = vshrl.u32 %v12072_v43, 16 }
 0x1bf   : > { %1961 = vst [vmem:[#allocation3 + $0x244] sm:$0xf] %v1668_v1  ;;  %v12136_v1 = vpop.f32.mrf.mxu3  ;;  %v2086_v51 = vsel %vm11662_vm7, %v2084_v35, %v16488_v25  ;;  %v1015_v61 = vpop.f32.mrf.mxu2  ;;  %v12156_v30 = vld [vmem:[#allocation2 + $0x1c] sm:$0xf]  ;;  %v2384_v35 = vsel %vm11662_vm7, %v2382_v41, %v16343_v44  ;;  %v12164_v25 = vld [vmem:[#allocation2 + $0x20] sm:$0xf] }
 0x1c0   : > { %16486 = vst [vmem:[#allocation37_spill] sm:$0xff] %v12126_v8  ;;  %v2381_v6 = vsel %vm11662_vm7, %v2379_v42, %v2380_v16  ;;  %v838_v16 = vadd.f32 %v11930_v49, %v11779_v63  ;;  %v3740_v41 = vshrl.u32 %v3668_v31, 16  ;;  %v16490_v63 = vrot.slane %v12114_v57, 6 }
 0x1c1   : > { %1962 = vst [vmem:[#allocation3 + $0x268] sm:$0xf] %v1678_v15  ;;  %v1152_v15 = vmax.f32 %v1103_v23, 0.0  ;;  %v16492_v43 = vrot.slane %v12126_v8, 6  ;;  %v12191_v8 = vld [vmem:[#allocation2 + $0x20] sm:$0xf] }
 0x1c2   : > { %1426 = vst [vmem:[#allocation3 + $0x240] sm:$0xf] %v1385_v21  ;;  %v16500_v26 = vrot.slane %v12164_v25, 5 }
 0x1c3   : > { %1301 = vst [vmem:[#allocation2 + $0x68] sm:$0xf] %v1183_v9  ;;  %v12154_v9 = vrot.slane %v2655_v14, 6  ;;  %v12162_v23 = vpack.c.bf16 %v1152_v15, %v1152_v15  ;;  %v1689_v14 = vshrl.u32 %v1470_v11, 16  ;;  %v3743_v15 = vshll.u32 %v3668_v31, 16 }
 0x1c4   : > { %1427 = vst [vmem:[#allocation3 + $0x264] sm:$0xf] %v1386_v33  ;;  %v2564_v33 = vld [vmem:[#allocation2 + $0x20] sm:$0xf]  ;;  %v12184_v31 = vpop.f32.mrf.mxu0  ;;  %v12207_v12 = vrot.slane %v16500_v26, 4 }
 0x1c5   : > { %16489 = vst [vmem:[#allocation38_spill] sm:$0xff] %v12156_v30  ;;  %v16346_v42 = vrot.slane %v12162_v23, 7  ;;  %v2662_v22 = vshrl.u32 %v2564_v33, 16  ;;  %v2665_v44 = vshll.u32 %v2564_v33, 16  ;;  %v12197_v33 = vrot.slane %v3740_v41, 6 }
 0x1c6   : > { %2235 = vst [vmem:[#allocation3 + $0x98] sm:$0xf] %v2083_v56  ;;  %v1685_v56 = vshll.u32 %v1470_v11, 16  ;;  %v10626_v60 = vld [vmem:[#allocation3 + $0x244] sm:$0xf]  ;;  %v841_v11 = vadd.f32 %v11930_v49, %v11794_v54  ;;  %v12199_v38 = vrot.slane %v3743_v15, 7 }
 0x1c7   : > { %2236 = vst [vmem:[#allocation3 + $0xbc] sm:$0xf] %v2086_v51  ;;  %v12175_v51 = vrot.slane %v16490_v63, 4  ;;  %v927_v63 = vadd.f32 %v11533_v36, %v838_v16  ;;  %v12189_v3 = vpop.f32.mrf.mxu3  ;;  %v1018_v20 = vpop.f32.mrf.mxu2  ;;  %v12220_v54 = vld [vmem:[#allocation2 + $0x34] sm:$0xf] }
 0x1c8   : > { %2525 = vst [vmem:[#allocation3 + $0x12c] sm:$0xf] %v2381_v6  ;;  %v9604_v21 = vld [vmem:[#allocation3 + $0x264] sm:$0xf0]  ;;  %v12179_v6 = vrot.slane %v16492_v43, 4 }
 0x1c9   : > { %2526 = vst [vmem:[#allocation3 + $0x150] sm:$0xf] %v2384_v35  ;;  %v9607_v7 = vor.u32 %v10626_v60, %v9604_v21  ;;  %v12182_v35 = vpop.f32.mrf.mxu1  ;;  %v12186_v60 = vld [vmem:[#allocation2 + $0x20] sm:$0xf]  ;;  %v1681_v21 = vrot.slane %v1679_v48, 4  ;;  %v1016_v16 = vadd.f32 %v1015_v61, %v927_v63 }
 0x1ca   : > { %1312 = vst [vmem:[#allocation2 + $0x6c] sm:$0xe] %v16346_v42  ;;  %v1471_v42 = vld [vmem:[#allocation2 + $0x50] sm:$0xf]  ;;  %v3669_v43 = vld [vmem:[#allocation2 + $0x20] sm:$0xf] }
 0x1cb   : > { %16491 = vst [vmem:[#allocation39_spill] sm:$0xff] %v12175_v51  ;;  %6394 = vmatmul.bf16.gmra.mxu1 %v9607_v7  ;;  %v16498_v7 = vrot.slane %v12156_v30, 7  ;;  %v9602_v36 = vld [vmem:[#allocation3 + $0x240] sm:$0xf]  ;;  %v12209_v51 = vrot.slane %v2662_v22, 5  ;;  %v3750_v15 = vshrl.u32 %v3669_v43, 16  ;;  %v1682_v30 = vor.u32 %v1681_v21, %v12100_v17 }
 0x1cc   : > { %16493 = vst [vmem:[#allocation40_spill] sm:$0xff] %v12179_v6  ;;  %v12195_v6 = vrot.slane %v1685_v56, 5  ;;  %v12212_v56 = vrot.slane %v2665_v44, 6  ;;  %v930_v22 = vadd.f32 %v11550_v47, %v841_v11  ;;  %v1699_v44 = vshrl.u32 %v1471_v42, 16  ;;  %v12230_v47 = vld [vmem:[#allocation2 + $0x24] sm:$0xf] }
 0x1cd   : > { %16494 = vst [vmem:[#allocation41_spill] sm:$0xff] %v12182_v35  ;;  %v1691_v35 = vrot.slane %v1689_v14, 4  ;;  %v12203_v48 = vrot.slane %v16498_v7, 4  ;;  %v1695_v14 = vshll.u32 %v1471_v42, 16  ;;  %v10630_v7 = vld [vmem:[#allocation3 + $0x260] sm:$0xf0]  ;;  %v1105_v41 = vadd.f32 %v12008_v46, %v1016_v16 }
 0x1ce   : > { %16495 = vst [vmem:[#allocation42_spill] sm:$0xff] %v12191_v8  ;;  %v9603_v61 = vor.u32 %v10630_v7, %v9602_v36  ;;  %v9394_v63 = vld [vmem:[#allocation3 + $0x98] sm:$0xf]  ;;  %v1019_v57 = vadd.f32 %v1018_v20, %v930_v22  ;;  %v12232_v11 = vld [vmem:[#allocation2 + $0x24] sm:$0xf]  ;;  %v1683_v42 = vrot.slane %v1682_v30, 4 }
 0x1cf   : > { %16496 = vst [vmem:[#allocation43_spill] sm:$0xff] %v12197_v33  ;;  %v1692_v26 = vor.u32 %v1691_v35, %v12195_v6  ;;  %v3753_v33 = vshll.u32 %v3669_v43, 16  ;;  %v12227_v21 = vrot.slane %v1695_v14, 5  ;;  %v10591_v36 = vld [vmem:[#allocation3 + $0x12c] sm:$0xf]  ;;  %v12240_v16 = vrot.slane %v3750_v15, 6 }
 0x1d0   : > { %16497 = vst [vmem:[#allocation44_spill] sm:$0xff] %v12199_v38  ;;  %v10577_v38 = vld [vmem:[#allocation3 + $0xb8] sm:$0xf0]  ;;  %6281 = vmatmul.bf16.gmra.mxu0 %v9603_v61  ;;  %v9468_v7 = vld [vmem:[#allocation3 + $0x14c] sm:$0xf0]  ;;  %v2386_v20 = vrot.slane %v12220_v54, 5  ;;  %v1688_v30 = vsel %vm11605_vm2, %v1683_v42, %v12195_v6 }
 0x1d1   : > { %16499 = vst [vmem:[#allocation45_spill] sm:$0xff] %v12203_v48  ;;  %v12216_v48 = vld [vmem:[#allocation2 + $0x20] sm:$0xf]  ;;  %v9471_v46 = vor.u32 %v10591_v36, %v9468_v7  ;;  %v1693_v14 = vrot.slane %v1692_v26, 4  ;;  %v12247_v22 = vrot.slane %v3753_v33, 7  ;;  %v1701_v35 = vrot.slane %v1699_v44, 4  ;;  %v12252_v36 = vpop.f32.mrf.mxu3  ;;  %v1020_v44 = vpop.f32.mrf.mxu2 }
 0x1d2   : > { %16501 = vst [vmem:[#allocation46_spill] sm:$0xff] %v12209_v51  ;;  %v16504_v51 = vrot.slane %v12186_v60, 6  ;;  %v1108_v33 = vadd.f32 %v12048_v34, %v1019_v57  ;;  %v16511_v6 = vrot.slane %v12059_v10, 5  ;;  %v16512_v42 = vld [vmem:[#allocation17_spill] sm:$0xff]  ;;  %v2388_v15 = vrot.slane %v2386_v20, 4 }
 0x1d3   : > { %16502 = vst [vmem:[#allocation47_spill] sm:$0xff] %v12212_v56  ;;  %v9395_v56 = vor.u32 %v10577_v38, %v9394_v63  ;;  %v843_v38 = vadd.f32 %v11930_v49, %v11817_v37  ;;  %v12245_v63 = vpop.f32.mrf.mxu0  ;;  %v1472_v37 = vld [vmem:[#allocation2 + $0x54] sm:$0xf]  ;;  %6600 = vmatmul.bf16.gmra.mxu3 %v9471_v46  ;;  %v1698_v26 = vsel %vm11605_vm2, %v1693_v14, %v12227_v21  ;;  %v12261_v46 = vld [vmem:[#allocation2 + $0x58] sm:$0xf]  ;;  %v16513_v34 = vrot.slane %v12088_v27, 5 }
 0x1d4   : > { %16503 = vst [vmem:[#allocation48_spill] sm:$0xff] %v12216_v48  ;;  %v12225_v17 = vrot.slane %v16504_v51, 4  ;;  %v16506_v51 = vrot.slane %v12191_v8, 6  ;;  %v1388_v54 = vld [vmem:[#allocation2 + $0x4c] sm:$0xf]  ;;  %v1702_v8 = vor.u32 %v1701_v35, %v12227_v21  ;;  %v1715_v10 = vshll.u32 %v12261_v46, 16 }
 0x1d5   : > { %6477 = vmatmul.bf16.gmra.mxu2 %v9395_v56  ;;  %16508 = vst [vmem:[#allocation51_spill] sm:$0xff] %v12240_v16  ;;  %v1153_v56 = vmax.f32 %v1105_v41, 0.0  ;;  %v2087_v41 = vrot.slane %v16511_v6, 4  ;;  %v12271_v7 = vld [vmem:[#allocation2 + $0x38] sm:$0xf]  ;;  %v1154_v35 = vmax.f32 %v1108_v33, 0.0 }
 0x1d6   : > { %16505 = vst [vmem:[#allocation49_spill] sm:$0xff] %v12225_v17  ;;  %v12238_v43 = vrot.slane %v16506_v51, 4  ;;  %v1387_v51 = vld [vmem:[#allocation2 + $0x48] sm:$0xf]  ;;  %v16356_v21 = vrot.slane %v12271_v7, 5  ;;  %v16515_v27 = vrot.slane %v12162_v23, 7 }
 0x1d7   : > { %16509 = vst [vmem:[#allocation52_spill] sm:$0xff] %v12245_v63  ;;  %v932_v63 = vadd.f32 %v16512_v42, %v843_v38  ;;  %v1185_v14 = vpack.c.bf16 %v1153_v56, %v1153_v56  ;;  %v2089_v57 = vsel %vm11662_vm7, %v2087_v41, %v16513_v34  ;;  %v16514_v38 = vrot.slane %v12164_v25, 5  ;;  %v12284_v41 = vld [vmem:[#allocation2 + $0x24] sm:$0xf] }
 0x1d8   : > { %16507 = vst [vmem:[#allocation50_spill] sm:$0xff] %v12238_v43  ;;  %v1709_v43 = vshrl.u32 %v1472_v37, 16  ;;  %v1305_v56 = vrot.slane %v16515_v27, 4  ;;  %v16516_v6 = vrot.slane %v12141_v18, 5  ;;  %v846_v25 = vadd.f32 %v11930_v49, %v11833_v53  ;;  %v12289_v33 = vld [vmem:[#allocation2 + $0x24] sm:$0xf] }
 0x1d9   : > { %16510 = vst [vmem:[#allocation53_spill] sm:$0xff] %v12247_v22  ;;  %v1021_v22 = vadd.f32 %v1020_v44, %v932_v63  ;;  %v1705_v44 = vshll.u32 %v1472_v37, 16  ;;  %v2390_v53 = vsel %vm11662_vm7, %v2388_v15, %v16356_v21 }
 0x1da   : > { %v12243_v61 = vpop.f32.mrf.mxu1  ;;  %1963 = vst [vmem:[#allocation3 + $0x28c] sm:$0xf] %v1688_v30  ;;  %v2092_v30 = vsel %vm11662_vm7, %v12124_v45, %v16514_v38  ;;  %v2385_v63 = vrot.slane %v16516_v6, 4  ;;  %v1711_v45 = vrot.slane %v1709_v43, 4  ;;  %v3670_v38 = vld [vmem:[#allocation2 + $0x24] sm:$0xf] }
 0x1db   : > { %1964 = vst [vmem:[#allocation3 + $0x2b0] sm:$0xf] %v1698_v26  ;;  %v1306_v26 = vrot.slane %v1185_v14, 7  ;;  %v1110_v42 = vadd.f32 %v12084_v0, %v1021_v22  ;;  %v1707_v37 = vrot.slane %v1705_v44, 5  ;;  %v1703_v14 = vrot.slane %v1702_v8, 4  ;;  %v12301_v34 = vpop.f32.mrf.mxu0 }
 0x1dc   : > { %1428 = vst [vmem:[#allocation3 + $0x288] sm:$0xf] %v1387_v51  ;;  %v1186_v51 = vpack.c.bf16 %v1154_v35, %v1154_v35  ;;  %v2387_v18 = vsel %vm11662_vm7, %v2385_v63, %v2386_v20  ;;  %v12306_v35 = vpop.f32.mrf.mxu3  ;;  %v16357_v6 = vrot.slane %v12289_v33, 6 }
 0x1dd   : > { %1429 = vst [vmem:[#allocation3 + $0x2ac] sm:$0xf] %v1388_v54  ;;  %v1307_v23 = vsel %vm11747_vm11, %v1305_v56, %v1306_v26  ;;  %v1308_v54 = vrot.slane %v1306_v26, 4  ;;  %v1155_v22 = vmax.f32 %v1110_v42, 0.0  ;;  %v1712_v20 = vor.u32 %v1711_v45, %v1707_v37  ;;  %v1023_v26 = vpop.f32.mrf.mxu2 }
 0x1de   : > { %16517 = vst [vmem:[#allocation17_spill] sm:$0xff] %v12284_v41  ;;  %v1317_v43 = vrot.slane %v1186_v51, 6  ;;  %v1708_v8 = vsel %vm11605_vm2, %v1703_v14, %v1707_v37 }
 0x1df   : > { %2237 = vst [vmem:[#allocation3 + $0xe0] sm:$0xf] %v2089_v57  ;;  %v1187_v15 = vpack.c.bf16 %v1155_v22, %v1155_v22  ;;  %v1713_v51 = vrot.slane %v1712_v20, 4 }
 0x1e0   : > { %16518 = vst [vmem:[#allocation54_spill] sm:$0xff] %v12289_v33 }
 0x1e1   : > { %2238 = vst [vmem:[#allocation3 + $0x104] sm:$0xf] %v2092_v30  ;;  %v12304_v30 = vrot.slane %v1715_v10, 5  ;;  %v10635_v27 = vld [vmem:[#allocation3 + $0x28c] sm:$0xf]  ;;  %v1319_v21 = vrot.slane %v1187_v15, 6 }
 0x1e2   : > { %1313 = vst [vmem:[#allocation2 + $0x70] sm:$0xf] %v1307_v23  ;;  %v12299_v0 = vpop.f32.mrf.mxu1  ;;  %v9640_v56 = vld [vmem:[#allocation3 + $0x2ac] sm:$0xf0]  ;;  %v16520_v10 = vld [vmem:[#allocation9_spill] sm:$0xff] }
 0x1e3   : > { %16519 = vst [vmem:[#allocation55_spill] sm:$0xff] %v12299_v0  ;;  %v9643_v63 = vor.u32 %v10635_v27, %v9640_v56  ;;  %v9638_v44 = vld [vmem:[#allocation3 + $0x288] sm:$0xf]  ;;  %v935_v42 = vadd.f32 %v16520_v10, %v846_v25  ;;  %v12312_v23 = vld [vmem:[#allocation2 + $0x24] sm:$0xf]  ;;  %v1718_v14 = vsel %vm11605_vm2, %v1713_v51, %v12304_v30  ;;  %v1321_v27 = vrot.slane %v1319_v21, 4 }
 0x1e4   : > { %1314 = vst [vmem:[#allocation2 + $0x74] sm:$0x1] %v1308_v54  ;;  %v10639_v45 = vld [vmem:[#allocation3 + $0x2a8] sm:$0xf0]  ;;  %v1318_v54 = vrot.slane %v1317_v43, 4  ;;  %v16524_v56 = vrot.slane %v12230_v47, 5 }
 0x1e5   : > { %2527 = vst [vmem:[#allocation3 + $0x174] sm:$0xf] %v2387_v18  ;;  %v3760_v18 = vshrl.u32 %v3670_v38, 16  ;;  %6399 = vmatmul.bf16.gmra.mxu1 %v9643_v63  ;;  %v9639_v57 = vor.u32 %v10639_v45, %v9638_v44  ;;  %v1024_v22 = vadd.f32 %v1023_v26, %v935_v42  ;;  %v16525_v63 = vshrl.u32 %v12232_v11, 16  ;;  %v1389_v10 = vld [vmem:[#allocation2 + $0x50] sm:$0xf] }
 0x1e6   : > { %2528 = vst [vmem:[#allocation3 + $0x198] sm:$0xf] %v2390_v53  ;;  %v9430_v37 = vld [vmem:[#allocation3 + $0xe0] sm:$0xf]  ;;  %v16522_v53 = vrot.slane %v12216_v48, 7  ;;  %v12325_v15 = vrot.slane %v16524_v56, 4 }
 0x1e7   : > { %16521 = vst [vmem:[#allocation9_spill] sm:$0xff] %v12312_v23  ;;  %v12329_v44 = vrot.slane %v16525_v63, 5  ;;  %6286 = vmatmul.bf16.gmra.mxu0 %v9639_v57  ;;  %v16529_v42 = vrot.slane %v12284_v41, 6  ;;  %v16359_v57 = vrot.slane %v12312_v23, 7  ;;  %v12358_v63 = vpop.f32.mrf.mxu3  ;;  %v2567_v0 = vld [vmem:[#allocation2 + $0x2c] sm:$0xf] }
 0x1e8   : > { %1325 = vst [vmem:[#allocation2 + $0x74] sm:$0xc] %v1317_v43  ;;  %v12319_v20 = vrot.slane %v16522_v53, 4  ;;  %v10586_v25 = vld [vmem:[#allocation3 + $0x100] sm:$0xf0]  ;;  %v1320_v43 = vsel %vm11674_vm8, %v1318_v54, %v1319_v21  ;;  %v3763_v21 = vshll.u32 %v3670_v38, 16  ;;  %v848_v54 = vadd.f32 %v11930_v49, %v11857_v24  ;;  %v12352_v24 = vpop.f32.mrf.mxu0 }
 0x1e9   : > { %1965 = vst [vmem:[#allocation3 + $0x2d4] sm:$0xf] %v1708_v8  ;;  %v16527_v8 = vshll.u32 %v12232_v11, 16  ;;  %v9431_v51 = vor.u32 %v10586_v25, %v9430_v37  ;;  %v12337_v45 = vrot.slane %v16529_v42, 4  ;;  %v12344_v53 = vrot.slane %v16357_v6, 4 }
 0x1ea   : > { %16523 = vst [vmem:[#allocation56_spill] sm:$0xff] %v12319_v20  ;;  %v12346_v11 = vrot.slane %v3760_v18, 6  ;;  %v1113_v37 = vadd.f32 %v12136_v1, %v1024_v22  ;;  %v12350_v56 = vpop.f32.mrf.mxu1  ;;  %v12354_v49 = vld [vmem:[#allocation2 + $0x28] sm:$0xf]  ;;  %v12369_v6 = vrot.slane %v16359_v57, 4 }
 0x1eb   : > { %1966 = vst [vmem:[#allocation3 + $0x2f8] sm:$0xf] %v1718_v14  ;;  %v12333_v26 = vrot.slane %v16527_v8, 6  ;;  %v1719_v14 = vshrl.u32 %v12261_v46, 16  ;;  %6482 = vmatmul.bf16.gmra.mxu2 %v9431_v51  ;;  %v12356_v46 = vld [vmem:[#allocation2 + $0x28] sm:$0xf]  ;;  %v1025_v8 = vpop.f32.mrf.mxu2 }
 0x1ec   : > { %16526 = vst [vmem:[#allocation57_spill] sm:$0xff] %v12329_v44  ;;  %v10600_v25 = vld [vmem:[#allocation3 + $0x174] sm:$0xf]  ;;  %v12360_v51 = vrot.slane %v3763_v21, 7  ;;  %v12364_v22 = vld [vmem:[#allocation2 + $0x28] sm:$0xf] }
 0x1ed   : > { %16528 = vst [vmem:[#allocation58_spill] sm:$0xff] %v12333_v26  ;;  %v9504_v38 = vld [vmem:[#allocation3 + $0x194] sm:$0xf0]  ;;  %v1721_v1 = vrot.slane %v1719_v14, 4  ;;  %v1474_v48 = vld [vmem:[#allocation2 + $0x5c] sm:$0xf] }
 0x1ee   : > { %16530 = vst [vmem:[#allocation59_spill] sm:$0xff] %v12337_v45  ;;  %v9507_v18 = vor.u32 %v10600_v25, %v9504_v38  ;;  %v1156_v25 = vmax.f32 %v1113_v37, 0.0  ;;  %v12378_v57 = vld [vmem:[#allocation2 + $0x2c] sm:$0xf]  ;;  %v16541_v21 = vrot.slane %v12271_v7, 5  ;;  %v1725_v33 = vshll.u32 %v1474_v48, 16 }
 0x1ef   : > { %1326 = vst [vmem:[#allocation2 + $0x78] sm:$0xf] %v1320_v43  ;;  %v2285_v43 = vld [vmem:[#allocation2 + $0x3c] sm:$0xf]  ;;  %v12381_v23 = vld [vmem:[#allocation2 + $0x2c] sm:$0xf]  ;;  %v1722_v37 = vor.u32 %v1721_v1, %v12304_v30 }
 0x1f0   : > { %16531 = vst [vmem:[#allocation60_spill] sm:$0xff] %v12344_v53  ;;  %6605 = vmatmul.bf16.gmra.mxu3 %v9507_v18  ;;  %v2392_v20 = vrot.slane %v2285_v43, 5  ;;  %v2391_v43 = vrot.slane %v16541_v21, 4  ;;  %v1390_v38 = vld [vmem:[#allocation2 + $0x54] sm:$0xf]  ;;  %v2695_v18 = vshll.u32 %v2567_v0, 16 }
 0x1f1   : > { %16532 = vst [vmem:[#allocation61_spill] sm:$0xff] %v12346_v11  ;;  %v16542_v30 = vrot.slane %v12230_v47, 5  ;;  %v16544_v16 = vrot.slane %v12364_v22, 5  ;;  %v12518_v41 = vld [vmem:[#allocation2 + $0x48] sm:$0xf] }
 0x1f2   : > { %1327 = vst [vmem:[#allocation2 + $0x7c] sm:$0x3] %v1321_v27  ;;  %v12362_v27 = vld [vmem:[#allocation2 + $0x2c] sm:$0xf]  ;;  %v9676_v53 = vld [vmem:[#allocation3 + $0x2f4] sm:$0xf0] }
 0x1f3   : > { %1430 = vst [vmem:[#allocation3 + $0x2d0] sm:$0xf] %v1389_v10  ;;  %v16537_v10 = vld [vmem:[#allocation10_spill] sm:$0xff]  ;;  %v2095_v7 = vsel %vm11662_vm7, %v12207_v12, %v16542_v30  ;;  %v2394_v1 = vrot.slane %v2392_v20, 4  ;;  %v2098_v47 = vsel %vm11662_vm7, %v12325_v15, %v16544_v16  ;;  %v12421_v30 = vpop.f32.mrf.mxu0  ;;  %v1727_v15 = vrot.slane %v1725_v33, 5 }
 0x1f4   : > { %16533 = vst [vmem:[#allocation62_spill] sm:$0xff] %v12352_v24  ;;  %v937_v42 = vadd.f32 %v16537_v10, %v848_v54  ;;  %v12371_v24 = vld [vmem:[#allocation2 + $0x40] sm:$0xf]  ;;  %v1729_v54 = vshrl.u32 %v1474_v48, 16  ;;  %v1188_v10 = vpack.c.bf16 %v1156_v25, %v1156_v25  ;;  %v12424_v48 = vpop.f32.mrf.mxu3 }
 0x1f5   : > { %16534 = vst [vmem:[#allocation63_spill] sm:$0xff] %v12354_v49 }
 0x1f6   : > { %16535 = vst [vmem:[#allocation64_spill] sm:$0xff] %v12356_v46  ;;  %v1026_v14 = vadd.f32 %v1025_v8, %v937_v42  ;;  %v10769_v42 = vld [vmem:[%s16321_s2 + $0x118] sm:$0xff]  ;;  %v12390_v46 = vld [vmem:[#allocation2 + $0x60] sm:$0xf]  ;;  %v16543_v8 = vrot.slane %v12362_v27, 5  ;;  %v1330_v16 = vrot.slane %v1188_v10, 5 }
 0x1f7   : > { %16536 = vst [vmem:[#allocation65_spill] sm:$0xff] %v12360_v51  ;;  %v10644_v51 = vld [vmem:[#allocation3 + $0x2d4] sm:$0xf]  ;;  %6689 = vmatpush.bf16.msra.mxu0 %v10769_v42  ;;  %v1731_v12 = vrot.slane %v1729_v54, 4 }
 0x1f8   : > { %16538 = vst [vmem:[#allocation10_spill] sm:$0xff] %v12369_v6  ;;  %v2692_v6 = vshrl.u32 %v2567_v0, 16  ;;  %v1115_v21 = vadd.f32 %v12189_v3, %v1026_v14  ;;  %v12400_v11 = vrot.slane %v16543_v8, 4  ;;  %v12403_v0 = vld [vmem:[#allocation2 + $0x2c] sm:$0xf]  ;;  %v9679_v25 = vor.u32 %v10644_v51, %v9676_v53  ;;  %v12419_v51 = vpop.f32.mrf.mxu1 }
 0x1f9   : > { %16539 = vst [vmem:[#allocation66_spill] sm:$0xff] %v12378_v57  ;;  %v12411_v42 = vld [vmem:[#allocation2 + $0x2c] sm:$0xf]  ;;  %v2393_v3 = vsel %vm11662_vm7, %v2391_v43, %v2392_v20  ;;  %v16546_v14 = vrot.slane %v12371_v24, 5  ;;  %v1723_v53 = vrot.slane %v1722_v37, 4  ;;  %v12428_v43 = vrot.slane %v2695_v18, 6 }
 0x1fa   : > { %16540 = vst [vmem:[#allocation67_spill] sm:$0xff] %v12381_v23  ;;  %6404 = vmatmul.bf16.gmra.mxu1 %v9679_v25  ;;  %v12426_v20 = vrot.slane %v2692_v6, 5  ;;  %v1157_v37 = vmax.f32 %v1115_v21, 0.0  ;;  %v3783_v10 = vshll.u32 %v12403_v0, 16  ;;  %v1732_v54 = vor.u32 %v1731_v12, %v1727_v15  ;;  %v1391_v21 = vld [vmem:[#allocation2 + $0x58] sm:$0xf] }
 0x1fb   : > { %16545 = vst [vmem:[#allocation68_spill] sm:$0xff] %v12411_v42  ;;  %v2396_v8 = vsel %vm11662_vm7, %v2394_v1, %v16546_v14  ;;  %v3780_v1 = vshrl.u32 %v12403_v0, 16  ;;  %v16550_v14 = vrot.slane %v12378_v57, 6  ;;  %v1728_v33 = vsel %vm11605_vm2, %v1723_v53, %v1727_v15  ;;  %v2569_v0 = vld [vmem:[#allocation2 + $0x34] sm:$0xf] }
 0x1fc   : > { %1431 = vst [vmem:[#allocation3 + $0x2f4] sm:$0xf] %v1390_v38  ;;  %v1735_v38 = vshll.u32 %v12390_v46, 16  ;;  %v16552_v6 = vrot.slane %v12381_v23, 6  ;;  %v1189_v25 = vpack.c.bf16 %v1157_v37, %v1157_v37  ;;  %v9674_v12 = vld [vmem:[#allocation3 + $0x2d0] sm:$0xf] }
 0x1fd   : > { %16547 = vst [vmem:[#allocation69_spill] sm:$0xff] %v12419_v51  ;;  %v12433_v51 = vrot.slane %v16550_v14, 4  ;;  %v1733_v14 = vrot.slane %v1732_v54, 4  ;;  %v12452_v37 = vld [vmem:[#allocation2 + $0x30] sm:$0xf] }
 0x1fe   : > { %2239 = vst [vmem:[#allocation3 + $0x128] sm:$0xf] %v2095_v7  ;;  %v12440_v7 = vrot.slane %v16552_v6, 4  ;;  %v1332_v53 = vrot.slane %v1189_v25, 5  ;;  %v12456_v23 = vld [vmem:[#allocation2 + $0x30] sm:$0xf] }
 0x1ff   : > { %16548 = vst [vmem:[#allocation70_spill] sm:$0xff] %v12426_v20  ;;  %v12484_v20 = vld [vmem:[#allocation2 + $0x34] sm:$0xf] }
 0x200   : > { %16549 = vst [vmem:[#allocation71_spill] sm:$0xff] %v12428_v43  ;;  %v1334_v54 = vrot.slane %v1332_v53, 4  ;;  %v2715_v43 = vshll.u32 %v2569_v0, 16 }
 0x201   : > { %2240 = vst [vmem:[#allocation3 + $0x14c] sm:$0xf] %v2098_v47  ;;  %v12443_v47 = vld [vmem:[#allocation2 + $0x34] sm:$0xf] }
 0x202   : > { %16551 = vst [vmem:[#allocation72_spill] sm:$0xff] %v12433_v51  ;;  %v12445_v51 = vrot.slane %v1735_v38, 5 }
 0x203   : > { %2529 = vst [vmem:[#allocation3 + $0x1bc] sm:$0xf] %v2393_v3  ;;  %v1331_v3 = vrot.slane %v1330_v16, 4  ;;  %v10648_v15 = vld [vmem:[#allocation3 + $0x2f0] sm:$0xf0] }
 0x204   : > { %16553 = vst [vmem:[#allocation73_spill] sm:$0xff] %v12440_v7  ;;  %v1738_v6 = vsel %vm11605_vm2, %v1733_v14, %v12445_v51  ;;  %v9675_v18 = vor.u32 %v10648_v15, %v9674_v12  ;;  %v12461_v12 = vpop.f32.mrf.mxu0  ;;  %v12477_v14 = vrot.slane %v3783_v10, 7  ;;  %v3674_v10 = vld [vmem:[#allocation2 + $0x34] sm:$0xf] }
 0x205   : > { %2530 = vst [vmem:[#allocation3 + $0x1e0] sm:$0xf] %v2396_v8  ;;  %v12450_v8 = vrot.slane %v3780_v1, 6  ;;  %v1333_v38 = vsel %vm11662_vm7, %v1331_v3, %v1332_v53  ;;  %v9466_v25 = vld [vmem:[#allocation3 + $0x128] sm:$0xf]  ;;  %v12463_v53 = vpop.f32.mrf.mxu3  ;;  %v3800_v26 = vshrl.u32 %v3674_v10, 16 }
 0x206   : > { %1338 = vst [vmem:[#allocation2 + $0x7c] sm:$0x8] %v1330_v16  ;;  %v1392_v16 = vld [vmem:[#allocation2 + $0x5c] sm:$0xf]  ;;  %6291 = vmatmul.bf16.gmra.mxu0 %v9675_v18  ;;  %v3803_v49 = vshll.u32 %v3674_v10, 16 }
 0x207   : > { %1967 = vst [vmem:[#allocation3 + $0x31c] sm:$0xf] %v1728_v33  ;;  %v1028_v33 = vpop.f32.mrf.mxu2 }
 0x208   : > { %1432 = vst [vmem:[#allocation3 + $0x318] sm:$0xf] %v1391_v21  ;;  %v10595_v7 = vld [vmem:[#allocation3 + $0x148] sm:$0xf0]  ;;  %v2712_v21 = vshrl.u32 %v2569_v0, 16 }
 0x209   : > { %16554 = vst [vmem:[#allocation74_spill] sm:$0xff] %v12450_v8  ;;  %v9467_v1 = vor.u32 %v10595_v7, %v9466_v25  ;;  %v12459_v8 = vpop.f32.mrf.mxu1  ;;  %v1476_v25 = vld [vmem:[#allocation2 + $0x64] sm:$0xf] }
 0x20a   : > { %16555 = vst [vmem:[#allocation75_spill] sm:$0xff] %v12452_v37  ;;  %v10609_v15 = vld [vmem:[#allocation3 + $0x1bc] sm:$0xf]  ;;  %v1745_v45 = vshll.u32 %v1476_v25, 16  ;;  %v1749_v0 = vshrl.u32 %v1476_v25, 16 }
 0x20b   : > { %1968 = vst [vmem:[#allocation3 + $0x340] sm:$0xf] %v1738_v6  ;;  %v12465_v6 = vld [vmem:[#allocation2 + $0x34] sm:$0xf]  ;;  %6487 = vmatmul.bf16.gmra.mxu2 %v9467_v1  ;;  %v16562_v1 = vrot.slane %v12443_v47, 5 }
 0x20c   : > { %1339 = vst [vmem:[#allocation2 + $0x80] sm:$0xf] %v1333_v38  ;;  %v9540_v3 = vld [vmem:[#allocation3 + $0x1dc] sm:$0xf0]  ;;  %v12470_v38 = vld [vmem:[%s16323_s4] ss:$0 sm:$0xff] }
 0x20d   : > { %16556 = vst [vmem:[#allocation76_spill] sm:$0xff] %v12456_v23  ;;  %v851_v7 = vadd.f32 %v12470_v38, %v11897_v13  ;;  %v853_v18 = vadd.f32 %v12470_v38, %v11943_v19  ;;  %v16565_v19 = vld [vmem:[#allocation11_spill] sm:$0xff]  ;;  %v2287_v25 = vld [vmem:[#allocation2 + $0x44] sm:$0xf]  ;;  %v12507_v17 = vrot.slane %v1745_v45, 5  ;;  %v12523_v45 = vpop.f32.mrf.mxu0 }
 0x20e   : > { %1340 = vst [vmem:[#allocation2 + $0x84] sm:$0x7] %v1334_v54  ;;  %v1739_v54 = vshrl.u32 %v12390_v46, 16  ;;  %v16566_v46 = vld [vmem:[#allocation12_spill] sm:$0xff] }
 0x20f   : > { %16557 = vst [vmem:[#allocation77_spill] sm:$0xff] %v12461_v12  ;;  %v16559_v12 = vrot.slane %v12411_v42, 7  ;;  %v12497_v42 = vld [vmem:[#allocation2 + $0x34] sm:$0xf]  ;;  %v942_v23 = vadd.f32 %v16566_v46, %v853_v18  ;;  %v1030_v37 = vpop.f32.mrf.mxu2  ;;  %v16568_v18 = vrot.slane %v12465_v6, 6 }
 0x210   : > { %1433 = vst [vmem:[#allocation3 + $0x33c] sm:$0xf] %v1392_v16  ;;  %v9543_v16 = vor.u32 %v10609_v15, %v9540_v3  ;;  %v12491_v15 = vrot.slane %v16562_v1, 4  ;;  %v12493_v3 = vrot.slane %v2712_v21, 5  ;;  %v1741_v13 = vrot.slane %v1739_v54, 4 }
 0x211   : > { %16558 = vst [vmem:[#allocation78_spill] sm:$0xff] %v12477_v14  ;;  %v12481_v57 = vrot.slane %v16559_v12, 4  ;;  %v940_v14 = vadd.f32 %v16565_v19, %v851_v7  ;;  %v12501_v1 = vrot.slane %v2715_v43, 6  ;;  %v12505_v21 = vld [vmem:[#allocation2 + $0x30] sm:$0xf]  ;;  %v1751_v54 = vrot.slane %v1749_v0, 4  ;;  %v12531_v0 = vpop.f32.mrf.mxu3 }
 0x212   : > { %16561 = vst [vmem:[#allocation80_spill] sm:$0xff] %v12484_v20  ;;  %6610 = vmatmul.bf16.gmra.mxu3 %v9543_v16  ;;  %v12503_v16 = vld [vmem:[#allocation2 + $0x68] sm:$0xf]  ;;  %v10653_v12 = vld [vmem:[#allocation3 + $0x31c] sm:$0xf]  ;;  %v12511_v19 = vrot.slane %v16568_v18, 4 }
 0x213   : > { %16560 = vst [vmem:[#allocation79_spill] sm:$0xff] %v12481_v57  ;;  %v1029_v44 = vadd.f32 %v1028_v33, %v940_v14  ;;  %v1031_v57 = vadd.f32 %v1030_v37, %v942_v23  ;;  %v16570_v43 = vrot.slane %v12484_v20, 6  ;;  %v1742_v33 = vor.u32 %v1741_v13, %v12445_v51  ;;  %v12521_v23 = vpop.f32.mrf.mxu1  ;;  %v12525_v37 = vld [vmem:[#allocation2 + $0x38] sm:$0xf] }
 0x214   : > { %16563 = vst [vmem:[#allocation81_spill] sm:$0xff] %v12493_v3  ;;  %v9712_v3 = vld [vmem:[#allocation3 + $0x33c] sm:$0xf0]  ;;  %v856_v14 = vadd.f32 %v12470_v38, %v11968_v58  ;;  %v1755_v10 = vshll.u32 %v12503_v16, 16  ;;  %v16574_v18 = vrot.slane %v12364_v22, 5  ;;  %v16575_v13 = vrot.slane %v12371_v24, 5 }
 0x215   : > { %16564 = vst [vmem:[#allocation82_spill] sm:$0xff] %v12497_v42  ;;  %v9715_v7 = vor.u32 %v10653_v12, %v9712_v3  ;;  %v12515_v46 = vrot.slane %v16570_v43, 4  ;;  %v2103_v3 = vrot.slane %v12505_v21, 5  ;;  %v2398_v12 = vrot.slane %v2287_v25, 5 }
 0x216   : > { %16567 = vst [vmem:[#allocation11_spill] sm:$0xff] %v12501_v1  ;;  %v2099_v51 = vrot.slane %v16574_v18, 4  ;;  %v2397_v43 = vrot.slane %v16575_v13, 4  ;;  %v1118_v1 = vadd.f32 %v12252_v36, %v1029_v44  ;;  %v12541_v58 = vrot.slane %v3803_v49, 7  ;;  %v9710_v18 = vld [vmem:[#allocation3 + $0x318] sm:$0xf] }
 0x217   : > { %16569 = vst [vmem:[#allocation12_spill] sm:$0xff] %v12511_v19  ;;  %6409 = vmatmul.bf16.gmra.mxu1 %v9715_v7  ;;  %v2401_v7 = vrot.slane %v12518_v41, 5  ;;  %v1752_v21 = vor.u32 %v1751_v54, %v12507_v17  ;;  %v16578_v25 = vrot.slane %v12497_v42, 7  ;;  %v16580_v24 = vrot.slane %v12362_v27, 5  ;;  %v1033_v44 = vpop.f32.mrf.mxu2  ;;  %v1478_v41 = vld [vmem:[#allocation2 + $0x6c] sm:$0xf] }
 0x218   : > { %16571 = vst [vmem:[#allocation83_spill] sm:$0xff] %v12515_v46  ;;  %v12539_v46 = vrot.slane %v3800_v26, 6  ;;  %v2104_v49 = vsel %vm11662_vm7, %v12400_v11, %v2103_v3  ;;  %v2400_v54 = vrot.slane %v2398_v12, 4  ;;  %v10657_v13 = vld [vmem:[#allocation3 + $0x338] sm:$0xf0]  ;;  %v2399_v27 = vsel %vm11662_vm7, %v2397_v43, %v2398_v12 }
 0x219   : > { %16572 = vst [vmem:[#allocation84_spill] sm:$0xff] %v12521_v23  ;;  %v1120_v23 = vadd.f32 %v12306_v35, %v1031_v57  ;;  %v12547_v20 = vrot.slane %v16578_v25, 4  ;;  %v2101_v36 = vsel %vm11662_vm7, %v2099_v51, %v16580_v24  ;;  %v1743_v35 = vrot.slane %v1742_v33, 4  ;;  %v16581_v51 = vld [vmem:[#allocation13_spill] sm:$0xff]  ;;  %v12563_v24 = vld [vmem:[#allocation2 + $0x38] sm:$0xf] }
 0x21a   : > { %16573 = vst [vmem:[#allocation85_spill] sm:$0xff] %v12525_v37  ;;  %v12555_v57 = vrot.slane %v1755_v10, 5  ;;  %v1158_v25 = vmax.f32 %v1118_v1, 0.0  ;;  %v945_v33 = vadd.f32 %v16581_v51, %v856_v14  ;;  %v858_v10 = vadd.f32 %v12470_v38, %v11991_v50  ;;  %v12569_v42 = vld [vmem:[#allocation2 + $0x50] sm:$0xf] }
 0x21b   : > { %16576 = vst [vmem:[#allocation86_spill] sm:$0xff] %v12539_v46  ;;  %v1159_v22 = vmax.f32 %v1120_v23, 0.0  ;;  %v1753_v26 = vrot.slane %v1752_v21, 4  ;;  %v2402_v11 = vsel %vm11662_vm7, %v2400_v54, %v2401_v7  ;;  %v1748_v1 = vsel %vm11605_vm2, %v1743_v35, %v12507_v17  ;;  %v12574_v14 = vld [vmem:[#allocation2 + $0x38] sm:$0xf]  ;;  %v12581_v17 = vpop.f32.mrf.mxu1  ;;  %v12584_v35 = vpop.f32.mrf.mxu0 }
 0x21c   : > { %16577 = vst [vmem:[#allocation87_spill] sm:$0xff] %v12541_v58  ;;  %v1034_v12 = vadd.f32 %v1033_v44, %v945_v33  ;;  %v1759_v43 = vshrl.u32 %v12503_v16, 16  ;;  %v1765_v50 = vshll.u32 %v1478_v41, 16  ;;  %v1769_v54 = vshrl.u32 %v1478_v41, 16  ;;  %v1394_v33 = vld [vmem:[#allocation2 + $0x64] sm:$0xf] }
 0x21d   : > { %16579 = vst [vmem:[#allocation88_spill] sm:$0xff] %v12547_v20  ;;  %v9711_v20 = vor.u32 %v10657_v13, %v9710_v18  ;;  %v10863_v23 = vpack.c.bf16 %v1159_v22, %v1158_v25  ;;  %v1758_v21 = vsel %vm11605_vm2, %v1753_v26, %v12555_v57  ;;  %v2105_v44 = vrot.slane %v2103_v3, 4  ;;  %v6581_v13 = vpop.f32.mrf.mxu3  ;;  %v12588_v25 = vld [vmem:[#allocation2 + $0x3c] sm:$0xf] }
 0x21e   : > { %16582 = vst [vmem:[#allocation13_spill] sm:$0xff] %v12563_v24  ;;  %v1123_v22 = vadd.f32 %v12358_v63, %v1034_v12  ;;  %v2403_v41 = vrot.slane %v2401_v7, 4  ;;  %v16376_v51 = vrot.slane %v12569_v42, 5  ;;  %v1761_v63 = vrot.slane %v1759_v43, 4  ;;  %v12593_v12 = vld [vmem:[#allocation2 + $0x70] sm:$0xf] }
 0x21f   : > { %2241 = vst [vmem:[#allocation3 + $0x170] sm:$0xf] %v2101_v36  ;;  %6296 = vmatmul.bf16.gmra.mxu0 %v9711_v20  ;;  %v2289_v36 = vld [vmem:[#allocation2 + $0x4c] sm:$0xf]  ;;  %v1393_v20 = vld [vmem:[#allocation2 + $0x60] sm:$0xf] }
 0x220   : > { %2242 = vst [vmem:[#allocation3 + $0x194] sm:$0xf] %v2104_v49  ;;  %v16377_v49 = vrot.slane %v12574_v14, 5  ;;  %v2404_v18 = vrot.slane %v2289_v36, 5  ;;  %v12591_v36 = vld [vmem:[#allocation2 + $0x3c] sm:$0xf] }
 0x221   : > { %2531 = vst [vmem:[#allocation3 + $0x204] sm:$0xf] %v2399_v27  ;;  %v16584_v27 = vld [vmem:[#allocation14_spill] sm:$0xff]  ;;  %v1771_v7 = vrot.slane %v1769_v54, 4  ;;  %v12606_v16 = vld [vmem:[#allocation2 + $0x3c] sm:$0xf] }
 0x222   : > { %2532 = vst [vmem:[#allocation3 + $0x228] sm:$0xf] %v2402_v11  ;;  %v947_v26 = vadd.f32 %v16584_v27, %v858_v10  ;;  %v1035_v11 = vpop.f32.mrf.mxu2  ;;  %v1160_v10 = vmax.f32 %v1123_v22, 0.0  ;;  %v12599_v27 = vrot.slane %v1765_v50, 5  ;;  %v2110_v43 = vsel %vm11662_vm7, %v12491_v15, %v16377_v49 }
 0x223   : > { %16583 = vst [vmem:[#allocation89_spill] sm:$0xff] %v12584_v35  ;;  %v2405_v22 = vsel %vm11662_vm7, %v2403_v41, %v2404_v18  ;;  %v12647_v35 = vld [vmem:[#allocation2 + $0x40] sm:$0xf] }
 0x224   : > { %1969 = vst [vmem:[#allocation3 + $0x364] sm:$0xf] %v1748_v1  ;;  %v16585_v1 = vrot.slane %v12443_v47, 5  ;;  %v1036_v13 = vadd.f32 %v1035_v11, %v947_v26  ;;  %v1775_v26 = vshll.u32 %v12593_v12, 16  ;;  %v2732_v11 = vshrl.u32 %v12588_v25, 16 }
 0x225   : > { %1970 = vst [vmem:[#allocation3 + $0x388] sm:$0xf] %v1758_v21  ;;  %v2406_v21 = vrot.slane %v2404_v18, 4  ;;  %v1192_v18 = vpack.c.bf16 %v1160_v10, %v1160_v10  ;;  %v12627_v10 = vld [vmem:[#allocation2 + $0x3c] sm:$0xf] }
 0x226   : > { %10966 = vst [vmem:[#allocation2 + $0x88] sm:$0xff] %v10863_v23   ;;  %v2107_v3 = vsel %vm11662_vm7, %v2105_v44, %v16585_v1  ;;  %v9502_v23 = vld [vmem:[#allocation3 + $0x170] sm:$0xf]  ;;  %v1125_v50 = vadd.f32 %v12424_v48, %v1036_v13  ;;  %v1762_v48 = vor.u32 %v1761_v63, %v12555_v57  ;;  %v2735_v13 = vshll.u32 %v12588_v25, 16 }
 0x227   : > { %1434 = vst [vmem:[#allocation3 + $0x360] sm:$0xf] %v1393_v20  ;;  %v10604_v47 = vld [vmem:[#allocation3 + $0x190] sm:$0xf0]  ;;  %v2408_v15 = vsel %vm11662_vm7, %v2406_v21, %v16376_v51  ;;  %v1772_v21 = vor.u32 %v1771_v7, %v12599_v27  ;;  %v861_v57 = vadd.f32 %v12470_v38, %v12006_v55  ;;  %v12631_v63 = vrot.slane %v1775_v26, 5  ;;  %v12635_v7 = vpop.f32.mrf.mxu0 }
 0x228   : > { %1435 = vst [vmem:[#allocation3 + $0x384] sm:$0xf] %v1394_v33  ;;  %v9503_v20 = vor.u32 %v10604_v47, %v9502_v23  ;;  %v10618_v44 = vld [vmem:[#allocation3 + $0x204] sm:$0xf]  ;;  %v1161_v41 = vmax.f32 %v1125_v50, 0.0  ;;  %v3820_v23 = vshrl.u32 %v12591_v36, 16  ;;  %v12633_v50 = vpop.f32.mrf.mxu1 }
 0x229   : > { %2243 = vst [vmem:[#allocation3 + $0x1b8] sm:$0xf] %v2107_v3  ;;  %v12618_v33 = vld [vmem:[#allocation2 + $0x3c] sm:$0xf]  ;;  %v9576_v1 = vld [vmem:[#allocation3 + $0x224] sm:$0xf0] }
 0x22a   : > { %16586 = vst [vmem:[#allocation14_spill] sm:$0xff] %v12618_v33  ;;  %v12622_v3 = vld [vmem:[#allocation2 + $0x3c] sm:$0xf]  ;;  %6492 = vmatmul.bf16.gmra.mxu2 %v9503_v20  ;;  %v9579_v47 = vor.u32 %v10618_v44, %v9576_v1  ;;  %v1345_v20 = vrot.slane %v1192_v18, 7  ;;  %v1763_v44 = vrot.slane %v1762_v48, 4  ;;  %v6583_v1 = vpop.f32.mrf.mxu3  ;;  %v12644_v26 = vrot.slane %v3820_v23, 6 }
 0x22b   : > { %2244 = vst [vmem:[#allocation3 + $0x1dc] sm:$0xf] %v2110_v43  ;;  %v10662_v54 = vld [vmem:[#allocation3 + $0x364] sm:$0xf]  ;;  %v12638_v43 = vrot.slane %v2732_v11, 5  ;;  %v1038_v11 = vpop.f32.mrf.mxu2 }
 0x22c   : > { %16587 = vst [vmem:[#allocation90_spill] sm:$0xff] %v12622_v3  ;;  %v9748_v51 = vld [vmem:[#allocation3 + $0x384] sm:$0xf0]  ;;  %6615 = vmatmul.bf16.gmra.mxu3 %v9579_v47  ;;  %v12652_v18 = vld [vmem:[#allocation2 + $0x44] sm:$0xf]  ;;  %v1346_v47 = vrot.slane %v1345_v20, 4 }
 0x22d   : > { %2533 = vst [vmem:[#allocation3 + $0x24c] sm:$0xf] %v2405_v22  ;;  %v9751_v25 = vor.u32 %v10662_v54, %v9748_v51  ;;  %v3823_v22 = vshll.u32 %v12591_v36, 16  ;;  %v1773_v51 = vrot.slane %v1772_v21, 4  ;;  %v12642_v54 = vrot.slane %v2735_v13, 6  ;;  %v16595_v21 = vld [vmem:[#allocation15_spill] sm:$0xff] }
 0x22e   : > { %2534 = vst [vmem:[#allocation3 + $0x270] sm:$0xf] %v2408_v15  ;;  %v1193_v15 = vpack.c.bf16 %v1161_v41, %v1161_v41  ;;  %v1768_v36 = vsel %vm11605_vm2, %v1763_v44, %v12599_v27  ;;  %v9746_v48 = vld [vmem:[#allocation3 + $0x360] sm:$0xf]  ;;  %v950_v23 = vadd.f32 %v16595_v21, %v861_v57  ;;  %v10768_v27 = vld [vmem:[%s16321_s2 + $0x110] sm:$0xff] }
 0x22f   : > { %16588 = vst [vmem:[#allocation91_spill] sm:$0xff] %v12627_v10  ;;  %6414 = vmatmul.bf16.gmra.mxu1 %v9751_v25  ;;  %v10666_v41 = vld [vmem:[#allocation3 + $0x380] sm:$0xf0]  ;;  %v1778_v13 = vsel %vm11605_vm2, %v1773_v51, %v12631_v63  ;;  %v12658_v25 = vrot.slane %v3823_v22, 7  ;;  %v12666_v57 = vld [vmem:[#allocation2 + $0x40] sm:$0xf]  ;;  %6690 = vmatpush.bf16.msra.mxu0 %v10768_v27  ;;  %v12681_v51 = vpop.f32.mrf.mxu0 }
 0x230   : > { %16589 = vst [vmem:[#allocation92_spill] sm:$0xff] %v12633_v50  ;;  %v9747_v1 = vor.u32 %v10666_v41, %v9746_v48  ;;  %v1347_v55 = vrot.slane %v1193_v15, 7  ;;  %v1480_v50 = vld [vmem:[#allocation2 + $0x74] sm:$0xf]  ;;  %v1039_v10 = vadd.f32 %v1038_v11, %v950_v23  ;;  %v1395_v15 = vld [vmem:[#allocation2 + $0x68] sm:$0xf] }
 0x231   : > { %16590 = vst [vmem:[#allocation93_spill] sm:$0xff] %v12638_v43  ;;  %v12670_v48 = vld [vmem:[#allocation2 + $0x48] sm:$0xf]  ;;  %v1396_v41 = vld [vmem:[#allocation2 + $0x6c] sm:$0xf]  ;;  %v1785_v11 = vshll.u32 %v1480_v50, 16 }
 0x232   : > { %16591 = vst [vmem:[#allocation94_spill] sm:$0xff] %v12642_v54  ;;  %6301 = vmatmul.bf16.gmra.mxu0 %v9747_v1  ;;  %v1348_v22 = vsel %vm11747_vm11, %v1346_v47, %v1347_v55  ;;  %v1789_v21 = vshrl.u32 %v1480_v50, 16  ;;  %v10613_v23 = vld [vmem:[#allocation3 + $0x1d8] sm:$0xf0]  ;;  %v1779_v47 = vshrl.u32 %v12593_v12, 16 }
 0x233   : > { %16592 = vst [vmem:[#allocation95_spill] sm:$0xff] %v12644_v26  ;;  %v9538_v27 = vld [vmem:[#allocation3 + $0x1b8] sm:$0xf]  ;;  %v2291_v12 = vld [vmem:[#allocation2 + $0x54] sm:$0xf]  ;;  %v12689_v44 = vrot.slane %v1785_v11, 5 }
 0x234   : > { %16593 = vst [vmem:[#allocation96_spill] sm:$0xff] %v12647_v35  ;;  %v9539_v1 = vor.u32 %v10613_v23, %v9538_v27  ;;  %v1791_v3 = vrot.slane %v1789_v21, 4  ;;  %v12698_v27 = vld [vmem:[#allocation2 + $0x78] sm:$0xf]  ;;  %v16603_v11 = vrot.slane %v12574_v14, 5  ;;  %v2410_v26 = vrot.slane %v2291_v12, 5 }
 0x235   : > { %16594 = vst [vmem:[#allocation97_spill] sm:$0xff] %v12652_v18  ;;  %v9612_v49 = vld [vmem:[#allocation3 + $0x26c] sm:$0xf0]  ;;  %v16606_v14 = vrot.slane %v12569_v42, 5 }
 0x236   : > { %16596 = vst [vmem:[#allocation15_spill] sm:$0xff] %v12658_v25  ;;  %v1781_v25 = vrot.slane %v1779_v47, 4  ;;  %v2111_v21 = vrot.slane %v16603_v11, 4  ;;  %v1792_v12 = vor.u32 %v1791_v3, %v12689_v44 }
 0x237   : > { %1353 = vst [vmem:[#allocation2 + $0x90] sm:$0xe] %v1345_v20  ;;  %v1349_v20 = vrot.slane %v1347_v55, 4  ;;  %v12678_v55 = vpop.f32.mrf.mxu1 }
 0x238   : > { %1971 = vst [vmem:[#allocation3 + $0x3ac] sm:$0xf] %v1768_v36  ;;  %v863_v36 = vadd.f32 %v12470_v38, %v12042_v40  ;;  %v12683_v40 = vpop.f32.mrf.mxu3  ;;  %v1782_v23 = vor.u32 %v1781_v25, %v12631_v63  ;;  %v3679_v63 = vld [vmem:[#allocation2 + $0x48] sm:$0xf]  ;;  %v12735_v25 = vld [vmem:[%s16324_s5] ss:$0 sm:$0xff] }
 0x239   : > { %16597 = vst [vmem:[#allocation98_spill] sm:$0xff] %v12666_v57  ;;  %v3850_v54 = vshrl.u32 %v3679_v63, 16  ;;  %v1793_v43 = vrot.slane %v1792_v12, 4 }
 0x23a   : > { %1972 = vst [vmem:[#allocation3 + $0x3d0] sm:$0xf] %v1778_v13  ;;  %v12675_v13 = vld [vmem:[#allocation2 + $0x44] sm:$0xf]  ;;  %6497 = vmatmul.bf16.gmra.mxu2 %v9539_v1  ;;  %v16604_v1 = vrot.slane %v12670_v48, 5 }
 0x23b   : > { %1354 = vst [vmem:[#allocation2 + $0x94] sm:$0xf] %v1348_v22  ;;  %v1128_v22 = vadd.f32 %v12463_v53, %v1039_v10  ;;  %v10627_v53 = vld [vmem:[#allocation3 + $0x24c] sm:$0xf]  ;;  %v12691_v10 = vld [vmem:[#allocation2 + $0x40] sm:$0xf] }
 0x23c   : > { %1355 = vst [vmem:[#allocation2 + $0x98] sm:$0x1] %v1349_v20  ;;  %v12687_v20 = vld [vmem:[#allocation2 + $0x48] sm:$0xf]  ;;  %v9615_v38 = vor.u32 %v10627_v53, %v9612_v49  ;;  %v12708_v47 = vrot.slane %v16604_v1, 4  ;;  %v2409_v53 = vrot.slane %v16606_v14, 4 }
 0x23d   : > { %16598 = vst [vmem:[#allocation99_spill] sm:$0xff] %v12675_v13  ;;  %v1162_v50 = vmax.f32 %v1128_v22, 0.0  ;;  %v12710_v22 = vld [vmem:[#allocation2 + $0x48] sm:$0xf]  ;;  %v1795_v1 = vshll.u32 %v12698_v27, 16  ;;  %v12727_v13 = vpop.f32.mrf.mxu0 }
 0x23e   : > { %1436 = vst [vmem:[#allocation3 + $0x3a8] sm:$0xf] %v1395_v15  ;;  %v1040_v15 = vpop.f32.mrf.mxu2  ;;  %6620 = vmatmul.bf16.gmra.mxu3 %v9615_v38 }
 0x23f   : > { %16599 = vst [vmem:[#allocation100_spill] sm:$0xff] %v12678_v55  ;;  %v1194_v35 = vpack.c.bf16 %v1162_v50, %v1162_v50  ;;  %v12879_v55 = vld [vmem:[#allocation2 + $0x88] sm:$0xf] }
 0x240   : > { %16600 = vst [vmem:[#allocation101_spill] sm:$0xff] %v12681_v51  ;;  %v16602_v51 = vld [vmem:[#allocation16_spill] sm:$0xff]  ;;  %v12751_v50 = vpop.f32.mrf.mxu3 }
 0x241   : > { %1437 = vst [vmem:[#allocation3 + $0x3cc] sm:$0xf] %v1396_v41  ;;  %v952_v18 = vadd.f32 %v16602_v51, %v863_v36  ;;  %v2762_v51 = vshrl.u32 %v12687_v20, 16  ;;  %v2765_v36 = vshll.u32 %v12687_v20, 16  ;;  %v9784_v11 = vld [vmem:[#allocation3 + $0x3cc] sm:$0xf0] }
 0x242   : > { %16601 = vst [vmem:[#allocation102_spill] sm:$0xff] %v12683_v40  ;;  %v12695_v40 = vld [vmem:[#allocation2 + $0x58] sm:$0xf]  ;;  %v16607_v20 = vrot.slane %v12606_v16, 5  ;;  %v12720_v41 = vld [vmem:[#allocation2 + $0x48] sm:$0xf] }
 0x243   : > { %v1041_v24 = vadd.f32 %v1040_v15, %v952_v18  ;;  %16605 = vst [vmem:[#allocation16_spill] sm:$0xff] %v12710_v22  ;;  %v10671_v15 = vld [vmem:[#allocation3 + $0x3ac] sm:$0xf]  ;;  %v2412_v18 = vrot.slane %v2410_v26, 4  ;;  %v12729_v57 = vrot.slane %v2762_v51, 5  ;;  %v16611_v16 = vrot.slane %v12691_v10, 5 }
 0x244   : > { %v2114_v38 = vrot.slane %v16607_v20, 4  ;;  %16608 = vst [vmem:[#allocation103_spill] sm:$0xff] %v12720_v41  ;;  %v9787_v49 = vor.u32 %v10671_v15, %v9784_v11  ;;  %v16609_v42 = vmov %v16607_v20  ;;  %v12741_v15 = vpop.f32.mrf.mxu1  ;;  %v2411_v11 = vsel %vm11662_vm7, %v2409_v53, %v2410_v26 }
 0x245   : > { %v2113_v14 = vsel %vm11662_vm7, %v2111_v21, %v16609_v42  ;;  %v1130_v3 = vadd.f32 %v12531_v0, %v1041_v24  ;;  %16610 = vst [vmem:[#allocation104_spill] sm:$0xff] %v12729_v57  ;;  %v12743_v0 = vld [vmem:[#allocation2 + $0x48] sm:$0xf]  ;;  %v9782_v24 = vld [vmem:[#allocation3 + $0x3a8] sm:$0xf]  ;;  %v16614_v20 = vrot.slane %v12695_v40, 5 }
 0x246   : > { %v2116_v21 = vsel %vm11662_vm7, %v2114_v38, %v16611_v16  ;;  %16612 = vst [vmem:[#allocation105_spill] sm:$0xff] %v12741_v15  ;;  %6419 = vmatmul.bf16.gmra.mxu1 %v9787_v49  ;;  %v1358_v38 = vrot.slane %v1194_v35, 6  ;;  %v1783_v16 = vrot.slane %v1782_v23, 4  ;;  %v12753_v15 = vrot.slane %v1795_v1, 5 }
 0x247   : > { %16613 = vst [vmem:[#allocation106_spill] sm:$0xff] %v12743_v0  ;;  %v2414_v42 = vsel %vm11662_vm7, %v2412_v18, %v16614_v20  ;;  %v16392_v49 = vrot.slane %v12720_v41, 6  ;;  %v1163_v58 = vmax.f32 %v1130_v3, 0.0  ;;  %v12756_v26 = vrot.slane %v2765_v36, 6 }
 0x248   : > { %v10675_v51 = vld [vmem:[#allocation3 + $0x3c8] sm:$0xf0]  ;;  %16615 = vst [vmem:[#allocation107_spill] sm:$0xff] %v12751_v50  ;;  %v3853_v53 = vshll.u32 %v3679_v63, 16  ;;  %v1788_v18 = vsel %vm11605_vm2, %v1783_v16, %v12689_v44  ;;  %v16617_v35 = vrot.slane %v12710_v22, 6  ;;  %v1798_v12 = vsel %vm11605_vm2, %v1793_v43, %v12753_v15  ;;  %v10781_v43 = vld [vmem:[%s16321_s2 + $0x178] sm:$0xff]  ;;  %v12787_v16 = vpop.f32.mrf.mxu0  ;;  %v12793_v1 = vpop.f32.mrf.mxu3 }
 0x249   : > { %v9783_v57 = vor.u32 %v10675_v51, %v9782_v24  ;;  %2245 = vst [vmem:[#allocation3 + $0x200] sm:$0xf] %v2113_v14  ;;  %v1195_v36 = vpack.c.bf16 %v1163_v58, %v1163_v58  ;;  %v12769_v14 = vld [vmem:[#allocation2 + $0x50] sm:$0xf]  ;;  %v12773_v3 = vrot.slane %v16392_v49, 4  ;;  %v12775_v44 = vrot.slane %v3850_v54, 6  ;;  %v6468_v58 = vpop.f32.mrf.mxu2  ;;  %6798 = vmatpush.bf16.msra.mxu1 %v10781_v43 }
 0x24a   : > { %2246 = vst [vmem:[#allocation3 + $0x224] sm:$0xf] %v2116_v21  ;;  %v12763_v23 = vrot.slane %v16617_v35, 4  ;;  %v1359_v63 = vrot.slane %v1358_v38, 4  ;;  %v12777_v24 = vrot.slane %v3853_v53, 7  ;;  %v16633_v22 = vrot.slane %v12691_v10, 5 }
 0x24b   : > { %16616 = vst [vmem:[#allocation108_spill] sm:$0xff] %v12756_v26  ;;  %6306 = vmatmul.bf16.gmra.mxu0 %v9783_v57  ;;  %v1397_v57 = vld [vmem:[#allocation2 + $0x70] sm:$0xf]  ;;  %v1360_v21 = vrot.slane %v1195_v36, 6  ;;  %v12779_v51 = vld [vmem:[#allocation2 + $0x4c] sm:$0xf] }
 0x24c   : > { %2535 = vst [vmem:[#allocation3 + $0x294] sm:$0xf] %v2411_v11  ;;  %v2576_v11 = vld [vmem:[#allocation2 + $0x50] sm:$0xf]  ;;  %v12789_v53 = vld [vmem:[#allocation2 + $0x4c] sm:$0xf] }
 0x24d   : > { %16618 = vst [vmem:[#allocation109_spill] sm:$0xff] %v12763_v23  ;;  %v1361_v54 = vsel %vm11674_vm8, %v1359_v63, %v1360_v21  ;;  %v2782_v36 = vshrl.u32 %v2576_v11, 16  ;;  %v2785_v58 = vshll.u32 %v2576_v11, 16  ;;  %v1482_v49 = vld [vmem:[#allocation2 + $0x7c] sm:$0xf]  ;;  %v2117_v26 = vrot.slane %v16633_v22, 4 }
 0x24e   : > { %2536 = vst [vmem:[#allocation3 + $0x2b8] sm:$0xf] %v2414_v42  ;;  %v1362_v42 = vrot.slane %v1360_v21, 4  ;;  %v2293_v43 = vld [vmem:[#allocation2 + $0x5c] sm:$0xf]  ;;  %v16637_v10 = vrot.slane %v12695_v40, 5 }
 0x24f   : > { %1366 = vst [vmem:[#allocation2 + $0x98] sm:$0xc] %v1358_v38  ;;  %v1398_v38 = vld [vmem:[#allocation2 + $0x74] sm:$0xf] }
 0x250   : > { %16619 = vst [vmem:[#allocation110_spill] sm:$0xff] %v12773_v3  ;;  %v12802_v3 = vld [vmem:[#allocation2 + $0x50] sm:$0xf] }
 0x251   : > { %16620 = vst [vmem:[#allocation111_spill] sm:$0xff] %v12775_v44  ;;  %v10622_v35 = vld [vmem:[#allocation3 + $0x220] sm:$0xf0] }
 0x252   : > { %1973 = vst [vmem:[#allocation3 + $0x3f4] sm:$0xf] %v1788_v18  ;;  %v9574_v18 = vld [vmem:[#allocation3 + $0x200] sm:$0xf] }
 0x253   : > { %16621 = vst [vmem:[#allocation112_spill] sm:$0xff] %v12777_v24  ;;  %v9575_v20 = vor.u32 %v10622_v35, %v9574_v18  ;;  %v10636_v63 = vld [vmem:[#allocation3 + $0x294] sm:$0xf]  ;;  %v1799_v18 = vshrl.u32 %v12698_v27, 16  ;;  %v1805_v35 = vshll.u32 %v1482_v49, 16  ;;  %v2416_v24 = vrot.slane %v2293_v43, 5 }
 0x254   : > { %16622 = vst [vmem:[#allocation113_spill] sm:$0xff] %v12779_v51  ;;  %v12821_v27 = vld [vmem:[#allocation2 + $0x50] sm:$0xf]  ;;  %v12829_v51 = vld [vmem:[#allocation2 + $0x60] sm:$0xf]  ;;  %v6248_v43 = vadd.f32 %v12735_v25, %v12184_v31 }
 0x255   : > { %1974 = vst [vmem:[#allocation3 + $0x418] sm:$0xf] %v1798_v12  ;;  %v12791_v12 = vpop.f32.mrf.mxu1  ;;  %v9648_v21 = vld [vmem:[#allocation3 + $0x2b4] sm:$0xf0]  ;;  %6502 = vmatmul.bf16.gmra.mxu2 %v9575_v20  ;;  %v12816_v20 = vld [vmem:[#allocation2 + $0x64] sm:$0xf] }
 0x256   : > { %1438 = vst [vmem:[#allocation3 + $0x3f0] sm:$0xf] %v1397_v57  ;;  %v16627_v57 = vrot.slane %v12743_v0, 7  ;;  %v9651_v11 = vor.u32 %v10636_v63, %v9648_v21  ;;  %v12814_v0 = vrot.slane %v2782_v36, 5  ;;  %v12818_v63 = vrot.slane %v2785_v58, 6 }
 0x257   : > { %16623 = vst [vmem:[#allocation114_spill] sm:$0xff] %v12787_v16  ;;  %v16629_v16 = vrot.slane %v12769_v14, 5  ;;  %v1483_v36 = vld [vmem:[#allocation2 + $0x80] sm:$0xf]  ;;  %v6361_v37 = vadd.f32 %v12131_v32, %v6248_v43 }
 0x258   : > { %16624 = vst [vmem:[#allocation115_spill] sm:$0xff] %v12789_v53  ;;  %v12797_v50 = vrot.slane %v16627_v57, 4  ;;  %6625 = vmatmul.bf16.gmra.mxu3 %v9651_v11  ;;  %v12832_v11 = vrot.slane %v1805_v35, 5  ;;  %v12834_v57 = vld [vmem:[#allocation2 + $0x60] sm:$0xf]  ;;  %v12849_v53 = vpop.f32.mrf.mxu3 }
 0x259   : > { %1367 = vst [vmem:[#allocation2 + $0x9c] sm:$0xf] %v1361_v54  ;;  %v12800_v54 = vld [vmem:[#allocation2 + $0x50] sm:$0xf]  ;;  %v10680_v23 = vld [vmem:[#allocation3 + $0x3f4] sm:$0xf] }
 0x25a   : > { %16625 = vst [vmem:[#allocation116_spill] sm:$0xff] %v12791_v12  ;;  %v1815_v12 = vshll.u32 %v1483_v36, 16 }
 0x25b   : > { %1368 = vst [vmem:[#allocation2 + $0xa0] sm:$0x3] %v1362_v42  ;;  %v12805_v42 = vld [vmem:[#allocation2 + $0x58] sm:$0xf] }
 0x25c   : > { %16626 = vst [vmem:[#allocation117_spill] sm:$0xff] %v12793_v1  ;;  %v6470_v1 = vpop.f32.mrf.mxu2  ;;  %v9820_v41 = vld [vmem:[#allocation3 + $0x414] sm:$0xf0] }
 0x25d   : > { %1439 = vst [vmem:[#allocation3 + $0x414] sm:$0xf] %v1398_v38  ;;  %v1809_v38 = vshrl.u32 %v1482_v49, 16  ;;  %v2003_v49 = vld [vmem:[#allocation2 + $0x44] sm:$0xf]  ;;  %v9823_v44 = vor.u32 %v10680_v23, %v9820_v41  ;;  %v2415_v41 = vrot.slane %v16637_v10, 4 }
 0x25e   : > { %16628 = vst [vmem:[#allocation118_spill] sm:$0xff] %v12797_v50  ;;  %v12812_v50 = vrot.slane %v16629_v16, 4  ;;  %v12825_v16 = vld [vmem:[#allocation2 + $0x64] sm:$0xf]  ;;  %v2118_v1 = vrot.slane %v2003_v49, 5 }
 0x25f   : > { %16630 = vst [vmem:[#allocation119_spill] sm:$0xff] %v12814_v0  ;;  %v12827_v0 = vpop.f32.mrf.mxu0  ;;  %v1811_v21 = vrot.slane %v1809_v38, 4  ;;  %v1484_v49 = vld [vmem:[#allocation2 + $0x84] sm:$0xf]  ;;  %v12854_v23 = vld [vmem:[#allocation2 + $0x68] sm:$0xf]  ;;  %6424 = vmatmul.bf16.gmra.mxu1 %v9823_v44 }
 0x260   : > { %16631 = vst [vmem:[#allocation120_spill] sm:$0xff] %v12818_v63  ;;  %v1801_v63 = vrot.slane %v1799_v18, 4  ;;  %v16635_v18 = vrot.slane %v12805_v42, 5  ;;  %v2120_v46 = vrot.slane %v2118_v1, 4  ;;  %v16639_v40 = vrot.slane %v12825_v16, 5 }
 0x261   : > { %16632 = vst [vmem:[#allocation121_spill] sm:$0xff] %v12827_v0  ;;  %v12839_v0 = vpop.f32.mrf.mxu1  ;;  %v1812_v35 = vor.u32 %v1811_v21, %v12832_v11  ;;  %v1829_v22 = vshrl.u32 %v1484_v49, 16  ;;  %v2119_v33 = vsel %vm11662_vm7, %v2117_v26, %v2118_v1  ;;  %v1817_v21 = vrot.slane %v1815_v12, 5 }
 0x262   : > { %16634 = vst [vmem:[#allocation122_spill] sm:$0xff] %v12839_v0  ;;  %v12845_v58 = vrot.slane %v16635_v18, 4  ;;  %v1802_v38 = vor.u32 %v1801_v63, %v12753_v15  ;;  %v2419_v18 = vrot.slane %v12834_v57, 5  ;;  %v16638_v0 = vrot.slane %v12816_v20, 5 }
 0x263   : > { %16636 = vst [vmem:[#allocation123_spill] sm:$0xff] %v12849_v53  ;;  %v2418_v53 = vrot.slane %v2416_v24, 4  ;;  %v12865_v10 = vrot.slane %v16639_v40, 4  ;;  %v2425_v15 = vrot.slane %v12854_v23, 5  ;;  %v1819_v63 = vshrl.u32 %v1483_v36, 16 }
 0x264   : > { %v12861_v31 = vrot.slane %v16638_v0, 4  ;;  %v6473_v44 = vpop.f32.mrf.mxu2  ;;  %v16640_v57 = vrot.slane %v12670_v48, 5  ;;  %v12877_v40 = vld [vmem:[#allocation2 + $0x6c] sm:$0xf]  ;;  %v2417_v26 = vsel %vm11662_vm7, %v2415_v41, %v2416_v24  ;;  %v1803_v12 = vrot.slane %v1802_v38, 4 }
 0x265   : > { %v1813_v1 = vrot.slane %v1812_v35, 4  ;;  %v9818_v23 = vld [vmem:[#allocation3 + $0x3f0] sm:$0xf]  ;;  %v10684_v36 = vld [vmem:[#allocation3 + $0x410] sm:$0xf0]  ;;  %v2420_v48 = vsel %vm11662_vm7, %v2418_v53, %v2419_v18  ;;  %v1831_v32 = vrot.slane %v1829_v22, 4 }
 0x266   : > { %v2122_v0 = vsel %vm11662_vm7, %v2120_v46, %v16640_v57  ;;  %2247 = vst [vmem:[#allocation3 + $0x248] sm:$0xf] %v2119_v33  ;;  %v12885_v46 = vadd.f32 %v6473_v44, %v6361_v37  ;;  %v9819_v43 = vor.u32 %v10684_v36, %v9818_v23  ;;  %v1808_v57 = vsel %vm11605_vm2, %v1803_v12, %v12832_v11  ;;  %v2005_v38 = vld [vmem:[#allocation2 + $0x4c] sm:$0xf]  ;;  %v1399_v53 = vld [vmem:[#allocation2 + $0x78] sm:$0xf] }
 0x267   : > { %v12875_v19 = vpop.f32.mrf.mxu0  ;;  %2248 = vst [vmem:[#allocation3 + $0x26c] sm:$0xf] %v2122_v0  ;;  %v1818_v24 = vsel %vm11605_vm2, %v1813_v1, %v1817_v21  ;;  %v2124_v35 = vrot.slane %v2005_v38, 5  ;;  %v1821_v41 = vrot.slane %v1819_v63, 4  ;;  %v1825_v33 = vshll.u32 %v1484_v49, 16  ;;  %v10767_v11 = vld [vmem:[%s16321_s2 + $0x108] sm:$0xff]  ;;  %v12901_v63 = vpop.f32.mrf.mxu3 }
 0x268   : > { %16641 = vst [vmem:[#allocation124_spill] sm:$0xff] %v12875_v19  ;;  %v1835_v19 = vshll.u32 %v12879_v55, 16  ;;  %v16404_v37 = vrot.slane %v12877_v40, 5  ;;  %6311 = vmatmul.bf16.gmra.mxu0 %v9819_v43  ;;  %v12899_v44 = vld [vmem:[#allocation2 + $0x8c] sm:$0xf]  ;;  %v12903_v1 = vrot.slane %v2425_v15, 4 }
 0x269   : > { %16642 = vst [vmem:[#allocation125_spill] sm:$0xff] %v12885_v46  ;;  %v12894_v22 = vpop.f32.mrf.mxu1  ;;  %v1400_v0 = vld [vmem:[#allocation2 + $0x7c] sm:$0xf]  ;;  %v1822_v49 = vor.u32 %v1821_v41, %v1817_v21  ;;  %v1827_v12 = vrot.slane %v1825_v33, 5  ;;  %v2125_v23 = vsel %vm11662_vm7, %v12708_v47, %v2124_v35  ;;  %v2421_v36 = vrot.slane %v2419_v18, 4  ;;  %6691 = vmatpush.bf16.msra.mxu0 %v10767_v11 }
 0x26a   : > { %2537 = vst [vmem:[#allocation3 + $0x2dc] sm:$0xf] %v2417_v26  ;;  %v2126_v26 = vrot.slane %v2124_v35, 4  ;;  %v2007_v43 = vld [vmem:[#allocation2 + $0x54] sm:$0xf]  ;;  %v2430_v47 = vrot.slane %v16404_v37, 4 }
 0x26b   : > { %2538 = vst [vmem:[#allocation3 + $0x300] sm:$0xf] %v2420_v48  ;;  %v12910_v38 = vld [vmem:[#allocation2 + $0x90] sm:$0xf]  ;;  %v1823_v41 = vrot.slane %v1822_v49, 4  ;;  %v1832_v33 = vor.u32 %v1831_v32, %v1827_v12  ;;  %v1839_v18 = vshrl.u32 %v12879_v55, 16 }
 0x26c   : > { %16643 = vst [vmem:[#allocation126_spill] sm:$0xff] %v12894_v22  ;;  %v12908_v48 = vpop.f32.mrf.mxu2  ;;  %v16647_v11 = vrot.slane %v12825_v16, 5  ;;  %v2130_v55 = vrot.slane %v2007_v43, 5  ;;  %v1849_v16 = vshrl.u32 %v12899_v44, 16  ;;  %v12941_v43 = vld [vmem:[#allocation2 + $0x68] sm:$0xf] }
 0x26d   : > { %1975 = vst [vmem:[#allocation3 + $0x43c] sm:$0xf] %v1808_v57  ;;  %v16646_v57 = vrot.slane %v12769_v14, 5  ;;  %v9610_v35 = vld [vmem:[#allocation3 + $0x248] sm:$0xf]  ;;  %v6253_v14 = vadd.f32 %v12735_v25, %v12301_v34  ;;  %v1833_v32 = vrot.slane %v1832_v33, 4  ;;  %v1828_v34 = vsel %vm11605_vm2, %v1823_v41, %v1827_v12 }
 0x26e   : > { %16644 = vst [vmem:[#allocation127_spill] sm:$0xff] %v12901_v63  ;;  %v2131_v12 = vsel %vm11662_vm7, %v12812_v50, %v2130_v55  ;;  %v2132_v41 = vrot.slane %v2130_v55, 4  ;;  %v2558_v63 = vld [vmem:[#allocation2 + $0x8] sm:$0xe]  ;;  %v16650_v50 = vrot.slane %v12805_v42, 5  ;;  %v1851_v55 = vrot.slane %v1849_v16, 4 }
 0x26f   : > { %1976 = vst [vmem:[#allocation3 + $0x460] sm:$0xf] %v1818_v24  ;;  %v2128_v21 = vsel %vm11662_vm7, %v2126_v26, %v16646_v57  ;;  %v12916_v24 = vrot.slane %v1835_v19, 5  ;;  %v10631_v26 = vld [vmem:[#allocation3 + $0x268] sm:$0xf0]  ;;  %v2426_v19 = vsel %vm11662_vm7, %v12865_v10, %v2425_v15  ;;  %v12930_v49 = vpop.f32.mrf.mxu0  ;;  %v12954_v22 = vpop.f32.mrf.mxu3  ;;  %v1859_v16 = vshrl.u32 %v12910_v38, 16 }
 0x270   : > { %16645 = vst [vmem:[#allocation128_spill] sm:$0xff] %v12908_v48  ;;  %v12932_v57 = vld [vmem:[#allocation2 + $0x74] sm:$0xf]  ;;  %v1402_v15 = vld [vmem:[#allocation2 + $0x84] sm:$0xf] }
 0x271   : > { %1440 = vst [vmem:[#allocation3 + $0x438] sm:$0xf] %v1399_v53  ;;  %v2423_v53 = vsel %vm11662_vm7, %v2421_v36, %v16647_v11  ;;  %v9611_v36 = vor.u32 %v10631_v26, %v9610_v35  ;;  %v10645_v11 = vld [vmem:[#allocation3 + $0x2dc] sm:$0xf]  ;;  %v1838_v10 = vsel %vm11605_vm2, %v1833_v32, %v12916_v24  ;;  %v12943_v35 = vld [vmem:[#allocation2 + $0x70] sm:$0xf]  ;;  %v12949_v32 = vpop.f32.mrf.mxu1 }
 0x272   : > { %1441 = vst [vmem:[#allocation3 + $0x45c] sm:$0xf] %v1400_v0  ;;  %v1855_v0 = vshll.u32 %v12910_v38, 16  ;;  %v9684_v37 = vld [vmem:[#allocation3 + $0x2fc] sm:$0xf0] }
 0x273   : > { %2249 = vst [vmem:[#allocation3 + $0x290] sm:$0xf] %v2125_v23  ;;  %v1401_v23 = vld [vmem:[#allocation2 + $0x80] sm:$0xf]  ;;  %6507 = vmatmul.bf16.gmra.mxu2 %v9611_v36  ;;  %v9687_v33 = vor.u32 %v10645_v11, %v9684_v37  ;;  %v6366_v37 = vadd.f32 %v12243_v61, %v6253_v14  ;;  %v1845_v11 = vshll.u32 %v12899_v44, 16  ;;  %v16651_v61 = vrot.slane %v12877_v40, 5 }
 0x274   : > { %2250 = vst [vmem:[#allocation3 + $0x2b4] sm:$0xf] %v2128_v21  ;;  %v10689_v48 = vld [vmem:[#allocation3 + $0x43c] sm:$0xf]  ;;  %v6478_v36 = vpop.f32.mrf.mxu2  ;;  %v3093_v42 = vld [vmem:[#allocation2 + $0x8] sm:$0xc] }
 0x275   : > { %2539 = vst [vmem:[#allocation3 + $0x324] sm:$0xf] %v2423_v53  ;;  %v16406_v53 = vrot.slane %v12943_v35, 5  ;;  %6630 = vmatmul.bf16.gmra.mxu3 %v9687_v33  ;;  %v2429_v44 = vsel %vm11662_vm7, %v12903_v1, %v16651_v61  ;;  %v1847_v14 = vrot.slane %v1845_v11, 5  ;;  %v9309_v61 = vrot.slane %v3093_v42, 10 }
 0x276   : > { %2540 = vst [vmem:[#allocation3 + $0x348] sm:$0xf] %v2426_v19  ;;  %v9856_v21 = vld [vmem:[#allocation3 + $0x45c] sm:$0xf0]  ;;  %v1841_v19 = vrot.slane %v1839_v18, 4  ;;  %v12965_v18 = vadd.f32 %v6478_v36, %v6366_v37  ;;  %v2603_v36 = vshrl.u32 %v2558_v63, 16 }
 0x277   : > { %1977 = vst [vmem:[#allocation3 + $0x484] sm:$0xf] %v1828_v34  ;;  %v9859_v26 = vor.u32 %v10689_v48, %v9856_v21  ;;  %v16405_v34 = vrot.slane %v12932_v57, 5  ;;  %v2134_v48 = vsel %vm11662_vm7, %v2132_v41, %v16650_v50  ;;  %v2432_v40 = vsel %vm11662_vm7, %v2430_v47, %v16406_v53  ;;  %v12979_v21 = vld [vmem:[#allocation2 + $0x94] sm:$0xf]  ;;  %v12987_v47 = vpop.f32.mrf.mxu0 }
 0x278   : > { %1978 = vst [vmem:[#allocation3 + $0x4a8] sm:$0xf] %v1838_v10  ;;  %v9854_v33 = vld [vmem:[#allocation3 + $0x438] sm:$0xf]  ;;  %v1842_v1 = vor.u32 %v1841_v19, %v12916_v24  ;;  %v1403_v37 = vld [vmem:[#allocation2 + $0x88] sm:$0xf] }
 0x279   : > { %16648 = vst [vmem:[#allocation129_spill] sm:$0xff] %v12949_v32  ;;  %v10693_v46 = vld [vmem:[#allocation3 + $0x458] sm:$0xf0]  ;;  %6429 = vmatmul.bf16.gmra.mxu1 %v9859_v26  ;;  %v1852_v26 = vor.u32 %v1851_v55, %v1847_v14  ;;  %v12983_v38 = vrot.slane %v16405_v34, 4  ;;  %v1404_v19 = vld [vmem:[#allocation2 + $0x8c] sm:$0xf]  ;;  %v13002_v42 = vpop.f32.mrf.mxu1 }
 0x27a   : > { %16649 = vst [vmem:[#allocation130_spill] sm:$0xff] %v12954_v22  ;;  %v9855_v41 = vor.u32 %v10693_v46, %v9854_v33  ;;  %v1843_v24 = vrot.slane %v1842_v1, 4  ;;  %v2606_v46 = vshll.u32 %v2558_v63, 16  ;;  %v2009_v50 = vld [vmem:[#allocation2 + $0x5c] sm:$0xf]  ;;  %v1869_v1 = vshrl.u32 %v12979_v21, 16 }
 0x27b   : > { %1442 = vst [vmem:[#allocation3 + $0x480] sm:$0xf] %v1401_v23  ;;  %v10780_v23 = vld [vmem:[%s16321_s2 + $0x170] sm:$0xff]  ;;  %v2136_v33 = vrot.slane %v2009_v50, 5 }
 0x27c   : > { %1443 = vst [vmem:[#allocation3 + $0x4a4] sm:$0xf] %v1402_v15  ;;  %v12977_v15 = vrot.slane %v1855_v0, 5  ;;  %6799 = vmatpush.bf16.msra.mxu1 %v10780_v23  ;;  %6316 = vmatmul.bf16.gmra.mxu0 %v9855_v41  ;;  %v1853_v0 = vrot.slane %v1852_v26, 4  ;;  %v1848_v11 = vsel %vm11605_vm2, %v1843_v24, %v1847_v14  ;;  %v1861_v23 = vrot.slane %v1859_v16, 4  ;;  %v13004_v16 = vpop.f32.mrf.mxu2  ;;  %v16659_v10 = vld [vmem:[#allocation19_spill] sm:$0xff] }
 0x27d   : > { %16652 = vst [vmem:[#allocation131_spill] sm:$0xff] %v12965_v18  ;;  %v10640_v41 = vld [vmem:[#allocation3 + $0x2b0] sm:$0xf0]  ;;  %v16655_v14 = vrot.slane %v12816_v20, 5  ;;  %v9720_v50 = vld [vmem:[#allocation3 + $0x344] sm:$0xf0] }
 0x27e   : > { %2251 = vst [vmem:[#allocation3 + $0x2d8] sm:$0xf] %v2131_v12  ;;  %v12985_v12 = vld [vmem:[#allocation2 + $0x98] sm:$0xf]  ;;  %v2559_v24 = vld [vmem:[#allocation2 + $0xc] sm:$0xf] }
 0x27f   : > { %2252 = vst [vmem:[#allocation3 + $0x2fc] sm:$0xf] %v2134_v48  ;;  %v16654_v48 = vrot.slane %v12829_v51, 5  ;;  %v1875_v63 = vshll.u32 %v12985_v12, 16  ;;  %v16660_v34 = vrot.slane %v16659_v10, 6  ;;  %v16661_v10 = vrot.slane %v12943_v35, 5 }
 0x280   : > { %2541 = vst [vmem:[#allocation3 + $0x36c] sm:$0xf] %v2429_v44  ;;  %v1858_v44 = vsel %vm11605_vm2, %v1853_v0, %v12977_v15  ;;  %v2608_v0 = vrot.slane %v2606_v46, 6 }
 0x281   : > { %16653 = vst [vmem:[#allocation132_spill] sm:$0xff] %v12987_v47  ;;  %v2141_v55 = vrot.slane %v16654_v48, 4  ;;  %v13009_v48 = vpop.f32.mrf.mxu3 }
 0x282   : > { %2542 = vst [vmem:[#allocation3 + $0x390] sm:$0xf] %v2432_v40  ;;  %v2605_v40 = vrot.slane %v2603_v36, 5  ;;  %v2138_v36 = vrot.slane %v2136_v33, 4 }
 0x283   : > { %1444 = vst [vmem:[#allocation3 + $0x4c8] sm:$0xf] %v1403_v37  ;;  %v2143_v26 = vsel %vm11662_vm7, %v2141_v55, %v16655_v14  ;;  %v2137_v37 = vsel %vm11662_vm7, %v12845_v58, %v2136_v33  ;;  %v9892_v55 = vld [vmem:[#allocation3 + $0x4a4] sm:$0xf0]  ;;  %v16658_v14 = vrot.slane %v12829_v51, 5  ;;  %v3178_v58 = vsel %vm11674_vm8, %v9309_v61, %v16660_v34 }
 0x284   : > { %1979 = vst [vmem:[#allocation3 + $0x4cc] sm:$0xf] %v1848_v11  ;;  %v9646_v11 = vld [vmem:[#allocation3 + $0x290] sm:$0xf]  ;;  %v2609_v46 = vor.u32 %v2608_v0, %v2605_v40  ;;  %v6258_v33 = vadd.f32 %v12735_v25, %v12421_v30  ;;  %v2612_v51 = vshrl.u32 %v2559_v24, 16  ;;  %v2615_v34 = vshll.u32 %v2559_v24, 16  ;;  %v13029_v30 = vpop.f32.mrf.mxu0 }
 0x285   : > { %1980 = vst [vmem:[#allocation3 + $0x4f0] sm:$0xf] %v1858_v44  ;;  %v9647_v20 = vor.u32 %v10640_v41, %v9646_v11  ;;  %v10654_v44 = vld [vmem:[#allocation3 + $0x324] sm:$0xf]  ;;  %v1879_v41 = vshrl.u32 %v12985_v12, 16  ;;  %v13027_v61 = vrot.slane %v1875_v63, 5 }
 0x286   : > { %16656 = vst [vmem:[#allocation133_spill] sm:$0xff] %v13004_v16  ;;  %v10698_v11 = vld [vmem:[#allocation3 + $0x484] sm:$0xf]  ;;  %v9723_v53 = vor.u32 %v10654_v44, %v9720_v50  ;;  %v9890_v0 = vld [vmem:[#allocation3 + $0x480] sm:$0xf]  ;;  %v16663_v50 = vrot.slane %v12932_v57, 5 }
 0x287   : > { %1445 = vst [vmem:[#allocation3 + $0x4ec] sm:$0xf] %v1404_v19  ;;  %v2140_v19 = vsel %vm11662_vm7, %v2138_v36, %v16658_v14  ;;  %6512 = vmatmul.bf16.gmra.mxu2 %v9647_v20  ;;  %v13023_v36 = vld [vmem:[#allocation2 + $0x78] sm:$0xf]  ;;  %v9895_v40 = vor.u32 %v10698_v11, %v9892_v55  ;;  %v1865_v24 = vshll.u32 %v12979_v21, 16  ;;  %v2610_v63 = vrot.slane %v2609_v46, 4 }
 0x288   : > { %16657 = vst [vmem:[#allocation134_spill] sm:$0xff] %v13009_v48  ;;  %6635 = vmatmul.bf16.gmra.mxu3 %v9723_v53  ;;  %v2614_v20 = vrot.slane %v2612_v51, 5  ;;  %v13039_v44 = vld [vmem:[#allocation2 + $0x6c] sm:$0xf]  ;;  %v10702_v55 = vld [vmem:[#allocation3 + $0x4a0] sm:$0xf0] }
 0x289   : > { %2253 = vst [vmem:[#allocation3 + $0x320] sm:$0xf] %v2137_v37  ;;  %v1862_v37 = vor.u32 %v1861_v23, %v12977_v15  ;;  %v2437_v15 = vrot.slane %v13023_v36, 5  ;;  %v13032_v23 = vld [vmem:[#allocation2 + $0x50] sm:$0xf]  ;;  %v16664_v57 = vrot.slane %v12941_v43, 5  ;;  %6434 = vmatmul.bf16.gmra.mxu1 %v9895_v40  ;;  %v9891_v40 = vor.u32 %v10702_v55, %v9890_v0 }
 0x28a   : > { %2255 = vst [vmem:[#allocation3 + $0x368] sm:$0xf] %v2143_v26  ;;  %v2433_v26 = vrot.slane %v16661_v10, 4  ;;  %v1867_v46 = vrot.slane %v1865_v24, 5  ;;  %v2617_v11 = vrot.slane %v2615_v34, 6  ;;  %v2628_v10 = vor.u32 %v12034_v29, %v12022_v62  ;;  %v13069_v24 = vpop.f32.mrf.mxu3  ;;  %v16672_v43 = vld [vmem:[#allocation25_spill] sm:$0xff] }
 0x28b   : > { %2254 = vst [vmem:[#allocation3 + $0x344] sm:$0xf] %v2140_v19  ;;  %v2438_v14 = vsel %vm11662_vm7, %v12983_v38, %v2437_v15  ;;  %v1863_v53 = vrot.slane %v1862_v37, 4  ;;  %v1871_v19 = vrot.slane %v1869_v1, 4  ;;  %v2146_v21 = vsel %vm11662_vm7, %v12861_v31, %v16664_v57  ;;  %v3096_v51 = vld [vmem:[#allocation2 + $0x14] sm:$0xf] }
 0x28c   : > { %3338 = vst [vmem:[#allocation3 + $0x14] sm:$0xf] %v3178_v58  ;;  %v2435_v35 = vsel %vm11662_vm7, %v2433_v26, %v16663_v50  ;;  %v13051_v58 = vpop.f32.mrf.mxu1  ;;  %v6371_v38 = vadd.f32 %v12350_v56, %v6258_v33  ;;  %v1405_v37 = vld [vmem:[#allocation2 + $0x90] sm:$0xf]  ;;  %v1406_v1 = vld [vmem:[#allocation2 + $0x94] sm:$0xf]  ;;  %v6483_v50 = vpop.f32.mrf.mxu2  ;;  %v2618_v62 = vor.u32 %v2617_v11, %v2614_v20  ;;  %v16669_v56 = vmov %v16664_v57 }
 0x28d   : > { %16662 = vst [vmem:[#allocation19_spill] sm:$0xff] %v13032_v23  ;;  %v16666_v26 = vmov 0  ;;  %v13062_v31 = vld [vmem:[#allocation2 + $0x7c] sm:$0xf]  ;;  %v1868_v34 = vsel %vm11605_vm2, %v1863_v53, %v1867_v46  ;;  %v2147_v33 = vrot.slane %v16669_v56, 4  ;;  %v3183_v57 = vrot.slane %v3096_v51, 6  ;;  %6321 = vmatmul.bf16.gmra.mxu0 %v9891_v40 }
 0x28e   : > { %2543 = vst [vmem:[#allocation3 + $0x3b4] sm:$0xf] %v2435_v35  ;;  %v16667_v26 = vsel %vm13058_vm14, 4294967295, %v16666_v26  ;;  %v1872_v35 = vor.u32 %v1871_v19, %v1867_v46  ;;  %v2148_v0 = vrot.slane %v13039_v44, 5  ;;  %v2619_v53 = vsel %vm13058_vm14, %v2610_v63, %v2618_v62  ;;  %v16673_v11 = vld [vmem:[#allocation24_spill] sm:$0xff] }
 0x28f   : > { %16665 = vst [vmem:[#allocation135_spill] sm:$0xff] %v13051_v58  ;;  %v2620_v20 = vrot.slane %v2618_v62, 4  ;;  %v2440_v19 = vrot.slane %v13062_v31, 5  ;;  %v3185_v46 = vrot.slane %v3183_v57, 4  ;;  %v16675_v31 = vshll.u32 %v16673_v11, 16  ;;  %v16677_v62 = vld [vmem:[#allocation27_spill] sm:$0xff] }
 0x290   : > { %2544 = vst [vmem:[#allocation3 + $0x3d8] sm:$0xf] %v2438_v14  ;;  %v13071_v14 = vadd.f32 %v6483_v50, %v6371_v38  ;;  %v1873_v55 = vrot.slane %v1872_v35, 4  ;;  %v16674_v38 = vshrl.u32 %v16673_v11, 16  ;;  %v1490_v50 = vld [vmem:[#allocation2 + $0x9c] sm:$0xf]  ;;  %v13091_v35 = vpop.f32.mrf.mxu0 }
 0x291   : > { %2256 = vst [vmem:[#allocation3 + $0x38c] sm:$0xf] %v2146_v21  ;;  %v3184_v21 = vsel %vm11674_vm8, %v16672_v43, %v3183_v57  ;;  %v2629_v63 = vsel %vm13058_vm14, %v2620_v20, %v2628_v10  ;;  %v2637_v40 = vrot.slane %v16675_v31, 6  ;;  %v16678_v56 = vrot.slane %v16677_v62, 6  ;;  %v9682_v20 = vld [vmem:[#allocation3 + $0x2d8] sm:$0xf] }
 0x292   : > { %16668 = vst [vmem:[#allocation136_spill] sm:$0xff] %v16667_v26  ;;  %v2634_v51 = vrot.slane %v16674_v38, 5  ;;  %v2630_v57 = vrot.slane %v2628_v10, 4  ;;  %v9756_v43 = vld [vmem:[#allocation3 + $0x38c] sm:$0xf0]  ;;  %v1889_v11 = vshrl.u32 %v1490_v50, 16 }
 0x293   : > { %1446 = vst [vmem:[#allocation3 + $0x510] sm:$0xf] %v1405_v37  ;;  %v1881_v37 = vrot.slane %v1879_v41, 4  ;;  %v3187_v12 = vsel %vm11674_vm8, %v3185_v46, %v16678_v56  ;;  %v2149_v41 = vsel %vm11662_vm7, %v2147_v33, %v2148_v0  ;;  %v10663_v10 = vld [vmem:[#allocation3 + $0x36c] sm:$0xf] }
 0x294   : > { %16670 = vst [vmem:[#allocation137_spill] sm:$0xff] %v13069_v24  ;;  %v9759_v31 = vor.u32 %v10663_v10, %v9756_v43  ;;  %v10707_v56 = vld [vmem:[#allocation3 + $0x4cc] sm:$0xf]  ;;  %v13130_v43 = vld [vmem:[#allocation2 + $0x74] sm:$0xf]  ;;  %v13134_v10 = vpop.f32.mrf.mxu2 }
 0x295   : > { %16671 = vst [vmem:[#allocation138_spill] sm:$0xff] %v13071_v14  ;;  %v1882_v33 = vor.u32 %v1881_v37, %v13027_v61  ;;  %v2442_v37 = vrot.slane %v2440_v19, 4  ;;  %v16408_v44 = vrot.slane %v13130_v43, 5  ;;  %v16720_v58 = vld [vmem:[#allocation33_spill] sm:$0xff]  ;;  %v13296_v16 = vld [vmem:[#allocation2 + $0x58] sm:$0xf] }
 0x296   : > { %1981 = vst [vmem:[#allocation3 + $0x514] sm:$0xf] %v1868_v34  ;;  %v10649_v34 = vld [vmem:[#allocation3 + $0x2f8] sm:$0xf0] }
 0x297   : > { %1447 = vst [vmem:[#allocation3 + $0x534] sm:$0xf] %v1406_v1  ;;  %v1878_v1 = vsel %vm11605_vm2, %v1873_v55, %v13027_v61  ;;  %v2638_v55 = vor.u32 %v2637_v40, %v2634_v51  ;;  %v9683_v38 = vor.u32 %v10649_v34, %v9682_v20  ;;  %v9928_v51 = vld [vmem:[#allocation3 + $0x4ec] sm:$0xf0]  ;;  %v13116_v40 = vld [vmem:[#allocation2 + $0x80] sm:$0xf] }
 0x298   : > { %3052 = vst [vmem:[#allocation3 + $0x10] sm:$0xf] %v2619_v53  ;;  %v13103_v53 = vor.u32 %v12097_v39, %v12092_v5  ;;  %v16679_v5 = vrot.slane %v12800_v54, 6  ;;  %v2439_v34 = vrot.slane %v2437_v15, 4  ;;  %6640 = vmatmul.bf16.gmra.mxu3 %v9759_v31  ;;  %v9931_v36 = vor.u32 %v10707_v56, %v9928_v51  ;;  %v10711_v15 = vld [vmem:[#allocation3 + $0x4e8] sm:$0xf0] }
 0x299   : > { %3340 = vst [vmem:[#allocation3 + $0x5c] sm:$0xf] %v3184_v21  ;;  %v13105_v21 = vpop.f32.mrf.mxu1  ;;  %v2639_v46 = vsel %vm13058_vm14, %v2630_v57, %v2638_v55  ;;  %6517 = vmatmul.bf16.gmra.mxu2 %v9683_v38  ;;  %v16407_v57 = vrot.slane %v13116_v40, 5  ;;  %v1408_v56 = vld [vmem:[#allocation2 + $0x9c] sm:$0xf] }
 0x29a   : > { %16676 = vst [vmem:[#allocation25_spill] sm:$0xff] %v13091_v35  ;;  %v13112_v39 = vrot.slane %v16679_v5, 4  ;;  %v2441_v38 = vsel %vm11662_vm7, %v2439_v34, %v2440_v19  ;;  %6439 = vmatmul.bf16.gmra.mxu1 %v9931_v36  ;;  %v10766_v19 = vld [vmem:[%s16321_s2 + $0x100] sm:$0xff]  ;;  %v2658_v34 = vor.u32 %v12154_v9, %v12152_v52  ;;  %v16683_v36 = vrot.slane %v16677_v62, 6 }
 0x29b   : > { %1982 = vst [vmem:[#allocation3 + $0x538] sm:$0xf] %v1878_v1  ;;  %v2640_v1 = vrot.slane %v2638_v55, 4  ;;  %v16681_v55 = vrot.slane %v12802_v3, 6  ;;  %v2444_v5 = vsel %vm11662_vm7, %v2442_v37, %v16407_v57  ;;  %v1407_v37 = vld [vmem:[#allocation2 + $0x98] sm:$0xf]  ;;  %6692 = vmatpush.bf16.msra.mxu0 %v10766_v19 }
 0x29c   : > { %3053 = vst [vmem:[#allocation3 + $0x34] sm:$0xf] %v2629_v63  ;;  %v13114_v63 = vld [vmem:[#allocation2 + $0xa0] sm:$0x7]  ;;  %v16684_v52 = vshrl.u32 %v12821_v27, 16 }
 0x29d   : > { %2257 = vst [vmem:[#allocation3 + $0x3b0] sm:$0xf] %v2149_v41  ;;  %v2649_v61 = vsel %vm13058_vm14, %v2640_v1, %v13103_v53  ;;  %v13123_v41 = vpop.f32.mrf.mxu3  ;;  %v13128_v20 = vrot.slane %v16681_v55, 4  ;;  %v2014_v1 = vld [vmem:[#allocation2 + $0x70] sm:$0xf]  ;;  %v1891_v55 = vrot.slane %v1889_v11, 4 }
 0x29e   : > { %3341 = vst [vmem:[#allocation3 + $0x80] sm:$0xf] %v3187_v12  ;;  %v9926_v12 = vld [vmem:[#allocation3 + $0x4c8] sm:$0xf]  ;;  %v1895_v29 = vshll.u32 %v13114_v63, 16  ;;  %v2151_v31 = vrot.slane %v2014_v1, 5 }
 0x29f   : > { %3054 = vst [vmem:[#allocation3 + $0x58] sm:$0xf] %v2639_v46  ;;  %v1885_v46 = vshll.u32 %v1490_v50, 16  ;;  %v10779_v50 = vld [vmem:[%s16321_s2 + $0x168] sm:$0xff]  ;;  %v2150_v11 = vrot.slane %v2148_v0, 4  ;;  %v13159_v9 = vrot.slane %v16684_v52, 6 }
 0x2a0   : > { %16680 = vst [vmem:[#allocation24_spill] sm:$0xff] %v13123_v41  ;;  %6800 = vmatpush.bf16.msra.mxu1 %v10779_v50  ;;  %v13174_v19 = vrot.slane %v1895_v29, 5  ;;  %v16688_v50 = vld [vmem:[#allocation46_spill] sm:$0xff]  ;;  %v2303_v52 = vld [vmem:[#allocation2 + $0x84] sm:$0xf] }
 0x2a1   : > { %3055 = vst [vmem:[#allocation3 + $0x7c] sm:$0xf] %v2649_v61  ;;  %v1883_v61 = vrot.slane %v1882_v33, 4  ;;  %v1887_v51 = vrot.slane %v1885_v46, 5  ;;  %v13151_v33 = vpop.f32.mrf.mxu0  ;;  %v9927_v46 = vor.u32 %v10711_v15, %v9926_v12  ;;  %v13162_v0 = vpop.f32.mrf.mxu1  ;;  %v2152_v62 = vsel %vm11662_vm7, %v2150_v11, %v2151_v31  ;;  %v16686_v12 = vld [vmem:[#allocation35_spill] sm:$0xff] }
 0x2a2   : > { %16682 = vst [vmem:[#allocation27_spill] sm:$0xff] %v13134_v10  ;;  %v16687_v15 = vrot.slane %v16686_v12, 6  ;;  %v16690_v11 = vshll.u32 %v12821_v27, 16  ;;  %v16692_v12 = vld [vmem:[#allocation39_spill] sm:$0xff]  ;;  %v2153_v27 = vrot.slane %v2151_v31, 4 }
 0x2a3   : > { %2545 = vst [vmem:[#allocation3 + $0x3fc] sm:$0xf] %v2441_v38  ;;  %v3188_v38 = vrot.slane %v16683_v36, 4  ;;  %v1892_v57 = vor.u32 %v1891_v55, %v1887_v51  ;;  %v6263_v55 = vadd.f32 %v12735_v25, %v12523_v45  ;;  %6326 = vmatmul.bf16.gmra.mxu0 %v9927_v46  ;;  %v2650_v25 = vrot.slane %v13103_v53, 4  ;;  %v13190_v29 = vld [vmem:[#allocation2 + $0x54] sm:$0xf] }
 0x2a4   : > { %2546 = vst [vmem:[#allocation3 + $0x420] sm:$0xf] %v2444_v5  ;;  %v1888_v5 = vsel %vm11605_vm2, %v1883_v61, %v1887_v51  ;;  %v13170_v61 = vld [vmem:[#allocation2 + $0x54] sm:$0xf]  ;;  %v2660_v46 = vrot.slane %v2658_v34, 4  ;;  %v2155_v31 = vsel %vm11662_vm7, %v2153_v27, %v16408_v44 }
 0x2a5   : > { %1448 = vst [vmem:[#allocation3 + $0x558] sm:$0xf] %v1407_v37  ;;  %v3190_v1 = vsel %vm11674_vm8, %v3188_v38, %v16687_v15  ;;  %v1893_v51 = vrot.slane %v1892_v57, 4  ;;  %v16689_v37 = vld [vmem:[#allocation47_spill] sm:$0xff]  ;;  %v16691_v38 = vrot.slane %v12186_v60, 6  ;;  %v2659_v53 = vsel %vm13058_vm14, %v2650_v25, %v2658_v34  ;;  %v6488_v25 = vpop.f32.mrf.mxu2  ;;  %v16697_v60 = vld [vmem:[#allocation17_spill] sm:$0xff] }
 0x2a6   : > { %16685 = vst [vmem:[#allocation139_spill] sm:$0xff] %v13162_v0  ;;  %v13178_v36 = vor.u32 %v16689_v37, %v16688_v50  ;;  %v10658_v57 = vld [vmem:[#allocation3 + $0x340] sm:$0xf0]  ;;  %v13200_v50 = vld [vmem:[#allocation2 + $0x58] sm:$0xf]  ;;  %v13202_v37 = vpop.f32.mrf.mxu3  ;;  %v16698_v27 = vrot.slane %v16697_v60, 6 }
 0x2a7   : > { %1983 = vst [vmem:[#allocation3 + $0x55c] sm:$0xf] %v1888_v5  ;;  %v13182_v5 = vrot.slane %v16690_v11, 7  ;;  %v3193_v45 = vsel %vm11674_vm8, %v16692_v12, %v16691_v38  ;;  %v9718_v11 = vld [vmem:[#allocation3 + $0x320] sm:$0xf]  ;;  %v16705_v60 = vld [vmem:[#allocation58_spill] sm:$0xff] }
 0x2a8   : > { %1449 = vst [vmem:[#allocation3 + $0x57c] sm:$0xf] %v1408_v56  ;;  %v1898_v56 = vsel %vm11605_vm2, %v1893_v51, %v13174_v19  ;;  %v6376_v51 = vadd.f32 %v12459_v8, %v6263_v55  ;;  %v13214_v38 = vld [vmem:[#allocation2 + $0x28] sm:$0xf]  ;;  %v9792_v34 = vld [vmem:[#allocation3 + $0x3d4] sm:$0xf0] }
 0x2a9   : > { %2258 = vst [vmem:[#allocation3 + $0x3d4] sm:$0xf] %v2152_v62  ;;  %v16693_v62 = vrot.slane %v13032_v23, 7  ;;  %v10672_v8 = vld [vmem:[#allocation3 + $0x3b4] sm:$0xf]  ;;  %v13240_v22 = vpop.f32.mrf.mxu1  ;;  %v16709_v10 = vld [vmem:[#allocation71_spill] sm:$0xff] }
 0x2aa   : > { %3342 = vst [vmem:[#allocation3 + $0xa4] sm:$0xf] %v3190_v1  ;;  %v2669_v1 = vsel %vm13058_vm14, %v2660_v46, %v13178_v36  ;;  %v13217_v55 = vadd.f32 %v6488_v25, %v6376_v51  ;;  %v16700_v46 = vld [vmem:[#allocation63_spill] sm:$0xff]  ;;  %v16704_v51 = vld [vmem:[#allocation57_spill] sm:$0xff] }
 0x2ab   : > { %v13197_v15 = vrot.slane %v16693_v62, 4  ;;  %16695 = vst [vmem:[#allocation46_spill] sm:$0xff] %v13202_v37  ;;  %v9719_v62 = vor.u32 %v10658_v57, %v9718_v11  ;;  %v16701_v2 = vshrl.u32 %v16700_v46, 16  ;;  %v16702_v12 = vshll.u32 %v16700_v46, 16  ;;  %v9964_v11 = vld [vmem:[#allocation3 + $0x534] sm:$0xf0] }
 0x2ac   : > { %1984 = vst [vmem:[#allocation3 + $0x580] sm:$0xf] %v1898_v56  ;;  %v2446_v56 = vrot.slane %v2303_v52, 5  ;;  %v2678_v25 = vor.u32 %v16705_v60, %v16704_v51  ;;  %v2805_v57 = vshll.u32 %v13200_v50, 16  ;;  %v2670_v51 = vrot.slane %v13178_v36, 4 }
 0x2ad   : > { %16694 = vst [vmem:[#allocation35_spill] sm:$0xff] %v13197_v15  ;;  %v2684_v24 = vrot.slane %v16701_v2, 5  ;;  %v2687_v52 = vrot.slane %v16702_v12, 6  ;;  %6522 = vmatmul.bf16.gmra.mxu2 %v9719_v62  ;;  %v13235_v2 = vld [vmem:[#allocation2 + $0x88] sm:$0xf]  ;;  %v16706_v12 = vrot.slane %v13116_v40, 5  ;;  %v13345_v32 = vpop.f32.mrf.mxu2 }
 0x2ae   : > { %3343 = vst [vmem:[#allocation3 + $0xc8] sm:$0xf] %v3193_v45  ;;  %v16699_v45 = vld [vmem:[#allocation49_spill] sm:$0xff]  ;;  %v10720_v62 = vld [vmem:[#allocation3 + $0x530] sm:$0xf0]  ;;  %v16710_v36 = vrot.slane %v13235_v2, 5 }
 0x2af   : > { %2259 = vst [vmem:[#allocation3 + $0x3f8] sm:$0xf] %v2155_v31  ;;  %v3196_v44 = vsel %vm11674_vm8, %v16699_v45, %v16698_v27  ;;  %v13229_v31 = vpop.f32.mrf.mxu0  ;;  %v9795_v27 = vor.u32 %v10672_v8, %v9792_v34  ;;  %v10716_v45 = vld [vmem:[#allocation3 + $0x514] sm:$0xf]  ;;  %v2445_v46 = vrot.slane %v16706_v12, 4  ;;  %v10778_v40 = vld [vmem:[%s16321_s2 + $0x160] sm:$0xff]  ;;  %v2688_v0 = vor.u32 %v2687_v52, %v2684_v24 }
 0x2b0   : > { %16696 = vst [vmem:[#allocation47_spill] sm:$0xff] %v13217_v55  ;;  %v9967_v60 = vor.u32 %v10716_v45, %v9964_v11  ;;  %v1409_v8 = vld [vmem:[#allocation2 + $0xa0] sm:$0x3]  ;;  %v1899_v12 = vshrl.u32 %v13114_v63, 16  ;;  %v2679_v24 = vsel %vm13058_vm14, %v2670_v51, %v2678_v25  ;;  %v16712_v52 = vrot.slane %v13130_v43, 5  ;;  %6801 = vmatpush.bf16.msra.mxu1 %v10778_v40 }
 0x2b1   : > { %3056 = vst [vmem:[#allocation3 + $0xa0] sm:$0xf] %v2659_v53  ;;  %v3198_v53 = vrot.slane %v13214_v38, 6  ;;  %6645 = vmatmul.bf16.gmra.mxu3 %v9795_v27  ;;  %v2447_v34 = vsel %vm11662_vm7, %v2445_v46, %v2446_v56  ;;  %v13256_v27 = vld [vmem:[#allocation2 + $0x78] sm:$0xf] }
 0x2b2   : > { %16703 = vst [vmem:[#allocation39_spill] sm:$0xff] %v13229_v31  ;;  %v16708_v31 = vld [vmem:[#allocation70_spill] sm:$0xff]  ;;  %6444 = vmatmul.bf16.gmra.mxu1 %v9967_v60  ;;  %v1901_v63 = vrot.slane %v1899_v12, 4  ;;  %v16411_v60 = vrot.slane %v13256_v27, 5  ;;  %v16714_v12 = vld [vmem:[#allocation75_spill] sm:$0xff] }
 0x2b3   : > { %3057 = vst [vmem:[#allocation3 + $0xc4] sm:$0xf] %v2669_v1  ;;  %v2448_v1 = vrot.slane %v2446_v56, 4  ;;  %v2698_v38 = vor.u32 %v16709_v10, %v16708_v31  ;;  %v16711_v56 = vld [vmem:[#allocation59_spill] sm:$0xff]  ;;  %v2680_v10 = vrot.slane %v2678_v25, 4  ;;  %v2156_v31 = vrot.slane %v16712_v52, 4 }
 0x2b4   : > { %16707 = vst [vmem:[#allocation17_spill] sm:$0xff] %v13240_v22  ;;  %v3199_v45 = vsel %vm11674_vm8, %v16711_v56, %v3198_v53  ;;  %v1902_v25 = vor.u32 %v1901_v63, %v13174_v19  ;;  %v3200_v51 = vrot.slane %v3198_v53, 4  ;;  %v13277_v40 = vld [vmem:[#allocation2 + $0x58] sm:$0xf]  ;;  %v16716_v19 = vshll.u32 %v16714_v12, 16  ;;  %v16717_v53 = vld [vmem:[#allocation66_spill] sm:$0xff] }
 0x2b5   : > { %3344 = vst [vmem:[#allocation3 + $0xec] sm:$0xf] %v3196_v44  ;;  %v9962_v44 = vld [vmem:[#allocation3 + $0x510] sm:$0xf]  ;;  %v2450_v11 = vsel %vm11662_vm7, %v2448_v1, %v16710_v36  ;;  %v13265_v1 = vpop.f32.mrf.mxu3  ;;  %v16715_v36 = vshrl.u32 %v16714_v12, 16  ;;  %v2689_v43 = vsel %vm13058_vm14, %v2680_v10, %v2688_v0  ;;  %v16718_v63 = vrot.slane %v16717_v53, 6 }
 0x2b6   : > { %2547 = vst [vmem:[#allocation3 + $0x444] sm:$0xf] %v2447_v34  ;;  %v9963_v46 = vor.u32 %v10720_v62, %v9962_v44  ;;  %v10777_v34 = vld [vmem:[%s16321_s2 + $0x158] sm:$0xff]  ;;  %v13283_v44 = vld [vmem:[#allocation2 + $0x30] sm:$0xf]  ;;  %v2707_v56 = vrot.slane %v16716_v19, 6 }
 0x2b7   : > { %2548 = vst [vmem:[#allocation3 + $0x468] sm:$0xf] %v2450_v11  ;;  %v2704_v11 = vrot.slane %v16715_v36, 5  ;;  %v3202_v10 = vsel %vm11674_vm8, %v3200_v51, %v16718_v63  ;;  %v16412_v52 = vrot.slane %v13283_v44, 6  ;;  %v2690_v36 = vrot.slane %v2688_v0, 4  ;;  %v16719_v62 = vld [vmem:[#allocation32_spill] sm:$0xff]  ;;  %v13298_v12 = vpop.f32.mrf.mxu0  ;;  %6802 = vmatpush.bf16.msra.mxu1 %v10777_v34 }
 0x2b8   : > { %16713 = vst [vmem:[#allocation49_spill] sm:$0xff] %v13265_v1  ;;  %6331 = vmatmul.bf16.gmra.mxu0 %v9963_v46  ;;  %v10776_v46 = vld [vmem:[%s16321_s2 + $0x150] sm:$0xff]  ;;  %v16727_v0 = vshrl.u32 %v13200_v50, 16  ;;  %v16728_v34 = vld [vmem:[#allocation72_spill] sm:$0xff]  ;;  %v13328_v50 = vpop.f32.mrf.mxu1  ;;  %v9754_v63 = vld [vmem:[#allocation3 + $0x368] sm:$0xf] }
 0x2b9   : > { %1450 = vst [vmem:[#allocation3 + $0x5a0] sm:$0x3] %v1409_v8  ;;  %v2158_v8 = vsel %vm11662_vm7, %v2156_v31, %v16411_v60  ;;  %v3736_v31 = vor.u32 %v16720_v58, %v16719_v62  ;;  %v16722_v60 = vld [vmem:[#allocation44_spill] sm:$0xff]  ;;  %v13303_v51 = vor.u32 %v2707_v56, %v2704_v11  ;;  %v16724_v58 = vmov 0  ;;  %v10667_v56 = vld [vmem:[#allocation3 + $0x388] sm:$0xf0] }
 0x2ba   : > { %3345 = vst [vmem:[#allocation3 + $0x110] sm:$0xf] %v3199_v45  ;;  %v1903_v45 = vrot.slane %v1902_v25, 4  ;;  %v2700_v25 = vrot.slane %v2698_v38, 4  ;;  %v16725_v58 = vsel %vm13307_vm1, 4294967295, %v16724_v58  ;;  %v13315_v62 = vrot.slane %v2805_v57, 6 }
 0x2bb   : > { %3058 = vst [vmem:[#allocation3 + $0xe8] sm:$0xf] %v2679_v24  ;;  %v16721_v24 = vld [vmem:[#allocation43_spill] sm:$0xff]  ;;  %v3205_v11 = vsel %vm11674_vm8, %v16728_v34, %v16412_v52  ;;  %v13326_v19 = vld [vmem:[#allocation2 + $0x7c] sm:$0xf]  ;;  %v16733_v34 = vld [vmem:[#allocation53_spill] sm:$0xff]  ;;  %6803 = vmatpush.bf16.msra.mxu1 %v10776_v46 }
 0x2bc   : > { %2260 = vst [vmem:[#allocation3 + $0x41c] sm:$0xf] %v2158_v8  ;;  %v3746_v35 = vor.u32 %v16722_v60, %v16721_v24  ;;  %v13313_v60 = vrot.slane %v16727_v0, 5  ;;  %v13324_v8 = vld [vmem:[#allocation2 + $0x58] sm:$0xf]  ;;  %v2709_v57 = vsel %vm13058_vm14, %v2700_v25, %v13303_v51  ;;  %v16732_v0 = vld [vmem:[#allocation51_spill] sm:$0xff] }
 0x2bd   : > { %16723 = vst [vmem:[#allocation63_spill] sm:$0xff] %v13298_v12  ;;  %v16730_v24 = vld [vmem:[#allocation36_spill] sm:$0xff]  ;;  %v13341_v52 = vor.u32 %v16733_v34, %v16732_v0  ;;  %v10775_v25 = vld [vmem:[%s16321_s2 + $0x148] sm:$0xff]  ;;  %v2160_v53 = vrot.slane %v13326_v19, 5  ;;  %v13357_v1 = vpop.f32.mrf.mxu3  ;;  %v16741_v19 = vld [vmem:[#allocation65_spill] sm:$0xff] }
 0x2be   : > { %3059 = vst [vmem:[#allocation3 + $0x10c] sm:$0xf] %v2689_v43  ;;  %v2699_v43 = vsel %vm13058_vm14, %v2690_v36, %v2698_v38  ;;  %v16731_v38 = vld [vmem:[#allocation26_spill] sm:$0xff]  ;;  %v16736_v0 = vrot.slane %v16730_v24, 4  ;;  %v3748_v47 = vrot.slane %v3746_v35, 4  ;;  %v16838_v12 = vld [vmem:[#allocation45_spill] sm:$0xff] }
 0x2bf   : > { %16726 = vst [vmem:[#allocation57_spill] sm:$0xff] %v16725_v58  ;;  %v3727_v36 = vsel %vm13307_vm1, %v16731_v38, %v16730_v24  ;;  %v9755_v38 = vor.u32 %v10667_v56, %v9754_v63  ;;  %v10000_v46 = vld [vmem:[#allocation3 + $0x57c] sm:$0xf0]  ;;  %v2305_v56 = vld [vmem:[#allocation2 + $0x8c] sm:$0xf]  ;;  %6804 = vmatpush.bf16.msra.mxu1 %v10775_v25  ;;  %v2162_v25 = vrot.slane %v2160_v53, 4 }
 0x2c0   : > { %1985 = vst [vmem:[#allocation3 + $0x5a4] sm:$0x3] %v1903_v45  ;;  %v13351_v45 = vld [vmem:[#allocation2 + $0x90] sm:$0xf]  ;;  %v3737_v34 = vsel %vm13307_vm1, %v16736_v0, %v3736_v31  ;;  %v10725_v0 = vld [vmem:[#allocation3 + $0x55c] sm:$0xf] }
 0x2c1   : > { %16729 = vst [vmem:[#allocation58_spill] sm:$0xff] %v13328_v50  ;;  %v9828_v50 = vld [vmem:[#allocation3 + $0x41c] sm:$0xf0]  ;;  %6527 = vmatmul.bf16.gmra.mxu2 %v9755_v38  ;;  %v10729_v38 = vld [vmem:[#allocation3 + $0x578] sm:$0xf0] }
 0x2c2   : > { %3346 = vst [vmem:[#allocation3 + $0x134] sm:$0xf] %v3202_v10  ;;  %v13343_v10 = vld [vmem:[#allocation2 + $0x58] sm:$0xf]  ;;  %v13507_v15 = vld [vmem:[#allocation2 + $0x60] sm:$0xf] }
 0x2c3   : > { %3347 = vst [vmem:[#allocation3 + $0x158] sm:$0xf] %v3205_v11  ;;  %v3738_v11 = vrot.slane %v3736_v31, 4  ;;  %v3757_v31 = vsel %vm13307_vm1, %v3748_v47, %v13341_v52  ;;  %v10003_v47 = vor.u32 %v10725_v0, %v10000_v46  ;;  %v13392_v46 = vld [vmem:[#allocation2 + $0x80] sm:$0xf] }
 0x2c4   : > { %16734 = vst [vmem:[#allocation70_spill] sm:$0xff] %v13343_v10  ;;  %v16413_v41 = vrot.slane %v13392_v46, 5 }
 0x2c5   : > { %16735 = vst [vmem:[#allocation71_spill] sm:$0xff] %v13345_v32  ;;  %v10681_v32 = vld [vmem:[#allocation3 + $0x3fc] sm:$0xf]  ;;  %6449 = vmatmul.bf16.gmra.mxu1 %v10003_v47  ;;  %v16747_v47 = vrot.slane %v13351_v45, 5 }
 0x2c6   : > { %3060 = vst [vmem:[#allocation3 + $0x130] sm:$0xf] %v2699_v43  ;;  %v3747_v43 = vsel %vm13307_vm1, %v3738_v11, %v3746_v35  ;;  %v9831_v37 = vor.u32 %v10681_v32, %v9828_v50  ;;  %v3893_v35 = vshll.u32 %v13324_v8, 16  ;;  %v13373_v32 = vld [vmem:[%s16324_s5] ss:$0 sm:$0xff] }
 0x2c7   : > { %3061 = vst [vmem:[#allocation3 + $0x154] sm:$0xf] %v2709_v57  ;;  %v16738_v57 = vrot.slane %v13235_v2, 5  ;;  %v6268_v2 = vadd.f32 %v13373_v32, %v12635_v7  ;;  %v10774_v50 = vld [vmem:[%s16321_s2 + $0x140] sm:$0xff]  ;;  %v10789_v7 = vld [vmem:[%s16321_s2 + $0x1b8] sm:$0xff] }
 0x2c8   : > { %16737 = vst [vmem:[#allocation59_spill] sm:$0xff] %v13357_v1  ;;  %6650 = vmatmul.bf16.gmra.mxu3 %v9831_v37  ;;  %v16740_v11 = vld [vmem:[#allocation61_spill] sm:$0xff]  ;;  %v10797_v37 = vld [vmem:[%s16321_s2 + $0x1f8] sm:$0xff]  ;;  %6805 = vmatpush.bf16.msra.mxu1 %v10774_v50  ;;  %v3385_v50 = vld [vmem:[#allocation2 + $0x28] sm:$0xf] }
 0x2c9   : > { %4165 = vst [vmem:[#allocation3 + $0x1c] sm:$0xf] %v3727_v36  ;;  %v2451_v63 = vrot.slane %v16738_v57, 4  ;;  %v2452_v36 = vrot.slane %v2305_v56, 5  ;;  %v3766_v24 = vor.u32 %v16741_v19, %v16740_v11  ;;  %v9998_v19 = vld [vmem:[#allocation3 + $0x558] sm:$0xf]  ;;  %v13400_v11 = vpop.f32.mrf.mxu1  ;;  %v6381_v18 = vadd.f32 %v12581_v17, %v6268_v2  ;;  %6911 = vmatpush.bf16.msrb.mxu2 %v10789_v7  ;;  %7024 = vmatpush.bf16.msrb.mxu3 %v10797_v37 }
 0x2ca   : > { %4166 = vst [vmem:[#allocation3 + $0x40] sm:$0xf] %v3737_v34  ;;  %v13380_v34 = vpop.f32.mrf.mxu0  ;;  %v9999_v14 = vor.u32 %v10729_v38, %v9998_v19  ;;  %v3478_v37 = vrot.slane %v3385_v50, 6 }
 0x2cb   : > { %4167 = vst [vmem:[#allocation3 + $0x64] sm:$0xf] %v3747_v43  ;;  %v2453_v56 = vsel %vm11662_vm7, %v2451_v63, %v2452_v36  ;;  %v2454_v57 = vrot.slane %v2452_v36, 4  ;;  %v16742_v43 = vld [vmem:[#allocation23_spill] sm:$0xff]  ;;  %v16744_v63 = vld [vmem:[#allocation21_spill] sm:$0xff] }
 0x2cc   : > { %16739 = vst [vmem:[#allocation75_spill] sm:$0xff] %v13380_v34  ;;  %v16743_v0 = vrot.slane %v16742_v43, 6  ;;  %v16745_v36 = vrot.slane %v16744_v63, 10  ;;  %v16748_v34 = vrot.slane %v13256_v27, 5  ;;  %v16749_v43 = vld [vmem:[#allocation30_spill] sm:$0xff]  ;;  %v16751_v63 = vld [vmem:[#allocation28_spill] sm:$0xff]  ;;  %6336 = vmatmul.bf16.gmra.mxu0 %v9999_v14 }
 0x2cd   : > { %4168 = vst [vmem:[#allocation3 + $0x88] sm:$0xf] %v3757_v31  ;;  %v16750_v48 = vrot.slane %v16749_v43, 6  ;;  %v3758_v27 = vrot.slane %v13341_v52, 4  ;;  %v3768_v14 = vrot.slane %v3766_v24, 4 }
 0x2ce   : > { %2549 = vst [vmem:[#allocation3 + $0x48c] sm:$0xf] %v2453_v56  ;;  %v3464_v31 = vsel %vm11674_vm8, %v16745_v36, %v16743_v0  ;;  %v2456_v56 = vsel %vm11662_vm7, %v2454_v57, %v16747_v47  ;;  %v2159_v1 = vrot.slane %v16748_v34, 4  ;;  %v16752_v36 = vrot.slane %v13277_v40, 6  ;;  %v6493_v34 = vpop.f32.mrf.mxu2  ;;  %v16753_v47 = vld [vmem:[#allocation64_spill] sm:$0xff] }
 0x2cf   : > { %16746 = vst [vmem:[#allocation66_spill] sm:$0xff] %v13400_v11  ;;  %v3467_v0 = vsel %vm11674_vm8, %v16751_v63, %v16750_v48  ;;  %v2164_v48 = vsel %vm11662_vm7, %v2162_v25, %v16413_v41  ;;  %v16754_v38 = vshrl.u32 %v16753_v47, 16  ;;  %v16755_v17 = vshll.u32 %v16753_v47, 16  ;;  %v13442_v63 = vpop.f32.mrf.mxu3  ;;  %v9864_v41 = vld [vmem:[#allocation3 + $0x464] sm:$0xf0] }
 0x2d0   : > { %v13416_v55 = vrot.slane %v16752_v36, 4  ;;  %2550 = vst [vmem:[#allocation3 + $0x4b0] sm:$0xf] %v2456_v56  ;;  %v2161_v57 = vsel %vm11662_vm7, %v2159_v1, %v2160_v53  ;;  %v13430_v7 = vadd.f32 %v6493_v34, %v6381_v18  ;;  %v3767_v52 = vsel %vm13307_vm1, %v3758_v27, %v3766_v24  ;;  %v13440_v56 = vld [vmem:[#allocation2 + $0x60] sm:$0xf]  ;;  %v16766_v24 = vld [vmem:[#allocation42_spill] sm:$0xff] }
 0x2d1   : > { %3624 = vst [vmem:[#allocation3 + $0x18] sm:$0xf] %v3464_v31  ;;  %v3772_v19 = vrot.slane %v16754_v38, 6  ;;  %v3775_v2 = vrot.slane %v16755_v17, 7  ;;  %v16757_v1 = vrot.slane %v16749_v43, 6  ;;  %v16758_v25 = vrot.slane %v13296_v16, 6 }
 0x2d2   : > { %16756 = vst [vmem:[#allocation32_spill] sm:$0xff] %v13430_v7  ;;  %v16761_v36 = vshrl.u32 %v13324_v8, 16  ;;  %v13448_v27 = vrot.slane %v3893_v35, 7  ;;  %v16762_v43 = vrot.slane %v13343_v10, 7  ;;  %v10676_v17 = vld [vmem:[#allocation3 + $0x3d0] sm:$0xf0]  ;;  %v13495_v10 = vpop.f32.mrf.mxu1 }
 0x2d3   : > { %2261 = vst [vmem:[#allocation3 + $0x440] sm:$0xf] %v2161_v57  ;;  %v3468_v53 = vrot.slane %v16757_v1, 4  ;;  %v13438_v31 = vrot.slane %v16758_v25, 4  ;;  %v3776_v18 = vor.u32 %v3775_v2, %v3772_v19  ;;  %v16764_v57 = vld [vmem:[#allocation37_spill] sm:$0xff]  ;;  %v16767_v35 = vrot.slane %v16766_v24, 6 }
 0x2d4   : > { %16760 = vst [vmem:[#allocation43_spill] sm:$0xff] %v13442_v63  ;;  %v13446_v34 = vrot.slane %v16761_v36, 6  ;;  %v13452_v50 = vrot.slane %v16762_v43, 4  ;;  %v16765_v47 = vrot.slane %v16764_v57, 6  ;;  %v16768_v19 = vld [vmem:[#allocation40_spill] sm:$0xff]  ;;  %v16769_v25 = vld [vmem:[#allocation54_spill] sm:$0xff]  ;;  %v13479_v63 = vpop.f32.mrf.mxu0 }
 0x2d5   : > { %16759 = vst [vmem:[#allocation33_spill] sm:$0xff] %v13438_v31  ;;  %v3777_v8 = vsel %vm13307_vm1, %v3768_v14, %v3776_v18  ;;  %v3473_v2 = vsel %vm11674_vm8, %v16768_v19, %v16767_v35  ;;  %v13468_v1 = vld [vmem:[#allocation2 + $0x84] sm:$0xf]  ;;  %v16771_v36 = vld [vmem:[#allocation50_spill] sm:$0xff]  ;;  %v3480_v57 = vrot.slane %v3478_v37, 4  ;;  %v16775_v35 = vld [vmem:[#allocation60_spill] sm:$0xff] }
 0x2d6   : > { %2262 = vst [vmem:[#allocation3 + $0x464] sm:$0xf] %v2164_v48  ;;  %v3470_v38 = vsel %vm11674_vm8, %v3468_v53, %v16765_v47  ;;  %v13458_v48 = vld [vmem:[#allocation3 + $0x5a0] sm:$0x33]  ;;  %v16770_v53 = vrot.slane %v16769_v25, 6  ;;  %v16772_v14 = vld [vmem:[#allocation74_spill] sm:$0xff] }
 0x2d7   : > { %16763 = vst [vmem:[#allocation44_spill] sm:$0xff] %v13452_v50  ;;  %v9790_v24 = vld [vmem:[#allocation3 + $0x3b0] sm:$0xf]  ;;  %v13484_v19 = vld [vmem:[#allocation2 + $0x5c] sm:$0xf]  ;;  %v2825_v25 = vshll.u32 %v13440_v56, 16 }
 0x2d8   : > { %3625 = vst [vmem:[#allocation3 + $0x3c] sm:$0xf] %v3467_v0  ;;  %v2822_v0 = vshrl.u32 %v13440_v56, 16  ;;  %v3476_v43 = vsel %vm11674_vm8, %v16771_v36, %v16770_v53  ;;  %v13487_v7 = vld [vmem:[#allocation2 + $0x98] sm:$0xf]  ;;  %v9791_v53 = vor.u32 %v10676_v17, %v9790_v24  ;;  %v5415_v36 = vunpack.c.h.b16 %v13458_v48  ;;  %v16781_v17 = vld [vmem:[#allocation81_spill] sm:$0xff] }
 0x2d9   : > { %4169 = vst [vmem:[#allocation3 + $0xac] sm:$0xf] %v3767_v52  ;;  %v16773_v52 = vld [vmem:[#allocation78_spill] sm:$0xff]  ;;  %v10690_v11 = vld [vmem:[#allocation3 + $0x444] sm:$0xf]  ;;  %v16780_v56 = vrot.slane %v13283_v44, 6  ;;  %v6273_v44 = vadd.f32 %v13373_v32, %v12727_v13 }
 0x2da   : > { %4170 = vst [vmem:[#allocation3 + $0xd0] sm:$0xf] %v3777_v8  ;;  %v13477_v47 = vor.u32 %v16773_v52, %v16772_v14  ;;  %v3479_v8 = vsel %vm11674_vm8, %v16775_v35, %v3478_v37  ;;  %v16776_v14 = vld [vmem:[#allocation67_spill] sm:$0xff]  ;;  %v13497_v37 = vpop.f32.mrf.mxu2  ;;  %6532 = vmatmul.bf16.gmra.mxu2 %v9791_v53  ;;  %v10699_v23 = vld [vmem:[#allocation3 + $0x48c] sm:$0xf] }
 0x2db   : > { %16774 = vst [vmem:[#allocation72_spill] sm:$0xff] %v13479_v63  ;;  %v16777_v52 = vrot.slane %v16776_v14, 6  ;;  %v3206_v35 = vrot.slane %v16780_v56, 4  ;;  %v16782_v24 = vld [vmem:[#allocation11_spill] sm:$0xff]  ;;  %v16784_v56 = vrot.slane %v12465_v6, 6  ;;  %v16787_v6 = vld [vmem:[#allocation22_spill] sm:$0xff] }
 0x2dc   : > { %3626 = vst [vmem:[#allocation3 + $0x60] sm:$0xf] %v3470_v38  ;;  %v2166_v38 = vrot.slane %v13468_v1, 5  ;;  %v13503_v63 = vor.u32 %v16782_v24, %v16781_v17  ;;  %v3778_v1 = vrot.slane %v3776_v18, 4  ;;  %v16785_v18 = vld [vmem:[#allocation29_spill] sm:$0xff]  ;;  %v16788_v53 = vrot.slane %v16787_v6, 11 }
 0x2dd   : > { %3627 = vst [vmem:[#allocation3 + $0x84] sm:$0xf] %v3473_v2  ;;  %v3482_v50 = vsel %vm11674_vm8, %v3480_v57, %v16777_v52  ;;  %v16783_v2 = vrot.slane %v13351_v45, 5  ;;  %v9867_v57 = vor.u32 %v10690_v11, %v9864_v41  ;;  %v2307_v52 = vld [vmem:[#allocation2 + $0x94] sm:$0xf]  ;;  %v3208_v17 = vsel %vm11674_vm8, %v3206_v35, %v16784_v56  ;;  %v10805_v11 = vld [vmem:[%s16321_s2 + $0x238] sm:$0xff]  ;;  %v13530_v35 = vpop.f32.mrf.mxu3 }
 0x2de   : > { %16778 = vst [vmem:[#allocation36_spill] sm:$0xff] %v13495_v10  ;;  %v16415_v10 = vrot.slane %v13487_v7, 5  ;;  %v5604_v45 = vpack.c.b16 %v5415_v36, %v5415_v36  ;;  %v5414_v41 = vunpack.c.l.b16 %v13458_v48  ;;  %v3787_v13 = vsel %vm13307_vm1, %v3778_v1, %v13477_v47  ;;  %v13537_v1 = vld [vmem:[#allocation2 + $0x60] sm:$0xf]  ;;  %v13539_v56 = vld [vmem:[#allocation2 + $0x5c] sm:$0xf]  ;;  %7137 = vmatpush.bf16.msrb.mxu0 %v10805_v11 }
 0x2df   : > { %16779 = vst [vmem:[#allocation26_spill] sm:$0xff] %v13497_v37  ;;  %v2457_v14 = vrot.slane %v16783_v2, 4  ;;  %6655 = vmatmul.bf16.gmra.mxu3 %v9867_v57  ;;  %v2710_v2 = vrot.slane %v13303_v51, 4  ;;  %v13553_v11 = vld [vmem:[#allocation2 + $0x88] sm:$0xf]  ;;  %v2168_v6 = vrot.slane %v2166_v38, 4 }
 0x2e0   : > { %3628 = vst [vmem:[#allocation3 + $0xa8] sm:$0xf] %v3476_v43  ;;  %v2458_v43 = vrot.slane %v2307_v52, 5  ;;  %6454 = vmatmul.bf16.gmra.mxu1 %v5604_v45  ;;  %v3105_v52 = vld [vmem:[#allocation2 + $0x38] sm:$0xf]  ;;  %v16847_v31 = vld [vmem:[#allocation95_spill] sm:$0xff] }
 0x2e1   : > { %3629 = vst [vmem:[#allocation3 + $0xcc] sm:$0xf] %v3479_v8  ;;  %v16786_v8 = vrot.slane %v16785_v18, 7  ;;  %v13543_v18 = vrot.slane %v2825_v25, 6 }
 0x2e2   : > { %3630 = vst [vmem:[#allocation3 + $0xf0] sm:$0xf] %v3482_v50  ;;  %v2459_v48 = vsel %vm11662_vm7, %v2457_v14, %v2458_v43  ;;  %v2460_v24 = vrot.slane %v2458_v43, 4  ;;  %v2719_v14 = vsel %vm13058_vm14, %v2710_v2, %v13503_v63  ;;  %v3387_v43 = vld [vmem:[#allocation2 + $0x30] sm:$0xf]  ;;  %v16795_v2 = vld [vmem:[#allocation76_spill] sm:$0xff] }
 0x2e3   : > { %3348 = vst [vmem:[#allocation3 + $0x17c] sm:$0xf] %v3208_v17  ;;  %v4293_v50 = vsel %vm11747_vm11, %v16788_v53, %v16786_v8  ;;  %v13541_v17 = vrot.slane %v2822_v0, 5  ;;  %v16792_v8 = vld [vmem:[#allocation100_spill] sm:$0xff]  ;;  %v16793_v0 = vrot.slane %v13392_v46, 5  ;;  %v6498_v53 = vpop.f32.mrf.mxu2  ;;  %v16796_v57 = vshrl.u32 %v16795_v2, 16 }
 0x2e4   : > { %16789 = vst [vmem:[#allocation51_spill] sm:$0xff] %v13530_v35  ;;  %v2462_v51 = vsel %vm11662_vm7, %v2460_v24, %v16415_v10  ;;  %v6386_v45 = vadd.f32 %v16792_v8, %v6273_v44  ;;  %v16416_v24 = vrot.slane %v13553_v11, 5  ;;  %v16798_v8 = vshll.u32 %v16795_v2, 16  ;;  %v16805_v35 = vld [vmem:[#allocation14_spill] sm:$0xff] }
 0x2e5   : > { %4171 = vst [vmem:[#allocation3 + $0xf4] sm:$0xf] %v3787_v13  ;;  %v5603_v13 = vpack.c.b16 %v5414_v41, %v5414_v41  ;;  %v2165_v25 = vrot.slane %v16793_v0, 4  ;;  %v13562_v41 = vld [vmem:[#allocation2 + $0x60] sm:$0xf]  ;;  %v13603_v37 = vpop.f32.mrf.mxu3 }
 0x2e6   : > { %16790 = vst [vmem:[#allocation53_spill] sm:$0xff] %v13537_v1  ;;  %v13564_v44 = vadd.f32 %v6498_v53, %v6386_v45  ;;  %v3795_v0 = vrot.slane %v16798_v8, 7  ;;  %v16800_v45 = vld [vmem:[#allocation12_spill] sm:$0xff]  ;;  %v3910_v10 = vshrl.u32 %v13562_v41, 16  ;;  %v16820_v1 = vrot.slane %v13487_v7, 5 }
 0x2e7   : > { %2551 = vst [vmem:[#allocation3 + $0x4d4] sm:$0xf] %v2459_v48  ;;  %v13557_v48 = vpop.f32.mrf.mxu0  ;;  %6341 = vmatmul.bf16.gmra.mxu0 %v5603_v13  ;;  %v2167_v46 = vsel %vm11662_vm7, %v2165_v25, %v2166_v38  ;;  %v3484_v13 = vrot.slane %v3387_v43, 6  ;;  %v16804_v43 = vld [vmem:[#allocation73_spill] sm:$0xff] }
 0x2e8   : > { %16791 = vst [vmem:[#allocation61_spill] sm:$0xff] %v13543_v18 }
 0x2e9   : > { %4455 = vst [vmem:[#allocation3 + $0x20] sm:$0xf] %v4293_v50  ;;  %v3792_v50 = vrot.slane %v16796_v57, 6  ;;  %v2170_v57 = vsel %vm11662_vm7, %v2168_v6, %v16416_v24  ;;  %v3788_v6 = vrot.slane %v13477_v47, 4  ;;  %v13590_v24 = vld [vmem:[#allocation2 + $0xa0] sm:$0xf] }
 0x2ea   : > { %2552 = vst [vmem:[#allocation3 + $0x4f8] sm:$0xf] %v2462_v51  ;;  %v3210_v51 = vrot.slane %v3105_v52, 6  ;;  %v16801_v52 = vld [vmem:[#allocation85_spill] sm:$0xff] }
 0x2eb   : > { %16794 = vst [vmem:[#allocation65_spill] sm:$0xff] %v13557_v48  ;;  %v16802_v25 = vshrl.u32 %v16801_v52, 16  ;;  %v16803_v2 = vshll.u32 %v16801_v52, 16  ;;  %v10685_v48 = vld [vmem:[#allocation3 + $0x418] sm:$0xf0]  ;;  %v16806_v52 = vrot.slane %v16805_v35, 6 }
 0x2ec   : > { %3062 = vst [vmem:[#allocation3 + $0x178] sm:$0xf] %v2719_v14  ;;  %v13572_v14 = vpop.f32.mrf.mxu1  ;;  %v3211_v38 = vsel %vm11674_vm8, %v16800_v45, %v3210_v51  ;;  %v3212_v36 = vrot.slane %v3210_v51, 4  ;;  %v2720_v45 = vrot.slane %v13503_v63, 4  ;;  %v16811_v63 = vld [vmem:[#allocation93_spill] sm:$0xff] }
 0x2ed   : > { %16797 = vst [vmem:[#allocation23_spill] sm:$0xff] %v13564_v44  ;;  %v2724_v53 = vrot.slane %v16802_v25, 5  ;;  %v2727_v8 = vrot.slane %v16803_v2, 6  ;;  %v3486_v2 = vrot.slane %v3484_v13, 4  ;;  %v16808_v44 = vld [vmem:[#allocation87_spill] sm:$0xff] }
 0x2ee   : > { %16799 = vst [vmem:[#allocation21_spill] sm:$0xff] %v13572_v14  ;;  %v3214_v51 = vsel %vm11674_vm8, %v3212_v36, %v16806_v52 }
 0x2ef   : > { %2263 = vst [vmem:[#allocation3 + $0x488] sm:$0xf] %v2167_v46  ;;  %v3796_v46 = vor.u32 %v3795_v0, %v3792_v50  ;;  %v2728_v25 = vor.u32 %v2727_v8, %v2724_v53  ;;  %v13601_v50 = vld [vmem:[#allocation2 + $0x60] sm:$0xf]  ;;  %v9826_v0 = vld [vmem:[#allocation3 + $0x3f8] sm:$0xf] }
 0x2f0   : > { %2264 = vst [vmem:[#allocation3 + $0x4ac] sm:$0xf] %v2170_v57  ;;  %v3485_v57 = vsel %vm11674_vm8, %v16804_v43, %v3484_v13  ;;  %v9900_v43 = vld [vmem:[#allocation3 + $0x4ac] sm:$0xf0]  ;;  %v9332_v13 = vld [vmem:[#allocation3 + $0x34] sm:$0xf0] }
 0x2f1   : > { %3349 = vst [vmem:[#allocation3 + $0x1a0] sm:$0xf] %v3211_v38  ;;  %v16807_v38 = vld [vmem:[#allocation86_spill] sm:$0xff]  ;;  %v3797_v36 = vsel %vm13307_vm1, %v3788_v6, %v3796_v46  ;;  %v2730_v52 = vrot.slane %v2728_v25, 4 }
 0x2f2   : > { %3631 = vst [vmem:[#allocation3 + $0x114] sm:$0xf] %v3485_v57  ;;  %v13599_v47 = vor.u32 %v16808_v44, %v16807_v38  ;;  %v16812_v53 = vld [vmem:[#allocation94_spill] sm:$0xff]  ;;  %v9827_v57 = vor.u32 %v10685_v48, %v9826_v0  ;;  %v2729_v44 = vsel %vm13058_vm14, %v2720_v45, %v2728_v25  ;;  %v16813_v38 = vld [vmem:[#allocation80_spill] sm:$0xff]  ;;  %v3913_v45 = vshll.u32 %v13562_v41, 16  ;;  %v13625_v0 = vpop.f32.mrf.mxu2 }
 0x2f3   : > { %16809 = vst [vmem:[#allocation30_spill] sm:$0xff] %v13601_v50  ;;  %v13607_v8 = vor.u32 %v16812_v53, %v16811_v63  ;;  %v16814_v14 = vrot.slane %v16813_v38, 6  ;;  %v10556_v63 = vld [vmem:[#allocation3 + $0x14] sm:$0xf]  ;;  %v16815_v53 = vld [vmem:[#allocation31_spill] sm:$0xff]  ;;  %v9903_v25 = vor.u32 %v10699_v23, %v9900_v43  ;;  %v16836_v50 = vld [vmem:[#allocation48_spill] sm:$0xff] }
 0x2f4   : > { %16810 = vst [vmem:[#allocation28_spill] sm:$0xff] %v13603_v37  ;;  %v16816_v22 = vrot.slane %v16815_v53, 7  ;;  %v16817_v6 = vld [vmem:[#allocation34_spill] sm:$0xff]  ;;  %6537 = vmatmul.bf16.gmra.mxu2 %v9827_v57  ;;  %v13631_v38 = vld [vmem:[#allocation2 + $0x64] sm:$0xf]  ;;  %v13636_v57 = vpop.f32.mrf.mxu0 }
 0x2f5   : > { %3350 = vst [vmem:[#allocation3 + $0x1c4] sm:$0xf] %v3214_v51  ;;  %v3488_v37 = vsel %vm11674_vm8, %v3486_v2, %v16814_v14  ;;  %v13617_v51 = vld [vmem:[#allocation2 + $0x64] sm:$0xf]  ;;  %v2739_v14 = vsel %vm13058_vm14, %v2730_v52, %v13607_v8  ;;  %v3798_v2 = vrot.slane %v3796_v46, 4  ;;  %6660 = vmatmul.bf16.gmra.mxu3 %v9903_v25  ;;  %v16822_v46 = vrot.slane %v16815_v53, 7 }
 0x2f6   : > { %4172 = vst [vmem:[#allocation3 + $0x118] sm:$0xf] %v3797_v36  ;;  %v4296_v48 = vsel %vm11747_vm11, %v16817_v6, %v16816_v22  ;;  %v2309_v36 = vld [vmem:[#allocation2 + $0x9c] sm:$0xf]  ;;  %v2463_v22 = vrot.slane %v16820_v1, 4  ;;  %v9335_v6 = vor.u32 %v10556_v63, %v9332_v13  ;;  %v13644_v1 = vrot.slane %v3910_v10, 6 }
 0x2f7   : > { %3063 = vst [vmem:[#allocation3 + $0x19c] sm:$0xf] %v2729_v44  ;;  %v2464_v23 = vrot.slane %v2309_v36, 5  ;;  %v9330_v52 = vld [vmem:[#allocation3 + $0x10] sm:$0xf]  ;;  %v4297_v7 = vrot.slane %v16822_v46, 4  ;;  %v13646_v44 = vpop.f32.mrf.mxu1 }
 0x2f8   : > { %16818 = vst [vmem:[#allocation64_spill] sm:$0xff] %v13625_v0  ;;  %v10560_v41 = vld [vmem:[#allocation3 + $0x30] sm:$0xf0]  ;;  %v13650_v13 = vrot.slane %v3913_v45, 7  ;;  %v2832_v63 = vshrl.u32 %v13617_v51, 16  ;;  %6806 = vmatmul.bf16.vlgmr.msra.gmra.mxu1 %v9335_v6  ;;  %v16829_v46 = vld [vmem:[#allocation121_spill] sm:$0xff]  ;;  %v13672_v0 = vpop.f32.mrf.mxu3 }
 0x2f9   : > { %3632 = vst [vmem:[#allocation3 + $0x138] sm:$0xf] %v3488_v37  ;;  %v3807_v37 = vsel %vm13307_vm1, %v3798_v2, %v13599_v47  ;;  %v2465_v36 = vsel %vm11662_vm7, %v2463_v22, %v2464_v23  ;;  %v16826_v53 = vld [vmem:[#allocation38_spill] sm:$0xff]  ;;  %v13659_v2 = vld [vmem:[#allocation2 + $0x64] sm:$0xf]  ;;  %v6278_v22 = vadd.f32 %v13373_v32, %v16829_v46  ;;  %v16831_v6 = vrot.slane %v16805_v35, 6 }
 0x2fa   : > { %16819 = vst [vmem:[#allocation37_spill] sm:$0xff] %v13631_v38  ;;  %v16827_v25 = vrot.slane %v16826_v53, 7  ;;  %v3389_v43 = vld [vmem:[#allocation2 + $0x38] sm:$0xf]  ;;  %v2835_v53 = vshll.u32 %v13617_v51, 16  ;;  %v16837_v51 = vrot.slane %v16836_v50, 7 }
 0x2fb   : > { %16821 = vst [vmem:[#allocation42_spill] sm:$0xff] %v13636_v57  ;;  %v16833_v46 = vld [vmem:[#allocation96_spill] sm:$0xff] }
 0x2fc   : > { %3064 = vst [vmem:[#allocation3 + $0x1c0] sm:$0xf] %v2739_v14  ;;  %v2466_v14 = vrot.slane %v2464_v23, 4  ;;  %v4299_v10 = vsel %vm11747_vm11, %v4297_v7, %v16827_v25  ;;  %v16830_v23 = vrot.slane %v13590_v24, 5  ;;  %v9331_v25 = vor.u32 %v10560_v41, %v9330_v52  ;;  %v16842_v7 = vld [vmem:[#allocation83_spill] sm:$0xff]  ;;  %v16845_v50 = vld [vmem:[#allocation56_spill] sm:$0xff] }
 0x2fd   : > { %4456 = vst [vmem:[#allocation3 + $0x44] sm:$0xf] %v4296_v48  ;;  %v13653_v48 = vld [vmem:[#allocation2 + $0x40] sm:$0xf]  ;;  %v16834_v35 = vshrl.u32 %v16833_v46, 16  ;;  %v4302_v41 = vsel %vm11747_vm11, %v16838_v12, %v16837_v51  ;;  %v2740_v51 = vrot.slane %v13607_v8, 4  ;;  %v13717_v8 = vpop.f32.mrf.mxu0 }
 0x2fe   : > { %16823 = vst [vmem:[#allocation40_spill] sm:$0xff] %v13644_v1  ;;  %v2468_v45 = vsel %vm11662_vm7, %v2466_v14, %v16830_v23  ;;  %6693 = vmatmul.bf16.vlgmr.msra.gmra.mxu0 %v9331_v25  ;;  %v16846_v25 = vld [vmem:[#allocation116_spill] sm:$0xff] }
 0x2ff   : > { %16824 = vst [vmem:[#allocation54_spill] sm:$0xff] %v13646_v44  ;;  %v3490_v44 = vrot.slane %v3389_v43, 6  ;;  %v2744_v23 = vrot.slane %v16834_v35, 5  ;;  %v16839_v43 = vld [vmem:[#allocation13_spill] sm:$0xff]  ;;  %v10694_v12 = vld [vmem:[#allocation3 + $0x460] sm:$0xf0] }
 0x300   : > { %4173 = vst [vmem:[#allocation3 + $0x13c] sm:$0xf] %v3807_v37  ;;  %v3215_v37 = vrot.slane %v16831_v6, 4  ;;  %v16835_v6 = vshll.u32 %v16833_v46, 16  ;;  %v16840_v52 = vshrl.u32 %v16839_v43, 16  ;;  %v16843_v35 = vld [vmem:[#allocation9_spill] sm:$0xff] }
 0x301   : > { %16825 = vst [vmem:[#allocation50_spill] sm:$0xff] %v13650_v13  ;;  %v3491_v46 = vsel %vm11674_vm8, %v16842_v7, %v3490_v44  ;;  %v6503_v7 = vpop.f32.mrf.mxu2  ;;  %v16848_v13 = vld [vmem:[#allocation15_spill] sm:$0xff] }
 0x302   : > { %2553 = vst [vmem:[#allocation3 + $0x51c] sm:$0xf] %v2465_v36  ;;  %v16422_v36 = vrot.slane %v13653_v48, 6  ;;  %v2747_v57 = vrot.slane %v16835_v6, 6  ;;  %v16844_v6 = vrot.slane %v16843_v35, 7 }
 0x303   : > { %16828 = vst [vmem:[#allocation74_spill] sm:$0xff] %v13659_v2 }
 0x304   : > { %2554 = vst [vmem:[#allocation3 + $0x540] sm:$0xf] %v2468_v45  ;;  %v3217_v14 = vsel %vm11674_vm8, %v3215_v37, %v16422_v36  ;;  %v3812_v45 = vrot.slane %v16840_v52, 6  ;;  %v16841_v37 = vshll.u32 %v16839_v43, 16  ;;  %v13704_v43 = vor.u32 %v2747_v57, %v2744_v23  ;;  %v13726_v23 = vld [vmem:[#allocation2 + $0x64] sm:$0xf] }
 0x305   : > { %16832 = vst [vmem:[#allocation78_spill] sm:$0xff] %v13672_v0  ;;  %v4305_v0 = vsel %vm11747_vm11, %v16845_v50, %v16844_v6  ;;  %v13706_v52 = vrot.slane %v2832_v63, 5  ;;  %v13711_v6 = vor.u32 %v16848_v13, %v16847_v31  ;;  %v13713_v50 = vld [vmem:[#allocation2 + $0x90] sm:$0xf]  ;;  %v9862_v63 = vld [vmem:[#allocation3 + $0x440] sm:$0xf] }
 0x306   : > { %4457 = vst [vmem:[#allocation3 + $0x68] sm:$0xf] %v4299_v10  ;;  %v3815_v36 = vrot.slane %v16841_v37, 7  ;;  %v13700_v10 = vld [vmem:[#allocation2 + $0x64] sm:$0xf]  ;;  %v3808_v37 = vrot.slane %v13599_v47, 4  ;;  %v2749_v57 = vsel %vm13058_vm14, %v2740_v51, %v13704_v43  ;;  %v9863_v51 = vor.u32 %v10694_v12, %v9862_v63 }
 0x307   : > { %3351 = vst [vmem:[#allocation3 + $0x1e8] sm:$0xf] %v3217_v14  ;;  %v6391_v14 = vadd.f32 %v16846_v25, %v6278_v22  ;;  %v3920_v47 = vshrl.u32 %v13700_v10, 16  ;;  %v16853_v25 = vrot.slane %v13553_v11, 5  ;;  %v2311_v12 = vld [vmem:[#allocation2 + $0xa4] sm:$0xf] }
 0x308   : > { %3633 = vst [vmem:[#allocation3 + $0x15c] sm:$0xf] %v3491_v46  ;;  %v3816_v35 = vor.u32 %v3815_v36, %v3812_v45  ;;  %v13728_v45 = vpop.f32.mrf.mxu1  ;;  %v2021_v46 = vld [vmem:[#allocation2 + $0x8c] sm:$0xf]  ;;  %6542 = vmatmul.bf16.gmra.mxu2 %v9863_v51  ;;  %v13740_v63 = vld [vmem:[#allocation2 + $0xa8] sm:$0x7] }
 0x309   : > { %4458 = vst [vmem:[#allocation3 + $0x8c] sm:$0xf] %v4302_v41  ;;  %v13715_v22 = vadd.f32 %v6503_v7, %v6391_v14  ;;  %v9936_v41 = vld [vmem:[#allocation3 + $0x4f4] sm:$0xf0]  ;;  %v2171_v14 = vrot.slane %v16853_v25, 4 }
 0x30a   : > { %16850 = vst [vmem:[#allocation67_spill] sm:$0xff] %v13717_v8  ;;  %v3817_v31 = vsel %vm13307_vm1, %v3808_v37, %v3816_v35  ;;  %v3818_v13 = vrot.slane %v3816_v35, 4  ;;  %v9368_v7 = vld [vmem:[#allocation3 + $0x7c] sm:$0xf0]  ;;  %v13736_v35 = vrot.slane %v2835_v53, 6 }
 0x30b   : > { %16849 = vst [vmem:[#allocation60_spill] sm:$0xff] %v13715_v22  ;;  %v10708_v36 = vld [vmem:[#allocation3 + $0x4d4] sm:$0xf]  ;;  %v10565_v8 = vld [vmem:[#allocation3 + $0x5c] sm:$0xf]  ;;  %v3492_v22 = vrot.slane %v3490_v44, 4 }
 0x30c   : > { %4459 = vst [vmem:[#allocation3 + $0xb0] sm:$0xf] %v4305_v0  ;;  %v3827_v37 = vsel %vm13307_vm1, %v3818_v13, %v13711_v6  ;;  %v16855_v13 = vrot.slane %v13631_v38, 6  ;;  %v13748_v0 = vpop.f32.mrf.mxu3  ;;  %v2470_v44 = vrot.slane %v2311_v12, 5  ;;  %v13750_v51 = vld [vmem:[#allocation2 + $0x44] sm:$0xf] }
 0x30d   : > { %3065 = vst [vmem:[#allocation3 + $0x1e4] sm:$0xf] %v2749_v57  ;;  %v2172_v57 = vrot.slane %v2021_v46, 5  ;;  %v10796_v12 = vld [vmem:[%s16321_s2 + $0x1f0] sm:$0xff] }
 0x30e   : > { %16851 = vst [vmem:[#allocation81_spill] sm:$0xff] %v13726_v23  ;;  %v13746_v53 = vrot.slane %v16855_v13, 4  ;;  %7025 = vmatpush.bf16.msrb.mxu3 %v10796_v12 }
 0x30f   : > { %16852 = vst [vmem:[#allocation11_spill] sm:$0xff] %v13728_v45  ;;  %v9939_v45 = vor.u32 %v10708_v36, %v9936_v41  ;;  %v2173_v11 = vsel %vm11662_vm7, %v2171_v14, %v2172_v57  ;;  %v2174_v25 = vrot.slane %v2172_v57, 4  ;;  %v16858_v36 = vrot.slane %v13659_v2, 6 }
 0x310   : > { %4174 = vst [vmem:[#allocation3 + $0x160] sm:$0xf] %v3817_v31  ;;  %v16854_v31 = vrot.slane %v13590_v24, 5  ;;  %v9371_v57 = vor.u32 %v10565_v8, %v9368_v7  ;;  %v16860_v24 = vrot.slane %v13713_v50, 5  ;;  %v16424_v8 = vrot.slane %v13740_v63, 5  ;;  %v13800_v1 = vpop.f32.mrf.mxu1 }
 0x311   : > { %4175 = vst [vmem:[#allocation3 + $0x184] sm:$0xf] %v3827_v37  ;;  %v13754_v41 = vrot.slane %v16858_v36, 4  ;;  %6665 = vmatmul.bf16.gmra.mxu3 %v9939_v45  ;;  %v2472_v45 = vrot.slane %v2470_v44, 4  ;;  %v16861_v7 = vrot.slane %v13653_v48, 6  ;;  %v3219_v36 = vrot.slane %v13750_v51, 6 }
 0x312   : > { %v2469_v46 = vrot.slane %v16854_v31, 4  ;;  %16856 = vst [vmem:[#allocation29_spill] sm:$0xff] %v13746_v53  ;;  %v2176_v37 = vsel %vm11662_vm7, %v2174_v25, %v16860_v24  ;;  %v10569_v31 = vld [vmem:[#allocation3 + $0x78] sm:$0xf0]  ;;  %6811 = vmatmul.bf16.gmra.mxu1 %v9371_v57  ;;  %v16862_v24 = vld [vmem:[#allocation97_spill] sm:$0xff]  ;;  %v10795_v48 = vld [vmem:[%s16321_s2 + $0x1e8] sm:$0xff] }
 0x313   : > { %16857 = vst [vmem:[#allocation22_spill] sm:$0xff] %v13748_v0  ;;  %v3218_v25 = vrot.slane %v16861_v7, 4  ;;  %v16863_v14 = vshrl.u32 %v16862_v24, 16  ;;  %v2474_v57 = vsel %vm11662_vm7, %v2472_v45, %v16424_v8  ;;  %v16867_v51 = vshll.u32 %v16862_v24, 16  ;;  %v16872_v45 = vld [vmem:[#allocation99_spill] sm:$0xff]  ;;  %7026 = vmatpush.bf16.msrb.mxu3 %v10795_v48 }
 0x314   : > { %2265 = vst [vmem:[#allocation3 + $0x4d0] sm:$0xf] %v2173_v11  ;;  %v10788_v11 = vld [vmem:[%s16321_s2 + $0x1b0] sm:$0xff]  ;;  %v2471_v13 = vsel %vm11662_vm7, %v2469_v46, %v2470_v44  ;;  %v13779_v46 = vpop.f32.mrf.mxu0  ;;  %v16873_v8 = vshrl.u32 %v16872_v45, 16  ;;  %v3828_v24 = vrot.slane %v13711_v6, 4 }
 0x315   : > { %16859 = vst [vmem:[#allocation100_spill] sm:$0xff] %v13754_v41  ;;  %6912 = vmatpush.bf16.msrb.mxu2 %v10788_v11  ;;  %v2754_v0 = vrot.slane %v16863_v14, 5  ;;  %v16864_v41 = vld [vmem:[#allocation90_spill] sm:$0xff]  ;;  %v9366_v44 = vld [vmem:[#allocation3 + $0x58] sm:$0xf]  ;;  %v2757_v14 = vrot.slane %v16867_v51, 6  ;;  %v3220_v12 = vsel %vm11674_vm8, %v3218_v25, %v3219_v36 }
 0x316   : > { %2266 = vst [vmem:[#allocation3 + $0x4f4] sm:$0xf] %v2176_v37  ;;  %v16865_v53 = vrot.slane %v16864_v41, 6  ;;  %v16868_v11 = vld [vmem:[#allocation98_spill] sm:$0xff]  ;;  %v9367_v2 = vor.u32 %v10569_v31, %v9366_v44  ;;  %v3842_v38 = vrot.slane %v16873_v8, 6  ;;  %v16876_v25 = vrot.slane %v16864_v41, 6 }
 0x317   : > { %2555 = vst [vmem:[#allocation3 + $0x564] sm:$0xf] %v2471_v13  ;;  %v16869_v13 = vshrl.u32 %v16868_v11, 16  ;;  %v13806_v31 = vor.u32 %v2757_v14, %v2754_v0  ;;  %v13810_v8 = vld [vmem:[#allocation2 + $0x68] sm:$0xf]  ;;  %v10804_v6 = vld [vmem:[%s16321_s2 + $0x230] sm:$0xff] }
 0x318   : > { %v3494_v37 = vsel %vm11674_vm8, %v3492_v22, %v16865_v53  ;;  %16866 = vst [vmem:[#allocation76_spill] sm:$0xff] %v13779_v46  ;;  %v16870_v22 = vshll.u32 %v16868_v11, 16  ;;  %v13794_v46 = vrot.slane %v3920_v47, 6  ;;  %6698 = vmatmul.bf16.gmra.mxu0 %v9367_v2  ;;  %v2750_v47 = vrot.slane %v13704_v43, 4  ;;  %v3392_v0 = vld [vmem:[#allocation2 + $0x44] sm:$0xf] }
 0x319   : > { %v3832_v7 = vrot.slane %v16869_v13, 6  ;;  %2556 = vst [vmem:[#allocation3 + $0x588] sm:$0xf] %v2474_v57  ;;  %v16875_v13 = vshll.u32 %v16872_v45, 16  ;;  %v3495_v44 = vrot.slane %v16876_v25, 4  ;;  %7138 = vmatpush.bf16.msrb.mxu0 %v10804_v6  ;;  %v6283_v6 = vadd.f32 %v13373_v32, %v12930_v49 }
 0x31a   : > { %v3835_v53 = vrot.slane %v16870_v22, 7  ;;  %16871 = vst [vmem:[#allocation12_spill] sm:$0xff] %v13794_v46  ;;  %v3391_v22 = vld [vmem:[#allocation2 + $0x40] sm:$0xf]  ;;  %v13819_v14 = vld [vmem:[#allocation2 + $0x98] sm:$0xf]  ;;  %v2759_v41 = vsel %vm13058_vm14, %v2750_v47, %v13806_v31 }
 0x31b   : > { %16874 = vst [vmem:[#allocation85_spill] sm:$0xff] %v13800_v1  ;;  %v3845_v11 = vrot.slane %v16875_v13, 7  ;;  %v3496_v57 = vrot.slane %v3391_v22, 6  ;;  %v3499_v13 = vrot.slane %v3392_v0, 6  ;;  %v9898_v47 = vld [vmem:[#allocation3 + $0x488] sm:$0xf] }
 0x31c   : > { %3352 = vst [vmem:[#allocation3 + $0x20c] sm:$0xf] %v3220_v12  ;;  %v3836_v51 = vor.u32 %v3835_v53, %v3832_v7  ;;  %v13812_v12 = vpop.f32.mrf.mxu2  ;;  %v16878_v53 = vshll.u32 %v13700_v10, 16  ;;  %v9404_v25 = vld [vmem:[#allocation3 + $0xc4] sm:$0xf0]  ;;  %v16882_v10 = vld [vmem:[#allocation108_spill] sm:$0xff] }
 0x31d   : > { %3634 = vst [vmem:[#allocation3 + $0x180] sm:$0xf] %v3494_v37  ;;  %v13824_v37 = vor.u32 %v3845_v11, %v3842_v38  ;;  %v3497_v48 = vsel %vm11674_vm8, %v3495_v44, %v3496_v57  ;;  %v3498_v7 = vrot.slane %v3496_v57, 4  ;;  %v3221_v38 = vrot.slane %v3219_v36, 4  ;;  %v16881_v44 = vld [vmem:[#allocation104_spill] sm:$0xff]  ;;  %v10794_v36 = vld [vmem:[%s16321_s2 + $0x1e0] sm:$0xff] }
 0x31e   : > { %16877 = vst [vmem:[#allocation73_spill] sm:$0xff] %v13812_v12  ;;  %v3837_v2 = vsel %vm13307_vm1, %v3828_v24, %v3836_v51  ;;  %v3838_v43 = vrot.slane %v3836_v51, 4  ;;  %v13830_v45 = vrot.slane %v16878_v53, 7  ;;  %v13832_v24 = vpop.f32.mrf.mxu3  ;;  %v10703_v51 = vld [vmem:[#allocation3 + $0x4a8] sm:$0xf0]  ;;  %v13840_v57 = vor.u32 %v16882_v10, %v16881_v44  ;;  %v16887_v1 = vld [vmem:[#allocation111_spill] sm:$0xff]  ;;  %7027 = vmatpush.bf16.msrb.mxu3 %v10794_v36 }
 0x31f   : > { %4176 = vst [vmem:[#allocation3 + $0x1a8] sm:$0xf] %v3837_v2  ;;  %v16883_v2 = vrot.slane %v13713_v50, 5  ;;  %v9972_v0 = vld [vmem:[#allocation3 + $0x53c] sm:$0xf0]  ;;  %v9899_v44 = vor.u32 %v10703_v51, %v9898_v47  ;;  %v2845_v46 = vshll.u32 %v13810_v8, 16 }
 0x320   : > { %16879 = vst [vmem:[#allocation14_spill] sm:$0xff] %v13830_v45  ;;  %v3847_v11 = vsel %vm13307_vm1, %v3838_v43, %v13824_v37  ;;  %v2023_v22 = vld [vmem:[#allocation2 + $0x94] sm:$0xf]  ;;  %v3500_v43 = vsel %vm11674_vm8, %v3498_v7, %v3499_v13  ;;  %v10574_v10 = vld [vmem:[#allocation3 + $0xa4] sm:$0xf]  ;;  %v2760_v51 = vrot.slane %v13806_v31, 4 }
 0x321   : > { %16880 = vst [vmem:[#allocation86_spill] sm:$0xff] %v13832_v24  ;;  %v2177_v53 = vrot.slane %v16883_v2, 4  ;;  %v2178_v50 = vrot.slane %v2023_v22, 5  ;;  %v16885_v2 = vld [vmem:[#allocation16_spill] sm:$0xff]  ;;  %v13858_v12 = vld [vmem:[#allocation2 + $0x28] sm:$0xf]  ;;  %6547 = vmatmul.bf16.gmra.mxu2 %v9899_v44 }
 0x322   : > { %3066 = vst [vmem:[#allocation3 + $0x208] sm:$0xf] %v2759_v41  ;;  %v13846_v41 = vpop.f32.mrf.mxu0  ;;  %v16886_v24 = vrot.slane %v16885_v2, 6  ;;  %v10717_v7 = vld [vmem:[#allocation3 + $0x51c] sm:$0xf]  ;;  %v16891_v36 = vld [vmem:[#allocation126_spill] sm:$0xff] }
 0x323   : > { %3635 = vst [vmem:[#allocation3 + $0x1a4] sm:$0xf] %v3497_v48  ;;  %v9975_v22 = vor.u32 %v10717_v7, %v9972_v0  ;;  %v2179_v47 = vsel %vm11662_vm7, %v2177_v53, %v2178_v50  ;;  %v9407_v48 = vor.u32 %v10574_v10, %v9404_v25  ;;  %v3848_v0 = vrot.slane %v13824_v37, 4  ;;  %v13879_v53 = vld [vmem:[#allocation2 + $0x68] sm:$0xf] }
 0x324   : > { %16884 = vst [vmem:[#allocation87_spill] sm:$0xff] %v13846_v41  ;;  %v3223_v49 = vsel %vm11674_vm8, %v3221_v38, %v16886_v24  ;;  %v16888_v41 = vld [vmem:[#allocation112_spill] sm:$0xff]  ;;  %v2180_v24 = vrot.slane %v2178_v50, 4  ;;  %v13868_v38 = vld [vmem:[#allocation2 + $0xa0] sm:$0x7]  ;;  %v16892_v44 = vrot.slane %v13819_v14, 5  ;;  %v2769_v25 = vsel %vm13058_vm14, %v2760_v51, %v13840_v57  ;;  %v6508_v7 = vpop.f32.mrf.mxu2 }
 0x325   : > { %4177 = vst [vmem:[#allocation3 + $0x1cc] sm:$0xf] %v3847_v11  ;;  %v13862_v45 = vor.u32 %v16888_v41, %v16887_v1  ;;  %v16889_v11 = vrot.slane %v13740_v63, 5  ;;  %v13872_v1 = vld [vmem:[#allocation2 + $0x68] sm:$0xf]  ;;  %v13874_v41 = vpop.f32.mrf.mxu1  ;;  %v16426_v31 = vrot.slane %v13868_v38, 5  ;;  %6670 = vmatmul.bf16.gmra.mxu3 %v9975_v22  ;;  %6816 = vmatmul.bf16.gmra.mxu1 %v9407_v48 }
 0x326   : > { %3353 = vst [vmem:[#allocation3 + $0x230] sm:$0xf] %v3223_v49  ;;  %v6396_v49 = vadd.f32 %v16891_v36, %v6283_v6  ;;  %v2182_v63 = vsel %vm11662_vm7, %v2180_v24, %v16892_v44  ;;  %v3501_v6 = vrot.slane %v3499_v13, 4  ;;  %v4307_v37 = vrot.slane %v13858_v12, 7  ;;  %v9402_v22 = vld [vmem:[#allocation3 + $0xa0] sm:$0xf] }
 0x327   : > { %v2475_v2 = vrot.slane %v16889_v11, 4  ;;  %3636 = vst [vmem:[#allocation3 + $0x1c8] sm:$0xf] %v3500_v43  ;;  %v10793_v43 = vld [vmem:[%s16321_s2 + $0x1d8] sm:$0xff]  ;;  %v16893_v10 = vrot.slane %v13726_v23, 7  ;;  %v2189_v24 = vrot.slane %v16426_v31, 4  ;;  %v3857_v11 = vsel %vm13307_vm1, %v3848_v0, %v13862_v45 }
 0x328   : > { %16890 = vst [vmem:[#allocation93_spill] sm:$0xff] %v13874_v41  ;;  %v13903_v13 = vadd.f32 %v6508_v7, %v6396_v49  ;;  %7028 = vmatpush.bf16.msrb.mxu3 %v10793_v43  ;;  %v3110_v12 = vld [vmem:[#allocation2 + $0x4c] sm:$0xf]  ;;  %v16896_v51 = vld [vmem:[#allocation103_spill] sm:$0xff]  ;;  %v13913_v41 = vpop.f32.mrf.mxu3 }
 0x329   : > { %2267 = vst [vmem:[#allocation3 + $0x518] sm:$0xf] %v2179_v47  ;;  %v13894_v50 = vrot.slane %v16893_v10, 4  ;;  %v10578_v47 = vld [vmem:[#allocation3 + $0xc0] sm:$0xf0]  ;;  %v16897_v36 = vrot.slane %v16896_v51, 6 }
 0x32a   : > { %2557 = vst [vmem:[#allocation3 + $0x5ac] sm:$0x3] %v2475_v2  ;;  %v13901_v2 = vld [vmem:[#allocation2 + $0x68] sm:$0xf]  ;;  %v16898_v10 = vshrl.u32 %v13810_v8, 16  ;;  %v13915_v0 = vpop.f32.mrf.mxu0  ;;  %v10792_v48 = vld [vmem:[%s16321_s2 + $0x1d0] sm:$0xff]  ;;  %v9403_v7 = vor.u32 %v10578_v47, %v9402_v22 }
 0x32b   : > { %16894 = vst [vmem:[#allocation94_spill] sm:$0xff] %v13894_v50  ;;  %v3503_v44 = vsel %vm11674_vm8, %v3501_v6, %v16897_v36  ;;  %v3225_v49 = vrot.slane %v3110_v12, 6  ;;  %v4309_v8 = vrot.slane %v4307_v37, 4  ;;  %v13924_v36 = vld [vmem:[#allocation2 + $0x68] sm:$0xf] }
 0x32c   : > { %2268 = vst [vmem:[#allocation3 + $0x53c] sm:$0xf] %v2182_v63  ;;  %v3394_v63 = vld [vmem:[#allocation2 + $0x4c] sm:$0xf]  ;;  %v13911_v31 = vrot.slane %v16898_v10, 5  ;;  %v16903_v10 = vld [vmem:[#allocation109_spill] sm:$0xff]  ;;  %6703 = vmatmul.bf16.gmra.mxu0 %v9403_v7  ;;  %7029 = vmatpush.bf16.msrb.mxu3 %v10792_v48 }
 0x32d   : > { %16895 = vst [vmem:[#allocation80_spill] sm:$0xff] %v13903_v13  ;;  %v3505_v43 = vrot.slane %v3394_v63, 6  ;;  %v16906_v12 = vld [vmem:[#allocation10_spill] sm:$0xff]  ;;  %v16908_v63 = vld [vmem:[#allocation115_spill] sm:$0xff]  ;;  %v3930_v48 = vshrl.u32 %v13901_v2, 16  ;;  %v13949_v7 = vpop.f32.mrf.mxu1 }
 0x32e   : > { %3067 = vst [vmem:[#allocation3 + $0x22c] sm:$0xf] %v2769_v25  ;;  %v13920_v25 = vrot.slane %v2845_v46, 6  ;;  %v4308_v46 = vsel %vm11747_vm11, %v16906_v12, %v4307_v37  ;;  %v10791_v22 = vld [vmem:[%s16321_s2 + $0x1c8] sm:$0xff]  ;;  %v4214_v12 = vld [vmem:[#allocation2 + $0x30] sm:$0xf] }
 0x32f   : > { %16899 = vst [vmem:[#allocation31_spill] sm:$0xff] %v13911_v31  ;;  %v16910_v6 = vld [vmem:[#allocation110_spill] sm:$0xff]  ;;  %v4313_v31 = vrot.slane %v4214_v12, 7 }
 0x330   : > { %16900 = vst [vmem:[#allocation34_spill] sm:$0xff] %v13913_v41  ;;  %v16904_v41 = vld [vmem:[#allocation113_spill] sm:$0xff]  ;;  %7030 = vmatpush.bf16.msrb.mxu3 %v10791_v22  ;;  %v2025_v22 = vld [vmem:[#allocation2 + $0x9c] sm:$0xf] }
 0x331   : > { %16901 = vst [vmem:[#allocation38_spill] sm:$0xff] %v13915_v0  ;;  %v16905_v13 = vshrl.u32 %v16904_v41, 16  ;;  %v16907_v47 = vshll.u32 %v16904_v41, 16  ;;  %v2184_v12 = vrot.slane %v2025_v22, 5 }
 0x332   : > { %2271 = vst [vmem:[#allocation3 + $0x5a8] sm:$0x3] %v2189_v24  ;;  %v3226_v24 = vsel %vm11674_vm8, %v16903_v10, %v3225_v49  ;;  %v16909_v10 = vshrl.u32 %v16908_v63, 16 }
 0x333   : > { %16902 = vst [vmem:[#allocation121_spill] sm:$0xff] %v13920_v25  ;;  %v2774_v0 = vrot.slane %v16905_v13, 5  ;;  %v3506_v13 = vsel %vm11674_vm8, %v16910_v6, %v3505_v43  ;;  %v2770_v6 = vrot.slane %v13840_v57, 4  ;;  %v3858_v25 = vrot.slane %v13862_v45, 4 }
 0x334   : > { %4178 = vst [vmem:[#allocation3 + $0x1f0] sm:$0xf] %v3857_v11  ;;  %v2777_v11 = vrot.slane %v16907_v47, 6  ;;  %v3862_v51 = vrot.slane %v16909_v10, 6  ;;  %v3933_v47 = vshll.u32 %v13901_v2, 16  ;;  %v3227_v2 = vrot.slane %v3225_v49, 4 }
 0x335   : > { %3637 = vst [vmem:[#allocation3 + $0x1ec] sm:$0xf] %v3503_v44  ;;  %v16911_v44 = vld [vmem:[#allocation68_spill] sm:$0xff]  ;;  %v3507_v57 = vrot.slane %v3505_v43, 4  ;;  %v6288_v45 = vadd.f32 %v13373_v32, %v13029_v30  ;;  %v10790_v49 = vld [vmem:[%s16321_s2 + $0x1c0] sm:$0xff]  ;;  %v16921_v32 = vrot.slane %v12802_v3, 6 }
 0x336   : > { %3354 = vst [vmem:[#allocation3 + $0x254] sm:$0xf] %v3226_v24  ;;  %v16912_v50 = vrot.slane %v16911_v44, 7  ;;  %v16914_v24 = vshll.u32 %v16908_v63, 16  ;;  %v2778_v23 = vor.u32 %v2777_v11, %v2774_v0  ;;  %v13956_v44 = vpop.f32.mrf.mxu2  ;;  %v10726_v63 = vld [vmem:[#allocation3 + $0x564] sm:$0xf]  ;;  %7031 = vmatpush.bf16.msrb.mxu3 %v10790_v49 }
 0x337   : > { %16913 = vst [vmem:[#allocation96_spill] sm:$0xff] %v13949_v7  ;;  %v16916_v0 = vld [vmem:[#allocation119_spill] sm:$0xff]  ;;  %v14032_v49 = vld [vmem:[#allocation2 + $0x6c] sm:$0xf] }
 0x338   : > { %v4311_v37 = vsel %vm11747_vm11, %v4309_v8, %v16912_v50  ;;  %v3865_v41 = vrot.slane %v16914_v24, 7  ;;  %3638 = vst [vmem:[#allocation3 + $0x210] sm:$0xf] %v3506_v13  ;;  %v9934_v50 = vld [vmem:[#allocation3 + $0x4d0] sm:$0xf]  ;;  %v2779_v10 = vsel %vm13058_vm14, %v2770_v6, %v2778_v23  ;;  %v3509_v6 = vsel %vm11674_vm8, %v3507_v57, %v16921_v32  ;;  %v16924_v3 = vld [vmem:[#allocation79_spill] sm:$0xff] }
 0x339   : > { %4460 = vst [vmem:[#allocation3 + $0xd4] sm:$0xf] %v4308_v46  ;;  %v10712_v8 = vld [vmem:[#allocation3 + $0x4f0] sm:$0xf0]  ;;  %v10008_v13 = vld [vmem:[#allocation3 + $0x584] sm:$0xf0]  ;;  %v4314_v57 = vsel %vm11747_vm11, %v16924_v3, %v4313_v31 }
 0x33a   : > { %16915 = vst [vmem:[#allocation48_spill] sm:$0xff] %v13956_v44  ;;  %v3866_v7 = vor.u32 %v3865_v41, %v3862_v51  ;;  %v9440_v24 = vld [vmem:[#allocation3 + $0x10c] sm:$0xf0]  ;;  %v16917_v46 = vld [vmem:[#allocation120_spill] sm:$0xff]  ;;  %v16918_v44 = vrot.slane %v13819_v14, 5  ;;  %v13969_v51 = vpop.f32.mrf.mxu3  ;;  %v9935_v41 = vor.u32 %v10712_v8, %v9934_v50  ;;  %v16920_v14 = vrot.slane %v12800_v54, 6 }
 0x33b   : > { %4461 = vst [vmem:[#allocation3 + $0xf8] sm:$0xf] %v4311_v37  ;;  %v13963_v11 = vor.u32 %v16917_v46, %v16916_v0  ;;  %v13971_v37 = vpop.f32.mrf.mxu0  ;;  %v16923_v54 = vrot.slane %v13879_v53, 6  ;;  %v10011_v0 = vor.u32 %v10726_v63, %v10008_v13  ;;  %v10583_v46 = vld [vmem:[#allocation3 + $0xec] sm:$0xf]  ;;  %v2780_v22 = vrot.slane %v2778_v23, 4 }
 0x33c   : > { %v2183_v18 = vrot.slane %v16918_v44, 4  ;;  %16919 = vst [vmem:[#allocation45_spill] sm:$0xff] %v13969_v51  ;;  %v3867_v43 = vsel %vm13307_vm1, %v3858_v25, %v3866_v7  ;;  %v3229_v30 = vsel %vm11674_vm8, %v3227_v2, %v16920_v14  ;;  %v13986_v44 = vld [vmem:[#allocation2 + $0x38] sm:$0xf]  ;;  %v16922_v25 = vrot.slane %v13872_v1, 6  ;;  %6552 = vmatmul.bf16.gmra.mxu2 %v9935_v41 }
 0x33d   : > { %3068 = vst [vmem:[#allocation3 + $0x250] sm:$0xf] %v2779_v10  ;;  %v13990_v10 = vor.u32 %v13182_v5, %v13159_v9  ;;  %v13998_v8 = vrot.slane %v16923_v54, 4  ;;  %v14000_v2 = vld [vmem:[#allocation2 + $0x6c] sm:$0xf]  ;;  %v2186_v5 = vrot.slane %v2184_v12, 4  ;;  %v9443_v14 = vor.u32 %v10583_v46, %v9440_v24  ;;  %6675 = vmatmul.bf16.gmra.mxu3 %v10011_v0 }
 0x33e   : > { %4179 = vst [vmem:[#allocation3 + $0x214] sm:$0xf] %v3867_v43  ;;  %v13994_v50 = vrot.slane %v16922_v25, 4  ;;  %v2185_v9 = vsel %vm11662_vm7, %v2183_v18, %v2184_v12  ;;  %v14007_v43 = vpop.f32.mrf.mxu1  ;;  %v3868_v32 = vrot.slane %v3866_v7, 4  ;;  %v4319_v25 = vrot.slane %v13986_v44, 7  ;;  %v6513_v7 = vpop.f32.mrf.mxu2  ;;  %v10787_v46 = vld [vmem:[%s16321_s2 + $0x1a8] sm:$0xff] }
 0x33f   : > { %3355 = vst [vmem:[#allocation3 + $0x278] sm:$0xf] %v3229_v30  ;;  %v4315_v30 = vrot.slane %v4313_v31, 4  ;;  %v14010_v54 = vrot.slane %v3930_v48, 6  ;;  %v14012_v41 = vld [vmem:[#allocation2 + $0x6c] sm:$0xf]  ;;  %v6401_v63 = vadd.f32 %v13002_v42, %v6288_v45  ;;  %v2789_v13 = vsel %vm13058_vm14, %v2780_v22, %v13963_v11  ;;  %6821 = vmatmul.bf16.gmra.mxu1 %v9443_v14  ;;  %6913 = vmatpush.bf16.msrb.mxu2 %v10787_v46 }
 0x340   : > { %3639 = vst [vmem:[#allocation3 + $0x234] sm:$0xf] %v3509_v6  ;;  %v16925_v18 = vrot.slane %v13868_v38, 5  ;;  %v14022_v31 = vrot.slane %v3933_v47, 7  ;;  %v2852_v48 = vshrl.u32 %v14000_v2, 16  ;;  %v3877_v42 = vsel %vm13307_vm1, %v3868_v32, %v13990_v10  ;;  %v16926_v38 = vld [vmem:[#allocation82_spill] sm:$0xff] }
 0x341   : > { %2269 = vst [vmem:[#allocation3 + $0x560] sm:$0xf] %v2185_v9  ;;  %v10587_v24 = vld [vmem:[#allocation3 + $0x108] sm:$0xf0]  ;;  %v16927_v45 = vrot.slane %v16926_v38, 7  ;;  %v14034_v12 = vadd.f32 %v6513_v7, %v6401_v63  ;;  %v16929_v6 = vld [vmem:[#allocation88_spill] sm:$0xff] }
 0x342   : > { %v2188_v23 = vsel %vm11662_vm7, %v2186_v5, %v16925_v18  ;;  %4462 = vst [vmem:[#allocation3 + $0x11c] sm:$0xf] %v4314_v57  ;;  %v3112_v47 = vld [vmem:[#allocation2 + $0x54] sm:$0xf]  ;;  %v4320_v44 = vsel %vm11747_vm11, %v16929_v6, %v4319_v25  ;;  %v14039_v3 = vpop.f32.mrf.mxu3  ;;  %v9438_v0 = vld [vmem:[#allocation3 + $0xe8] sm:$0xf]  ;;  %v14068_v6 = vor.u32 %v13315_v62, %v13313_v60 }
 0x343   : > { %2270 = vst [vmem:[#allocation3 + $0x584] sm:$0xf] %v2188_v23  ;;  %v4317_v4 = vsel %vm11747_vm11, %v4315_v30, %v16927_v45  ;;  %v14041_v57 = vpop.f32.mrf.mxu0  ;;  %v3231_v9 = vrot.slane %v3112_v47, 6  ;;  %v16931_v5 = vrot.slane %v13924_v36, 7  ;;  %v9439_v32 = vor.u32 %v10587_v24, %v9438_v0  ;;  %v3396_v30 = vld [vmem:[#allocation2 + $0x54] sm:$0xf] }
 0x344   : > { %16928 = vst [vmem:[#allocation13_spill] sm:$0xff] %v14034_v12  ;;  %v14052_v18 = vld [vmem:[#allocation2 + $0x6c] sm:$0xf]  ;;  %v16933_v24 = vshll.u32 %v13170_v61, 16  ;;  %v14072_v0 = vld [vmem:[#allocation3 + $0x5a8] sm:$0x33] }
 0x345   : > { %3069 = vst [vmem:[#allocation3 + $0x274] sm:$0xf] %v2789_v13  ;;  %v14048_v22 = vrot.slane %v16931_v5, 4  ;;  %v3232_v23 = vsel %vm11674_vm8, %v13112_v39, %v3231_v9  ;;  %v16932_v13 = vshrl.u32 %v13170_v61, 16  ;;  %6708 = vmatmul.bf16.gmra.mxu0 %v9439_v32  ;;  %v3511_v46 = vrot.slane %v3396_v30, 6  ;;  %v16975_v12 = vld [vmem:[#allocation74_spill] sm:$0xff] }
 0x346   : > { %16930 = vst [vmem:[#allocation83_spill] sm:$0xff] %v14039_v3  ;;  %v2797_v45 = vrot.slane %v16933_v24, 6  ;;  %v14070_v39 = vpop.f32.mrf.mxu1  ;;  %v4218_v5 = vld [vmem:[#allocation2 + $0x40] sm:$0xf]  ;;  %v3940_v32 = vshrl.u32 %v14052_v18, 16  ;;  %v2790_v61 = vrot.slane %v13963_v11, 4  ;;  %v14078_v24 = vpop.f32.mrf.mxu2  ;;  %v5417_v30 = vunpack.c.h.b16 %v14072_v0 }
 0x347   : > { %4180 = vst [vmem:[#allocation3 + $0x238] sm:$0xf] %v3877_v42  ;;  %v2794_v7 = vrot.slane %v16932_v13, 5  ;;  %v14059_v42 = vrot.slane %v2852_v48, 5  ;;  %v16935_v48 = vshll.u32 %v13190_v29, 16  ;;  %v4321_v13 = vrot.slane %v4319_v25, 4 }
 0x348   : > { %4463 = vst [vmem:[#allocation3 + $0x140] sm:$0xf] %v4317_v4  ;;  %v16934_v4 = vshrl.u32 %v13190_v29, 16  ;;  %v3878_v60 = vrot.slane %v13990_v10, 4  ;;  %v3512_v38 = vsel %vm11674_vm8, %v13128_v20, %v3511_v46  ;;  %v4325_v29 = vrot.slane %v4218_v5, 7 }
 0x349   : > { %4464 = vst [vmem:[#allocation3 + $0x164] sm:$0xf] %v4320_v44  ;;  %v3885_v44 = vrot.slane %v16935_v48, 7  ;;  %v9970_v48 = vld [vmem:[#allocation3 + $0x518] sm:$0xf]  ;;  %v3233_v63 = vrot.slane %v3231_v9, 4  ;;  %v14089_v25 = vor.u32 %v13448_v27, %v13446_v34 }
 0x34a   : > { %3356 = vst [vmem:[#allocation3 + $0x29c] sm:$0xf] %v3232_v23  ;;  %v3882_v47 = vrot.slane %v16934_v4, 6  ;;  %v2798_v23 = vor.u32 %v2797_v45, %v2794_v7  ;;  %v10721_v4 = vld [vmem:[#allocation3 + $0x538] sm:$0xf0]  ;;  %v3513_v7 = vrot.slane %v3511_v46, 4  ;;  %v14098_v45 = vpop.f32.mrf.mxu3 }
 0x34b   : > { %16936 = vst [vmem:[#allocation9_spill] sm:$0xff] %v14078_v24  ;;  %v14094_v10 = vld [vmem:[%s16324_s5] ss:$0 sm:$0xff]  ;;  %v14100_v9 = vpop.f32.mrf.mxu0  ;;  %v16938_v27 = vld [vmem:[#allocation91_spill] sm:$0xff]  ;;  %v4219_v46 = vld [vmem:[#allocation2 + $0x44] sm:$0xf] }
 0x34c   : > { %v3886_v62 = vor.u32 %v3885_v44, %v3882_v47  ;;  %v2799_v11 = vsel %vm13058_vm14, %v2790_v61, %v2798_v23  ;;  %3640 = vst [vmem:[#allocation3 + $0x258] sm:$0xf] %v3512_v38  ;;  %v6293_v20 = vadd.f32 %v14094_v10, %v13151_v33  ;;  %v10786_v38 = vld [vmem:[%s16321_s2 + $0x1a0] sm:$0xff]  ;;  %v16939_v47 = vrot.slane %v16938_v27, 7  ;;  %v14109_v5 = vld [vmem:[#allocation2 + $0x6c] sm:$0xf] }
 0x34d   : > { %16937 = vst [vmem:[#allocation56_spill] sm:$0xff] %v14098_v45  ;;  %v9971_v61 = vor.u32 %v10721_v4, %v9970_v48  ;;  %v9476_v33 = vld [vmem:[#allocation3 + $0x154] sm:$0xf0]  ;;  %v16940_v14 = vrot.slane %v13277_v40, 6  ;;  %v16941_v3 = vrot.slane %v13296_v16, 6  ;;  %v3943_v51 = vshll.u32 %v14052_v18, 16  ;;  %6914 = vmatpush.bf16.msrb.mxu2 %v10786_v38 }
 0x34e   : > { %3070 = vst [vmem:[#allocation3 + $0x298] sm:$0xf] %v2799_v11  ;;  %v3887_v34 = vsel %vm13307_vm1, %v3878_v60, %v3886_v62  ;;  %v4324_v44 = vrot.slane %v16939_v47, 4  ;;  %v16942_v60 = vmov %v16939_v47  ;;  %v10592_v4 = vld [vmem:[#allocation3 + $0x134] sm:$0xf]  ;;  %v2800_v16 = vrot.slane %v2798_v23, 4  ;;  %v14138_v27 = vpop.f32.mrf.mxu1 }
 0x34f   : > { %v3235_v45 = vsel %vm11674_vm8, %v3233_v63, %v16940_v14  ;;  %4181 = vst [vmem:[#allocation3 + $0x25c] sm:$0xf] %v3887_v34  ;;  %v3515_v11 = vsel %vm11674_vm8, %v3513_v7, %v16941_v3  ;;  %v4323_v47 = vsel %vm11747_vm11, %v4321_v13, %v16942_v60  ;;  %v4327_v14 = vrot.slane %v4325_v29, 4  ;;  %6557 = vmatmul.bf16.gmra.mxu2 %v9971_v61 }
 0x350   : > { %3357 = vst [vmem:[#allocation3 + $0x2c0] sm:$0xf] %v3235_v45  ;;  %v4326_v40 = vsel %vm11747_vm11, %v4324_v44, %v4325_v29  ;;  %v5606_v63 = vpack.c.b16 %v5417_v30, %v5417_v30  ;;  %v3888_v48 = vrot.slane %v3886_v62, 4  ;;  %v4328_v3 = vrot.slane %v4219_v46, 7  ;;  %v14141_v62 = vld [vmem:[#allocation2 + $0x70] sm:$0xf] }
 0x351   : > { %3641 = vst [vmem:[#allocation3 + $0x27c] sm:$0xf] %v3515_v11  ;;  %v16943_v7 = vshll.u32 %v14000_v2, 16  ;;  %v16944_v13 = vrot.slane %v14012_v41, 6  ;;  %v16945_v45 = vrot.slane %v14032_v49, 6  ;;  %v9479_v29 = vor.u32 %v10592_v4, %v9476_v33  ;;  %v10785_v30 = vld [vmem:[%s16321_s2 + $0x198] sm:$0xff]  ;;  %v6518_v33 = vpop.f32.mrf.mxu2 }
 0x352   : > { %16946 = vst [vmem:[#allocation116_spill] sm:$0xff] %v14138_v27  ;;  %v16428_v23 = vrot.slane %v14109_v5, 7  ;;  %6680 = vmatmul.bf16.gmra.mxu3 %v5606_v63  ;;  %v6406_v2 = vadd.f32 %v13105_v21, %v6293_v20  ;;  %v2809_v44 = vsel %vm13058_vm14, %v2800_v16, %v14068_v6  ;;  %v3897_v46 = vsel %vm13307_vm1, %v3888_v48, %v14089_v25  ;;  %v10596_v11 = vld [vmem:[#allocation3 + $0x150] sm:$0xf0]  ;;  %v3114_v4 = vld [vmem:[#allocation2 + $0x5c] sm:$0xf]  ;;  %v14161_v16 = vpop.f32.mrf.mxu3 }
 0x353   : > { %v14128_v34 = vrot.slane %v16943_v7, 6  ;;  %v14132_v18 = vrot.slane %v16944_v13, 4  ;;  %v14136_v38 = vrot.slane %v16945_v45, 4  ;;  %4465 = vst [vmem:[#allocation3 + $0x188] sm:$0xf] %v4323_v47  ;;  %v14153_v61 = vrot.slane %v3940_v32, 6  ;;  %6826 = vmatmul.bf16.gmra.mxu1 %v9479_v29  ;;  %6915 = vmatpush.bf16.msrb.mxu2 %v10785_v30  ;;  %v14163_v32 = vpop.f32.mrf.mxu0 }
 0x354   : > { %4466 = vst [vmem:[#allocation3 + $0x1ac] sm:$0xf] %v4326_v40  ;;  %v4329_v21 = vsel %vm11747_vm11, %v4327_v14, %v4328_v3  ;;  %v4330_v20 = vrot.slane %v4328_v3, 4  ;;  %v14157_v60 = vadd.f32 %v6518_v33, %v6406_v2  ;;  %v9474_v47 = vld [vmem:[#allocation3 + $0x130] sm:$0xf]  ;;  %v14159_v63 = vrot.slane %v3943_v51, 7 }
 0x355   : > { %3071 = vst [vmem:[#allocation3 + $0x2bc] sm:$0xf] %v2809_v44  ;;  %v10803_v40 = vld [vmem:[%s16321_s2 + $0x228] sm:$0xff]  ;;  %v10784_v14 = vld [vmem:[%s16321_s2 + $0x190] sm:$0xff]  ;;  %v3237_v48 = vrot.slane %v3114_v4, 6  ;;  %v14177_v51 = vrot.slane %v16428_v23, 4  ;;  %v9475_v2 = vor.u32 %v10596_v11, %v9474_v47  ;;  %v14190_v4 = vor.u32 %v13736_v35, %v13706_v52 }
 0x356   : > { %16947 = vst [vmem:[#allocation95_spill] sm:$0xff] %v14157_v60  ;;  %v16949_v3 = vld [vmem:[#allocation106_spill] sm:$0xff]  ;;  %v14180_v29 = vld [vmem:[#allocation2 + $0x70] sm:$0xf]  ;;  %v3398_v30 = vld [vmem:[#allocation2 + $0x5c] sm:$0xf]  ;;  %7139 = vmatpush.bf16.msrb.mxu0 %v10803_v40 }
 0x357   : > { %4182 = vst [vmem:[#allocation3 + $0x280] sm:$0xf] %v3897_v46  ;;  %v16950_v7 = vrot.slane %v16949_v3, 7  ;;  %v3238_v46 = vsel %vm11674_vm8, %v13416_v55, %v3237_v48  ;;  %v3239_v33 = vrot.slane %v3237_v48, 4  ;;  %6713 = vmatmul.bf16.gmra.mxu0 %v9475_v2  ;;  %6916 = vmatpush.bf16.msrb.mxu2 %v10784_v14  ;;  %v10783_v11 = vld [vmem:[%s16321_s2 + $0x188] sm:$0xff]  ;;  %v16952_v47 = vshll.u32 %v13484_v19, 16 }
 0x358   : > { %16948 = vst [vmem:[#allocation15_spill] sm:$0xff] %v14161_v16  ;;  %v16953_v55 = vshrl.u32 %v13539_v56, 16  ;;  %v16954_v3 = vshll.u32 %v13539_v56, 16  ;;  %v16956_v52 = vrot.slane %v13507_v15, 6  ;;  %v2810_v14 = vrot.slane %v14068_v6, 4  ;;  %v16960_v23 = vld [vmem:[#allocation50_spill] sm:$0xff] }
 0x359   : > { %v4332_v13 = vsel %vm11747_vm11, %v4330_v20, %v16950_v7  ;;  %4467 = vst [vmem:[#allocation3 + $0x1d0] sm:$0xf] %v4329_v21  ;;  %v16951_v21 = vshrl.u32 %v13484_v19, 16  ;;  %v2817_v40 = vrot.slane %v16952_v47, 6  ;;  %v3517_v19 = vrot.slane %v3398_v30, 6  ;;  %v16958_v47 = vld [vmem:[#allocation61_spill] sm:$0xff]  ;;  %v14219_v6 = vpop.f32.mrf.mxu2 }
 0x35a   : > { %4468 = vst [vmem:[#allocation3 + $0x1f4] sm:$0xf] %v4332_v13  ;;  %v3902_v48 = vrot.slane %v16953_v55, 6  ;;  %v3905_v7 = vrot.slane %v16954_v3, 7  ;;  %v14201_v13 = vpop.f32.mrf.mxu1  ;;  %v3241_v35 = vsel %vm11674_vm8, %v3239_v33, %v16956_v52  ;;  %v16957_v2 = vmov %v16956_v52  ;;  %v16959_v3 = vld [vmem:[#allocation40_spill] sm:$0xff]  ;;  %v16962_v16 = vld [vmem:[#allocation14_spill] sm:$0xff] }
 0x35b   : > { %v2814_v20 = vrot.slane %v16951_v21, 5  ;;  %3358 = vst [vmem:[#allocation3 + $0x2e4] sm:$0xf] %v3238_v46  ;;  %v3242_v46 = vrot.slane %v16957_v2, 4  ;;  %v2828_v55 = vor.u32 %v16958_v47, %v13541_v17  ;;  %v3916_v44 = vor.u32 %v16960_v23, %v16959_v3  ;;  %v16961_v45 = vld [vmem:[#allocation12_spill] sm:$0xff]  ;;  %6917 = vmatpush.bf16.msrb.mxu2 %v10783_v11  ;;  %v16967_v2 = vld [vmem:[#allocation63_spill] sm:$0xff]  ;;  %v14234_v47 = vpop.f32.mrf.mxu3  ;;  %v14236_v3 = vpop.f32.mrf.mxu0 }
 0x35c   : > { %16955 = vst [vmem:[#allocation97_spill] sm:$0xff] %v14201_v13  ;;  %v3906_v56 = vor.u32 %v3905_v7, %v3902_v48  ;;  %v14216_v60 = vor.u32 %v16962_v16, %v16961_v45  ;;  %v10730_v15 = vld [vmem:[#allocation3 + $0x580] sm:$0xf0]  ;;  %v9340_v52 = vld [vmem:[#allocation3 + $0x3c] sm:$0xf0]  ;;  %v3898_v30 = vrot.slane %v14089_v25, 4  ;;  %v6298_v25 = vadd.f32 %v14094_v10, %v16967_v2 }
 0x35d   : > { %3359 = vst [vmem:[#allocation3 + $0x308] sm:$0xf] %v3241_v35  ;;  %v2818_v21 = vor.u32 %v2817_v40, %v2814_v20  ;;  %v16964_v20 = vld [vmem:[#allocation33_spill] sm:$0xff]  ;;  %v10006_v48 = vld [vmem:[#allocation3 + $0x560] sm:$0xf]  ;;  %v17017_v13 = vld [vmem:[#allocation42_spill] sm:$0xff] }
 0x35e   : > { %16963 = vst [vmem:[#allocation90_spill] sm:$0xff] %v14219_v6  ;;  %v3518_v17 = vsel %vm11674_vm8, %v16964_v20, %v3517_v19  ;;  %v16965_v45 = vld [vmem:[#allocation37_spill] sm:$0xff]  ;;  %v3519_v20 = vrot.slane %v3517_v19, 4  ;;  %v4221_v2 = vld [vmem:[#allocation2 + $0x4c] sm:$0xf] }
 0x35f   : > { %v2819_v23 = vsel %vm13058_vm14, %v2810_v14, %v2818_v21  ;;  %v2820_v16 = vrot.slane %v2818_v21, 4  ;;  %v16966_v7 = vrot.slane %v16965_v45, 6  ;;  %3642 = vst [vmem:[#allocation3 + $0x2a0] sm:$0xf] %v3518_v17  ;;  %v10782_v11 = vld [vmem:[%s16321_s2 + $0x180] sm:$0xff]  ;;  %v3907_v14 = vsel %vm13307_vm1, %v3898_v30, %v3906_v56 }
 0x360   : > { %16968 = vst [vmem:[#allocation98_spill] sm:$0xff] %v14234_v47  ;;  %v3908_v21 = vrot.slane %v3906_v56, 4  ;;  %v10007_v45 = vor.u32 %v10730_v15, %v10006_v48  ;;  %v2830_v17 = vrot.slane %v2828_v55, 4  ;;  %v10557_v40 = vld [vmem:[#allocation3 + $0x1c] sm:$0xf]  ;;  %6918 = vmatpush.bf16.msrb.mxu2 %v10782_v11 }
 0x361   : > { %v3244_v35 = vsel %vm11674_vm8, %v3242_v46, %v16966_v7  ;;  %16969 = vst [vmem:[#allocation99_spill] sm:$0xff] %v14236_v3  ;;  %v2829_v46 = vsel %vm13058_vm14, %v2820_v16, %v2828_v55  ;;  %v3918_v7 = vrot.slane %v3916_v44, 4  ;;  %v9512_v33 = vld [vmem:[#allocation3 + $0x19c] sm:$0xf0]  ;;  %v14247_v6 = vld [vmem:[#allocation2 + $0x74] sm:$0xf]  ;;  %v9343_v56 = vor.u32 %v10557_v40, %v9340_v52  ;;  %v6523_v24 = vpop.f32.mrf.mxu2 }
 0x362   : > { %3072 = vst [vmem:[#allocation3 + $0x2e0] sm:$0xf] %v2819_v23  ;;  %v3917_v47 = vsel %vm13307_vm1, %v3908_v21, %v3916_v44  ;;  %v2585_v23 = vld [vmem:[#allocation2 + $0x74] sm:$0xf]  ;;  %6562 = vmatmul.bf16.gmra.mxu2 %v10007_v45  ;;  %v2839_v19 = vsel %vm13058_vm14, %v2830_v17, %v14190_v4  ;;  %v14255_v15 = vpop.f32.mrf.mxu1  ;;  %v16971_v44 = vld [vmem:[#allocation53_spill] sm:$0xff] }
 0x363   : > { %3360 = vst [vmem:[#allocation3 + $0x32c] sm:$0xf] %v3244_v35  ;;  %v3927_v55 = vsel %vm13307_vm1, %v3918_v7, %v14216_v60  ;;  %v10601_v30 = vld [vmem:[#allocation3 + $0x17c] sm:$0xf]  ;;  %v16972_v48 = vrot.slane %v16971_v44, 6  ;;  %v4334_v35 = vrot.slane %v4221_v2, 7  ;;  %7032 = vmatmul.bf16.vlgmr.msrb.gmra.mxu3 %v9343_v56 }
 0x364   : > { %3073 = vst [vmem:[#allocation3 + $0x304] sm:$0xf] %v2829_v46  ;;  %v14263_v21 = vld [vmem:[#allocation2 + $0x74] sm:$0xf]  ;;  %v9515_v46 = vor.u32 %v10601_v30, %v9512_v33  ;;  %v2872_v7 = vshrl.u32 %v2585_v23, 16  ;;  %v2875_v11 = vshll.u32 %v2585_v23, 16 }
 0x365   : > { %4183 = vst [vmem:[#allocation3 + $0x2a4] sm:$0xf] %v3907_v14  ;;  %v3521_v16 = vsel %vm11674_vm8, %v3519_v20, %v16972_v48  ;;  %v16973_v52 = vmov %v16972_v48  ;;  %v16974_v14 = vld [vmem:[#allocation17_spill] sm:$0xff]  ;;  %v10605_v17 = vld [vmem:[#allocation3 + $0x198] sm:$0xf0]  ;;  %v16431_v2 = vrot.slane %v14247_v6, 6  ;;  %v14288_v48 = vpop.f32.mrf.mxu0 }
 0x366   : > { %16970 = vst [vmem:[#allocation104_spill] sm:$0xff] %v14255_v15  ;;  %v3522_v40 = vrot.slane %v16973_v52, 4  ;;  %v6411_v45 = vadd.f32 %v16974_v14, %v6298_v25  ;;  %v16976_v15 = vrot.slane %v16975_v12, 6  ;;  %6831 = vmatmul.bf16.gmra.mxu1 %v9515_v46  ;;  %v9510_v56 = vld [vmem:[#allocation3 + $0x178] sm:$0xf]  ;;  %v16978_v33 = vrot.slane %v13872_v1, 6 }
 0x367   : > { %3074 = vst [vmem:[#allocation3 + $0x328] sm:$0xf] %v2839_v19  ;;  %v3690_v19 = vld [vmem:[#allocation2 + $0x74] sm:$0xf]  ;;  %v16979_v25 = vld [vmem:[#allocation29_spill] sm:$0xff]  ;;  %v16980_v23 = vrot.slane %v13879_v53, 6  ;;  %v9511_v1 = vor.u32 %v10605_v17, %v9510_v56 }
 0x368   : > { %4184 = vst [vmem:[#allocation3 + $0x2c8] sm:$0xf] %v3917_v47  ;;  %v3524_v20 = vsel %vm11674_vm8, %v3522_v40, %v16976_v15  ;;  %v14271_v44 = vadd.f32 %v6523_v24, %v6411_v45  ;;  %v3247_v47 = vsel %vm11674_vm8, %v16979_v25, %v16978_v33  ;;  %v16430_v15 = vrot.slane %v14263_v21, 6  ;;  %v14284_v30 = vld [vmem:[#allocation2 + $0x74] sm:$0xf]  ;;  %v14286_v24 = vpop.f32.mrf.mxu3  ;;  %v16984_v40 = vld [vmem:[#allocation118_spill] sm:$0xff] }
 0x369   : > { %4185 = vst [vmem:[#allocation3 + $0x2ec] sm:$0xf] %v3927_v55  ;;  %v16981_v55 = vld [vmem:[#allocation100_spill] sm:$0xff]  ;;  %v2840_v52 = vrot.slane %v14190_v4, 4  ;;  %v4335_v53 = vsel %vm11747_vm11, %v16984_v40, %v4334_v35  ;;  %v16986_v14 = vld [vmem:[#allocation121_spill] sm:$0xff]  ;;  %v3928_v46 = vrot.slane %v14216_v60, 4  ;;  %v14301_v33 = vor.u32 %v14022_v31, %v14010_v54  ;;  %6718 = vmatmul.bf16.gmra.mxu0 %v9511_v1 }
 0x36a   : > { %16977 = vst [vmem:[#allocation108_spill] sm:$0xff] %v14271_v44  ;;  %v3527_v12 = vsel %vm11674_vm8, %v16981_v55, %v16980_v23  ;;  %v4336_v25 = vrot.slane %v4334_v35, 4  ;;  %v3960_v17 = vshrl.u32 %v3690_v19, 16  ;;  %v3963_v56 = vshll.u32 %v3690_v19, 16  ;;  %v4223_v4 = vld [vmem:[#allocation2 + $0x54] sm:$0xf] }
 0x36b   : > { %3643 = vst [vmem:[#allocation3 + $0x2c4] sm:$0xf] %v3521_v16  ;;  %v16985_v16 = vld [vmem:[#allocation31_spill] sm:$0xff]  ;;  %v14304_v23 = vld [vmem:[#allocation2 + $0x78] sm:$0xf]  ;;  %v3937_v54 = vsel %vm13307_vm1, %v3928_v46, %v14301_v33  ;;  %v14316_v19 = vrot.slane %v2872_v7, 5 }
 0x36c   : > { %16982 = vst [vmem:[#allocation16_spill] sm:$0xff] %v14286_v24  ;;  %v14296_v45 = vor.u32 %v16986_v14, %v16985_v16  ;;  %v16987_v31 = vld [vmem:[#allocation19_spill] sm:$0xff]  ;;  %v4340_v1 = vrot.slane %v4223_v4, 7  ;;  %v14322_v40 = vrot.slane %v2875_v11, 6  ;;  %v2587_v16 = vld [vmem:[#allocation2 + $0x7c] sm:$0xf]  ;;  %v5416_v14 = vunpack.c.l.b16 %v14072_v0 }
 0x36d   : > { %16983 = vst [vmem:[#allocation111_spill] sm:$0xff] %v14288_v48  ;;  %v16988_v60 = vrot.slane %v16987_v31, 7  ;;  %v14331_v7 = vrot.slane %v16430_v15, 4  ;;  %v14335_v46 = vrot.slane %v3963_v56, 7  ;;  %v16991_v11 = vld [vmem:[#allocation35_spill] sm:$0xff]  ;;  %v14351_v56 = vor.u32 %v14128_v34, %v14059_v42  ;;  %v14358_v15 = vpop.f32.mrf.mxu0 }
 0x36e   : > { %3361 = vst [vmem:[#allocation3 + $0x350] sm:$0xf] %v3247_v47  ;;  %v16429_v47 = vrot.slane %v14284_v30, 7  ;;  %v2849_v55 = vsel %vm13058_vm14, %v2840_v52, %v14296_v45  ;;  %v14326_v52 = vrot.slane %v16431_v2, 4  ;;  %v4341_v4 = vsel %vm11747_vm11, %v16991_v11, %v4340_v1  ;;  %v14360_v0 = vld [vmem:[#allocation2 + $0x7c] sm:$0xf] }
 0x36f   : > { %3644 = vst [vmem:[#allocation3 + $0x2e8] sm:$0xf] %v3524_v20  ;;  %v4338_v35 = vsel %vm11747_vm11, %v4336_v25, %v16988_v60  ;;  %v14318_v20 = vld [vmem:[#allocation2 + $0x78] sm:$0xf]  ;;  %v14337_v25 = vpop.f32.mrf.mxu2  ;;  %v2892_v60 = vshrl.u32 %v2587_v16, 16  ;;  %v16995_v42 = vrot.slane %v14012_v41, 6 }
 0x370   : > { %3645 = vst [vmem:[#allocation3 + $0x30c] sm:$0xf] %v3527_v12  ;;  %v14320_v12 = vpop.f32.mrf.mxu1  ;;  %v14356_v11 = vpop.f32.mrf.mxu3  ;;  %v16994_v2 = vld [vmem:[#allocation72_spill] sm:$0xff]  ;;  %v16996_v31 = vrot.slane %v14032_v49, 6  ;;  %v2895_v44 = vshll.u32 %v2587_v16, 16  ;;  %v2850_v49 = vrot.slane %v14296_v45, 4 }
 0x371   : > { %4469 = vst [vmem:[#allocation3 + $0x218] sm:$0xf] %v4335_v53  ;;  %v14333_v53 = vrot.slane %v3960_v17, 6  ;;  %v5605_v17 = vpack.c.b16 %v5416_v14, %v5416_v14  ;;  %v10566_v24 = vld [vmem:[#allocation3 + $0x64] sm:$0xf]  ;;  %v3250_v34 = vsel %vm11674_vm8, %v13994_v50, %v16995_v42  ;;  %v4342_v14 = vrot.slane %v4340_v1, 4 }
 0x372   : > { %16989 = vst [vmem:[#allocation112_spill] sm:$0xff] %v14320_v12  ;;  %v14379_v12 = vld [vmem:[#allocation2 + $0x7c] sm:$0xf]  ;;  %v16998_v16 = vld [vmem:[#allocation70_spill] sm:$0xff]  ;;  %v2859_v45 = vsel %vm13058_vm14, %v2850_v49, %v14351_v56  ;;  %v17019_v3 = vrot.slane %v14263_v21, 6 }
 0x373   : > { %3075 = vst [vmem:[#allocation3 + $0x34c] sm:$0xf] %v2849_v55  ;;  %v14344_v55 = vrot.slane %v16429_v47, 4  ;;  %v9376_v47 = vld [vmem:[#allocation3 + $0x84] sm:$0xf0]  ;;  %6567 = vmatmul.bf16.gmra.mxu2 %v5605_v17  ;;  %v17000_v17 = vld [vmem:[#allocation66_spill] sm:$0xff] }
 0x374   : > { %4186 = vst [vmem:[#allocation3 + $0x310] sm:$0xf] %v3937_v54  ;;  %v3692_v54 = vld [vmem:[#allocation2 + $0x7c] sm:$0xf]  ;;  %v9379_v50 = vor.u32 %v10566_v24, %v9376_v47  ;;  %v16432_v42 = vrot.slane %v14379_v12, 7 }
 0x375   : > { %16990 = vst [vmem:[#allocation126_spill] sm:$0xff] %v14337_v25  ;;  %v14376_v25 = vor.u32 %v14159_v63, %v14153_v61  ;;  %v10610_v61 = vld [vmem:[#allocation3 + $0x1c4] sm:$0xf]  ;;  %v3938_v63 = vrot.slane %v14301_v33, 4  ;;  %v3983_v41 = vshll.u32 %v3692_v54, 16 }
 0x376   : > { %4470 = vst [vmem:[#allocation3 + $0x23c] sm:$0xf] %v4338_v35  ;;  %v14354_v35 = vld [vmem:[#allocation2 + $0x7c] sm:$0xf]  ;;  %7037 = vmatmul.bf16.gmra.mxu3 %v9379_v50  ;;  %v14402_v50 = vrot.slane %v2895_v44, 6 }
 0x377   : > { %4471 = vst [vmem:[#allocation3 + $0x260] sm:$0xf] %v4341_v4  ;;  %v6303_v4 = vadd.f32 %v14094_v10, %v16994_v2  ;;  %v9548_v2 = vld [vmem:[#allocation3 + $0x1e4] sm:$0xf0]  ;;  %v6528_v33 = vpop.f32.mrf.mxu2 }
 0x378   : > { %16992 = vst [vmem:[#allocation103_spill] sm:$0xff] %v14356_v11  ;;  %v3530_v11 = vsel %vm11674_vm8, %v13998_v8, %v16996_v31  ;;  %v3980_v8 = vshrl.u32 %v3692_v54, 16  ;;  %v14383_v31 = vpop.f32.mrf.mxu1  ;;  %v9551_v47 = vor.u32 %v10610_v61, %v9548_v2  ;;  %v3947_v54 = vsel %vm13307_vm1, %v3938_v63, %v14376_v25  ;;  %v3403_v2 = vld [vmem:[#allocation2 + $0x70] sm:$0xf]  ;;  %v14408_v61 = vpop.f32.mrf.mxu3  ;;  %v14420_v44 = vld [vmem:[#allocation2 + $0x80] sm:$0xf] }
 0x379   : > { %16993 = vst [vmem:[#allocation109_spill] sm:$0xff] %v14358_v15  ;;  %v6416_v24 = vadd.f32 %v17000_v17, %v6303_v4  ;;  %v3119_v4 = vld [vmem:[#allocation2 + $0x70] sm:$0xf]  ;;  %v3532_v17 = vrot.slane %v3403_v2, 6  ;;  %v17005_v63 = vrot.slane %v14360_v0, 6  ;;  %v17006_v2 = vshrl.u32 %v14141_v62, 16 }
 0x37a   : > { %3362 = vst [vmem:[#allocation3 + $0x374] sm:$0xf] %v3250_v34  ;;  %v16999_v34 = vrot.slane %v16998_v16, 7  ;;  %6836 = vmatmul.bf16.gmra.mxu1 %v9551_v47  ;;  %v14410_v16 = vpop.f32.mrf.mxu0  ;;  %v14416_v47 = vrot.slane %v3980_v8, 6 }
 0x37b   : > { %3646 = vst [vmem:[#allocation3 + $0x330] sm:$0xf] %v3530_v11  ;;  %v14394_v11 = vrot.slane %v2892_v60, 5  ;;  %v17002_v60 = vrot.slane %v14354_v35, 6 }
 0x37c   : > { %16997 = vst [vmem:[#allocation113_spill] sm:$0xff] %v14383_v31  ;;  %v4344_v1 = vsel %vm11747_vm11, %v4342_v14, %v16999_v34  ;;  %v10614_v31 = vld [vmem:[#allocation3 + $0x1e0] sm:$0xf0]  ;;  %v14400_v14 = vadd.f32 %v6528_v33, %v6416_v24  ;;  %v9546_v34 = vld [vmem:[#allocation3 + $0x1c0] sm:$0xf]  ;;  %v14414_v24 = vrot.slane %v17005_v63, 4 }
 0x37d   : > { %4472 = vst [vmem:[#allocation3 + $0x284] sm:$0xf] %v4344_v1  ;;  %v14406_v49 = vrot.slane %v17002_v60, 4  ;;  %v3252_v1 = vrot.slane %v3119_v4, 6  ;;  %v9547_v33 = vor.u32 %v10614_v31, %v9546_v34  ;;  %v2864_v60 = vrot.slane %v17006_v2, 5 }
 0x37e   : > { %3076 = vst [vmem:[#allocation3 + $0x370] sm:$0xf] %v2859_v45  ;;  %v14418_v45 = vrot.slane %v3983_v41, 7  ;;  %v17007_v63 = vshll.u32 %v14141_v62, 16  ;;  %v17008_v41 = vshrl.u32 %v14180_v29, 16  ;;  %v17009_v34 = vshll.u32 %v14180_v29, 16 }
 0x37f   : > { %17001 = vst [vmem:[#allocation10_spill] sm:$0xff] %v14400_v14  ;;  %v3253_v4 = vsel %vm11674_vm8, %v14132_v18, %v3252_v1  ;;  %6723 = vmatmul.bf16.gmra.mxu0 %v9547_v33  ;;  %v3533_v18 = vsel %vm11674_vm8, %v14136_v38, %v3532_v17  ;;  %v2860_v62 = vrot.slane %v14351_v56, 4  ;;  %v4225_v33 = vld [vmem:[#allocation2 + $0x5c] sm:$0xf]  ;;  %v3948_v29 = vrot.slane %v14376_v25, 4  ;;  %v14456_v56 = vpop.f32.mrf.mxu2 }
 0x380   : > { %4187 = vst [vmem:[#allocation3 + $0x334] sm:$0xf] %v3947_v54  ;;  %v14424_v54 = vrot.slane %v16432_v42, 4  ;;  %v2867_v8 = vrot.slane %v17007_v63, 6  ;;  %v3952_v31 = vrot.slane %v17008_v41, 6  ;;  %v3955_v42 = vrot.slane %v17009_v34, 7  ;;  %v14443_v2 = vpop.f32.mrf.mxu1 }
 0x381   : > { %17003 = vst [vmem:[#allocation115_spill] sm:$0xff] %v14408_v61  ;;  %v14433_v61 = vld [vmem:[#allocation2 + $0x84] sm:$0xf]  ;;  %v4346_v34 = vrot.slane %v4225_v33, 7  ;;  %v14452_v38 = vor.u32 %v14322_v40, %v14316_v19  ;;  %v9412_v25 = vld [vmem:[#allocation3 + $0xcc] sm:$0xf0]  ;;  %v14469_v33 = vor.u32 %v14335_v46, %v14333_v53  ;;  %v6308_v53 = vadd.f32 %v14094_v10, %v17017_v13 }
 0x382   : > { %17004 = vst [vmem:[#allocation110_spill] sm:$0xff] %v14410_v16  ;;  %v2868_v63 = vor.u32 %v2867_v8, %v2864_v60  ;;  %v14447_v16 = vld [vmem:[#allocation2 + $0x84] sm:$0xf]  ;;  %v3956_v41 = vor.u32 %v3955_v42, %v3952_v31  ;;  %v2912_v14 = vshrl.u32 %v14433_v61, 16  ;;  %v9338_v60 = vld [vmem:[#allocation3 + $0x18] sm:$0xf]  ;;  %v14474_v15 = vpop.f32.mrf.mxu0 }
 0x383   : > { %3363 = vst [vmem:[#allocation3 + $0x398] sm:$0xf] %v3253_v4  ;;  %v10561_v8 = vld [vmem:[#allocation3 + $0x38] sm:$0xf0]  ;;  %v14460_v4 = vld [vmem:[#allocation2 + $0x84] sm:$0xf] }
 0x384   : > { %17010 = vst [vmem:[#allocation68_spill] sm:$0xff] %v14443_v2  ;;  %v2915_v2 = vshll.u32 %v14433_v61, 16  ;;  %v3254_v42 = vrot.slane %v3252_v1, 4  ;;  %v3957_v19 = vsel %vm13307_vm1, %v3948_v29, %v3956_v41  ;;  %v3534_v40 = vrot.slane %v3532_v17, 4  ;;  %v17012_v31 = vld [vmem:[#allocation44_spill] sm:$0xff]  ;;  %v10802_v1 = vld [vmem:[%s16321_s2 + $0x220] sm:$0xff] }
 0x385   : > { %3647 = vst [vmem:[#allocation3 + $0x354] sm:$0xf] %v3533_v18  ;;  %v2869_v18 = vsel %vm13058_vm14, %v2860_v62, %v2868_v63  ;;  %v4347_v61 = vsel %vm11747_vm11, %v17012_v31, %v4346_v34  ;;  %v14472_v62 = vpop.f32.mrf.mxu3  ;;  %v4348_v17 = vrot.slane %v4346_v34, 4  ;;  %v17015_v29 = vld [vmem:[#allocation30_spill] sm:$0xff]  ;;  %v14481_v31 = vld [vmem:[#allocation2 + $0x80] sm:$0xf]  ;;  %v9339_v46 = vor.u32 %v10561_v8, %v9338_v60  ;;  %7140 = vmatpush.bf16.msrb.mxu0 %v10802_v1 }
 0x386   : > { %17011 = vst [vmem:[#allocation119_spill] sm:$0xff] %v14456_v56  ;;  %v9584_v56 = vld [vmem:[#allocation3 + $0x22c] sm:$0xf0]  ;;  %v3536_v34 = vsel %vm11674_vm8, %v3534_v40, %v17019_v3  ;;  %v17020_v27 = vrot.slane %v17015_v29, 7  ;;  %v17021_v60 = vld [vmem:[#allocation81_spill] sm:$0xff]  ;;  %v3958_v3 = vrot.slane %v3956_v41, 4 }
 0x387   : > { %3077 = vst [vmem:[#allocation3 + $0x394] sm:$0xf] %v2869_v18  ;;  %v17016_v18 = vrot.slane %v17015_v29, 7  ;;  %6919 = vmatmul.bf16.vlgmr.msrb.gmra.mxu2 %v9339_v46  ;;  %v14501_v40 = vrot.slane %v2912_v14, 5  ;;  %v6533_v41 = vpop.f32.mrf.mxu2  ;;  %v3993_v46 = vshll.u32 %v14481_v31, 16 }
 0x388   : > { %17013 = vst [vmem:[#allocation120_spill] sm:$0xff] %v14472_v62  ;;  %v17018_v62 = vrot.slane %v14247_v6, 6  ;;  %v4350_v13 = vsel %vm11747_vm11, %v4348_v17, %v17020_v27  ;;  %v17022_v6 = vrot.slane %v17021_v60, 7  ;;  %v6455_v1 = vpop.f32.mrf.mxu1  ;;  %v17023_v17 = vld [vmem:[#allocation21_spill] sm:$0xff]  ;;  %v3967_v14 = vsel %vm13307_vm1, %v3958_v3, %v14469_v33 }
 0x389   : > { %17014 = vst [vmem:[#allocation79_spill] sm:$0xff] %v14474_v15  ;;  %v4351_v48 = vrot.slane %v17016_v18, 4  ;;  %v10575_v18 = vld [vmem:[#allocation3 + $0xac] sm:$0xf]  ;;  %v6421_v60 = vadd.f32 %v17023_v17, %v6308_v53  ;;  %v3121_v53 = vld [vmem:[#allocation2 + $0x78] sm:$0xf] }
 0x38a   : > { %4188 = vst [vmem:[#allocation3 + $0x358] sm:$0xf] %v3957_v19  ;;  %v3256_v15 = vsel %vm11674_vm8, %v3254_v42, %v17018_v62  ;;  %v3694_v19 = vld [vmem:[#allocation2 + $0x84] sm:$0xf]  ;;  %v9415_v21 = vor.u32 %v10575_v18, %v9412_v25  ;;  %v2870_v62 = vrot.slane %v2868_v63, 4  ;;  %v3968_v3 = vrot.slane %v14469_v33, 4 }
 0x38b   : > { %4473 = vst [vmem:[#allocation3 + $0x2a8] sm:$0xf] %v4347_v61  ;;  %v4353_v8 = vsel %vm11747_vm11, %v4351_v48, %v17022_v6  ;;  %v10619_v42 = vld [vmem:[#allocation3 + $0x20c] sm:$0xf]  ;;  %v3990_v61 = vshrl.u32 %v14481_v31, 16  ;;  %v4000_v27 = vshrl.u32 %v3694_v19, 16  ;;  %v6342_v6 = vpop.f32.mrf.mxu0 }
 0x38c   : > { %3364 = vst [vmem:[#allocation3 + $0x3bc] sm:$0xf] %v3256_v15  ;;  %v9587_v29 = vor.u32 %v10619_v42, %v9584_v56  ;;  %7042 = vmatmul.bf16.gmra.mxu3 %v9415_v21  ;;  %v2879_v48 = vsel %vm13058_vm14, %v2870_v62, %v14452_v38  ;;  %v14512_v63 = vld [vmem:[#allocation2 + $0x84] sm:$0xf]  ;;  %v14514_v56 = vrot.slane %v2915_v2, 6  ;;  %v4003_v18 = vshll.u32 %v3694_v19, 16 }
 0x38d   : > { %3648 = vst [vmem:[#allocation3 + $0x378] sm:$0xf] %v3536_v34  ;;  %v10623_v25 = vld [vmem:[#allocation3 + $0x228] sm:$0xf0]  ;;  %v14517_v34 = vadd.f32 %v6533_v41, %v6421_v60  ;;  %v9582_v21 = vld [vmem:[#allocation3 + $0x208] sm:$0xf] }
 0x38e   : > { %4474 = vst [vmem:[#allocation3 + $0x2cc] sm:$0xf] %v4350_v13  ;;  %6841 = vmatmul.bf16.gmra.mxu1 %v9587_v29  ;;  %v14519_v13 = vpop.f32.mrf.mxu3  ;;  %v3405_v42 = vld [vmem:[#allocation2 + $0x78] sm:$0xf]  ;;  %v14521_v62 = vrot.slane %v4000_v27, 6  ;;  %v9583_v2 = vor.u32 %v10623_v25, %v9582_v21  ;;  %v17024_v29 = vshrl.u32 %v14304_v23, 16  ;;  %v14641_v31 = vor.u32 %v14514_v56, %v14501_v40 }
 0x38f   : > { %4475 = vst [vmem:[#allocation3 + $0x2f0] sm:$0xf] %v4353_v8  ;;  %v3258_v8 = vrot.slane %v3121_v53, 6  ;;  %v3538_v1 = vrot.slane %v3405_v42, 6  ;;  %v14524_v17 = vld [vmem:[#allocation2 + $0x88] sm:$0xf] }
 0x390   : > { %3078 = vst [vmem:[#allocation3 + $0x3b8] sm:$0xf] %v2879_v48  ;;  %v14526_v60 = vld [vmem:[#allocation2 + $0x8c] sm:$0xf]  ;;  %v2884_v48 = vrot.slane %v17024_v29, 5  ;;  %6728 = vmatmul.bf16.gmra.mxu0 %v9583_v2  ;;  %v17026_v25 = vshrl.u32 %v14318_v20, 16  ;;  %v6457_v29 = vpop.f32.mrf.mxu1 }
 0x391   : > { %4189 = vst [vmem:[#allocation3 + $0x37c] sm:$0xf] %v3967_v14  ;;  %v3259_v19 = vsel %vm11674_vm8, %v14326_v52, %v3258_v8  ;;  %v17025_v14 = vshll.u32 %v14304_v23, 16  ;;  %v14535_v27 = vld [vmem:[#allocation2 + $0x88] sm:$0xf]  ;;  %v17027_v6 = vshll.u32 %v14318_v20, 16  ;;  %v3539_v52 = vsel %vm11674_vm8, %v14331_v7, %v3538_v1 }
 0x392   : > { %3365 = vst [vmem:[#allocation3 + $0x3e0] sm:$0xf] %v3259_v19  ;;  %v3972_v53 = vrot.slane %v17026_v25, 6  ;;  %v14544_v42 = vrot.slane %v4003_v18, 7  ;;  %v2880_v23 = vrot.slane %v14452_v38, 4  ;;  %v17028_v2 = vrot.slane %v13924_v36, 7 }
 0x393   : > { %v2887_v41 = vrot.slane %v17025_v14, 6  ;;  %v3975_v21 = vrot.slane %v17027_v6, 7  ;;  %3649 = vst [vmem:[#allocation3 + $0x39c] sm:$0xf] %v3539_v52  ;;  %v17029_v19 = vld [vmem:[#allocation94_spill] sm:$0xff] }
 0x394   : > { %v4356_v25 = vsel %vm11747_vm11, %v17029_v19, %v17028_v2  ;;  %v10570_v36 = vld [vmem:[#allocation3 + $0x80] sm:$0xf0]  ;;  %v2592_v29 = vld [vmem:[#allocation2 + $0x90] sm:$0xf]  ;;  %v3260_v2 = vrot.slane %v3258_v8, 4  ;;  %v14570_v19 = vor.u32 %v14418_v45, %v14416_v47  ;;  %v17032_v47 = vrot.slane %v14360_v0, 6 }
 0x395   : > { %v2888_v14 = vor.u32 %v2887_v41, %v2884_v48  ;;  %v3976_v7 = vor.u32 %v3975_v21, %v3972_v53  ;;  %4476 = vst [vmem:[#allocation3 + $0x314] sm:$0xf] %v4356_v25  ;;  %v14558_v41 = vpop.f32.mrf.mxu2  ;;  %v3540_v53 = vrot.slane %v3538_v1, 4  ;;  %v14566_v21 = vor.u32 %v14402_v50, %v14394_v11  ;;  %v9374_v48 = vld [vmem:[#allocation3 + $0x60] sm:$0xf] }
 0x396   : > { %v14572_v25 = vpop.f32.mrf.mxu3  ;;  %v9448_v38 = vld [vmem:[#allocation3 + $0x114] sm:$0xf0]  ;;  %v17030_v8 = vld [vmem:[#allocation76_spill] sm:$0xff]  ;;  %v9375_v1 = vor.u32 %v10570_v36, %v9374_v48  ;;  %v17031_v11 = vrot.slane %v14354_v35, 6  ;;  %v2942_v6 = vshrl.u32 %v2592_v29, 16  ;;  %v17033_v0 = vrot.slane %v14109_v5, 7 }
 0x397   : > { %v2889_v52 = vsel %vm13058_vm14, %v2880_v23, %v2888_v14  ;;  %v3977_v33 = vsel %vm13307_vm1, %v3968_v3, %v3976_v7  ;;  %v6344_v23 = vpop.f32.mrf.mxu0  ;;  %v6313_v3 = vadd.f32 %v14094_v10, %v17030_v8  ;;  %v9620_v18 = vld [vmem:[#allocation3 + $0x274] sm:$0xf0]  ;;  %v3542_v45 = vsel %vm11674_vm8, %v3540_v53, %v17032_v47  ;;  %v10628_v15 = vld [vmem:[#allocation3 + $0x254] sm:$0xf] }
 0x398   : > { %3079 = vst [vmem:[#allocation3 + $0x3dc] sm:$0xf] %v2889_v52  ;;  %v14574_v52 = vld [vmem:[#allocation2 + $0x8c] sm:$0xf]  ;;  %v3262_v50 = vsel %vm11674_vm8, %v3260_v2, %v17031_v11  ;;  %v2945_v23 = vshll.u32 %v2592_v29, 16  ;;  %6924 = vmatmul.bf16.gmra.mxu2 %v9375_v1  ;;  %v2890_v8 = vrot.slane %v2888_v14, 4  ;;  %v6807_v2 = vpop.f32.mrf.mxu1  ;;  %v9623_v11 = vor.u32 %v10628_v15, %v9620_v18 }
 0x399   : > { %4190 = vst [vmem:[#allocation3 + $0x3a0] sm:$0xf] %v3977_v33  ;;  %v10584_v33 = vld [vmem:[#allocation3 + $0xf4] sm:$0xf]  ;;  %v3978_v48 = vrot.slane %v3976_v7, 4  ;;  %v4359_v29 = vsel %vm11747_vm11, %v14048_v22, %v17033_v0  ;;  %v17034_v14 = vld [vmem:[#allocation11_spill] sm:$0xff] }
 0x39a   : > { %3366 = vst [vmem:[#allocation3 + $0x404] sm:$0xf] %v3262_v50  ;;  %v9451_v20 = vor.u32 %v10584_v33, %v9448_v38  ;;  %v14593_v53 = vld [vmem:[#allocation2 + $0x90] sm:$0xf]  ;;  %v6426_v7 = vadd.f32 %v17034_v14, %v6313_v3  ;;  %v2899_v38 = vsel %vm13058_vm14, %v2890_v8, %v14566_v21  ;;  %v14605_v18 = vrot.slane %v2942_v6, 5 }
 0x39b   : > { %3650 = vst [vmem:[#allocation3 + $0x3c0] sm:$0xf] %v3542_v45  ;;  %v14595_v1 = vld [vmem:[#allocation2 + $0x90] sm:$0xf]  ;;  %v3987_v15 = vsel %vm13307_vm1, %v3978_v48, %v14570_v19  ;;  %v10632_v50 = vld [vmem:[#allocation3 + $0x270] sm:$0xf0] }
 0x39c   : > { %7047 = vmatmul.bf16.gmra.mxu3 %v9451_v20  ;;  %4477 = vst [vmem:[#allocation3 + $0x338] sm:$0xf] %v4359_v29  ;;  %v14607_v47 = vrot.slane %v2945_v23, 6  ;;  %v17035_v20 = vld [vmem:[#allocation87_spill] sm:$0xff]  ;;  %v3123_v33 = vld [vmem:[#allocation2 + $0x80] sm:$0xf] }
 0x39d   : > { %v6538_v22 = vpop.f32.mrf.mxu2  ;;  %3080 = vst [vmem:[#allocation3 + $0x400] sm:$0xf] %v2899_v38  ;;  %v6315_v3 = vadd.f32 %v14094_v10, %v17035_v20  ;;  %v3276_v8 = vrot.slane %v14593_v53, 6  ;;  %v9618_v6 = vld [vmem:[#allocation3 + $0x250] sm:$0xf]  ;;  %v3264_v0 = vrot.slane %v3123_v33, 6 }
 0x39e   : > { %v14611_v45 = vadd.f32 %v6538_v22, %v6426_v7  ;;  %6846 = vmatmul.bf16.gmra.mxu1 %v9623_v11  ;;  %4191 = vst [vmem:[#allocation3 + $0x3c4] sm:$0xf] %v3987_v15  ;;  %v14614_v48 = vpop.f32.mrf.mxu3  ;;  %v3407_v29 = vld [vmem:[#allocation2 + $0x80] sm:$0xf]  ;;  %v9619_v23 = vor.u32 %v10632_v50, %v9618_v6  ;;  %v17036_v11 = vshrl.u32 %v14420_v44, 16  ;;  %v17037_v15 = vshll.u32 %v14420_v44, 16 }
 0x39f   : > { %v6694_v2 = vpop.f32.mrf.mxu0  ;;  %v3544_v38 = vrot.slane %v3407_v29, 6  ;;  %v3265_v7 = vsel %vm11674_vm8, %v14406_v49, %v3264_v0  ;;  %v3266_v5 = vrot.slane %v3264_v0, 4  ;;  %v3697_v36 = vld [vmem:[#allocation2 + $0x90] sm:$0xf]  ;;  %v3992_v50 = vrot.slane %v3990_v61, 6 }
 0x3a0   : > { %v2904_v22 = vrot.slane %v17036_v11, 5  ;;  %v2907_v20 = vrot.slane %v17037_v15, 6  ;;  %v17038_v2 = vld [vmem:[#allocation85_spill] sm:$0xff]  ;;  %6733 = vmatmul.bf16.gmra.mxu0 %v9619_v23  ;;  %3367 = vst [vmem:[#allocation3 + $0x428] sm:$0xf] %v3265_v7  ;;  %v3995_v33 = vrot.slane %v3993_v46, 7  ;;  %v6809_v6 = vpop.f32.mrf.mxu1 }
 0x3a1   : > { %v6428_v35 = vadd.f32 %v17038_v2, %v6315_v3  ;;  %v3545_v49 = vsel %vm11674_vm8, %v14414_v24, %v3544_v38  ;;  %v2900_v44 = vrot.slane %v14566_v21, 4  ;;  %v17039_v0 = vrot.slane %v14447_v16, 6  ;;  %v4230_v7 = vld [vmem:[#allocation2 + $0x70] sm:$0xf]  ;;  %v9692_v53 = vld [vmem:[#allocation3 + $0x304] sm:$0xf0] }
 0x3a2   : > { %v2908_v29 = vor.u32 %v2907_v20, %v2904_v22  ;;  %3651 = vst [vmem:[#allocation3 + $0x3e4] sm:$0xf] %v3545_v49  ;;  %v3546_v23 = vrot.slane %v3544_v38, 4  ;;  %v14637_v61 = vld [vmem:[#allocation2 + $0x90] sm:$0xf]  ;;  %v3988_v24 = vrot.slane %v14570_v19, 4  ;;  %v3996_v46 = vor.u32 %v3995_v33, %v3992_v50 }
 0x3a3   : > { %v3268_v3 = vsel %vm11674_vm8, %v3266_v5, %v17039_v0  ;;  %v14646_v21 = vor.u32 %v14544_v42, %v14521_v62  ;;  %v4030_v11 = vshrl.u32 %v3697_v36, 16  ;;  %v10579_v5 = vld [vmem:[#allocation3 + $0xc8] sm:$0xf0]  ;;  %v4361_v20 = vrot.slane %v4230_v7, 7  ;;  %v9410_v62 = vld [vmem:[#allocation3 + $0xa8] sm:$0xf] }
 0x3a4   : > { %3368 = vst [vmem:[#allocation3 + $0x44c] sm:$0xf] %v3268_v3  ;;  %v2909_v38 = vsel %vm13058_vm14, %v2900_v44, %v2908_v29  ;;  %v2910_v15 = vrot.slane %v2908_v29, 4  ;;  %v4033_v2 = vshll.u32 %v3697_v36, 16  ;;  %v3997_v40 = vsel %vm13307_vm1, %v3988_v24, %v3996_v46  ;;  %v9484_v42 = vld [vmem:[#allocation3 + $0x15c] sm:$0xf0] }
 0x3a5   : > { %v6540_v22 = vpop.f32.mrf.mxu2  ;;  %3081 = vst [vmem:[#allocation3 + $0x424] sm:$0xf] %v2909_v38  ;;  %v3998_v56 = vrot.slane %v3996_v46, 4  ;;  %v17041_v6 = vrot.slane %v14460_v4, 6  ;;  %v17042_v44 = vld [vmem:[#allocation38_spill] sm:$0xff]  ;;  %v9411_v0 = vor.u32 %v10579_v5, %v9410_v62  ;;  %v14671_v24 = vrot.slane %v3276_v8, 4 }
 0x3a6   : > { %v14650_v49 = vadd.f32 %v6540_v22, %v6428_v35  ;;  %v14654_v19 = vpop.f32.mrf.mxu3  ;;  %v2919_v33 = vsel %vm13058_vm14, %v2910_v15, %v14641_v31  ;;  %4192 = vst [vmem:[#allocation3 + $0x3e8] sm:$0xf] %v3997_v40  ;;  %v6318_v29 = vadd.f32 %v14094_v10, %v17042_v44  ;;  %v10593_v3 = vld [vmem:[#allocation3 + $0x13c] sm:$0xf]  ;;  %v9656_v46 = vld [vmem:[#allocation3 + $0x2bc] sm:$0xf0]  ;;  %v4362_v15 = vsel %vm11747_vm11, %v14177_v51, %v4361_v20 }
 0x3a7   : > { %17040 = vst [vmem:[#allocation82_spill] sm:$0xff] %v14654_v19  ;;  %v6696_v50 = vpop.f32.mrf.mxu0  ;;  %v3548_v35 = vsel %vm11674_vm8, %v3546_v23, %v17041_v6  ;;  %v4007_v7 = vsel %vm13307_vm1, %v3998_v56, %v14646_v21  ;;  %v4363_v22 = vrot.slane %v4361_v20, 4  ;;  %v14673_v23 = vrot.slane %v4030_v11, 6  ;;  %v10641_v5 = vld [vmem:[#allocation3 + $0x2b8] sm:$0xf0] }
 0x3a8   : > { %3082 = vst [vmem:[#allocation3 + $0x448] sm:$0xf] %v2919_v33  ;;  %v14675_v38 = vrot.slane %v4033_v2, 7  ;;  %6929 = vmatmul.bf16.gmra.mxu2 %v9411_v0  ;;  %v9487_v10 = vor.u32 %v10593_v3, %v9484_v42  ;;  %v14680_v40 = vpop.f32.mrf.mxu1  ;;  %v10637_v56 = vld [vmem:[#allocation3 + $0x29c] sm:$0xf]  ;;  %v17043_v33 = vrot.slane %v14284_v30, 7 }
 0x3a9   : > { %4193 = vst [vmem:[#allocation3 + $0x40c] sm:$0xf] %v4007_v7  ;;  %v9654_v62 = vld [vmem:[#allocation3 + $0x298] sm:$0xf]  ;;  %v3125_v50 = vld [vmem:[#allocation2 + $0x88] sm:$0xf]  ;;  %v9659_v42 = vor.u32 %v10637_v56, %v9656_v46 }
 0x3aa   : > { %3652 = vst [vmem:[#allocation3 + $0x408] sm:$0xf] %v3548_v35  ;;  %v4365_v11 = vsel %vm11747_vm11, %v4363_v22, %v17043_v33  ;;  %v17044_v2 = vld [vmem:[#allocation93_spill] sm:$0xff]  ;;  %v17045_v35 = vrot.slane %v14447_v16, 6  ;;  %v3270_v0 = vrot.slane %v3125_v50, 6  ;;  %v9655_v22 = vor.u32 %v10641_v5, %v9654_v62  ;;  %v17048_v33 = vld [vmem:[#allocation102_spill] sm:$0xff] }
 0x3ab   : > { %v6431_v6 = vadd.f32 %v17044_v2, %v6318_v29  ;;  %v3126_v3 = vld [vmem:[#allocation2 + $0x8c] sm:$0xf]  ;;  %v3409_v51 = vld [vmem:[#allocation2 + $0x88] sm:$0xf]  ;;  %v14692_v20 = vld [vmem:[%s16324_s5] ss:$0 sm:$0xff] }
 0x3ac   : > { %7052 = vmatmul.bf16.gmra.mxu3 %v9487_v10  ;;  %v3269_v44 = vrot.slane %v17045_v35, 4  ;;  %v6320_v30 = vadd.f32 %v14692_v20, %v13971_v37  ;;  %v17046_v10 = vrot.slane %v14460_v4, 6  ;;  %v3550_v46 = vrot.slane %v3409_v51, 6  ;;  %v3410_v56 = vld [vmem:[#allocation2 + $0x8c] sm:$0xf]  ;;  %v17047_v50 = vld [vmem:[#allocation125_spill] sm:$0xff] }
 0x3ad   : > { %v6543_v7 = vpop.f32.mrf.mxu2  ;;  %4478 = vst [vmem:[#allocation3 + $0x35c] sm:$0xf] %v4362_v15  ;;  %v6587_v2 = vadd.f32 %v17048_v33, %v17047_v50  ;;  %v17049_v36 = vshrl.u32 %v14524_v17, 16  ;;  %v10801_v15 = vld [vmem:[%s16321_s2 + $0x218] sm:$0xff]  ;;  %v2920_v62 = vrot.slane %v14641_v31, 4  ;;  %v3273_v51 = vrot.slane %v3126_v3, 6 }
 0x3ae   : > { %v3549_v29 = vrot.slane %v17046_v10, 4  ;;  %v14698_v16 = vadd.f32 %v6543_v7, %v6431_v6  ;;  %6851 = vmatmul.bf16.gmra.mxu1 %v9659_v42  ;;  %v3271_v35 = vsel %vm11674_vm8, %v3269_v44, %v3270_v0  ;;  %4479 = vst [vmem:[#allocation3 + $0x380] sm:$0xf] %v4365_v11  ;;  %v14706_v5 = vpop.f32.mrf.mxu3  ;;  %v17051_v6 = vshll.u32 %v14524_v17, 16  ;;  %v14716_v7 = vld [vmem:[#allocation2 + $0x94] sm:$0xf]  ;;  %7141 = vmatpush.bf16.msrb.mxu0 %v10801_v15 }
 0x3af   : > { %v2924_v37 = vrot.slane %v17049_v36, 5  ;;  %17050 = vst [vmem:[#allocation88_spill] sm:$0xff] %v14706_v5  ;;  %v6699_v4 = vpop.f32.mrf.mxu0  ;;  %v3272_v11 = vrot.slane %v3270_v0, 4  ;;  %v17052_v10 = vshrl.u32 %v14526_v60, 16  ;;  %v3553_v33 = vrot.slane %v3410_v56, 6 }
 0x3b0   : > { %3369 = vst [vmem:[#allocation3 + $0x470] sm:$0xf] %v3271_v35  ;;  %v2927_v42 = vrot.slane %v17051_v6, 6  ;;  %v3551_v44 = vsel %vm11674_vm8, %v3549_v29, %v3550_v46  ;;  %v14718_v36 = vadd.f32 %v6699_v4, %v6587_v2  ;;  %v17053_v31 = vshll.u32 %v14526_v60, 16  ;;  %6738 = vmatmul.bf16.gmra.mxu0 %v9655_v22  ;;  %v9518_v5 = vld [vmem:[#allocation3 + $0x180] sm:$0xf] }
 0x3b1   : > { %v2934_v50 = vrot.slane %v17052_v10, 5  ;;  %v17054_v17 = vshrl.u32 %v14535_v27, 16  ;;  %v17055_v6 = vshll.u32 %v14535_v27, 16  ;;  %3653 = vst [vmem:[#allocation3 + $0x42c] sm:$0xf] %v3551_v44  ;;  %v3274_v0 = vsel %vm11674_vm8, %v3272_v11, %v3273_v51 }
 0x3b2   : > { %v2928_v35 = vor.u32 %v2927_v42, %v2924_v37  ;;  %v2937_v14 = vrot.slane %v17053_v31, 6  ;;  %v17056_v2 = vshrl.u32 %v14574_v52, 16  ;;  %v17057_v56 = vshll.u32 %v14574_v52, 16  ;;  %v14735_v42 = vpop.f32.mrf.mxu1  ;;  %3370 = vst [vmem:[#allocation3 + $0x494] sm:$0xf] %v3274_v0  ;;  %v17058_v31 = vld [vmem:[#allocation96_spill] sm:$0xff] }
 0x3b3   : > { %v4012_v3 = vrot.slane %v17054_v17, 6  ;;  %v4015_v29 = vrot.slane %v17055_v6, 7  ;;  %v3552_v15 = vrot.slane %v3550_v46, 4  ;;  %v4232_v10 = vld [vmem:[#allocation2 + $0x78] sm:$0xf]  ;;  %v6433_v11 = vadd.f32 %v17058_v31, %v6320_v30 }
 0x3b4   : > { %v4022_v4 = vrot.slane %v17056_v2, 6  ;;  %v4025_v37 = vrot.slane %v17057_v56, 7  ;;  %v2929_v27 = vsel %vm13058_vm14, %v2920_v62, %v2928_v35  ;;  %v2930_v44 = vrot.slane %v2928_v35, 4  ;;  %v10588_v17 = vld [vmem:[#allocation3 + $0x110] sm:$0xf0] }
 0x3b5   : > { %v2938_v22 = vor.u32 %v2937_v14, %v2934_v50  ;;  %3083 = vst [vmem:[#allocation3 + $0x46c] sm:$0xf] %v2929_v27  ;;  %v4008_v6 = vrot.slane %v14646_v21, 4  ;;  %v4016_v52 = vor.u32 %v4015_v29, %v4012_v3  ;;  %v3554_v46 = vsel %vm11674_vm8, %v3552_v15, %v3553_v33  ;;  %v6545_v2 = vpop.f32.mrf.mxu2  ;;  %v9446_v50 = vld [vmem:[#allocation3 + $0xf0] sm:$0xf] }
 0x3b6   : > { %v3275_v56 = vrot.slane %v3273_v51, 4  ;;  %v4026_v62 = vor.u32 %v4025_v37, %v4022_v4  ;;  %3654 = vst [vmem:[#allocation3 + $0x450] sm:$0xf] %v3554_v46  ;;  %v4367_v35 = vrot.slane %v4232_v10, 7  ;;  %v14745_v14 = vadd.f32 %v6545_v2, %v6433_v11  ;;  %v2594_v51 = vld [vmem:[#allocation2 + $0x98] sm:$0xf]  ;;  %v14753_v0 = vpop.f32.mrf.mxu3 }
 0x3b7   : > { %v2939_v60 = vsel %vm13058_vm14, %v2930_v44, %v2938_v22  ;;  %v4017_v30 = vsel %vm13307_vm1, %v4008_v6, %v4016_v52  ;;  %v4018_v21 = vrot.slane %v4016_v52, 4  ;;  %v3555_v3 = vrot.slane %v3553_v33, 4  ;;  %17059 = vst [vmem:[#allocation91_spill] sm:$0xff] %v14753_v0  ;;  %v9520_v4 = vld [vmem:[#allocation3 + $0x1a4] sm:$0xf0]  ;;  %v14755_v37 = vpop.f32.mrf.mxu0 }
 0x3b8   : > { %3084 = vst [vmem:[#allocation3 + $0x490] sm:$0xf] %v2939_v60  ;;  %v14751_v29 = vor.u32 %v14607_v47, %v14605_v18  ;;  %v9447_v15 = vor.u32 %v10588_v17, %v9446_v50  ;;  %v4368_v60 = vsel %vm11747_vm11, %v14344_v55, %v4367_v35  ;;  %v14760_v27 = vld [vmem:[#allocation2 + $0x98] sm:$0xf]  ;;  %v6323_v33 = vadd.f32 %v14692_v20, %v14041_v57  ;;  %v10602_v44 = vld [vmem:[#allocation3 + $0x184] sm:$0xf] }
 0x3b9   : > { %4194 = vst [vmem:[#allocation3 + $0x430] sm:$0xf] %v4017_v30  ;;  %v3277_v18 = vsel %vm11674_vm8, %v3275_v56, %v3276_v8  ;;  %v4027_v47 = vsel %vm13307_vm1, %v4018_v21, %v4026_v62  ;;  %v17060_v10 = vrot.slane %v14595_v1, 6  ;;  %v14776_v55 = vor.u32 %v14675_v38, %v14673_v23  ;;  %v3698_v11 = vld [vmem:[#allocation2 + $0x94] sm:$0xf] }
 0x3ba   : > { %4480 = vst [vmem:[#allocation3 + $0x3a4] sm:$0xf] %v4368_v60  ;;  %v2955_v57 = vshll.u32 %v14716_v7, 16  ;;  %v4369_v17 = vrot.slane %v4367_v35, 4  ;;  %v2962_v8 = vshrl.u32 %v2594_v51, 16  ;;  %6934 = vmatmul.bf16.gmra.mxu2 %v9447_v15  ;;  %v9523_v52 = vor.u32 %v10602_v44, %v9520_v4  ;;  %v14779_v56 = vpop.f32.mrf.mxu1 }
 0x3bb   : > { %v3557_v31 = vsel %vm11674_vm8, %v3555_v3, %v17060_v10  ;;  %3371 = vst [vmem:[#allocation3 + $0x4b8] sm:$0xf] %v3277_v18  ;;  %v3699_v6 = vld [vmem:[#allocation2 + $0x98] sm:$0xf]  ;;  %v2940_v46 = vrot.slane %v2938_v22, 4  ;;  %v2965_v2 = vshll.u32 %v2594_v51, 16  ;;  %v6436_v35 = vadd.f32 %v14007_v43, %v6323_v33 }
 0x3bc   : > { %4195 = vst [vmem:[#allocation3 + $0x454] sm:$0xf] %v4027_v47  ;;  %v10646_v50 = vld [vmem:[#allocation3 + $0x2e4] sm:$0xf]  ;;  %v4028_v30 = vrot.slane %v4026_v62, 4  ;;  %v17061_v23 = vrot.slane %v14379_v12, 7  ;;  %7057 = vmatmul.bf16.gmra.mxu3 %v9523_v52 }
 0x3bd   : > { %3655 = vst [vmem:[#allocation3 + $0x474] sm:$0xf] %v3557_v31  ;;  %v3282_v21 = vrot.slane %v14760_v27, 6  ;;  %v9695_v3 = vor.u32 %v10646_v50, %v9692_v53  ;;  %v2949_v22 = vsel %vm13058_vm14, %v2940_v46, %v14751_v29  ;;  %v4050_v51 = vshrl.u32 %v3699_v6, 16  ;;  %v6548_v62 = vpop.f32.mrf.mxu2  ;;  %v10650_v4 = vld [vmem:[#allocation3 + $0x300] sm:$0xf0] }
 0x3be   : > { %v4371_v38 = vsel %vm11747_vm11, %v4369_v17, %v17061_v23  ;;  %v4053_v15 = vshll.u32 %v3699_v6, 16  ;;  %3085 = vst [vmem:[#allocation3 + $0x4b4] sm:$0xf] %v2949_v22  ;;  %v4037_v12 = vsel %vm13307_vm1, %v4028_v30, %v14776_v55  ;;  %v4040_v60 = vshrl.u32 %v3698_v11, 16  ;;  %v17062_v43 = vld [vmem:[#allocation131_spill] sm:$0xff]  ;;  %v17063_v33 = vld [vmem:[#allocation117_spill] sm:$0xff]  ;;  %v14803_v52 = vpop.f32.mrf.mxu3 }
 0x3bf   : > { %4481 = vst [vmem:[#allocation3 + $0x3c8] sm:$0xf] %v4371_v38  ;;  %v4043_v44 = vshll.u32 %v3698_v11, 16  ;;  %v14793_v18 = vadd.f32 %v6548_v62, %v6436_v35  ;;  %6856 = vmatmul.bf16.gmra.mxu1 %v9695_v3  ;;  %v6592_v47 = vadd.f32 %v17063_v33, %v17062_v43  ;;  %v3128_v10 = vld [vmem:[#allocation2 + $0x94] sm:$0xf]  ;;  %v17064_v31 = vrot.slane %v14595_v1, 6  ;;  %v6704_v46 = vpop.f32.mrf.mxu0 }
 0x3c0   : > { %4196 = vst [vmem:[#allocation3 + $0x478] sm:$0xf] %v4037_v12  ;;  %v2964_v17 = vrot.slane %v2962_v8, 5  ;;  %v6325_v6 = vadd.f32 %v14692_v20, %v14100_v9  ;;  %v9690_v11 = vld [vmem:[#allocation3 + $0x2e0] sm:$0xf]  ;;  %v3279_v50 = vrot.slane %v3128_v10, 6 }
 0x3c1   : > { %v14799_v53 = vrot.slane %v17064_v31, 4  ;;  %17065 = vst [vmem:[#allocation106_spill] sm:$0xff] %v14803_v52  ;;  %v2967_v30 = vrot.slane %v2965_v2, 6  ;;  %v14807_v23 = vrot.slane %v3282_v21, 4  ;;  %v14809_v38 = vld [vmem:[#allocation2 + $0x9c] sm:$0xf]  ;;  %v14811_v1 = vadd.f32 %v6704_v46, %v6592_v47 }
 0x3c2   : > { %v2596_v35 = vld [vmem:[#allocation2 + $0xa0] sm:$0xf]  ;;  %v9691_v3 = vor.u32 %v10650_v4, %v9690_v11  ;;  %v4052_v8 = vrot.slane %v4050_v51, 6  ;;  %v4055_v22 = vrot.slane %v4053_v15, 7  ;;  %v3280_v9 = vsel %vm11674_vm8, %v14671_v24, %v3279_v50  ;;  %v14820_v15 = vpop.f32.mrf.mxu1  ;;  %v9592_v52 = vld [vmem:[#allocation3 + $0x234] sm:$0xf0] }
 0x3c3   : > { %v17066_v62 = vshrl.u32 %v14716_v7, 16  ;;  %v4234_v2 = vld [vmem:[#allocation2 + $0x80] sm:$0xf]  ;;  %3372 = vst [vmem:[#allocation3 + $0x4dc] sm:$0xf] %v3280_v9  ;;  %v2957_v43 = vrot.slane %v2955_v57, 6  ;;  %v6438_v46 = vadd.f32 %v14070_v39, %v6325_v6 }
 0x3c4   : > { %6743 = vmatmul.bf16.gmra.mxu0 %v9691_v3  ;;  %v4042_v33 = vrot.slane %v4040_v60, 6  ;;  %v4045_v10 = vrot.slane %v4043_v44, 7  ;;  %v4373_v31 = vrot.slane %v4234_v2, 7  ;;  %v2982_v51 = vshrl.u32 %v2596_v35, 16  ;;  %v10597_v44 = vld [vmem:[#allocation3 + $0x158] sm:$0xf0] }
 0x3c5   : > { %v2954_v12 = vrot.slane %v17066_v62, 5  ;;  %v2950_v24 = vrot.slane %v14751_v29, 4  ;;  %v6550_v60 = vpop.f32.mrf.mxu2  ;;  %v4038_v3 = vrot.slane %v14776_v55, 4  ;;  %v2985_v62 = vshll.u32 %v2596_v35, 16  ;;  %v9736_v19 = vld [vmem:[#allocation3 + $0x354] sm:$0xf0] }
 0x3c6   : > { %v4046_v11 = vor.u32 %v4045_v10, %v4042_v33  ;;  %v4374_v57 = vsel %vm11747_vm11, %v14424_v54, %v4373_v31  ;;  %v4375_v9 = vrot.slane %v4373_v31, 4  ;;  %v14828_v2 = vadd.f32 %v6550_v60, %v6438_v46  ;;  %v14834_v6 = vpop.f32.mrf.mxu3  ;;  %v14846_v10 = vld [vmem:[#allocation2 + $0xa0] sm:$0xf]  ;;  %v14856_v60 = vld [vmem:[#allocation2 + $0x9c] sm:$0xf] }
 0x3c7   : > { %v2958_v7 = vor.u32 %v2957_v43, %v2954_v12  ;;  %4482 = vst [vmem:[#allocation3 + $0x3ec] sm:$0xf] %v4374_v57  ;;  %v3281_v4 = vrot.slane %v3279_v50, 4  ;;  %v14832_v29 = vor.u32 %v2967_v30, %v2964_v17  ;;  %v9482_v12 = vld [vmem:[#allocation3 + $0x138] sm:$0xf]  ;;  %v14836_v54 = vpop.f32.mrf.mxu0  ;;  %v17069_v35 = vrot.slane %v14512_v63, 7 }
 0x3c8   : > { %17067 = vst [vmem:[#allocation61_spill] sm:$0xff] %v14828_v2  ;;  %v9556_v43 = vld [vmem:[#allocation3 + $0x1ec] sm:$0xf0]  ;;  %v4047_v55 = vsel %vm13307_vm1, %v4038_v3, %v4046_v11  ;;  %v14844_v33 = vor.u32 %v4055_v22, %v4052_v8  ;;  %v14848_v17 = vld [vmem:[#allocation2 + $0xa0] sm:$0xf]  ;;  %v6328_v30 = vadd.f32 %v14692_v20, %v14163_v32  ;;  %v9483_v31 = vor.u32 %v10597_v44, %v9482_v12 }
 0x3c9   : > { %v2959_v39 = vsel %vm13058_vm14, %v2950_v24, %v2958_v7  ;;  %17068 = vst [vmem:[#allocation40_spill] sm:$0xff] %v14834_v6  ;;  %v4377_v50 = vsel %vm11747_vm11, %v4375_v9, %v17069_v35  ;;  %v3283_v46 = vsel %vm11674_vm8, %v3281_v4, %v3282_v21  ;;  %v10611_v24 = vld [vmem:[#allocation3 + $0x1cc] sm:$0xf]  ;;  %v9728_v57 = vld [vmem:[#allocation3 + $0x34c] sm:$0xf0]  ;;  %v2960_v22 = vrot.slane %v2958_v7, 4 }
 0x3ca   : > { %3086 = vst [vmem:[#allocation3 + $0x4d8] sm:$0xf] %v2959_v39  ;;  %6939 = vmatmul.bf16.gmra.mxu2 %v9483_v31  ;;  %v9559_v8 = vor.u32 %v10611_v24, %v9556_v43  ;;  %v4048_v3 = vrot.slane %v4046_v11, 4  ;;  %v2984_v9 = vrot.slane %v2982_v51, 5  ;;  %v2987_v39 = vrot.slane %v2985_v62, 6  ;;  %v14860_v44 = vpop.f32.mrf.mxu1  ;;  %v17070_v4 = vld [vmem:[#allocation116_spill] sm:$0xff] }
 0x3cb   : > { %4197 = vst [vmem:[#allocation3 + $0x49c] sm:$0xf] %v4047_v55  ;;  %v3288_v32 = vrot.slane %v14846_v10, 6  ;;  %v4070_v27 = vshrl.u32 %v14848_v17, 16  ;;  %v10655_v21 = vld [vmem:[#allocation3 + $0x32c] sm:$0xf]  ;;  %v6441_v12 = vadd.f32 %v17070_v4, %v6328_v30  ;;  %v2969_v7 = vsel %vm13058_vm14, %v2960_v22, %v14832_v29 }
 0x3cc   : > { %3373 = vst [vmem:[#allocation3 + $0x500] sm:$0xf] %v3283_v46  ;;  %7062 = vmatmul.bf16.gmra.mxu3 %v9559_v8  ;;  %v9731_v55 = vor.u32 %v10655_v21, %v9728_v57  ;;  %v10659_v35 = vld [vmem:[#allocation3 + $0x348] sm:$0xf0]  ;;  %v4057_v51 = vsel %vm13307_vm1, %v4048_v3, %v14844_v33  ;;  %v4073_v43 = vshll.u32 %v14848_v17, 16  ;;  %v17073_v46 = vld [vmem:[#allocation138_spill] sm:$0xff] }
 0x3cd   : > { %4483 = vst [vmem:[#allocation3 + $0x410] sm:$0xf] %v4377_v50  ;;  %v17071_v50 = vld [vmem:[#allocation99_spill] sm:$0xff]  ;;  %v6553_v30 = vpop.f32.mrf.mxu2  ;;  %v9726_v8 = vld [vmem:[#allocation3 + $0x328] sm:$0xf]  ;;  %v14878_v3 = vrot.slane %v4070_v27, 6 }
 0x3ce   : > { %v6330_v10 = vadd.f32 %v14692_v20, %v17071_v50  ;;  %3087 = vst [vmem:[#allocation3 + $0x4fc] sm:$0xf] %v2969_v7  ;;  %v14874_v31 = vadd.f32 %v6553_v30, %v6441_v12  ;;  %v17074_v24 = vld [vmem:[#allocation127_spill] sm:$0xff]  ;;  %v3130_v22 = vld [vmem:[#allocation2 + $0x9c] sm:$0xf]  ;;  %v14880_v21 = vpop.f32.mrf.mxu3  ;;  %v9727_v17 = vor.u32 %v10659_v35, %v9726_v8  ;;  %v17076_v30 = vld [vmem:[#allocation97_spill] sm:$0xff] }
 0x3cf   : > { %6861 = vmatmul.bf16.gmra.mxu1 %v9731_v55  ;;  %v6597_v57 = vadd.f32 %v17074_v24, %v17073_v46  ;;  %4198 = vst [vmem:[#allocation3 + $0x4c0] sm:$0xf] %v4057_v51  ;;  %v6709_v4 = vpop.f32.mrf.mxu0  ;;  %v3285_v62 = vrot.slane %v3130_v22, 6  ;;  %v3132_v11 = vld [vmem:[#allocation2 + $0xa4] sm:$0xf]  ;;  %v17077_v46 = vshrl.u32 %v14809_v38, 16 }
 0x3d0   : > { %17072 = vst [vmem:[#allocation50_spill] sm:$0xff] %v14874_v31  ;;  %v2597_v50 = vld [vmem:[#allocation2 + $0xa4] sm:$0xf]  ;;  %v3291_v12 = vrot.slane %v3132_v11, 6  ;;  %v6443_v6 = vadd.f32 %v17076_v30, %v6330_v10  ;;  %v2598_v35 = vld [vmem:[#allocation2 + $0xa8] sm:$0xf] }
 0x3d1   : > { %17075 = vst [vmem:[#allocation12_spill] sm:$0xff] %v14880_v21  ;;  %v14882_v47 = vadd.f32 %v6709_v4, %v6597_v57  ;;  %v2992_v7 = vshrl.u32 %v2597_v50, 16  ;;  %v2995_v55 = vshll.u32 %v2597_v50, 16  ;;  %v3286_v51 = vsel %vm11674_vm8, %v14807_v23, %v3285_v62  ;;  %v14890_v21 = vld [vmem:[#allocation2 + $0xa8] sm:$0xf] }
 0x3d2   : > { %v3287_v27 = vrot.slane %v3285_v62, 4  ;;  %v2974_v24 = vrot.slane %v17077_v46, 5  ;;  %3374 = vst [vmem:[#allocation3 + $0x524] sm:$0xf] %v3286_v51  ;;  %v17078_v57 = vshll.u32 %v14809_v38, 16  ;;  %v3290_v8 = vrot.slane %v3288_v32, 4  ;;  %v14895_v4 = vpop.f32.mrf.mxu1 }
 0x3d3   : > { %v3293_v22 = vrot.slane %v3291_v12, 4  ;;  %v16433_v10 = vrot.slane %v14890_v21, 6  ;;  %v2970_v62 = vrot.slane %v14832_v29, 4  ;;  %v2994_v50 = vrot.slane %v2992_v7, 5  ;;  %v10606_v46 = vld [vmem:[#allocation3 + $0x1a0] sm:$0xf0] }
 0x3d4   : > { %6748 = vmatmul.bf16.gmra.mxu0 %v9727_v17  ;;  %v2977_v11 = vrot.slane %v17078_v57, 6  ;;  %v3289_v23 = vsel %vm11674_vm8, %v3287_v27, %v3288_v32  ;;  %v2997_v30 = vrot.slane %v2995_v55, 6  ;;  %v2988_v51 = vor.u32 %v2987_v39, %v2984_v9  ;;  %v4236_v55 = vld [vmem:[#allocation2 + $0x88] sm:$0xf]  ;;  %v15114_v2 = vld [vmem:[%s16324_s5] ss:$0 sm:$0xff] }
 0x3d5   : > { %3375 = vst [vmem:[#allocation3 + $0x548] sm:$0xf] %v3289_v23  ;;  %v3292_v38 = vsel %vm11674_vm8, %v3290_v8, %v3291_v12  ;;  %v3295_v57 = vsel %vm11674_vm8, %v3293_v22, %v16433_v10  ;;  %v6555_v0 = vpop.f32.mrf.mxu2  ;;  %v3002_v29 = vshrl.u32 %v2598_v35, 16  ;;  %v3005_v7 = vshll.u32 %v2598_v35, 16  ;;  %v14914_v35 = vld [vmem:[#allocation2 + $0x98] sm:$0xf] }
 0x3d6   : > { %v2978_v17 = vor.u32 %v2977_v11, %v2974_v24  ;;  %3376 = vst [vmem:[#allocation3 + $0x56c] sm:$0xf] %v3292_v38  ;;  %v2998_v32 = vor.u32 %v2997_v30, %v2994_v50  ;;  %v14906_v27 = vadd.f32 %v6555_v0, %v6443_v6  ;;  %v2990_v12 = vrot.slane %v2988_v51, 4  ;;  %v3412_v24 = vld [vmem:[#allocation2 + $0x94] sm:$0xf]  ;;  %v14910_v8 = vpop.f32.mrf.mxu3 }
 0x3d7   : > { %3377 = vst [vmem:[#allocation3 + $0x590] sm:$0xf] %v3295_v57  ;;  %v4075_v11 = vrot.slane %v4073_v43, 7  ;;  %v14912_v22 = vpop.f32.mrf.mxu0  ;;  %v3004_v50 = vrot.slane %v3002_v29, 5  ;;  %v3007_v30 = vrot.slane %v3005_v7, 6  ;;  %v17081_v0 = vld [vmem:[#allocation111_spill] sm:$0xff]  ;;  %v9519_v38 = vor.u32 %v10606_v46, %v9518_v5 }
 0x3d8   : > { %17079 = vst [vmem:[#allocation14_spill] sm:$0xff] %v14906_v27  ;;  %v2979_v9 = vsel %vm13058_vm14, %v2970_v62, %v2978_v17  ;;  %v2980_v39 = vrot.slane %v2978_v17, 4  ;;  %v3000_v23 = vrot.slane %v2998_v32, 4  ;;  %v6333_v6 = vadd.f32 %v14692_v20, %v17081_v0  ;;  %v10620_v62 = vld [vmem:[#allocation3 + $0x214] sm:$0xf] }
 0x3d9   : > { %17080 = vst [vmem:[#allocation33_spill] sm:$0xff] %v14910_v8  ;;  %v2999_v43 = vsel %vm13058_vm14, %v2990_v12, %v2998_v32  ;;  %v4237_v57 = vld [vmem:[#allocation2 + $0x8c] sm:$0xf]  ;;  %v9595_v10 = vor.u32 %v10620_v62, %v9592_v52  ;;  %v9764_v8 = vld [vmem:[#allocation3 + $0x394] sm:$0xf0]  ;;  %v17082_v29 = vshrl.u32 %v14856_v60, 16 }
 0x3da   : > { %3088 = vst [vmem:[#allocation3 + $0x520] sm:$0xf] %v2979_v9  ;;  %v2989_v17 = vsel %vm13058_vm14, %v2980_v39, %v2988_v51  ;;  %v14922_v9 = vor.u32 %v3007_v30, %v3004_v50  ;;  %v17083_v27 = vshll.u32 %v14856_v60, 16  ;;  %6944 = vmatmul.bf16.gmra.mxu2 %v9519_v38  ;;  %v3559_v5 = vrot.slane %v3412_v24, 6  ;;  %v14930_v12 = vpop.f32.mrf.mxu1  ;;  %v10664_v52 = vld [vmem:[#allocation3 + $0x374] sm:$0xf] }
 0x3db   : > { %3089 = vst [vmem:[#allocation3 + $0x544] sm:$0xf] %v2989_v17  ;;  %v4062_v7 = vrot.slane %v17082_v29, 6  ;;  %v17084_v46 = vrot.slane %v14512_v63, 7  ;;  %v4379_v39 = vrot.slane %v4236_v55, 7  ;;  %v4382_v32 = vrot.slane %v4237_v57, 7 }
 0x3dc   : > { %v4065_v0 = vrot.slane %v17083_v27, 7  ;;  %3090 = vst [vmem:[#allocation3 + $0x568] sm:$0xf] %v2999_v43  ;;  %v3009_v50 = vsel %vm13058_vm14, %v3000_v23, %v14922_v9  ;;  %v4058_v30 = vrot.slane %v14844_v33, 4  ;;  %v14937_v60 = vor.u32 %v4075_v11, %v14878_v3  ;;  %7067 = vmatmul.bf16.gmra.mxu3 %v9595_v10  ;;  %v17085_v63 = vld [vmem:[#allocation104_spill] sm:$0xff]  ;;  %v10800_v38 = vld [vmem:[%s16321_s2 + $0x210] sm:$0xff] }
 0x3dd   : > { %v4378_v51 = vrot.slane %v17084_v46, 4  ;;  %v16434_v27 = vrot.slane %v14914_v35, 6  ;;  %v6446_v24 = vadd.f32 %v17085_v63, %v6333_v6  ;;  %v9767_v55 = vor.u32 %v10664_v52, %v9764_v8  ;;  %3091 = vst [vmem:[#allocation3 + $0x58c] sm:$0xf] %v3009_v50  ;;  %v6558_v33 = vpop.f32.mrf.mxu2  ;;  %v10668_v17 = vld [vmem:[#allocation3 + $0x390] sm:$0xf0]  ;;  %7142 = vmatpush.bf16.msrb.mxu0 %v10800_v38 }
 0x3de   : > { %v4066_v62 = vor.u32 %v4065_v0, %v4062_v7  ;;  %v3560_v23 = vsel %vm11674_vm8, %v14799_v53, %v3559_v5  ;;  %v4381_v8 = vrot.slane %v4379_v39, 4  ;;  %v17087_v43 = vld [vmem:[#allocation47_spill] sm:$0xff]  ;;  %v17088_v57 = vld [vmem:[#allocation134_spill] sm:$0xff]  ;;  %v3561_v53 = vrot.slane %v3559_v5, 4  ;;  %v17089_v0 = vld [vmem:[#allocation109_spill] sm:$0xff]  ;;  %v6681_v52 = vpop.f32.mrf.mxu3 }
 0x3df   : > { %3656 = vst [vmem:[#allocation3 + $0x498] sm:$0xf] %v3560_v23  ;;  %v4380_v10 = vsel %vm11747_vm11, %v4378_v51, %v4379_v39  ;;  %v14951_v6 = vadd.f32 %v6558_v33, %v6446_v24  ;;  %6866 = vmatmul.bf16.gmra.mxu1 %v9767_v55  ;;  %v6602_v29 = vadd.f32 %v17088_v57, %v17087_v43  ;;  %v4384_v7 = vrot.slane %v4382_v32, 4  ;;  %v6714_v50 = vpop.f32.mrf.mxu0  ;;  %v4239_v38 = vld [vmem:[#allocation2 + $0x94] sm:$0xf] }
 0x3e0   : > { %v4067_v3 = vsel %vm13307_vm1, %v4058_v30, %v4066_v62  ;;  %v4068_v11 = vrot.slane %v4066_v62, 4  ;;  %v6335_v46 = vadd.f32 %v14692_v20, %v17089_v0  ;;  %v9762_v30 = vld [vmem:[#allocation3 + $0x370] sm:$0xf]  ;;  %4484 = vst [vmem:[#allocation3 + $0x434] sm:$0xf] %v4380_v10  ;;  %v4383_v39 = vsel %vm11747_vm11, %v4381_v8, %v4382_v32 }
 0x3e1   : > { %17086 = vst [vmem:[#allocation37_spill] sm:$0xff] %v14951_v6  ;;  %v14962_v62 = vadd.f32 %v6714_v50, %v6602_v29  ;;  %v9763_v63 = vor.u32 %v10668_v17, %v9762_v30  ;;  %v3563_v5 = vsel %vm11674_vm8, %v3561_v53, %v16434_v27  ;;  %v17090_v24 = vrot.slane %v14637_v61, 7  ;;  %v10615_v57 = vld [vmem:[#allocation3 + $0x1e8] sm:$0xf0]  ;;  %v9628_v61 = vld [vmem:[#allocation3 + $0x27c] sm:$0xf0] }
 0x3e2   : > { %4199 = vst [vmem:[#allocation3 + $0x4e4] sm:$0xf] %v4067_v3  ;;  %v4077_v51 = vsel %vm13307_vm1, %v4068_v11, %v14937_v60  ;;  %v4388_v32 = vrot.slane %v4239_v38, 7  ;;  %v14974_v17 = vpop.f32.mrf.mxu1  ;;  %v14976_v3 = vld [vmem:[#allocation2 + $0x98] sm:$0xf]  ;;  %v17094_v30 = vld [vmem:[#allocation110_spill] sm:$0xff] }
 0x3e3   : > { %4200 = vst [vmem:[#allocation3 + $0x508] sm:$0xf] %v4077_v51  ;;  %v4386_v55 = vsel %vm11747_vm11, %v4384_v7, %v17090_v24  ;;  %v17091_v23 = vmov %v17090_v24  ;;  %v17092_v11 = vld [vmem:[#allocation112_spill] sm:$0xff]  ;;  %v4391_v53 = vrot.slane %v14976_v3, 7  ;;  %v9554_v0 = vld [vmem:[#allocation3 + $0x1c8] sm:$0xf]  ;;  %v6338_v51 = vadd.f32 %v14692_v20, %v17094_v30 }
 0x3e4   : > { %3657 = vst [vmem:[#allocation3 + $0x4bc] sm:$0xf] %v3563_v5  ;;  %v4387_v33 = vrot.slane %v17091_v23, 4  ;;  %6753 = vmatmul.bf16.gmra.mxu0 %v9763_v63  ;;  %v6448_v10 = vadd.f32 %v17092_v11, %v6335_v46  ;;  %v3702_v50 = vld [vmem:[#allocation2 + $0xa4] sm:$0xf]  ;;  %v9555_v46 = vor.u32 %v10615_v57, %v9554_v0  ;;  %v17098_v6 = vld [vmem:[#allocation32_spill] sm:$0xff] }
 0x3e5   : > { %4485 = vst [vmem:[#allocation3 + $0x458] sm:$0xf] %v4383_v39  ;;  %v6560_v43 = vpop.f32.mrf.mxu2  ;;  %v10629_v39 = vld [vmem:[#allocation3 + $0x25c] sm:$0xf]  ;;  %v9800_v63 = vld [vmem:[#allocation3 + $0x3dc] sm:$0xf0] }
 0x3e6   : > { %4486 = vst [vmem:[#allocation3 + $0x47c] sm:$0xf] %v4386_v55  ;;  %v4389_v8 = vsel %vm11747_vm11, %v4387_v33, %v4388_v32  ;;  %v14981_v29 = vadd.f32 %v6560_v43, %v6448_v10  ;;  %v6683_v7 = vpop.f32.mrf.mxu3  ;;  %v4080_v5 = vshrl.u32 %v3702_v50, 16  ;;  %v4083_v24 = vshll.u32 %v3702_v50, 16  ;;  %v14988_v55 = vld [vmem:[#allocation2 + $0xa0] sm:$0xf] }
 0x3e7   : > { %4487 = vst [vmem:[#allocation3 + $0x4a0] sm:$0xf] %v4389_v8  ;;  %v14984_v52 = vpop.f32.mrf.mxu0  ;;  %v9631_v38 = vor.u32 %v10629_v39, %v9628_v61  ;;  %v3703_v23 = vld [vmem:[#allocation2 + $0xa8] sm:$0xf]  ;;  %v4390_v33 = vrot.slane %v4388_v32, 4  ;;  %v17095_v7 = vld [vmem:[#allocation101_spill] sm:$0xff] }
 0x3e8   : > { %17093 = vst [vmem:[#allocation63_spill] sm:$0xff] %v14981_v29  ;;  %v10673_v3 = vld [vmem:[#allocation3 + $0x3bc] sm:$0xf]  ;;  %v4082_v11 = vrot.slane %v4080_v5, 6  ;;  %v4085_v10 = vrot.slane %v4083_v24, 7  ;;  %v4090_v8 = vshrl.u32 %v3703_v23, 16  ;;  %v6270_v27 = vadd.f32 %v14692_v20, %v17095_v7 }
 0x3e9   : > { %v4093_v43 = vshll.u32 %v3703_v23, 16  ;;  %v9803_v57 = vor.u32 %v10673_v3, %v9800_v63  ;;  %v4392_v0 = vsel %vm11747_vm11, %v4390_v33, %v4391_v53  ;;  %v17096_v50 = vld [vmem:[#allocation113_spill] sm:$0xff]  ;;  %v10677_v39 = vld [vmem:[#allocation3 + $0x3d8] sm:$0xf0]  ;;  %v17097_v5 = vrot.slane %v14914_v35, 6  ;;  %v17099_v63 = vld [vmem:[#allocation24_spill] sm:$0xff] }
 0x3ea   : > { %6949 = vmatmul.bf16.gmra.mxu2 %v9555_v46  ;;  %v14992_v30 = vpop.f32.mrf.mxu1  ;;  %v6451_v61 = vadd.f32 %v17096_v50, %v6338_v51  ;;  %v4086_v32 = vor.u32 %v4085_v10, %v4082_v11  ;;  %v4092_v46 = vrot.slane %v4090_v8, 6  ;;  %4488 = vst [vmem:[#allocation3 + $0x4c4] sm:$0xf] %v4392_v0  ;;  %v3568_v23 = vrot.slane %v14988_v55, 6  ;;  %v4242_v7 = vld [vmem:[#allocation2 + $0xa0] sm:$0xf] }
 0x3eb   : > { %v4095_v26 = vrot.slane %v4093_v43, 7  ;;  %v3564_v24 = vrot.slane %v17097_v5, 4  ;;  %v6607_v3 = vadd.f32 %v17099_v63, %v17098_v6  ;;  %v4078_v51 = vrot.slane %v14937_v60, 4  ;;  %v3414_v10 = vld [vmem:[#allocation2 + $0x9c] sm:$0xf]  ;;  %v17103_v43 = vld [vmem:[#allocation79_spill] sm:$0xff] }
 0x3ec   : > { %7072 = vmatmul.bf16.gmra.mxu3 %v9631_v38  ;;  %v9798_v38 = vld [vmem:[#allocation3 + $0x3b8] sm:$0xf]  ;;  %v4088_v33 = vrot.slane %v4086_v32, 4  ;;  %v17102_v8 = vld [vmem:[#allocation92_spill] sm:$0xff]  ;;  %v6340_v55 = vadd.f32 %v14692_v20, %v17103_v43  ;;  %v10502_v6 = vld [vmem:[%s16322_s3 + $0xe0] sm:$0xf] }
 0x3ed   : > { %v6563_v29 = vpop.f32.mrf.mxu2  ;;  %v15005_v11 = vor.u32 %v4095_v26, %v4092_v46  ;;  %v6383_v35 = vadd.f32 %v17102_v8, %v6270_v27  ;;  %v9799_v5 = vor.u32 %v10677_v39, %v9798_v38  ;;  %v10852_v60 = vld [vmem:[%s16322_s3 + $0xec] sm:$0xf0]  ;;  %v4087_v27 = vsel %vm13307_vm1, %v4078_v51, %v4086_v32  ;;  %v4241_v38 = vld [vmem:[#allocation2 + $0x9c] sm:$0xf]  ;;  %v17104_v43 = vld [vmem:[#allocation26_spill] sm:$0xff] }
 0x3ee   : > { %v15002_v31 = vadd.f32 %v6563_v29, %v6451_v61  ;;  %v7033_v0 = vpop.f32.mrf.mxu3  ;;  %v3565_v29 = vrot.slane %v3414_v10, 6  ;;  %v4397_v39 = vrot.slane %v4242_v7, 7  ;;  %4201 = vst [vmem:[#allocation3 + $0x52c] sm:$0xf] %v4087_v27  ;;  %v4393_v8 = vrot.slane %v4391_v53, 4 }
 0x3ef   : > { %6871 = vmatmul.bf16.gmra.mxu1 %v9803_v57  ;;  %17101 = vst [vmem:[#allocation17_spill] sm:$0xff] %v15005_v11  ;;  %v6719_v50 = vpop.f32.mrf.mxu0  ;;  %v10503_v57 = vor.u32 %v10852_v60, %v10502_v6  ;;  %v4097_v61 = vsel %vm13307_vm1, %v4088_v33, %v15005_v11  ;;  %v6496_v10 = vadd.f32 %v17104_v43, %v6383_v35  ;;  %v4394_v0 = vrot.slane %v4241_v38, 7  ;;  %v10624_v51 = vld [vmem:[#allocation3 + $0x230] sm:$0xf0]  ;;  %v15031_v6 = vld [vmem:[#allocation2 + $0xa8] sm:$0xf] }
 0x3f0   : > { %17100 = vst [vmem:[#allocation53_spill] sm:$0xff] %v15002_v31  ;;  %v15016_v26 = vadd.f32 %v6719_v50, %v6607_v3  ;;  %v3566_v46 = vsel %vm11674_vm8, %v3564_v24, %v3565_v29  ;;  %v3567_v63 = vrot.slane %v3565_v29, 4  ;;  %v3416_v3 = vld [vmem:[#allocation2 + $0xa4] sm:$0xf]  ;;  %v17105_v50 = vld [vmem:[#allocation68_spill] sm:$0xff]  ;;  %v3570_v60 = vrot.slane %v3568_v23, 4 }
 0x3f1   : > { %8226 = vmatpush.bf16.msrb.mxu1 %v10503_v57  ;;  %4202 = vst [vmem:[#allocation3 + $0x550] sm:$0xf] %v4097_v61  ;;  %v3571_v33 = vrot.slane %v3416_v3, 6  ;;  %v6453_v24 = vadd.f32 %v17105_v50, %v6340_v55  ;;  %v4395_v53 = vsel %vm11747_vm11, %v4393_v8, %v4394_v0  ;;  %v4396_v35 = vrot.slane %v4394_v0, 4  ;;  %v4243_v43 = vld [vmem:[#allocation2 + $0xa4] sm:$0xf] }
 0x3f2   : > { %v15026_v32 = vpop.f32.mrf.mxu1  ;;  %v3569_v7 = vsel %vm11674_vm8, %v3567_v63, %v3568_v23  ;;  %3658 = vst [vmem:[#allocation3 + $0x4e0] sm:$0xf] %v3566_v46  ;;  %v16437_v57 = vrot.slane %v15031_v6, 6  ;;  %v4399_v27 = vrot.slane %v4397_v39, 4  ;;  %v9590_v46 = vld [vmem:[#allocation3 + $0x210] sm:$0xf] }
 0x3f3   : > { %3659 = vst [vmem:[#allocation3 + $0x504] sm:$0xf] %v3569_v7  ;;  %v3573_v29 = vrot.slane %v3571_v33, 4  ;;  %v17107_v63 = vld [vmem:[#allocation46_spill] sm:$0xff]  ;;  %v4398_v55 = vsel %vm11747_vm11, %v4396_v35, %v4397_v39  ;;  %v9664_v0 = vld [vmem:[#allocation3 + $0x2c4] sm:$0xf0]  ;;  %v3572_v23 = vsel %vm11674_vm8, %v3570_v60, %v3571_v33 }
 0x3f4   : > { %6758 = vmatmul.bf16.gmra.mxu0 %v9799_v5  ;;  %4489 = vst [vmem:[#allocation3 + $0x4e8] sm:$0xf] %v4395_v53  ;;  %v6609_v38 = vadd.f32 %v17107_v63, %v6496_v10  ;;  %v15041_v3 = vld [vmem:[#allocation2 + $0xa8] sm:$0xf]  ;;  %v9591_v10 = vor.u32 %v10624_v51, %v9590_v46  ;;  %v10638_v53 = vld [vmem:[#allocation3 + $0x2a4] sm:$0xf] }
 0x3f5   : > { %v6565_v5 = vpop.f32.mrf.mxu2  ;;  %17108 = vst [vmem:[#allocation29_spill] sm:$0xff] %v15041_v3  ;;  %v3575_v50 = vsel %vm11674_vm8, %v3573_v29, %v16437_v57  ;;  %v16438_v39 = vrot.slane %v15041_v3, 7  ;;  %v9836_v35 = vld [vmem:[#allocation3 + $0x424] sm:$0xf0]  ;;  %v9667_v60 = vor.u32 %v10638_v53, %v9664_v0  ;;  %v10682_v29 = vld [vmem:[#allocation3 + $0x404] sm:$0xf] }
 0x3f6   : > { %v15036_v61 = vadd.f32 %v6565_v5, %v6453_v24  ;;  %v7035_v8 = vpop.f32.mrf.mxu3  ;;  %4490 = vst [vmem:[#allocation3 + $0x50c] sm:$0xf] %v4398_v55  ;;  %v4400_v24 = vrot.slane %v4243_v43, 7  ;;  %v17109_v46 = vld [vmem:[#allocation114_spill] sm:$0xff]  ;;  %v9839_v55 = vor.u32 %v10682_v29, %v9836_v35  ;;  %v17111_v0 = vld [vmem:[#allocation49_spill] sm:$0xff] }
 0x3f7   : > { %v6721_v7 = vpop.f32.mrf.mxu0  ;;  %3660 = vst [vmem:[#allocation3 + $0x528] sm:$0xf] %v3572_v23  ;;  %v17113_v53 = vld [vmem:[#allocation105_spill] sm:$0xff]  ;;  %v10633_v29 = vld [vmem:[#allocation3 + $0x278] sm:$0xf0] }
 0x3f8   : > { %17106 = vst [vmem:[#allocation74_spill] sm:$0xff] %v15036_v61  ;;  %v15049_v5 = vadd.f32 %v6721_v7, %v6609_v38  ;;  %v4401_v63 = vsel %vm11747_vm11, %v4399_v27, %v4400_v24  ;;  %v4402_v33 = vrot.slane %v4400_v24, 4  ;;  %v6275_v38 = vadd.f32 %v14692_v20, %v17109_v46  ;;  %v10686_v27 = vld [vmem:[#allocation3 + $0x420] sm:$0xf0]  ;;  %v17110_v7 = vld [vmem:[#allocation23_spill] sm:$0xff]  ;;  %v17122_v61 = vld [vmem:[#allocation73_spill] sm:$0xff] }
 0x3f9   : > { %3661 = vst [vmem:[#allocation3 + $0x54c] sm:$0xf] %v3575_v50  ;;  %v6612_v23 = vadd.f32 %v17111_v0, %v17110_v7  ;;  %v9626_v7 = vld [vmem:[#allocation3 + $0x258] sm:$0xf]  ;;  %v9700_v0 = vld [vmem:[#allocation3 + $0x30c] sm:$0xf0] }
 0x3fa   : > { %6954 = vmatmul.bf16.gmra.mxu2 %v9591_v10  ;;  %4491 = vst [vmem:[#allocation3 + $0x530] sm:$0xf] %v4401_v63  ;;  %v15054_v8 = vpop.f32.mrf.mxu1  ;;  %v4404_v51 = vsel %vm11747_vm11, %v4402_v33, %v16438_v39  ;;  %v9834_v10 = vld [vmem:[#allocation3 + $0x400] sm:$0xf]  ;;  %v6388_v63 = vadd.f32 %v17113_v53, %v6275_v38  ;;  %v10799_v38 = vld [vmem:[%s16321_s2 + $0x208] sm:$0xff] }
 0x3fb   : > { %4492 = vst [vmem:[#allocation3 + $0x554] sm:$0xf] %v4404_v51  ;;  %v9835_v33 = vor.u32 %v10686_v27, %v9834_v10  ;;  %v17114_v39 = vld [vmem:[#allocation64_spill] sm:$0xff]  ;;  %v17115_v51 = vld [vmem:[#allocation59_spill] sm:$0xff]  ;;  %7143 = vmatpush.bf16.msrb.mxu0 %v10799_v38  ;;  %v10695_v3 = vld [vmem:[#allocation3 + $0x468] sm:$0xf0] }
 0x3fc   : > { %7077 = vmatmul.bf16.gmra.mxu3 %v9667_v60  ;;  %v6501_v46 = vadd.f32 %v17114_v39, %v6388_v63  ;;  %v10647_v39 = vld [vmem:[#allocation3 + $0x2ec] sm:$0xf]  ;;  %v9870_v38 = vld [vmem:[#allocation3 + $0x448] sm:$0xf]  ;;  %v9906_v58 = vld [vmem:[#allocation3 + $0x490] sm:$0xf] }
 0x3fd   : > { %v6568_v43 = vpop.f32.mrf.mxu2  ;;  %v9703_v10 = vor.u32 %v10647_v39, %v9700_v0  ;;  %v10691_v63 = vld [vmem:[#allocation3 + $0x44c] sm:$0xf] }
 0x3fe   : > { %v15064_v50 = vpop.f32.mrf.mxu3 }
 0x3ff   : > { %6876 = vmatmul.bf16.gmra.mxu1 %v9839_v55  ;;  %17112 = vst [vmem:[#allocation100_spill] sm:$0xff] %v15064_v50  ;;  %v6724_v24 = vpop.f32.mrf.mxu0  ;;  %v6614_v55 = vadd.f32 %v17115_v51, %v6501_v46  ;;  %v9871_v50 = vor.u32 %v10695_v3, %v9870_v38  ;;  %v10486_v3 = vld [vmem:[%s16322_s3 + $0xc0] sm:$0xf] }
 0x400   : > { %v15067_v57 = vadd.f32 %v6724_v24, %v6612_v23  ;;  %v9627_v23 = vor.u32 %v10633_v29, %v9626_v7  ;;  %v9872_v24 = vld [vmem:[#allocation3 + $0x46c] sm:$0xf0]  ;;  %v17119_v29 = vld [vmem:[#allocation43_spill] sm:$0xff] }
 0x402   : > { %v15070_v35 = vpop.f32.mrf.mxu1 }
 0x404   : > { %6763 = vmatmul.bf16.gmra.mxu0 %v9835_v33  ;;  %v17117_v33 = vld [vmem:[#allocation124_spill] sm:$0xff] }
 0x405   : > { %v6570_v60 = vpop.f32.mrf.mxu2  ;;  %v6280_v46 = vadd.f32 %v14692_v20, %v17117_v33 }
 0x406   : > { %v15073_v43 = vpop.f32.mrf.mxu3  ;;  %v9875_v60 = vor.u32 %v10691_v63, %v9872_v24  ;;  %v17123_v24 = vld [vmem:[#allocation52_spill] sm:$0xff] }
 0x407   : > { %17116 = vst [vmem:[#allocation118_spill] sm:$0xff] %v15073_v43  ;;  %v6726_v28 = vpop.f32.mrf.mxu0  ;;  %v17118_v43 = vld [vmem:[#allocation60_spill] sm:$0xff]  ;;  %v6250_v63 = vadd.f32 %v14692_v20, %v17123_v24 }
 0x408   : > { %v15078_v27 = vadd.f32 %v6726_v28, %v6614_v55  ;;  %v6617_v28 = vadd.f32 %v17119_v29, %v17118_v43  ;;  %v9662_v43 = vld [vmem:[#allocation3 + $0x2a0] sm:$0xf] }
 0x40a   : > { %6959 = vmatmul.bf16.gmra.mxu2 %v9627_v23  ;;  %v17121_v23 = vld [vmem:[#allocation122_spill] sm:$0xff] }
 0x40b   : > { %v15080_v53 = vpop.f32.mrf.mxu1  ;;  %v6393_v0 = vadd.f32 %v17121_v23, %v6280_v46  ;;  %v10656_v23 = vld [vmem:[#allocation3 + $0x334] sm:$0xf] }
 0x40c   : > { %7082 = vmatmul.bf16.gmra.mxu3 %v9703_v10 }
 0x40d   : > { %v6920_v51 = vpop.f32.mrf.mxu2  ;;  %v6506_v31 = vadd.f32 %v17122_v61, %v6393_v0  ;;  %v10848_v61 = vld [vmem:[%s16322_s3 + $0xcc] sm:$0xf0]  ;;  %v17127_v0 = vld [vmem:[#allocation128_spill] sm:$0xff] }
 0x40e   : > { %v17124_v51 = vld [vmem:[#allocation51_spill] sm:$0xff]  ;;  %v10487_v38 = vor.u32 %v10848_v61, %v10486_v3  ;;  %v10704_v3 = vld [vmem:[#allocation3 + $0x4b0] sm:$0xf0] }
 0x40f   : > { %6881 = vmatmul.bf16.gmra.mxu1 %v9875_v60  ;;  %v15086_v55 = vpop.f32.mrf.mxu3  ;;  %v6729_v7 = vpop.f32.mrf.mxu0  ;;  %v10642_v60 = vld [vmem:[#allocation3 + $0x2c0] sm:$0xf0]  ;;  %v6619_v29 = vadd.f32 %v17124_v51, %v6506_v31  ;;  %v9908_v31 = vld [vmem:[#allocation3 + $0x4b4] sm:$0xf0] }
 0x410   : > { %17120 = vst [vmem:[#allocation31_spill] sm:$0xff] %v15086_v55  ;;  %v15089_v39 = vadd.f32 %v6729_v7, %v6617_v28  ;;  %v9663_v20 = vor.u32 %v10642_v60, %v9662_v43  ;;  %8227 = vmatpush.bf16.msrb.mxu1 %v10487_v38  ;;  %v6813_v43 = vadd.f32 %v14680_v40, %v14718_v36 }
 0x411   : > { %v9907_v36 = vor.u32 %v10704_v3, %v9906_v58  ;;  %v9772_v58 = vld [vmem:[#allocation3 + $0x39c] sm:$0xf0] }
 0x413   : > { %v15092_v10 = vpop.f32.mrf.mxu1 }
 0x414   : > { %6768 = vmatmul.bf16.gmra.mxu0 %v9871_v50  ;;  %v17126_v50 = vld [vmem:[#allocation41_spill] sm:$0xff] }
 0x415   : > { %v6922_v33 = vpop.f32.mrf.mxu2  ;;  %v6363_v28 = vadd.f32 %v17126_v50, %v6250_v63  ;;  %v17128_v63 = vld [vmem:[#allocation132_spill] sm:$0xff] }
 0x416   : > { %v9739_v33 = vor.u32 %v10656_v23, %v9736_v19  ;;  %v6285_v60 = vadd.f32 %v15114_v2, %v17128_v63  ;;  %v17129_v19 = vld [vmem:[#allocation107_spill] sm:$0xff]  ;;  %v17133_v63 = vld [vmem:[#allocation129_spill] sm:$0xff] }
 0x417   : > { %v15097_v55 = vpop.f32.mrf.mxu3  ;;  %v6731_v46 = vpop.f32.mrf.mxu0  ;;  %v6476_v24 = vadd.f32 %v17127_v0, %v6363_v28  ;;  %v17130_v28 = vld [vmem:[#allocation80_spill] sm:$0xff] }
 0x418   : > { %17125 = vst [vmem:[#allocation121_spill] sm:$0xff] %v15097_v55  ;;  %v15106_v7 = vadd.f32 %v6731_v46, %v6619_v29  ;;  %v10700_v55 = vld [vmem:[#allocation3 + $0x494] sm:$0xf] }
 0x419   : > { %v9911_v29 = vor.u32 %v10700_v55, %v9908_v31  ;;  %v6589_v61 = vadd.f32 %v17129_v19, %v6476_v24  ;;  %v17134_v55 = vld [vmem:[#allocation48_spill] sm:$0xff] }
 0x41a   : > { %6964 = vmatmul.bf16.gmra.mxu2 %v9663_v20  ;;  %v17131_v20 = vld [vmem:[#allocation28_spill] sm:$0xff] }
 0x41b   : > { %v15109_v51 = vpop.f32.mrf.mxu1  ;;  %v6622_v38 = vadd.f32 %v17131_v20, %v17130_v28  ;;  %v6702_v11 = vadd.f32 %v14755_v37, %v6589_v61  ;;  %v10651_v28 = vld [vmem:[#allocation3 + $0x308] sm:$0xf0]  ;;  %v9698_v61 = vld [vmem:[#allocation3 + $0x2e8] sm:$0xf] }
 0x41c   : > { %7087 = vmatmul.bf16.gmra.mxu3 %v9739_v33  ;;  %v6398_v33 = vadd.f32 %v17133_v63, %v6285_v60  ;;  %v17137_v60 = vld [vmem:[#allocation78_spill] sm:$0xff] }
 0x41d   : > { %v6925_v46 = vpop.f32.mrf.mxu2 }
 0x41e   : > { %v15121_v50 = vadd.f32 %v6925_v46, %v6813_v43  ;;  %v6511_v31 = vadd.f32 %v17134_v55, %v6398_v33  ;;  %v17135_v43 = vld [vmem:[#allocation62_spill] sm:$0xff]  ;;  %v6815_v46 = vadd.f32 %v14735_v42, %v6702_v11  ;;  %v9699_v33 = vor.u32 %v10651_v28, %v9698_v61  ;;  %v10665_v55 = vld [vmem:[#allocation3 + $0x37c] sm:$0xf] }
 0x41f   : > { %6886 = vmatmul.bf16.gmra.mxu1 %v9911_v29  ;;  %v15125_v23 = vpop.f32.mrf.mxu3  ;;  %v6734_v0 = vpop.f32.mrf.mxu0  ;;  %v6255_v29 = vadd.f32 %v15114_v2, %v17135_v43  ;;  %v9944_v43 = vld [vmem:[#allocation3 + $0x4fc] sm:$0xf0]  ;;  %v9775_v11 = vor.u32 %v10665_v55, %v9772_v58  ;;  %v17142_v61 = vld [vmem:[#allocation123_spill] sm:$0xff]  ;;  %v17145_v58 = vld [vmem:[#allocation22_spill] sm:$0xff] }
 0x420   : > { %17132 = vst [vmem:[#allocation19_spill] sm:$0xff] %v15125_v23  ;;  %v15129_v40 = vadd.f32 %v6734_v0, %v6622_v38  ;;  %v6624_v63 = vadd.f32 %v17137_v60, %v6511_v31  ;;  %v17139_v38 = vld [vmem:[#allocation55_spill] sm:$0xff]  ;;  %v17140_v23 = vld [vmem:[#allocation133_spill] sm:$0xff] }
 0x421   : > { %v6368_v0 = vadd.f32 %v17139_v38, %v6255_v29  ;;  %v17141_v31 = vld [vmem:[#allocation25_spill] sm:$0xff] }
 0x422   : > { %v6290_v60 = vadd.f32 %v15114_v2, %v17141_v31 }
 0x423   : > { %v15132_v24 = vpop.f32.mrf.mxu1  ;;  %v6481_v42 = vadd.f32 %v17140_v23, %v6368_v0  ;;  %v17144_v23 = vld [vmem:[#allocation13_spill] sm:$0xff] }
 0x424   : > { %6773 = vmatmul.bf16.gmra.mxu0 %v9907_v36  ;;  %v6627_v0 = vadd.f32 %v17145_v58, %v17144_v23 }
 0x425   : > { %v6927_v19 = vpop.f32.mrf.mxu2 }
 0x426   : > { %v15137_v20 = vadd.f32 %v6927_v19, %v6815_v46  ;;  %v10709_v19 = vld [vmem:[#allocation3 + $0x4dc] sm:$0xf] }
 0x427   : > { %v15140_v37 = vpop.f32.mrf.mxu3  ;;  %v6736_v3 = vpop.f32.mrf.mxu0  ;;  %v9947_v29 = vor.u32 %v10709_v19, %v9944_v43 }
 0x428   : > { %17136 = vst [vmem:[#allocation35_spill] sm:$0xff] %v15137_v20  ;;  %v15143_v36 = vadd.f32 %v6736_v3, %v6624_v63  ;;  %v10713_v63 = vld [vmem:[#allocation3 + $0x4f8] sm:$0xf0]  ;;  %v6594_v3 = vadd.f32 %v17142_v61, %v6481_v42  ;;  %v9942_v20 = vld [vmem:[#allocation3 + $0x4d8] sm:$0xf]  ;;  %v17148_v42 = vld [vmem:[#allocation9_spill] sm:$0xff] }
 0x429   : > { %17138 = vst [vmem:[#allocation72_spill] sm:$0xff] %v15140_v37  ;;  %v6818_v37 = vadd.f32 %v14779_v56, %v14811_v1  ;;  %v17147_v56 = vld [vmem:[#allocation135_spill] sm:$0xff] }
 0x42a   : > { %6969 = vmatmul.bf16.gmra.mxu2 %v9699_v33  ;;  %v6403_v1 = vadd.f32 %v17147_v56, %v6290_v60  ;;  %v6707_v43 = vadd.f32 %v14836_v54, %v6594_v3  ;;  %v17151_v60 = vld [vmem:[#allocation86_spill] sm:$0xff] }
 0x42b   : > { %v15146_v46 = vpop.f32.mrf.mxu1 }
 0x42c   : > { %7092 = vmatmul.bf16.gmra.mxu3 %v9775_v11  ;;  %v10798_v11 = vld [vmem:[%s16321_s2 + $0x200] sm:$0xff]  ;;  %v6516_v31 = vadd.f32 %v17148_v42, %v6403_v1  ;;  %v6820_v23 = vadd.f32 %v14820_v15, %v6707_v43 }
 0x42d   : > { %v6930_v28 = vpop.f32.mrf.mxu2  ;;  %7144 = vmatpush.bf16.msrb.mxu0 %v10798_v11  ;;  %v9980_v42 = vld [vmem:[#allocation3 + $0x544] sm:$0xf0] }
 0x42e   : > { %v15153_v38 = vadd.f32 %v6930_v28, %v6818_v37  ;;  %v9943_v37 = vor.u32 %v10713_v63, %v9942_v20  ;;  %v17150_v28 = vld [vmem:[#allocation77_spill] sm:$0xff]  ;;  %v6629_v54 = vadd.f32 %v17151_v60, %v6516_v31  ;;  %v9734_v20 = vld [vmem:[#allocation3 + $0x330] sm:$0xf]  ;;  %v10718_v60 = vld [vmem:[#allocation3 + $0x524] sm:$0xf] }
 0x42f   : > { %6891 = vmatmul.bf16.gmra.mxu1 %v9947_v29  ;;  %v15157_v33 = vpop.f32.mrf.mxu3  ;;  %v6739_v55 = vpop.f32.mrf.mxu0  ;;  %v6260_v61 = vadd.f32 %v15114_v2, %v17150_v28  ;;  %v9808_v63 = vld [vmem:[#allocation3 + $0x3e4] sm:$0xf0]  ;;  %v17155_v28 = vld [vmem:[#allocation27_spill] sm:$0xff] }
 0x430   : > { %17143 = vst [vmem:[#allocation70_spill] sm:$0xff] %v15153_v38  ;;  %v15164_v19 = vadd.f32 %v6739_v55, %v6627_v0  ;;  %v17153_v55 = vld [vmem:[#allocation69_spill] sm:$0xff] }
 0x431   : > { %17146 = vst [vmem:[#allocation66_spill] sm:$0xff] %v15157_v33  ;;  %v10660_v33 = vld [vmem:[#allocation3 + $0x350] sm:$0xf0]  ;;  %v6373_v11 = vadd.f32 %v17153_v55, %v6260_v61  ;;  %v9983_v61 = vor.u32 %v10718_v60, %v9980_v42 }
 0x432   : > { %v9735_v56 = vor.u32 %v10660_v33, %v9734_v20  ;;  %v17157_v20 = vld [vmem:[#allocation130_spill] sm:$0xff] }
 0x433   : > { %v15167_v29 = vpop.f32.mrf.mxu1  ;;  %v6486_v15 = vadd.f32 %v17155_v28, %v6373_v11  ;;  %v17158_v11 = vld [vmem:[#allocation95_spill] sm:$0xff] }
 0x434   : > { %6778 = vmatmul.bf16.gmra.mxu0 %v9943_v37  ;;  %17149 = vst [vmem:[#allocation44_spill] sm:$0xff] %v15167_v29  ;;  %v10674_v37 = vld [vmem:[#allocation3 + $0x3c4] sm:$0xf]  ;;  %v6823_v29 = vadd.f32 %v14860_v44, %v14882_v47  ;;  %v10470_v47 = vld [vmem:[%s16322_s3 + $0xa0] sm:$0xf] }
 0x435   : > { %v6932_v58 = vpop.f32.mrf.mxu2  ;;  %v9811_v43 = vor.u32 %v10674_v37, %v9808_v63  ;;  %v17159_v63 = vld [vmem:[#allocation34_spill] sm:$0xff]  ;;  %v17160_v37 = vld [vmem:[#allocation139_spill] sm:$0xff] }
 0x436   : > { %v15172_v38 = vadd.f32 %v6932_v58, %v6820_v23  ;;  %v17156_v23 = vld [vmem:[#allocation39_spill] sm:$0xff] }
 0x437   : > { %v15175_v3 = vpop.f32.mrf.mxu3  ;;  %v6741_v0 = vpop.f32.mrf.mxu0  ;;  %v6295_v58 = vadd.f32 %v15114_v2, %v17156_v23  ;;  %v10844_v44 = vld [vmem:[%s16322_s3 + $0xac] sm:$0xf0] }
 0x438   : > { %17152 = vst [vmem:[#allocation30_spill] sm:$0xff] %v15175_v3  ;;  %v15178_v1 = vadd.f32 %v6741_v0, %v6629_v54  ;;  %v10722_v54 = vld [vmem:[#allocation3 + $0x540] sm:$0xf0]  ;;  %v6599_v0 = vadd.f32 %v17157_v20, %v6486_v15  ;;  %v10471_v60 = vor.u32 %v10844_v44, %v10470_v47  ;;  %v17164_v20 = vld [vmem:[#allocation89_spill] sm:$0xff]  ;;  %v17166_v47 = vrot.slane %v14890_v21, 6 }
 0x439   : > { %v6408_v28 = vadd.f32 %v17160_v37, %v6295_v58 }
 0x43a   : > { %17154 = vst [vmem:[#allocation42_spill] sm:$0xff] %v15178_v1  ;;  %6974 = vmatmul.bf16.gmra.mxu2 %v9735_v56  ;;  %v6632_v56 = vadd.f32 %v17159_v63, %v17158_v11  ;;  %8228 = vmatpush.bf16.msrb.mxu1 %v10471_v60  ;;  %v6265_v11 = vadd.f32 %v15114_v2, %v17164_v20  ;;  %v3296_v44 = vrot.slane %v17166_v47, 4  ;;  %v10727_v20 = vld [vmem:[#allocation3 + $0x56c] sm:$0xf] }
 0x43b   : > { %v17171_v47 = vld [vmem:[#allocation137_spill] sm:$0xff] }
 0x43c   : > { %v15183_v31 = vpop.f32.mrf.mxu1  ;;  %7097 = vmatmul.bf16.gmra.mxu3 %v9811_v43  ;;  %v9978_v43 = vld [vmem:[#allocation3 + $0x520] sm:$0xf]  ;;  %3378 = vst [vmem:[#allocation3 + $0x5b4] sm:$0x3] %v3296_v44  ;;  %v17173_v44 = vld [vmem:[#allocation83_spill] sm:$0xff] }
 0x43d   : > { %v6935_v33 = vpop.f32.mrf.mxu2  ;;  %v9979_v15 = vor.u32 %v10722_v54, %v9978_v43  ;;  %v9770_v54 = vld [vmem:[#allocation3 + $0x378] sm:$0xf]  ;;  %v3010_v43 = vrot.slane %v14922_v9, 4 }
 0x43e   : > { %v15188_v55 = vadd.f32 %v6935_v33, %v6823_v29  ;;  %v6712_v29 = vadd.f32 %v14912_v22, %v6599_v0  ;;  %v17165_v22 = vld [vmem:[#allocation45_spill] sm:$0xff]  ;;  %v17170_v9 = vld [vmem:[#allocation75_spill] sm:$0xff] }
 0x43f   : > { %6896 = vmatmul.bf16.gmra.mxu1 %v9983_v61  ;;  %v15193_v23 = vpop.f32.mrf.mxu3  ;;  %v17162_v61 = vld [vmem:[#allocation90_spill] sm:$0xff]  ;;  %3092 = vst [vmem:[#allocation3 + $0x5b0] sm:$0x3] %v3010_v43  ;;  %v6300_v21 = vadd.f32 %v15114_v2, %v17170_v9 }
 0x440   : > { %17161 = vst [vmem:[#allocation81_spill] sm:$0xff] %v15193_v23  ;;  %v6521_v58 = vadd.f32 %v17162_v61, %v6408_v28  ;;  %v6825_v63 = vadd.f32 %v14895_v4, %v6712_v29  ;;  %v10669_v23 = vld [vmem:[#allocation3 + $0x398] sm:$0xf0]  ;;  %v10683_v4 = vld [vmem:[#allocation3 + $0x40c] sm:$0xf] }
 0x441   : > { %v6744_v1 = vpop.f32.mrf.mxu0  ;;  %v9771_v61 = vor.u32 %v10669_v23, %v9770_v54  ;;  %v6828_v23 = vadd.f32 %v14930_v12, %v14962_v62  ;;  %v10014_v54 = vld [vmem:[#allocation3 + $0x568] sm:$0xf] }
 0x442   : > { %v15202_v42 = vadd.f32 %v6744_v1, %v6632_v56  ;;  %v6634_v1 = vadd.f32 %v17165_v22, %v6521_v58  ;;  %v9844_v56 = vld [vmem:[#allocation3 + $0x42c] sm:$0xf0]  ;;  %v17169_v58 = vld [vmem:[#allocation71_spill] sm:$0xff] }
 0x443   : > { %v9847_v22 = vor.u32 %v10683_v4, %v9844_v56  ;;  %v17172_v56 = vld [vmem:[#allocation108_spill] sm:$0xff] }
 0x444   : > { %6783 = vmatmul.bf16.gmra.mxu0 %v9979_v15  ;;  %v15205_v33 = vpop.f32.mrf.mxu1  ;;  %v17167_v15 = vld [vmem:[#allocation84_spill] sm:$0xff] }
 0x445   : > { %17163 = vst [vmem:[#allocation21_spill] sm:$0xff] %v15205_v33  ;;  %v6937_v37 = vpop.f32.mrf.mxu2  ;;  %v6378_v60 = vadd.f32 %v17167_v15, %v6265_v11 }
 0x446   : > { %v15210_v3 = vadd.f32 %v6937_v37, %v6825_v63  ;;  %v10016_v63 = vld [vmem:[#allocation3 + $0x58c] sm:$0xf0] }
 0x447   : > { %v15213_v0 = vpop.f32.mrf.mxu3  ;;  %v6491_v37 = vadd.f32 %v17169_v58, %v6378_v60  ;;  %v10019_v11 = vor.u32 %v10727_v20, %v10016_v63  ;;  %v6637_v60 = vadd.f32 %v17173_v44, %v17172_v56  ;;  %v17174_v58 = vld [vmem:[#allocation58_spill] sm:$0xff]  ;;  %v17177_v44 = vld [vmem:[#allocation56_spill] sm:$0xff] }
 0x448   : > { %v17175_v20 = vld [vmem:[#allocation126_spill] sm:$0xff] }
 0x449   : > { %v6746_v28 = vpop.f32.mrf.mxu0  ;;  %v6604_v43 = vadd.f32 %v17171_v47, %v6491_v37  ;;  %v4698_v47 = vld [vmem:[#allocation3 + $0x5b0] sm:$0x33] }
 0x44a   : > { %v15219_v29 = vadd.f32 %v6746_v28, %v6634_v1  ;;  %6979 = vmatmul.bf16.gmra.mxu2 %v9771_v61  ;;  %v10731_v28 = vld [vmem:[#allocation3 + $0x588] sm:$0xf0] }
 0x44b   : > { %v6717_v9 = vadd.f32 %v14984_v52, %v6604_v43  ;;  %v10015_v62 = vor.u32 %v10731_v28, %v10014_v54  ;;  %v9806_v52 = vld [vmem:[#allocation3 + $0x3c0] sm:$0xf]  ;;  %v9880_v43 = vld [vmem:[#allocation3 + $0x474] sm:$0xf0] }
 0x44c   : > { %17168 = vst [vmem:[#allocation94_spill] sm:$0xff] %v15219_v29  ;;  %v15222_v33 = vpop.f32.mrf.mxu1  ;;  %7102 = vmatmul.bf16.gmra.mxu3 %v9847_v22  ;;  %v6413_v22 = vadd.f32 %v17174_v58, %v6300_v21  ;;  %v5419_v21 = vunpack.c.h.b16 %v4698_v47 }
 0x44d   : > { %v6940_v1 = vpop.f32.mrf.mxu2 }
 0x44e   : > { %v15229_v15 = vadd.f32 %v6940_v1, %v6828_v23  ;;  %v6526_v63 = vadd.f32 %v17175_v20, %v6413_v22  ;;  %v6830_v23 = vadd.f32 %v14974_v17, %v6717_v9  ;;  %v10678_v1 = vld [vmem:[#allocation3 + $0x3e0] sm:$0xf0]  ;;  %v5418_v17 = vunpack.c.l.b16 %v4698_v47  ;;  %v17178_v20 = vld [vmem:[#allocation65_spill] sm:$0xff] }
 0x44f   : > { %6901 = vmatmul.bf16.gmra.mxu1 %v10019_v11  ;;  %v15233_v61 = vpop.f32.mrf.mxu3  ;;  %v9807_v28 = vor.u32 %v10678_v1, %v9806_v52  ;;  %v5608_v9 = vpack.c.b16 %v5419_v21, %v5419_v21  ;;  %v17179_v1 = vld [vmem:[#allocation10_spill] sm:$0xff]  ;;  %v17181_v21 = vld [vmem:[#allocation36_spill] sm:$0xff] }
 0x450   : > { %v6639_v29 = vadd.f32 %v17177_v44, %v6526_v63  ;;  %v6833_v63 = vadd.f32 %v14992_v30, %v15016_v26  ;;  %v6835_v30 = vadd.f32 %v15026_v32, %v15049_v5  ;;  %v17186_v32 = vld [vmem:[#allocation67_spill] sm:$0xff] }
 0x451   : > { %v6749_v4 = vpop.f32.mrf.mxu0  ;;  %v6310_v5 = vadd.f32 %v15114_v2, %v17186_v32 }
 0x452   : > { %v15237_v12 = vadd.f32 %v6749_v4, %v6637_v60  ;;  %v10692_v4 = vld [vmem:[#allocation3 + $0x454] sm:$0xf] }
 0x453   : > { %v9883_v22 = vor.u32 %v10692_v4, %v9880_v43 }
 0x454   : > { %6788 = vmatmul.bf16.gmra.mxu0 %v10015_v62  ;;  %v15240_v37 = vpop.f32.mrf.mxu1 }
 0x455   : > { %17176 = vst [vmem:[#allocation76_spill] sm:$0xff] %v15240_v37  ;;  %v6942_v11 = vpop.f32.mrf.mxu2 }
 0x456   : > { %v15243_v56 = vadd.f32 %v6942_v11, %v6830_v23  ;;  %v6305_v23 = vadd.f32 %v15114_v2, %v17178_v20  ;;  %v17182_v20 = vld [vmem:[#allocation119_spill] sm:$0xff] }
 0x457   : > { %v15246_v58 = vpop.f32.mrf.mxu3 }
 0x459   : > { %v6751_v54 = vpop.f32.mrf.mxu0 }
 0x45a   : > { %v15248_v60 = vadd.f32 %v6751_v54, %v6639_v29  ;;  %6984 = vmatmul.bf16.gmra.mxu2 %v9807_v28  ;;  %v17180_v29 = vld [vmem:[#allocation15_spill] sm:$0xff]  ;;  %v5607_v54 = vpack.c.b16 %v5418_v17, %v5418_v17  ;;  %v6418_v28 = vadd.f32 %v17181_v21, %v6305_v23  ;;  %v17184_v17 = vld [vmem:[#allocation98_spill] sm:$0xff]  ;;  %v9916_v23 = vld [vmem:[#allocation3 + $0x4bc] sm:$0xf0] }
 0x45b   : > { %v6642_v52 = vadd.f32 %v17180_v29, %v17179_v1  ;;  %v9842_v29 = vld [vmem:[#allocation3 + $0x408] sm:$0xf] }
 0x45c   : > { %v15250_v62 = vpop.f32.mrf.mxu1  ;;  %7107 = vmatmul.bf16.gmra.mxu3 %v9883_v22  ;;  %v6531_v22 = vadd.f32 %v17182_v20, %v6418_v28 }
 0x45d   : > { %v6945_v11 = vpop.f32.mrf.mxu2 }
 0x45e   : > { %v15256_v44 = vadd.f32 %v6945_v11, %v6833_v63  ;;  %v10687_v63 = vld [vmem:[#allocation3 + $0x428] sm:$0xf0] }
 0x45f   : > { %6906 = vmatmul.bf16.gmra.mxu1 %v5608_v9  ;;  %v15260_v43 = vpop.f32.mrf.mxu3  ;;  %v6644_v9 = vadd.f32 %v17184_v17, %v6531_v22  ;;  %v6838_v22 = vadd.f32 %v15054_v8, %v15067_v57  ;;  %v10562_v17 = vld [vmem:[#allocation3 + $0x40] sm:$0xf0]  ;;  %v9346_v57 = vld [vmem:[#allocation3 + $0x20] sm:$0xf]  ;;  %v17188_v8 = vld [vmem:[#allocation54_spill] sm:$0xff] }
 0x460   : > { %v9347_v32 = vor.u32 %v10562_v17, %v9346_v57 }
 0x461   : > { %v6754_v47 = vpop.f32.mrf.mxu0 }
 0x462   : > { %v15263_v4 = vadd.f32 %v6754_v47, %v6642_v52  ;;  %v9843_v47 = vor.u32 %v10687_v63, %v9842_v29 }
 0x464   : > { %6793 = vmatmul.bf16.gmra.mxu0 %v5607_v54  ;;  %v15266_v37 = vpop.f32.mrf.mxu1  ;;  %v10701_v54 = vld [vmem:[#allocation3 + $0x49c] sm:$0xf] }
 0x465   : > { %17183 = vst [vmem:[#allocation11_spill] sm:$0xff] %v15266_v37  ;;  %v6947_v26 = vpop.f32.mrf.mxu2  ;;  %v9919_v28 = vor.u32 %v10701_v54, %v9916_v23  ;;  %v17187_v23 = vld [vmem:[#allocation16_spill] sm:$0xff]  ;;  %v6423_v54 = vadd.f32 %v17188_v8, %v6310_v5  ;;  %v9878_v5 = vld [vmem:[#allocation3 + $0x450] sm:$0xf] }
 0x466   : > { %v15270_v11 = vadd.f32 %v6947_v26, %v6835_v30  ;;  %v10454_v30 = vld [vmem:[%s16322_s3 + $0x80] sm:$0xf]  ;;  %v10840_v26 = vld [vmem:[%s16322_s3 + $0x8c] sm:$0xf0]  ;;  %v6647_v2 = vadd.f32 %v17187_v23, %v14517_v34  ;;  %v10696_v34 = vld [vmem:[#allocation3 + $0x470] sm:$0xf0] }
 0x467   : > { %v15273_v1 = vpop.f32.mrf.mxu3  ;;  %v6536_v37 = vadd.f32 %v14558_v41, %v6423_v54  ;;  %v9879_v17 = vor.u32 %v10696_v34, %v9878_v5  ;;  %v10710_v41 = vld [vmem:[#allocation3 + $0x4e4] sm:$0xf] }
 0x469   : > { %v6756_v52 = vpop.f32.mrf.mxu0 }
 0x46a   : > { %v15275_v21 = vadd.f32 %v6756_v52, %v6644_v9  ;;  %6989 = vmatmul.bf16.gmra.mxu2 %v9843_v47  ;;  %v10455_v9 = vor.u32 %v10840_v26, %v10454_v30 }
 0x46c   : > { %17185 = vst [vmem:[#allocation87_spill] sm:$0xff] %v15275_v21  ;;  %v15277_v20 = vpop.f32.mrf.mxu1  ;;  %7112 = vmatmul.bf16.gmra.mxu3 %v9919_v28  ;;  %8229 = vmatpush.bf16.msrb.mxu1 %v10455_v9 }
 0x46d   : > { %v6950_v63 = vpop.f32.mrf.mxu2 }
 0x46e   : > { %v15289_v29 = vadd.f32 %v6950_v63, %v6838_v22  ;;  %v6840_v22 = vadd.f32 %v15070_v35, %v15078_v27  ;;  %v17190_v63 = vld [vmem:[#allocation103_spill] sm:$0xff]  ;;  %v6843_v35 = vadd.f32 %v15080_v53, %v15089_v39  ;;  %v6845_v53 = vadd.f32 %v15092_v10, %v15106_v7 }
 0x46f   : > { %v15293_v52 = vpop.f32.mrf.mxu3  ;;  %v6649_v23 = vadd.f32 %v17190_v63, %v6536_v37  ;;  %v6848_v10 = vadd.f32 %v15109_v51, %v15129_v40  ;;  %v6850_v51 = vadd.f32 %v15132_v24, %v15143_v36  ;;  %v10714_v40 = vld [vmem:[#allocation3 + $0x500] sm:$0xf0]  ;;  %v10836_v24 = vld [vmem:[%s16322_s3 + $0x6c] sm:$0xf0]  ;;  %v3418_v36 = vld [vmem:[#allocation2 + $0xac] sm:$0xf] }
 0x471   : > { %v6759_v47 = vpop.f32.mrf.mxu0 }
 0x472   : > { %v15296_v28 = vadd.f32 %v6759_v47, %v6647_v2  ;;  %v9952_v2 = vld [vmem:[#allocation3 + $0x504] sm:$0xf0] }
 0x473   : > { %v9955_v8 = vor.u32 %v10710_v41, %v9952_v2 }
 0x474   : > { %7145 = vmatmul.bf16.vlgmr.msrb.gmra.mxu0 %v9347_v32  ;;  %v15299_v21 = vpop.f32.mrf.mxu1  ;;  %v10571_v32 = vld [vmem:[#allocation3 + $0x88] sm:$0xf0] }
 0x475   : > { %17189 = vst [vmem:[#allocation85_spill] sm:$0xff] %v15299_v21  ;;  %v6952_v30 = vpop.f32.mrf.mxu2 }
 0x476   : > { %v15303_v26 = vadd.f32 %v6952_v30, %v6840_v22  ;;  %v17192_v22 = vld [vmem:[#allocation115_spill] sm:$0xff] }
 0x477   : > { %v15306_v9 = vpop.f32.mrf.mxu3  ;;  %v6652_v30 = vadd.f32 %v17192_v22, %v14611_v45  ;;  %v10719_v22 = vld [vmem:[#allocation3 + $0x52c] sm:$0xf] }
 0x479   : > { %v6761_v47 = vpop.f32.mrf.mxu0 }
 0x47a   : > { %v15308_v57 = vadd.f32 %v6761_v47, %v6649_v23  ;;  %6994 = vmatmul.bf16.gmra.mxu2 %v9879_v17  ;;  %v9382_v23 = vld [vmem:[#allocation3 + $0x68] sm:$0xf]  ;;  %v10705_v17 = vld [vmem:[#allocation3 + $0x4b8] sm:$0xf0] }
 0x47b   : > { %v9383_v2 = vor.u32 %v10571_v32, %v9382_v23 }
 0x47c   : > { %17191 = vst [vmem:[#allocation38_spill] sm:$0xff] %v15308_v57  ;;  %v15310_v54 = vpop.f32.mrf.mxu1  ;;  %7117 = vmatmul.bf16.gmra.mxu3 %v9955_v8  ;;  %v17194_v8 = vld [vmem:[#allocation120_spill] sm:$0xff] }
 0x47d   : > { %v6955_v27 = vpop.f32.mrf.mxu2  ;;  %v6654_v45 = vadd.f32 %v17194_v8, %v14650_v49 }
 0x47e   : > { %v15314_v37 = vadd.f32 %v6955_v27, %v6843_v35  ;;  %v9914_v27 = vld [vmem:[#allocation3 + $0x498] sm:$0xf] }
 0x47f   : > { %v15318_v63 = vpop.f32.mrf.mxu3  ;;  %v9915_v32 = vor.u32 %v10705_v17, %v9914_v27 }
 0x481   : > { %v6764_v34 = vpop.f32.mrf.mxu0 }
 0x482   : > { %v15320_v5 = vadd.f32 %v6764_v34, %v6652_v30  ;;  %v9988_v30 = vld [vmem:[#allocation3 + $0x54c] sm:$0xf0] }
 0x484   : > { %7150 = vmatmul.bf16.gmra.mxu0 %v9383_v2  ;;  %v15322_v47 = vpop.f32.mrf.mxu1  ;;  %v9991_v2 = vor.u32 %v10719_v22, %v9988_v30 }
 0x485   : > { %17193 = vst [vmem:[#allocation93_spill] sm:$0xff] %v15322_v47  ;;  %v6957_v39 = vpop.f32.mrf.mxu2 }
 0x486   : > { %v15326_v41 = vadd.f32 %v6957_v39, %v6845_v53  ;;  %v10580_v53 = vld [vmem:[#allocation3 + $0xd0] sm:$0xf0]  ;;  %v6657_v39 = vadd.f32 %v14519_v13, %v14698_v16  ;;  %v6659_v13 = vadd.f32 %v14572_v25, %v14745_v14  ;;  %v3577_v14 = vrot.slane %v3418_v36, 6  ;;  %v10589_v36 = vld [vmem:[#allocation3 + $0x118] sm:$0xf0] }
 0x487   : > { %v15330_v35 = vpop.f32.mrf.mxu3 }
 0x489   : > { %v6766_v34 = vpop.f32.mrf.mxu0 }
 0x48a   : > { %v15332_v23 = vadd.f32 %v6766_v34, %v6654_v45  ;;  %6999 = vmatmul.bf16.gmra.mxu2 %v9915_v32  ;;  %v9418_v45 = vld [vmem:[#allocation3 + $0xb0] sm:$0xf] }
 0x48b   : > { %v9419_v22 = vor.u32 %v10580_v53, %v9418_v45  ;;  %v10438_v53 = vld [vmem:[%s16322_s3 + $0x60] sm:$0xf]  ;;  %v3419_v45 = vld [vmem:[#allocation2 + $0xb0] sm:$0xf] }
 0x48c   : > { %17195 = vst [vmem:[#allocation125_spill] sm:$0xff] %v15332_v23  ;;  %v15334_v47 = vpop.f32.mrf.mxu1  ;;  %7122 = vmatmul.bf16.gmra.mxu3 %v9991_v2  ;;  %v9950_v2 = vld [vmem:[#allocation3 + $0x4e0] sm:$0xf]  ;;  %v3705_v23 = vld [vmem:[#allocation2 + $0xb0] sm:$0xf] }
 0x48d   : > { %v6960_v7 = vpop.f32.mrf.mxu2 }
 0x48e   : > { %v15338_v49 = vadd.f32 %v6960_v7, %v6848_v10  ;;  %v9951_v10 = vor.u32 %v10714_v40, %v9950_v2 }
 0x48f   : > { %v15342_v8 = vpop.f32.mrf.mxu3 }
 0x491   : > { %v6769_v17 = vpop.f32.mrf.mxu0 }
 0x492   : > { %v15344_v27 = vadd.f32 %v6769_v17, %v6657_v39  ;;  %v10439_v17 = vor.u32 %v10836_v24, %v10438_v53 }
 0x494   : > { %7155 = vmatmul.bf16.gmra.mxu0 %v9419_v22  ;;  %v15346_v30 = vpop.f32.mrf.mxu1  ;;  %v17198_v22 = vrot.slane %v15031_v6, 6  ;;  %8230 = vmatpush.bf16.msrb.mxu1 %v10439_v17  ;;  %v4110_v17 = vshrl.u32 %v3705_v23, 16 }
 0x495   : > { %17196 = vst [vmem:[#allocation102_spill] sm:$0xff] %v15346_v30  ;;  %v6962_v34 = vpop.f32.mrf.mxu2  ;;  %v3704_v30 = vld [vmem:[#allocation2 + $0xac] sm:$0xf] }
 0x496   : > { %v15350_v32 = vadd.f32 %v6962_v34, %v6850_v51  ;;  %v3576_v25 = vrot.slane %v17198_v22, 4  ;;  %v3580_v51 = vrot.slane %v3419_v45, 6  ;;  %v3579_v34 = vrot.slane %v3577_v14, 4 }
 0x497   : > { %v15354_v16 = vpop.f32.mrf.mxu3  ;;  %v4103_v53 = vshll.u32 %v3704_v30, 16  ;;  %v4113_v45 = vshll.u32 %v3705_v23, 16 }
 0x498   : > { %v3578_v40 = vsel %vm11674_vm8, %v3576_v25, %v3577_v14  ;;  %v3581_v6 = vsel %vm11674_vm8, %v3579_v34, %v3580_v51  ;;  %v17199_v25 = vld [vmem:[#allocation17_spill] sm:$0xff]  ;;  %v4112_v34 = vrot.slane %v4110_v17, 6 }
 0x499   : > { %v6771_v7 = vpop.f32.mrf.mxu0  ;;  %3662 = vst [vmem:[#allocation3 + $0x570] sm:$0xf] %v3578_v40  ;;  %v4098_v14 = vrot.slane %v17199_v25, 4  ;;  %v9986_v17 = vld [vmem:[#allocation3 + $0x528] sm:$0xf] }
 0x49a   : > { %v15362_v39 = vadd.f32 %v6771_v7, %v6659_v13  ;;  %7004 = vmatmul.bf16.gmra.mxu2 %v9951_v10  ;;  %v6853_v13 = vadd.f32 %v15146_v46, %v15164_v19  ;;  %v4100_v7 = vshrl.u32 %v3704_v30, 16  ;;  %v6662_v10 = vadd.f32 %v14614_v48, %v14793_v18  ;;  %3663 = vst [vmem:[#allocation3 + $0x594] sm:$0xf] %v3581_v6  ;;  %v9454_v19 = vld [vmem:[#allocation3 + $0xf8] sm:$0xf] }
 0x49b   : > { %v4115_v30 = vrot.slane %v4113_v45, 7  ;;  %v9455_v57 = vor.u32 %v10589_v36, %v9454_v19  ;;  %v10723_v45 = vld [vmem:[#allocation3 + $0x548] sm:$0xf0]  ;;  %v17204_v36 = vld [vmem:[#allocation82_spill] sm:$0xff] }
 0x49c   : > { %17197 = vst [vmem:[#allocation96_spill] sm:$0xff] %v15362_v39  ;;  %v15368_v2 = vpop.f32.mrf.mxu1  ;;  %v4102_v40 = vrot.slane %v4100_v7, 6  ;;  %v4105_v39 = vrot.slane %v4103_v53, 7 }
 0x49d   : > { %v6965_v24 = vpop.f32.mrf.mxu2  ;;  %v4116_v18 = vor.u32 %v4115_v30, %v4112_v34 }
 0x49e   : > { %v15376_v22 = vadd.f32 %v6965_v24, %v6853_v13  ;;  %v4106_v48 = vor.u32 %v4105_v39, %v4102_v40  ;;  %v3582_v40 = vrot.slane %v3580_v51, 4 }
 0x49f   : > { %v15379_v46 = vpop.f32.mrf.mxu3  ;;  %v4118_v34 = vrot.slane %v4116_v18, 4 }
 0x4a0   : > { %17200 = vst [vmem:[#allocation131_spill] sm:$0xff] %v15379_v46  ;;  %v4107_v23 = vsel %vm13307_vm1, %v4098_v14, %v4106_v48  ;;  %v4108_v13 = vrot.slane %v4106_v48, 4  ;;  %v3706_v14 = vld [vmem:[#allocation2 + $0xb4] sm:$0x1] }
 0x4a1   : > { %v6774_v59 = vpop.f32.mrf.mxu0  ;;  %4203 = vst [vmem:[#allocation3 + $0x574] sm:$0xf] %v4107_v23  ;;  %v4120_v30 = vshll.u32 %v3706_v14, 16 }
 0x4a2   : > { %v15381_v21 = vadd.f32 %v6774_v59, %v6662_v10  ;;  %v4117_v7 = vsel %vm13307_vm1, %v4108_v13, %v4116_v18  ;;  %v17203_v10 = vld [vmem:[#allocation61_spill] sm:$0xff]  ;;  %v9987_v59 = vor.u32 %v10723_v45, %v9986_v17  ;;  %3664 = vst [vmem:[#allocation3 + $0x5b8] sm:$0x3] %v3582_v40  ;;  %v17207_v18 = vld [vmem:[#allocation50_spill] sm:$0xff] }
 0x4a3   : > { %4204 = vst [vmem:[#allocation3 + $0x598] sm:$0xf] %v4117_v7  ;;  %v6664_v39 = vadd.f32 %v17204_v36, %v17203_v10  ;;  %v4122_v23 = vrot.slane %v4120_v30, 7  ;;  %v6858_v7 = vadd.f32 %v15183_v31, %v15202_v42 }
 0x4a4   : > { %7160 = vmatmul.bf16.gmra.mxu0 %v9455_v57  ;;  %v15385_v24 = vpop.f32.mrf.mxu1 }
 0x4a5   : > { %17202 = vst [vmem:[#allocation117_spill] sm:$0xff] %v15385_v24  ;;  %v15389_v53 = vpop.f32.mrf.mxu2  ;;  %v4123_v36 = vsel %vm13307_vm1, %v4118_v34, %v4122_v23  ;;  %v10598_v24 = vld [vmem:[#allocation3 + $0x160] sm:$0xf0]  ;;  %v10022_v34 = vld [vmem:[#allocation3 + $0x570] sm:$0xf] }
 0x4a6   : > { %4205 = vst [vmem:[#allocation3 + $0x5bc] sm:$0x3] %v4123_v36  ;;  %v10732_v23 = vld [vmem:[#allocation3 + $0x590] sm:$0xf0]  ;;  %v17212_v36 = vld [vmem:[#allocation91_spill] sm:$0xff] }
 0x4a7   : > { %v15393_v25 = vpop.f32.mrf.mxu3 }
 0x4a8   : > { %17205 = vst [vmem:[#allocation116_spill] sm:$0xff] %v15393_v25  ;;  %v10728_v48 = vld [vmem:[#allocation3 + $0x574] sm:$0xf]  ;;  %v9526_v25 = vld [vmem:[#allocation3 + $0x188] sm:$0xf] }
 0x4a9   : > { %v6776_v57 = vpop.f32.mrf.mxu0 }
 0x4aa   : > { %v15395_v19 = vadd.f32 %v6776_v57, %v6664_v39  ;;  %7009 = vmatmul.bf16.gmra.mxu2 %v9987_v59  ;;  %v10024_v10 = vld [vmem:[#allocation3 + $0x594] sm:$0xf0]  ;;  %v17208_v39 = vld [vmem:[#allocation88_spill] sm:$0xff] }
 0x4ab   : > { %v10027_v17 = vor.u32 %v10728_v48, %v10024_v10  ;;  %v6667_v57 = vadd.f32 %v17208_v39, %v17207_v18  ;;  %v9490_v59 = vld [vmem:[#allocation3 + $0x140] sm:$0xf]  ;;  %v17211_v10 = vld [vmem:[#allocation14_spill] sm:$0xff] }
 0x4ac   : > { %17206 = vst [vmem:[#allocation99_spill] sm:$0xff] %v15395_v19  ;;  %v15397_v13 = vpop.f32.mrf.mxu1  ;;  %v9491_v31 = vor.u32 %v10598_v24, %v9490_v59 }
 0x4ad   : > { %v6970_v51 = vpop.f32.mrf.mxu2  ;;  %7127 = vmatmul.bf16.gmra.mxu3 %v10027_v17  ;;  %v4699_v18 = vld [vmem:[#allocation3 + $0x5b8] sm:$0x33] }
 0x4ae   : > { %v15403_v45 = vadd.f32 %v6970_v51, %v6858_v7  ;;  %v10023_v7 = vor.u32 %v10732_v23, %v10022_v34  ;;  %v6669_v51 = vadd.f32 %v17212_v36, %v17211_v10  ;;  %v17216_v23 = vld [vmem:[#allocation37_spill] sm:$0xff]  ;;  %v17217_v10 = vld [vmem:[#allocation106_spill] sm:$0xff] }
 0x4af   : > { %v15407_v40 = vpop.f32.mrf.mxu3  ;;  %v6672_v36 = vadd.f32 %v17217_v10, %v17216_v23  ;;  %v17220_v23 = vld [vmem:[#allocation63_spill] sm:$0xff]  ;;  %v17221_v10 = vld [vmem:[#allocation40_spill] sm:$0xff] }
 0x4b0   : > { %17209 = vst [vmem:[#allocation138_spill] sm:$0xff] %v15407_v40  ;;  %v5421_v40 = vunpack.c.h.b16 %v4699_v18 }
 0x4b1   : > { %v6779_v14 = vpop.f32.mrf.mxu0 }
 0x4b2   : > { %v15409_v30 = vadd.f32 %v6779_v14, %v6667_v57  ;;  %v5610_v57 = vpack.c.b16 %v5421_v40, %v5421_v40  ;;  %v6863_v14 = vadd.f32 %v15222_v33, %v15237_v12  ;;  %v10832_v33 = vld [vmem:[%s16322_s3 + $0x4c] sm:$0xf0] }
 0x4b4   : > { %7165 = vmatmul.bf16.gmra.mxu0 %v9491_v31  ;;  %v15411_v42 = vpop.f32.mrf.mxu1  ;;  %v10607_v31 = vld [vmem:[#allocation3 + $0x1a8] sm:$0xf0] }
 0x4b5   : > { %17210 = vst [vmem:[#allocation127_spill] sm:$0xff] %v15411_v42  ;;  %v15413_v48 = vpop.f32.mrf.mxu2  ;;  %v9527_v40 = vor.u32 %v10607_v31, %v9526_v25  ;;  %v6868_v25 = vadd.f32 %v15250_v62, %v15263_v4  ;;  %v10616_v31 = vld [vmem:[#allocation3 + $0x1f0] sm:$0xf0]  ;;  %v17231_v4 = vld [vmem:[#allocation33_spill] sm:$0xff] }
 0x4b6   : > { %v17230_v62 = vld [vmem:[#allocation74_spill] sm:$0xff] }
 0x4b7   : > { %v15417_v39 = vpop.f32.mrf.mxu3 }
 0x4b8   : > { %17213 = vst [vmem:[#allocation97_spill] sm:$0xff] %v15417_v39 }
 0x4b9   : > { %v6781_v19 = vpop.f32.mrf.mxu0 }
 0x4ba   : > { %v15419_v17 = vadd.f32 %v6781_v19, %v6669_v51  ;;  %7014 = vmatmul.bf16.gmra.mxu2 %v10023_v7  ;;  %v10422_v19 = vld [vmem:[%s16322_s3 + $0x40] sm:$0xf]  ;;  %v5420_v51 = vunpack.c.l.b16 %v4699_v18 }
 0x4bb   : > { %v10423_v7 = vor.u32 %v10832_v33, %v10422_v19  ;;  %v17225_v19 = vld [vmem:[#allocation53_spill] sm:$0xff]  ;;  %v17226_v33 = vld [vmem:[#allocation12_spill] sm:$0xff] }
 0x4bc   : > { %17214 = vst [vmem:[#allocation111_spill] sm:$0xff] %v15419_v17  ;;  %v15421_v24 = vpop.f32.mrf.mxu1  ;;  %v6674_v17 = vadd.f32 %v17221_v10, %v17220_v23 }
 0x4bd   : > { %v6975_v59 = vpop.f32.mrf.mxu2  ;;  %7132 = vmatmul.bf16.gmra.mxu3 %v5610_v57  ;;  %8231 = vmatpush.bf16.msrb.mxu1 %v10423_v7  ;;  %v5609_v57 = vpack.c.b16 %v5420_v51, %v5420_v51  ;;  %v9562_v51 = vld [vmem:[#allocation3 + $0x1d0] sm:$0xf] }
 0x4be   : > { %v15425_v34 = vadd.f32 %v6975_v59, %v6863_v14 }
 0x4bf   : > { %v15429_v42 = vpop.f32.mrf.mxu3 }
 0x4c0   : > { %17215 = vst [vmem:[#allocation104_spill] sm:$0xff] %v15425_v34 }
 0x4c1   : > { %17218 = vst [vmem:[#allocation47_spill] sm:$0xff] %v15429_v42  ;;  %v6784_v39 = vpop.f32.mrf.mxu0 }
 0x4c2   : > { %v15437_v12 = vadd.f32 %v6784_v39, %v6672_v36 }
 0x4c4   : > { %7170 = vmatmul.bf16.gmra.mxu0 %v9527_v40  ;;  %v15439_v14 = vpop.f32.mrf.mxu1  ;;  %v6677_v40 = vadd.f32 %v17226_v33, %v17225_v19  ;;  %v6873_v33 = vadd.f32 %v15277_v20, %v15296_v28  ;;  %v10504_v20 = vld [vmem:[%s16322_s3 + $0xf0] sm:$0xf0]  ;;  %v10510_v28 = vld [vmem:[%s16322_s3 + $0xe8] sm:$0xf] }
 0x4c5   : > { %17219 = vst [vmem:[#allocation134_spill] sm:$0xff] %v15439_v14  ;;  %v15441_v59 = vpop.f32.mrf.mxu2  ;;  %v6679_v14 = vadd.f32 %v17231_v4, %v17230_v62  ;;  %v10850_v4 = vld [vmem:[%s16322_s3 + $0xe4] sm:$0xf] }
 0x4c7   : > { %v15445_v42 = vpop.f32.mrf.mxu3 }
 0x4c8   : > { %17222 = vst [vmem:[#allocation109_spill] sm:$0xff] %v15445_v42 }
 0x4c9   : > { %v6786_v46 = vpop.f32.mrf.mxu0 }
 0x4ca   : > { %v15447_v34 = vadd.f32 %v6786_v46, %v6674_v17  ;;  %7019 = vmatmul.bf16.gmra.mxu2 %v5609_v57  ;;  %v9563_v46 = vor.u32 %v10616_v31, %v9562_v51 }
 0x4cc   : > { %17223 = vst [vmem:[#allocation112_spill] sm:$0xff] %v15447_v34  ;;  %v15449_v39 = vpop.f32.mrf.mxu1 }
 0x4cd   : > { %v6980_v18 = vpop.f32.mrf.mxu2 }
 0x4ce   : > { %v15453_v36 = vadd.f32 %v6980_v18, %v6868_v25 }
 0x4cf   : > { %v15457_v23 = vpop.f32.mrf.mxu3 }
 0x4d0   : > { %17224 = vst [vmem:[#allocation110_spill] sm:$0xff] %v15453_v36 }
 0x4d1   : > { %v6789_v7 = vpop.f32.mrf.mxu0  ;;  %17227 = vst [vmem:[#allocation101_spill] sm:$0xff] %v15457_v23 }
 0x4d2   : > { %v15459_v10 = vadd.f32 %v6789_v7, %v6677_v40  ;;  %v10625_v7 = vld [vmem:[#allocation3 + $0x238] sm:$0xf0] }
 0x4d4   : > { %7175 = vmatmul.bf16.gmra.mxu0 %v9563_v46  ;;  %v15461_v17 = vpop.f32.mrf.mxu1  ;;  %v9598_v46 = vld [vmem:[#allocation3 + $0x218] sm:$0xf] }
 0x4d5   : > { %17228 = vst [vmem:[#allocation113_spill] sm:$0xff] %v15461_v17  ;;  %v15463_v57 = vpop.f32.mrf.mxu2  ;;  %v9599_v17 = vor.u32 %v10625_v7, %v9598_v46  ;;  %v6878_v7 = vadd.f32 %v15310_v54, %v15320_v5  ;;  %v10634_v46 = vld [vmem:[#allocation3 + $0x280] sm:$0xf0]  ;;  %v10643_v54 = vld [vmem:[#allocation3 + $0x2c8] sm:$0xf0] }
 0x4d6   : > { %17229 = vst [vmem:[#allocation32_spill] sm:$0xff] %v15463_v57 }
 0x4d7   : > { %v15469_v34 = vpop.f32.mrf.mxu3 }
 0x4d8   : > { %17233 = vst [vmem:[#allocation92_spill] sm:$0xff] %v15469_v34 }
 0x4d9   : > { %v6791_v25 = vpop.f32.mrf.mxu0 }
 0x4da   : > { %v15467_v18 = vadd.f32 %v6791_v25, %v6679_v14  ;;  %v10507_v25 = vor.u32 %v10850_v4, %v10504_v20 }
 0x4dc   : > { %17232 = vst [vmem:[#allocation24_spill] sm:$0xff] %v15467_v18  ;;  %v6907_v19 = vpop.f32.mrf.mxu1  ;;  %8315 = vmatpush.bf16.msra.mxu2 %v10507_v25  ;;  %v9634_v18 = vld [vmem:[#allocation3 + $0x260] sm:$0xf]  ;;  %v6883_v25 = vadd.f32 %v15334_v47, %v15344_v27 }
 0x4dd   : > { %v6985_v40 = vpop.f32.mrf.mxu2  ;;  %v10828_v19 = vld [vmem:[%s16322_s3 + $0x2c] sm:$0xf0] }
 0x4de   : > { %v15473_v31 = vadd.f32 %v6985_v40, %v6873_v33 }
 0x4df   : > { %v15475_v42 = vpop.f32.mrf.mxu3 }
 0x4e0   : > { %17234 = vst [vmem:[#allocation79_spill] sm:$0xff] %v15473_v31 }
 0x4e1   : > { %v6794_v51 = vpop.f32.mrf.mxu0  ;;  %17235 = vst [vmem:[#allocation26_spill] sm:$0xff] %v15475_v42  ;;  %v9635_v42 = vor.u32 %v10634_v46, %v9634_v18 }
 0x4e4   : > { %7180 = vmatmul.bf16.gmra.mxu0 %v9599_v17  ;;  %v6909_v23 = vpop.f32.mrf.mxu1  ;;  %v10406_v17 = vld [vmem:[%s16322_s3 + $0x20] sm:$0xf] }
 0x4e5   : > { %v15477_v62 = vpop.f32.mrf.mxu2  ;;  %v10853_v23 = vld [vmem:[%s16322_s3 + $0xf4] sm:$0xf0]  ;;  %v10407_v40 = vor.u32 %v10828_v19, %v10406_v17 }
 0x4e6   : > { %17236 = vst [vmem:[#allocation68_spill] sm:$0xff] %v15477_v62  ;;  %v10511_v33 = vor.u32 %v10853_v23, %v10510_v28 }
 0x4e7   : > { %8232 = vmatpush.bf16.msrb.mxu1 %v10407_v40 }
 0x4e8   : > { %8404 = vmatpush.bf16.msra.mxu3 %v10511_v33  ;;  %v9670_v33 = vld [vmem:[#allocation3 + $0x2a8] sm:$0xf] }
 0x4e9   : > { %v6796_v14 = vpop.f32.mrf.mxu0  ;;  %v9671_v40 = vor.u32 %v10643_v54, %v9670_v33  ;;  %v6888_v54 = vadd.f32 %v15368_v2, %v15381_v21  ;;  %v10494_v21 = vld [vmem:[%s16322_s3 + $0xc8] sm:$0xf] }
 0x4ea   : > { %v15499_v14 = vpop.f32.mrf.mxu3 }
 0x4eb   : > { %17237 = vst [vmem:[#allocation46_spill] sm:$0xff] %v15499_v14 }
 0x4ed   : > { %v6990_v51 = vpop.f32.mrf.mxu2 }
 0x4ee   : > { %v15501_v4 = vadd.f32 %v6990_v51, %v6878_v7 }
 0x4f0   : > { %17238 = vst [vmem:[#allocation114_spill] sm:$0xff] %v15501_v4 }
 0x4f1   : > { %v7146_v20 = vpop.f32.mrf.mxu0 }
 0x4f2   : > { %v15505_v23 = vpop.f32.mrf.mxu3  ;;  %v17245_v20 = vld [vmem:[#allocation35_spill] sm:$0xff] }
 0x4f3   : > { %17240 = vst [vmem:[#allocation49_spill] sm:$0xff] %v15505_v23 }
 0x4f4   : > { %7185 = vmatmul.bf16.gmra.mxu0 %v9635_v42  ;;  %v17243_v42 = vld [vmem:[#allocation100_spill] sm:$0xff] }
 0x4f5   : > { %v15503_v34 = vpop.f32.mrf.mxu2  ;;  %v7039_v18 = vadd.f32 %v17243_v42, %v15121_v50  ;;  %v9706_v50 = vld [vmem:[#allocation3 + $0x2f0] sm:$0xf]  ;;  %v10846_v42 = vld [vmem:[%s16322_s3 + $0xc4] sm:$0xf] }
 0x4f6   : > { %17239 = vst [vmem:[#allocation23_spill] sm:$0xff] %v15503_v34 }
 0x4f9   : > { %v7148_v28 = vpop.f32.mrf.mxu0 }
 0x4fa   : > { %v15511_v7 = vpop.f32.mrf.mxu3  ;;  %v17246_v28 = vld [vmem:[#allocation118_spill] sm:$0xff] }
 0x4fb   : > { %17242 = vst [vmem:[#allocation64_spill] sm:$0xff] %v15511_v7  ;;  %v7041_v23 = vadd.f32 %v17246_v28, %v17245_v20  ;;  %v10652_v7 = vld [vmem:[#allocation3 + $0x310] sm:$0xf0]  ;;  %v10472_v20 = vld [vmem:[%s16322_s3 + $0xb0] sm:$0xf0] }
 0x4fc   : > { %v9707_v2 = vor.u32 %v10652_v7, %v9706_v50  ;;  %v10845_v7 = vld [vmem:[%s16322_s3 + $0xb4] sm:$0xf0] }
 0x4fd   : > { %v6995_v17 = vpop.f32.mrf.mxu2  ;;  %v10841_v50 = vld [vmem:[%s16322_s3 + $0x94] sm:$0xf0] }
 0x4fe   : > { %v15509_v5 = vadd.f32 %v6995_v17, %v6883_v25 }
 0x500   : > { %17241 = vst [vmem:[#allocation105_spill] sm:$0xff] %v15509_v5 }
 0x501   : > { %v7151_v19 = vpop.f32.mrf.mxu0 }
 0x502   : > { %v7152_v46 = vadd.f32 %v7151_v19, %v7039_v18  ;;  %v15519_v17 = vpop.f32.mrf.mxu3  ;;  %v10849_v18 = vld [vmem:[%s16322_s3 + $0xd4] sm:$0xf0] }
 0x503   : > { %17247 = vst [vmem:[#allocation124_spill] sm:$0xff] %v15519_v17  ;;  %v10495_v28 = vor.u32 %v10849_v18, %v10494_v21 }
 0x504   : > { %7190 = vmatmul.bf16.gmra.mxu0 %v9671_v40  ;;  %v7252_v14 = vmax.f32 %v7152_v46, 0.0  ;;  %v10842_v46 = vld [vmem:[%s16322_s3 + $0xa4] sm:$0xf] }
 0x505   : > { %v15515_v51 = vpop.f32.mrf.mxu2  ;;  %8405 = vmatpush.bf16.msra.mxu3 %v10495_v28 }
 0x506   : > { %17244 = vst [vmem:[#allocation59_spill] sm:$0xff] %v15515_v51  ;;  %v17252_v51 = vld [vmem:[#allocation121_spill] sm:$0xff] }
 0x507   : > { %v7046_v4 = vadd.f32 %v17252_v51, %v15172_v38  ;;  %v6893_v38 = vadd.f32 %v15397_v13, %v15409_v30  ;;  %v10834_v51 = vld [vmem:[%s16322_s3 + $0x64] sm:$0xf]  ;;  %v10837_v13 = vld [vmem:[%s16322_s3 + $0x74] sm:$0xf0]  ;;  %v10390_v30 = vld [vmem:[%s16322_s3] sm:$0xf] }
 0x509   : > { %v7153_v47 = vpop.f32.mrf.mxu0 }
 0x50a   : > { %v7154_v27 = vadd.f32 %v7153_v47, %v7041_v23  ;;  %v10488_v23 = vld [vmem:[%s16322_s3 + $0xd0] sm:$0xf0]  ;;  %v10478_v47 = vld [vmem:[%s16322_s3 + $0xa8] sm:$0xf] }
 0x50c   : > { %v7253_v25 = vmax.f32 %v7154_v27, 0.0  ;;  %v10475_v27 = vor.u32 %v10842_v46, %v10472_v20  ;;  %v15565_v20 = vpop.f32.mrf.mxu3 }
 0x50d   : > { %v7000_v40 = vpop.f32.mrf.mxu2 }
 0x50e   : > { %v10873_v33 = vpack.c.bf16 %v7253_v25, %v7252_v14  ;;  %v15523_v5 = vadd.f32 %v7000_v40, %v6888_v54  ;;  %v10491_v14 = vor.u32 %v10846_v42, %v10488_v23  ;;  %v10838_v25 = vld [vmem:[%s16322_s3 + $0x84] sm:$0xf]  ;;  %v10456_v54 = vld [vmem:[%s16322_s3 + $0x90] sm:$0xf0]  ;;  %v10462_v40 = vld [vmem:[%s16322_s3 + $0x88] sm:$0xf] }
 0x50f   : > { %v10459_v46 = vor.u32 %v10838_v25, %v10456_v54  ;;  %v10463_v31 = vor.u32 %v10841_v50, %v10462_v40  ;;  %v10824_v40 = vld [vmem:[%s16322_s3 + $0xc] sm:$0xf0]  ;;  %v10830_v50 = vld [vmem:[%s16322_s3 + $0x44] sm:$0xf] }
 0x510   : > { %17248 = vst [vmem:[#allocation60_spill] sm:$0xff] %v15523_v5  ;;  %8316 = vmatpush.bf16.msra.mxu2 %v10491_v14  ;;  %v17251_v14 = vld [vmem:[#allocation31_spill] sm:$0xff] }
 0x511   : > { %10967 = vst [vmem:[#allocation4 + $0x8] sm:$0xff] %v10873_v33   ;;  %v7156_v19 = vpop.f32.mrf.mxu0  ;;  %v10479_v33 = vor.u32 %v10845_v7, %v10478_v47 }
 0x513   : > { %8406 = vmatpush.bf16.msra.mxu3 %v10479_v33 }
 0x514   : > { %7195 = vmatmul.bf16.gmra.mxu0 %v9707_v2  ;;  %v17250_v2 = vld [vmem:[#allocation70_spill] sm:$0xff]  ;;  %8317 = vmatpush.bf16.msra.mxu2 %v10475_v27 }
 0x515   : > { %v15561_v21 = vpop.f32.mrf.mxu2  ;;  %v7044_v18 = vadd.f32 %v17251_v14, %v17250_v2 }
 0x516   : > { %17249 = vst [vmem:[#allocation43_spill] sm:$0xff] %v15561_v21 }
 0x517   : > { %v7157_v5 = vadd.f32 %v7156_v19, %v7044_v18  ;;  %8407 = vmatpush.bf16.msra.mxu3 %v10463_v31 }
 0x518   : > { %v7373_v42 = vld [vmem:[#allocation4 + $0x8] sm:$0xe]  ;;  %v7374_v23 = vld [vmem:[#allocation4 + $0xc] sm:$0xf]  ;;  %8318 = vmatpush.bf16.msra.mxu2 %v10459_v46  ;;  %v10391_v46 = vor.u32 %v10824_v40, %v10390_v30  ;;  %v10825_v30 = vld [vmem:[%s16322_s3 + $0x14] sm:$0xf0] }
 0x519   : > { %v7377_v28 = vshrl.u32 %v7373_v42, 16  ;;  %v7380_v47 = vshll.u32 %v7373_v42, 16  ;;  %v7386_v7 = vshrl.u32 %v7374_v23, 16  ;;  %v7389_v17 = vshll.u32 %v7374_v23, 16  ;;  %v7158_v34 = vpop.f32.mrf.mxu0  ;;  %v10661_v42 = vld [vmem:[#allocation3 + $0x358] sm:$0xf0] }
 0x51a   : > { %v7159_v2 = vadd.f32 %v7158_v34, %v7046_v4  ;;  %v7254_v54 = vmax.f32 %v7157_v5, 0.0  ;;  %v10440_v34 = vld [vmem:[%s16322_s3 + $0x70] sm:$0xf0]  ;;  %v9742_v5 = vld [vmem:[#allocation3 + $0x338] sm:$0xf]  ;;  %8233 = vmatpush.bf16.msrb.mxu1 %v10391_v46  ;;  %v17255_v40 = vld [vmem:[#allocation72_spill] sm:$0xff] }
 0x51b   : > { %v7379_v62 = vrot.slane %v7377_v28, 5  ;;  %v7382_v21 = vrot.slane %v7380_v47, 6  ;;  %v7388_v36 = vrot.slane %v7386_v7, 5  ;;  %v7391_v57 = vrot.slane %v7389_v17, 6  ;;  %v10430_v47 = vld [vmem:[%s16322_s3 + $0x48] sm:$0xf] }
 0x51c   : > { %v7255_v14 = vmax.f32 %v7159_v2, 0.0  ;;  %v10443_v17 = vor.u32 %v10834_v51, %v10440_v34  ;;  %v10833_v7 = vld [vmem:[%s16322_s3 + $0x54] sm:$0xf0]  ;;  %v15608_v2 = vpop.f32.mrf.mxu3 }
 0x51d   : > { %v7383_v25 = vor.u32 %v7382_v21, %v7379_v62  ;;  %v15569_v27 = vor.u32 %v7391_v57, %v7388_v36  ;;  %v7005_v62 = vpop.f32.mrf.mxu2  ;;  %v10446_v36 = vld [vmem:[%s16322_s3 + $0x68] sm:$0xf]  ;;  %v10424_v21 = vld [vmem:[%s16322_s3 + $0x50] sm:$0xf0]  ;;  %v10829_v51 = vld [vmem:[%s16322_s3 + $0x34] sm:$0xf0] }
 0x51e   : > { %v10878_v4 = vpack.c.bf16 %v7255_v14, %v7254_v54  ;;  %v15591_v19 = vadd.f32 %v7005_v62, %v6893_v38  ;;  %v10447_v33 = vor.u32 %v10837_v13, %v10446_v36  ;;  %8319 = vmatpush.bf16.msra.mxu2 %v10443_v17  ;;  %v10427_v28 = vor.u32 %v10830_v50, %v10424_v21  ;;  %v10826_v14 = vld [vmem:[%s16322_s3 + $0x24] sm:$0xf]  ;;  %v10414_v38 = vld [vmem:[%s16322_s3 + $0x28] sm:$0xf]  ;;  %v17254_v17 = vld [vmem:[#allocation19_spill] sm:$0xff] }
 0x51f   : > { %v7384_v23 = vrot.slane %v7383_v25, 4  ;;  %v9743_v25 = vor.u32 %v10661_v42, %v9742_v5  ;;  %v10431_v54 = vor.u32 %v10833_v7, %v10430_v47  ;;  %v10415_v34 = vor.u32 %v10829_v51, %v10414_v38  ;;  %v10822_v62 = vld [vmem:[%s16322_s3 + $0x4] sm:$0xf]  ;;  %v10398_v13 = vld [vmem:[%s16322_s3 + $0x8] sm:$0xf] }
 0x520   : > { %10968 = vst [vmem:[#allocation4 + $0x10] sm:$0xff] %v10878_v4   ;;  %8408 = vmatpush.bf16.msra.mxu3 %v10447_v33  ;;  %v10392_v4 = vld [vmem:[%s16322_s3 + $0x10] sm:$0xf0]  ;;  %v7049_v36 = vadd.f32 %v17254_v17, %v15188_v55  ;;  %v7051_v50 = vadd.f32 %v17255_v40, %v15210_v3  ;;  %v10399_v55 = vor.u32 %v10825_v30, %v10398_v13  ;;  %v10670_v13 = vld [vmem:[#allocation3 + $0x3a0] sm:$0xf0] }
 0x521   : > { %v7393_v31 = vsel %vm13058_vm14, %v7384_v23, %v15569_v27  ;;  %v7161_v18 = vpop.f32.mrf.mxu0  ;;  %v10408_v23 = vld [vmem:[%s16322_s3 + $0x30] sm:$0xf0]  ;;  %v10395_v46 = vor.u32 %v10822_v62, %v10392_v4  ;;  %v6898_v3 = vadd.f32 %v15421_v24, %v15437_v12  ;;  %v9778_v40 = vld [vmem:[#allocation3 + $0x380] sm:$0xf] }
 0x522   : > { %7406 = vst [vmem:[#allocation5] sm:$0xf] %v7393_v31  ;;  %8320 = vmatpush.bf16.msra.mxu2 %v10427_v28  ;;  %v10411_v42 = vor.u32 %v10826_v14, %v10408_v23  ;;  %v7162_v33 = vadd.f32 %v7161_v18, %v7049_v36  ;;  %v7394_v18 = vrot.slane %v15569_v27, 4 }
 0x524   : > { %7200 = vmatmul.bf16.gmra.mxu0 %v9743_v25  ;;  %8409 = vmatpush.bf16.msra.mxu3 %v10431_v54  ;;  %v15640_v25 = vpop.f32.mrf.mxu3  ;;  %v7256_v38 = vmax.f32 %v7162_v33, 0.0 }
 0x525   : > { %v15628_v5 = vpop.f32.mrf.mxu2 }
 0x526   : > { %8321 = vmatpush.bf16.msra.mxu2 %v10411_v42 }
 0x527   : > { %v7375_v31 = vld [vmem:[#allocation4 + $0x10] sm:$0x3]  ;;  %v7408_v23 = vld [vmem:[#allocation4 + $0x10] sm:$0xc]  ;;  %v7409_v42 = vld [vmem:[#allocation4 + $0x14] sm:$0xf] }
 0x528   : > { %v7396_v28 = vshrl.u32 %v7375_v31, 16  ;;  %v7399_v47 = vshll.u32 %v7375_v31, 16  ;;  %8410 = vmatpush.bf16.msra.mxu3 %v10415_v34  ;;  %v7412_v62 = vshrl.u32 %v7408_v23, 16  ;;  %v7415_v34 = vshll.u32 %v7408_v23, 16 }
 0x529   : > { %v7163_v21 = vpop.f32.mrf.mxu0  ;;  %v7421_v27 = vshrl.u32 %v7409_v42, 16 }
 0x52a   : > { %v7164_v7 = vadd.f32 %v7163_v21, %v7051_v50  ;;  %v7398_v54 = vrot.slane %v7396_v28, 5  ;;  %v7401_v14 = vrot.slane %v7399_v47, 6  ;;  %8322 = vmatpush.bf16.msra.mxu2 %v10395_v46  ;;  %v7424_v50 = vshll.u32 %v7409_v42, 16 }
 0x52b   : > { %v9779_v21 = vor.u32 %v10670_v13, %v9778_v40  ;;  %v7414_v24 = vrot.slane %v7412_v62, 6  ;;  %v7417_v12 = vrot.slane %v7415_v34, 7  ;;  %v7423_v28 = vrot.slane %v7421_v27, 6 }
 0x52c   : > { %v7257_v51 = vmax.f32 %v7164_v7, 0.0  ;;  %v7402_v17 = vor.u32 %v7401_v14, %v7398_v54  ;;  %8411 = vmatpush.bf16.msra.mxu3 %v10399_v55  ;;  %v7426_v47 = vrot.slane %v7424_v50, 7  ;;  %v17256_v54 = vld [vmem:[#allocation66_spill] sm:$0xff] }
 0x52d   : > { %v7010_v4 = vpop.f32.mrf.mxu2  ;;  %v7418_v55 = vor.u32 %v7417_v12, %v7414_v24  ;;  %v7054_v14 = vadd.f32 %v17256_v54, %v15229_v15  ;;  %v10679_v12 = vld [vmem:[#allocation3 + $0x3e8] sm:$0xf0] }
 0x52e   : > { %v10883_v36 = vpack.c.bf16 %v7257_v51, %v7256_v38  ;;  %v7403_v30 = vsel %vm13058_vm14, %v7394_v18, %v7402_v17  ;;  %v15647_v31 = vadd.f32 %v7010_v4, %v6898_v3  ;;  %v17257_v18 = vld [vmem:[#allocation30_spill] sm:$0xff]  ;;  %v7427_v42 = vor.u32 %v7426_v47, %v7423_v28 }
 0x52f   : > { %7407 = vst [vmem:[#allocation5 + $0x4] sm:$0xf] %v7403_v30  ;;  %v7056_v17 = vadd.f32 %v17257_v18, %v15243_v56  ;;  %v7419_v4 = vrot.slane %v7418_v55, 4  ;;  %v6903_v56 = vadd.f32 %v15449_v39, %v15459_v10  ;;  %v10851_v47 = vld [vmem:[%s16322_s3 + $0xec] sm:$0xf] }
 0x530   : > { %10969 = vst [vmem:[#allocation4 + $0x18] sm:$0xff] %v10883_v36   ;;  %v7128_v46 = vpop.f32.mrf.mxu3  ;;  %v7429_v50 = vrot.slane %v7427_v42, 4  ;;  %v10512_v55 = vld [vmem:[%s16322_s3 + $0xf8] sm:$0xf0] }
 0x531   : > { %v7166_v33 = vpop.f32.mrf.mxu0  ;;  %v7428_v28 = vsel %vm13307_vm1, %v7419_v4, %v7427_v42  ;;  %v10515_v39 = vor.u32 %v10851_v47, %v10512_v55  ;;  %v17258_v42 = vld [vmem:[#allocation81_spill] sm:$0xff] }
 0x532   : > { %v7167_v51 = vadd.f32 %v7166_v33, %v7054_v14  ;;  %7441 = vst [vmem:[#allocation5 + $0x8] sm:$0xf] %v7428_v28 }
 0x533   : > { %8493 = vmatpush.bf16.msra.mxu1 %v10515_v39 }
 0x534   : > { %7205 = vmatmul.bf16.gmra.mxu0 %v9779_v21  ;;  %v7258_v15 = vmax.f32 %v7167_v51, 0.0 }
 0x535   : > { %v15649_v7 = vpop.f32.mrf.mxu2 }
 0x536   : > { %v10806_v23 = vld [vmem:[#allocation5] sm:$0xff] }
 0x537   : > { %v7410_v38 = vld [vmem:[#allocation4 + $0x18] sm:$0x7]  ;;  %8234 = vmatmul.bf16.vlgmr.msrb.gmra.mxu1 %v10806_v23  ;;  %8323 = vmatmul.bf16.vlgmr.msra.gmra.mxu2 %v10806_v23  ;;  %v7444_v18 = vld [vmem:[#allocation4 + $0x1c] sm:$0xf]  ;;  %v7443_v4 = vld [vmem:[#allocation4 + $0x18] sm:$0x8] }
 0x538   : > { %v7431_v62 = vshrl.u32 %v7410_v38, 16  ;;  %v7434_v34 = vshll.u32 %v7410_v38, 16  ;;  %8412 = vmatmul.bf16.vlgmr.msra.gmra.mxu3 %v10806_v23  ;;  %v15655_v40 = vpop.f32.mrf.mxu3  ;;  %v9814_v23 = vld [vmem:[#allocation3 + $0x3c8] sm:$0xf] }
 0x539   : > { %v7168_v3 = vpop.f32.mrf.mxu0  ;;  %v9815_v51 = vor.u32 %v10679_v12, %v9814_v23 }
 0x53a   : > { %v7169_v36 = vadd.f32 %v7168_v3, %v7056_v17  ;;  %v7433_v13 = vrot.slane %v7431_v62, 6  ;;  %v7436_v30 = vrot.slane %v7434_v34, 7  ;;  %v7455_v3 = vshrl.u32 %v7444_v18, 16 }
 0x53b   : > { %v7059_v62 = vadd.f32 %v17258_v42, %v15256_v44 }
 0x53c   : > { %v7259_v27 = vmax.f32 %v7169_v36, 0.0  ;;  %v7437_v33 = vor.u32 %v7436_v30, %v7433_v13  ;;  %v7061_v30 = vadd.f32 %v15213_v0, %v15270_v11 }
 0x53d   : > { %v7015_v21 = vpop.f32.mrf.mxu2 }
 0x53e   : > { %v10888_v24 = vpack.c.bf16 %v7259_v27, %v7258_v15  ;;  %v7016_v54 = vadd.f32 %v7015_v21, %v6903_v56  ;;  %v7438_v14 = vsel %vm13307_vm1, %v7429_v50, %v7437_v33  ;;  %v7457_v50 = vrot.slane %v7455_v3, 7 }
 0x53f   : > { %7442 = vst [vmem:[#allocation5 + $0xc] sm:$0xf] %v7438_v14  ;;  %v7450_v56 = vshrl.u32 %v7443_v4, 16 }
 0x540   : > { %10970 = vst [vmem:[#allocation4 + $0x20] sm:$0xff] %v10888_v24   ;;  %v15669_v38 = vadd.f32 %v7128_v46, %v7016_v54  ;;  %v7133_v17 = vpop.f32.mrf.mxu3  ;;  %v7458_v24 = vshll.u32 %v7444_v18, 16  ;;  %v7462_v11 = vrot.slane %v7457_v50, 4  ;;  %v9850_v18 = vld [vmem:[#allocation3 + $0x410] sm:$0xf] }
 0x541   : > { %v7171_v10 = vpop.f32.mrf.mxu0  ;;  %v10320_v0 = vrot.slane %v7450_v56, 11 }
 0x542   : > { %v7172_v13 = vadd.f32 %v7171_v10, %v7059_v62  ;;  %v7460_v54 = vor.u32 %v7458_v24, %v7457_v50 }
 0x544   : > { %7210 = vmatmul.bf16.gmra.mxu0 %v9815_v51  ;;  %v7260_v28 = vmax.f32 %v7172_v13, 0.0  ;;  %v10688_v51 = vld [vmem:[#allocation3 + $0x430] sm:$0xf0]  ;;  %v7461_v4 = vsel %vm15677_vm5, %v10320_v0, %v7460_v54 }
 0x545   : > { %v15673_v34 = vpop.f32.mrf.mxu2  ;;  %v9851_v62 = vor.u32 %v10688_v51, %v9850_v18  ;;  %7473 = vst [vmem:[#allocation5 + $0x10] sm:$0xf] %v7461_v4  ;;  %v10697_v18 = vld [vmem:[#allocation3 + $0x478] sm:$0xf0] }
 0x546   : > { %v10807_v27 = vld [vmem:[#allocation5 + $0x8] sm:$0xff] }
 0x547   : > { %v7445_v36 = vld [vmem:[#allocation4 + $0x20] sm:$0xf]  ;;  %8239 = vmatmul.bf16.gmra.mxu1 %v10807_v27  ;;  %8328 = vmatmul.bf16.gmra.mxu2 %v10807_v27  ;;  %v7475_v44 = vld [vmem:[#allocation4 + $0x24] sm:$0xf] }
 0x548   : > { %v7464_v46 = vshrl.u32 %v7445_v36, 16  ;;  %v7467_v12 = vshll.u32 %v7445_v36, 16  ;;  %8417 = vmatmul.bf16.gmra.mxu3 %v10807_v27  ;;  %v7135_v55 = vpop.f32.mrf.mxu3  ;;  %v7479_v10 = vshrl.u32 %v7475_v44, 16  ;;  %v7482_v17 = vshll.u32 %v7475_v44, 16 }
 0x549   : > { %v7173_v15 = vpop.f32.mrf.mxu0  ;;  %v7064_v27 = vadd.f32 %v15233_v61, %v15289_v29 }
 0x54a   : > { %v7174_v33 = vadd.f32 %v7173_v15, %v7061_v30  ;;  %v7466_v21 = vrot.slane %v7464_v46, 7  ;;  %v7481_v13 = vrot.slane %v7479_v10, 4  ;;  %v7484_v30 = vrot.slane %v7482_v17, 5 }
 0x54c   : > { %v7261_v47 = vmax.f32 %v7174_v33, 0.0  ;;  %v7469_v14 = vor.u32 %v7467_v12, %v7466_v21  ;;  %v7485_v33 = vor.u32 %v7484_v30, %v7481_v13  ;;  %v7066_v12 = vadd.f32 %v15246_v58, %v15303_v26  ;;  %v10847_v58 = vld [vmem:[%s16322_s3 + $0xcc] sm:$0xf]  ;;  %v10496_v26 = vld [vmem:[%s16322_s3 + $0xd8] sm:$0xf0] }
 0x54d   : > { %v7020_v23 = vpop.f32.mrf.mxu2 }
 0x54e   : > { %v10893_v39 = vpack.c.bf16 %v7261_v47, %v7260_v28  ;;  %v7470_v36 = vsel %vm15677_vm5, %v7462_v11, %v7469_v14 }
 0x54f   : > { %7474 = vst [vmem:[#allocation5 + $0x14] sm:$0xf] %v7470_v36 }
 0x550   : > { %10971 = vst [vmem:[#allocation4 + $0x28] sm:$0xff] %v10893_v39   ;;  %v7486_v39 = vrot.slane %v7485_v33, 4  ;;  %v7069_v33 = vadd.f32 %v15260_v43, %v15314_v37 }
 0x551   : > { %v7176_v3 = vpop.f32.mrf.mxu0 }
 0x552   : > { %v7177_v24 = vadd.f32 %v7176_v3, %v7064_v27 }
 0x554   : > { %7215 = vmatmul.bf16.gmra.mxu0 %v9851_v62  ;;  %v7262_v10 = vmax.f32 %v7177_v24, 0.0  ;;  %v10499_v62 = vor.u32 %v10847_v58, %v10496_v26 }
 0x555   : > { %v7022_v50 = vpop.f32.mrf.mxu2 }
 0x556   : > { %v10808_v14 = vld [vmem:[#allocation5 + $0x10] sm:$0xff]  ;;  %8494 = vmatpush.bf16.msra.mxu1 %v10499_v62  ;;  %v10706_v62 = vld [vmem:[#allocation3 + $0x4c0] sm:$0xf0] }
 0x557   : > { %v7476_v46 = vld [vmem:[#allocation4 + $0x28] sm:$0xf]  ;;  %v7477_v15 = vld [vmem:[#allocation4 + $0x2c] sm:$0x1]  ;;  %v7506_v11 = vld [vmem:[#allocation4 + $0x2c] sm:$0xe]  ;;  %8244 = vmatmul.bf16.gmra.mxu1 %v10808_v14  ;;  %8333 = vmatmul.bf16.gmra.mxu2 %v10808_v14 }
 0x558   : > { %v7488_v56 = vshll.u32 %v7476_v46, 16  ;;  %v7492_v21 = vshrl.u32 %v7476_v46, 16  ;;  %v7498_v55 = vshll.u32 %v7477_v15, 16  ;;  %8422 = vmatmul.bf16.gmra.mxu3 %v10808_v14  ;;  %v7510_v4 = vshrl.u32 %v7506_v11, 16  ;;  %v9886_v46 = vld [vmem:[#allocation3 + $0x458] sm:$0xf] }
 0x559   : > { %v7178_v44 = vpop.f32.mrf.mxu0  ;;  %v7513_v36 = vshll.u32 %v7506_v11, 16  ;;  %v9887_v15 = vor.u32 %v10697_v18, %v9886_v46 }
 0x55a   : > { %v7490_v28 = vrot.slane %v7488_v56, 5  ;;  %v7494_v47 = vrot.slane %v7492_v21, 4  ;;  %v7179_v54 = vadd.f32 %v7178_v44, %v7066_v12  ;;  %v7500_v29 = vrot.slane %v7498_v55, 5 }
 0x55b   : > { %v7512_v27 = vrot.slane %v7510_v4, 5  ;;  %v7515_v50 = vrot.slane %v7513_v36, 6  ;;  %v7071_v44 = vadd.f32 %v15273_v1, %v15326_v41 }
 0x55c   : > { %v7495_v0 = vor.u32 %v7494_v47, %v7490_v28  ;;  %v7263_v23 = vmax.f32 %v7179_v54, 0.0  ;;  %v7491_v17 = vsel %vm11605_vm2, %v7486_v39, %v7490_v28 }
 0x55d   : > { %7504 = vst [vmem:[#allocation5 + $0x18] sm:$0xf] %v7491_v17  ;;  %v7516_v56 = vor.u32 %v7515_v50, %v7512_v27 }
 0x55e   : > { %v7496_v61 = vrot.slane %v7495_v0, 4  ;;  %v10898_v3 = vpack.c.bf16 %v7263_v23, %v7262_v10 }
 0x55f   : > { %v7517_v17 = vrot.slane %v7516_v56, 4 }
 0x560   : > { %v7501_v13 = vsel %vm11605_vm2, %v7496_v61, %v7500_v29  ;;  %10972 = vst [vmem:[#allocation4 + $0x30] sm:$0xff] %v10898_v3  }
 0x561   : > { %v7181_v30 = vpop.f32.mrf.mxu0  ;;  %7505 = vst [vmem:[#allocation5 + $0x1c] sm:$0xf] %v7501_v13  ;;  %v9922_v13 = vld [vmem:[#allocation3 + $0x4a0] sm:$0xf] }
 0x562   : > { %v7182_v12 = vadd.f32 %v7181_v30, %v7069_v33  ;;  %v9923_v46 = vor.u32 %v10706_v62, %v9922_v13  ;;  %v17262_v62 = vld [vmem:[#allocation42_spill] sm:$0xff] }
 0x564   : > { %7220 = vmatmul.bf16.gmra.mxu0 %v9887_v15  ;;  %v7264_v43 = vmax.f32 %v7182_v12, 0.0 }
 0x567   : > { %v7507_v21 = vld [vmem:[#allocation4 + $0x30] sm:$0xf]  ;;  %v7508_v24 = vld [vmem:[#allocation4 + $0x34] sm:$0x3]  ;;  %v7541_v29 = vld [vmem:[#allocation4 + $0x34] sm:$0xc] }
 0x568   : > { %v7519_v28 = vshrl.u32 %v7507_v21, 16  ;;  %v7522_v47 = vshll.u32 %v7507_v21, 16  ;;  %v7529_v55 = vshrl.u32 %v7508_v24, 16  ;;  %v7532_v54 = vshll.u32 %v7508_v24, 16  ;;  %v10809_v39 = vld [vmem:[#allocation5 + $0x18] sm:$0xff] }
 0x569   : > { %v7183_v14 = vpop.f32.mrf.mxu0  ;;  %8249 = vmatmul.bf16.gmra.mxu1 %v10809_v39  ;;  %8338 = vmatmul.bf16.gmra.mxu2 %v10809_v39  ;;  %v7545_v26 = vshrl.u32 %v7541_v29, 16  ;;  %v7548_v18 = vshll.u32 %v7541_v29, 16  ;;  %v7074_v21 = vadd.f32 %v15293_v52, %v15338_v49 }
 0x56a   : > { %v7184_v0 = vadd.f32 %v7183_v14, %v7071_v44  ;;  %v7521_v11 = vrot.slane %v7519_v28, 5  ;;  %v7524_v10 = vrot.slane %v7522_v47, 6  ;;  %v7531_v23 = vrot.slane %v7529_v55, 5  ;;  %8427 = vmatmul.bf16.gmra.mxu3 %v10809_v39 }
 0x56b   : > { %v7534_v61 = vrot.slane %v7532_v54, 6  ;;  %v7547_v15 = vrot.slane %v7545_v26, 6  ;;  %v7550_v27 = vrot.slane %v7548_v18, 7  ;;  %v7076_v55 = vadd.f32 %v15306_v9, %v15350_v32  ;;  %v10843_v9 = vld [vmem:[%s16322_s3 + $0xac] sm:$0xf] }
 0x56c   : > { %v7265_v37 = vmax.f32 %v7184_v0, 0.0  ;;  %v7525_v58 = vor.u32 %v7524_v10, %v7521_v11  ;;  %v10480_v32 = vld [vmem:[%s16322_s3 + $0xb8] sm:$0xf0]  ;;  %v10715_v26 = vld [vmem:[#allocation3 + $0x508] sm:$0xf0] }
 0x56d   : > { %v7535_v3 = vor.u32 %v7534_v61, %v7531_v23  ;;  %v7551_v50 = vor.u32 %v7550_v27, %v7547_v15  ;;  %v9958_v18 = vld [vmem:[#allocation3 + $0x4e8] sm:$0xf] }
 0x56e   : > { %v10903_v1 = vpack.c.bf16 %v7265_v37, %v7264_v43  ;;  %v7527_v41 = vrot.slane %v7525_v58, 4  ;;  %v7526_v4 = vsel %vm13058_vm14, %v7517_v17, %v7525_v58  ;;  %v9959_v13 = vor.u32 %v10715_v26, %v9958_v18 }
 0x56f   : > { %7539 = vst [vmem:[#allocation5 + $0x20] sm:$0xf] %v7526_v4  ;;  %v7552_v61 = vrot.slane %v7551_v50, 4  ;;  %v17263_v4 = vld [vmem:[#allocation44_spill] sm:$0xff] }
 0x570   : > { %10973 = vst [vmem:[#allocation4 + $0x38] sm:$0xff] %v10903_v1   ;;  %v7536_v30 = vsel %vm13058_vm14, %v7527_v41, %v7535_v3  ;;  %v10483_v1 = vor.u32 %v10843_v9, %v10480_v32 }
 0x571   : > { %v7186_v36 = vpop.f32.mrf.mxu0  ;;  %7540 = vst [vmem:[#allocation5 + $0x24] sm:$0xf] %v7536_v30 }
 0x572   : > { %v7187_v47 = vadd.f32 %v7186_v36, %v7074_v21  ;;  %8495 = vmatpush.bf16.msra.mxu1 %v10483_v1  ;;  %v6855_v36 = vadd.f32 %v17263_v4, %v17262_v62 }
 0x574   : > { %7225 = vmatmul.bf16.gmra.mxu0 %v9923_v46  ;;  %v7266_v43 = vmax.f32 %v7187_v47, 0.0  ;;  %v6968_v30 = vadd.f32 %v15389_v53, %v6855_v36  ;;  %v7079_v46 = vadd.f32 %v15318_v63, %v15376_v22 }
 0x577   : > { %v7542_v33 = vld [vmem:[#allocation4 + $0x38] sm:$0xf]  ;;  %v7543_v56 = vld [vmem:[#allocation4 + $0x3c] sm:$0x7]  ;;  %v7576_v15 = vld [vmem:[#allocation4 + $0x3c] sm:$0x8] }
 0x578   : > { %v7554_v24 = vshrl.u32 %v7542_v33, 16  ;;  %v7557_v12 = vshll.u32 %v7542_v33, 16  ;;  %v7564_v44 = vshrl.u32 %v7543_v56, 16  ;;  %v7567_v28 = vshll.u32 %v7543_v56, 16  ;;  %v10810_v14 = vld [vmem:[#allocation5 + $0x20] sm:$0xff] }
 0x579   : > { %v7188_v54 = vpop.f32.mrf.mxu0  ;;  %8254 = vmatmul.bf16.gmra.mxu1 %v10810_v14  ;;  %8343 = vmatmul.bf16.gmra.mxu2 %v10810_v14  ;;  %v7081_v56 = vadd.f32 %v15330_v35, %v6968_v30  ;;  %v9994_v35 = vld [vmem:[#allocation3 + $0x530] sm:$0xf] }
 0x57a   : > { %v7556_v39 = vrot.slane %v7554_v24, 6  ;;  %v7559_v0 = vrot.slane %v7557_v12, 7  ;;  %v7566_v11 = vrot.slane %v7564_v44, 6  ;;  %v7569_v10 = vrot.slane %v7567_v28, 7  ;;  %8432 = vmatmul.bf16.gmra.mxu3 %v10810_v14 }
 0x57b   : > { %v7189_v23 = vadd.f32 %v7188_v54, %v7076_v55  ;;  %v7580_v28 = vshrl.u32 %v7576_v15, 16 }
 0x57c   : > { %v7560_v29 = vor.u32 %v7559_v0, %v7556_v39  ;;  %v7570_v49 = vor.u32 %v7569_v10, %v7566_v11 }
 0x57d   : > { %v7267_v37 = vmax.f32 %v7189_v23, 0.0  ;;  %v10321_v10 = vrot.slane %v7580_v28, 11 }
 0x57e   : > { %v7562_v52 = vrot.slane %v7560_v29, 4  ;;  %v7561_v17 = vsel %vm13307_vm1, %v7552_v61, %v7560_v29  ;;  %v10724_v61 = vld [vmem:[#allocation3 + $0x550] sm:$0xf0] }
 0x57f   : > { %v10908_v58 = vpack.c.bf16 %v7267_v37, %v7266_v43  ;;  %7574 = vst [vmem:[#allocation5 + $0x28] sm:$0xf] %v7561_v17  ;;  %v4245_v37 = vld [vmem:[#allocation2 + $0xac] sm:$0xf]  ;;  %v9995_v1 = vor.u32 %v10724_v61, %v9994_v35  ;;  %v10464_v61 = vld [vmem:[%s16322_s3 + $0x98] sm:$0xf0] }
 0x580   : > { %v7571_v41 = vsel %vm13307_vm1, %v7562_v52, %v7570_v49  ;;  %v4246_v52 = vld [vmem:[#allocation2 + $0xb0] sm:$0xf]  ;;  %v17264_v49 = vld [vmem:[#allocation29_spill] sm:$0xff]  ;;  %v10839_v35 = vld [vmem:[%s16322_s3 + $0x8c] sm:$0xf] }
 0x581   : > { %10974 = vst [vmem:[#allocation4 + $0x40] sm:$0xff] %v10908_v58   ;;  %v7191_v3 = vpop.f32.mrf.mxu0  ;;  %v17265_v17 = vrot.slane %v17264_v49, 7  ;;  %v4406_v58 = vrot.slane %v4245_v37, 7  ;;  %v4409_v26 = vrot.slane %v4246_v52, 7  ;;  %v17269_v37 = vld [vmem:[#allocation76_spill] sm:$0xff] }
 0x582   : > { %7575 = vst [vmem:[#allocation5 + $0x2c] sm:$0xf] %v7571_v41  ;;  %v7192_v33 = vadd.f32 %v7191_v3, %v7079_v46  ;;  %v17266_v41 = vld [vmem:[#allocation94_spill] sm:$0xff]  ;;  %v17267_v3 = vld [vmem:[#allocation21_spill] sm:$0xff]  ;;  %v6865_v52 = vadd.f32 %v17269_v37, %v15248_v60 }
 0x583   : > { %v4405_v9 = vrot.slane %v17265_v17, 4  ;;  %v6860_v18 = vadd.f32 %v17267_v3, %v17266_v41  ;;  %v4408_v36 = vrot.slane %v4406_v58, 4 }
 0x584   : > { %7230 = vmatmul.bf16.gmra.mxu0 %v9959_v13  ;;  %v7268_v39 = vmax.f32 %v7192_v33, 0.0 }
 0x585   : > { %v4407_v4 = vsel %vm11747_vm11, %v4405_v9, %v4406_v58  ;;  %v6973_v13 = vadd.f32 %v15413_v48, %v6860_v18  ;;  %v4410_v30 = vsel %vm11747_vm11, %v4408_v36, %v4409_v26  ;;  %v6978_v9 = vadd.f32 %v15441_v59, %v6865_v52  ;;  %v17271_v58 = vld [vmem:[#allocation131_spill] sm:$0xff]  ;;  %v17272_v18 = vld [vmem:[#allocation116_spill] sm:$0xff] }
 0x586   : > { %4493 = vst [vmem:[#allocation3 + $0x578] sm:$0xf] %v4407_v4 }
 0x587   : > { %4494 = vst [vmem:[#allocation3 + $0x59c] sm:$0xf] %v4410_v30  ;;  %v7091_v4 = vadd.f32 %v17272_v18, %v6978_v9 }
 0x588   : > { %v7577_v27 = vld [vmem:[#allocation4 + $0x40] sm:$0xf]  ;;  %v7578_v50 = vld [vmem:[#allocation4 + $0x44] sm:$0xf] }
 0x589   : > { %v7585_v21 = vshrl.u32 %v7577_v27, 16  ;;  %v7594_v24 = vshrl.u32 %v7578_v50, 16  ;;  %v7193_v12 = vpop.f32.mrf.mxu0  ;;  %v10811_v44 = vld [vmem:[#allocation5 + $0x28] sm:$0xff]  ;;  %v7588_v54 = vshll.u32 %v7577_v27, 16  ;;  %v7597_v53 = vshll.u32 %v7578_v50, 16 }
 0x58a   : > { %v7194_v47 = vadd.f32 %v7193_v12, %v7081_v56  ;;  %8259 = vmatmul.bf16.gmra.mxu1 %v10811_v44  ;;  %8348 = vmatmul.bf16.gmra.mxu2 %v10811_v44  ;;  %v7084_v27 = vadd.f32 %v15342_v8, %v15403_v45 }
 0x58b   : > { %v7587_v55 = vrot.slane %v7585_v21, 7  ;;  %v7596_v14 = vrot.slane %v7594_v24, 7  ;;  %8437 = vmatmul.bf16.gmra.mxu3 %v10811_v44  ;;  %v7086_v21 = vadd.f32 %v15354_v16, %v6973_v13  ;;  %v4411_v16 = vrot.slane %v4409_v26, 4 }
 0x58c   : > { %v7269_v0 = vmax.f32 %v7194_v47, 0.0 }
 0x58d   : > { %v7590_v11 = vor.u32 %v7588_v54, %v7587_v55  ;;  %v7592_v63 = vrot.slane %v7587_v55, 4  ;;  %v7599_v22 = vor.u32 %v7597_v53, %v7596_v14  ;;  %v10030_v53 = vld [vmem:[#allocation3 + $0x578] sm:$0xf] }
 0x58e   : > { %v10913_v23 = vpack.c.bf16 %v7269_v0, %v7268_v39  ;;  %v10733_v39 = vld [vmem:[#allocation3 + $0x598] sm:$0xf0] }
 0x58f   : > { %v7591_v29 = vsel %vm15677_vm5, %v10321_v10, %v7590_v11  ;;  %v7600_v43 = vsel %vm15677_vm5, %v7592_v63, %v7599_v22  ;;  %v4247_v63 = vld [vmem:[#allocation2 + $0xb4] sm:$0x1]  ;;  %v10031_v22 = vor.u32 %v10733_v39, %v10030_v53 }
 0x590   : > { %10975 = vst [vmem:[#allocation4 + $0x48] sm:$0xff] %v10913_v23   ;;  %v4412_v10 = vrot.slane %v4247_v63, 7 }
 0x591   : > { %v7196_v32 = vpop.f32.mrf.mxu0  ;;  %7603 = vst [vmem:[#allocation5 + $0x30] sm:$0xf] %v7591_v29 }
 0x592   : > { %7604 = vst [vmem:[#allocation5 + $0x34] sm:$0xf] %v7600_v43  ;;  %v7197_v56 = vadd.f32 %v7196_v32, %v7084_v27  ;;  %v10467_v43 = vor.u32 %v10839_v35, %v10464_v61  ;;  %v4413_v49 = vsel %vm11747_vm11, %v4411_v16, %v4412_v10  ;;  %v17270_v32 = vld [vmem:[#allocation104_spill] sm:$0xff]  ;;  %v17277_v35 = vld [vmem:[#allocation138_spill] sm:$0xff] }
 0x593   : > { %4495 = vst [vmem:[#allocation3 + $0x5c0] sm:$0x3] %v4413_v49  ;;  %v7089_v26 = vadd.f32 %v17271_v58, %v17270_v32  ;;  %v8582_v49 = vld [vmem:[%s11268_s17] sm:$0xff] }
 0x594   : > { %7235 = vmatmul.bf16.gmra.mxu0 %v9995_v1  ;;  %v7270_v54 = vmax.f32 %v7197_v56, 0.0  ;;  %8496 = vmatpush.bf16.msra.mxu1 %v10467_v43  ;;  %v17278_v32 = vld [vmem:[#allocation97_spill] sm:$0xff] }
 0x597   : > { %v7605_v46 = vld [vmem:[#allocation4 + $0x48] sm:$0xf]  ;;  %v7606_v15 = vld [vmem:[#allocation4 + $0x4c] sm:$0xf] }
 0x598   : > { %v7609_v50 = vshrl.u32 %v7605_v46, 16  ;;  %v7612_v33 = vshll.u32 %v7605_v46, 16  ;;  %v7618_v28 = vshll.u32 %v7606_v15, 16  ;;  %v7622_v45 = vshrl.u32 %v7606_v15, 16 }
 0x599   : > { %v7198_v24 = vpop.f32.mrf.mxu0  ;;  %v10812_v48 = vld [vmem:[#allocation5 + $0x30] sm:$0xff] }
 0x59a   : > { %v7611_v12 = vrot.slane %v7609_v50, 4  ;;  %v7614_v44 = vrot.slane %v7612_v33, 5  ;;  %v7199_v47 = vadd.f32 %v7198_v24, %v7086_v21  ;;  %8264 = vmatmul.bf16.gmra.mxu1 %v10812_v48  ;;  %8353 = vmatmul.bf16.gmra.mxu2 %v10812_v48  ;;  %v7620_v8 = vrot.slane %v7618_v28, 5  ;;  %v4700_v62 = vld [vmem:[#allocation3 + $0x5c0] sm:$0x3] }
 0x59b   : > { %8442 = vmatmul.bf16.gmra.mxu3 %v10812_v48  ;;  %v7624_v17 = vrot.slane %v7622_v45, 4  ;;  %v5422_v50 = vunpack.c.l.b16 %v4700_v62 }
 0x59c   : > { %v7615_v55 = vor.u32 %v7614_v44, %v7611_v12  ;;  %v7271_v14 = vmax.f32 %v7199_v47, 0.0 }
 0x59d   : > { %v7625_v1 = vor.u32 %v7624_v17, %v7620_v8  ;;  %v5611_v44 = vpack.c.b16 %v5422_v50, %v5422_v50  ;;  %v8583_v50 = vld [vmem:[%s11268_s17 + $0x8] sm:$0xff] }
 0x59e   : > { %v7616_v0 = vrot.slane %v7615_v55, 4  ;;  %v10918_v11 = vpack.c.bf16 %v7271_v14, %v7270_v54  ;;  %v7960_v55 = vld [vmem:[%s16325_s6] sm:$0xf]  ;;  %v17273_v54 = vld [vmem:[#allocation87_spill] sm:$0xff] }
 0x59f   : > { %v7626_v30 = vrot.slane %v7625_v1, 4  ;;  %v17274_v14 = vld [vmem:[#allocation11_spill] sm:$0xff]  ;;  %v15777_v18 = vperm.slane %v7960_v55, 1 }
 0x5a0   : > { %v7621_v23 = vsel %vm11605_vm2, %v7616_v0, %v7620_v8  ;;  %10976 = vst [vmem:[#allocation4 + $0x50] sm:$0xff] %v10918_v11   ;;  %v6870_v53 = vadd.f32 %v17274_v14, %v17273_v54  ;;  %v17275_v8 = vld [vmem:[#allocation32_spill] sm:$0xff]  ;;  %v15767_v11 = vperm.slane %v7960_v55, 0 }
 0x5a1   : > { %v7201_v29 = vpop.f32.mrf.mxu0  ;;  %7634 = vst [vmem:[#allocation5 + $0x38] sm:$0xf] %v7621_v23  ;;  %v17276_v23 = vld [vmem:[#allocation110_spill] sm:$0xff] }
 0x5a2   : > { %v7202_v3 = vadd.f32 %v7201_v29, %v7089_v26  ;;  %v6983_v45 = vadd.f32 %v17275_v8, %v6870_v53  ;;  %v7094_v61 = vadd.f32 %v17277_v35, %v17276_v23  ;;  %v17279_v23 = vld [vmem:[#allocation38_spill] sm:$0xff]  ;;  %v17280_v35 = vld [vmem:[#allocation85_spill] sm:$0xff] }
 0x5a4   : > { %7240 = vmatmul.bf16.gmra.mxu0 %v10031_v22  ;;  %v7272_v15 = vmax.f32 %v7202_v3, 0.0  ;;  %v7096_v58 = vadd.f32 %v17278_v32, %v6983_v45 }
 0x5a7   : > { %v7607_v41 = vld [vmem:[#allocation4 + $0x50] sm:$0x1]  ;;  %v7636_v33 = vld [vmem:[#allocation4 + $0x50] sm:$0xe]  ;;  %v7637_v21 = vld [vmem:[#allocation4 + $0x54] sm:$0xf] }
 0x5a8   : > { %v7628_v36 = vshll.u32 %v7607_v41, 16  ;;  %v7640_v24 = vshrl.u32 %v7636_v33, 16  ;;  %v7643_v12 = vshll.u32 %v7636_v33, 16  ;;  %v7649_v47 = vshrl.u32 %v7637_v21, 16 }
 0x5a9   : > { %v7203_v60 = vpop.f32.mrf.mxu0  ;;  %v7652_v48 = vshll.u32 %v7637_v21, 16 }
 0x5aa   : > { %v7204_v13 = vadd.f32 %v7203_v60, %v7091_v4  ;;  %v7630_v46 = vrot.slane %v7628_v36, 5  ;;  %v7642_v39 = vrot.slane %v7640_v24, 5  ;;  %v7645_v0 = vrot.slane %v7643_v12, 6  ;;  %v8584_v24 = vld [vmem:[%s11268_s17 + $0x10] sm:$0xff] }
 0x5ab   : > { %v7651_v16 = vrot.slane %v7649_v47, 5  ;;  %v7654_v22 = vrot.slane %v7652_v48, 6  ;;  %v15779_v60 = vperm.slane %v7960_v55, 2  ;;  %v8586_v48 = vld [vmem:[%s11268_s17 + $0x20] sm:$0xff] }
 0x5ac   : > { %v7273_v27 = vmax.f32 %v7204_v13, 0.0  ;;  %v7631_v59 = vsel %vm11605_vm2, %v7626_v30, %v7630_v46  ;;  %v7646_v43 = vor.u32 %v7645_v0, %v7642_v39 }
 0x5ad   : > { %7635 = vst [vmem:[#allocation5 + $0x3c] sm:$0xf] %v7631_v59  ;;  %v7655_v1 = vor.u32 %v7654_v22, %v7651_v16 }
 0x5ae   : > { %v10923_v56 = vpack.c.bf16 %v7273_v27, %v7272_v15  ;;  %v7647_v13 = vrot.slane %v7646_v43, 4 }
 0x5af   : > { %v7657_v33 = vrot.slane %v7655_v1, 4 }
 0x5b0   : > { %10977 = vst [vmem:[#allocation4 + $0x58] sm:$0xff] %v10923_v56   ;;  %v7656_v14 = vsel %vm13058_vm14, %v7647_v13, %v7655_v1  ;;  %v8587_v1 = vld [vmem:[%s11268_s17 + $0x28] sm:$0xff] }
 0x5b1   : > { %v7206_v28 = vpop.f32.mrf.mxu0  ;;  %7669 = vst [vmem:[#allocation5 + $0x40] sm:$0xf] %v7656_v14 }
 0x5b2   : > { %v7207_v17 = vadd.f32 %v7206_v28, %v7094_v61  ;;  %v6875_v61 = vadd.f32 %v17280_v35, %v17279_v23 }
 0x5b4   : > { %7245 = vmatmul.bf16.gmra.mxu0 %v5611_v44  ;;  %v10813_v63 = vld [vmem:[#allocation5 + $0x38] sm:$0xff]  ;;  %v8235_v29 = vpop.f32.mrf.mxu1  ;;  %v7274_v30 = vmax.f32 %v7207_v17, 0.0 }
 0x5b5   : > { %8269 = vmatmul.bf16.gmra.mxu1 %v10813_v63  ;;  %8358 = vmatmul.bf16.gmra.mxu2 %v10813_v63  ;;  %v8236_v9 = vadd.f32 %v8235_v29, %v15767_v11  ;;  %v17281_v17 = vld [vmem:[#allocation68_spill] sm:$0xff] }
 0x5b6   : > { %8447 = vmatmul.bf16.gmra.mxu3 %v10813_v63 }
 0x5b7   : > { %v7638_v10 = vld [vmem:[#allocation4 + $0x58] sm:$0x3]  ;;  %v8710_v4 = vadd.f32 %v8582_v49, %v8236_v9  ;;  %v7671_v59 = vld [vmem:[#allocation4 + $0x58] sm:$0xc]  ;;  %v7672_v12 = vld [vmem:[#allocation4 + $0x5c] sm:$0xf]  ;;  %v6988_v9 = vadd.f32 %v17281_v17, %v6875_v61 }
 0x5b8   : > { %v7659_v37 = vshrl.u32 %v7638_v10, 16  ;;  %v7662_v52 = vshll.u32 %v7638_v10, 16  ;;  %v7675_v39 = vshrl.u32 %v7671_v59, 16  ;;  %v7678_v0 = vshll.u32 %v7671_v59, 16  ;;  %v10835_v10 = vld [vmem:[%s16322_s3 + $0x6c] sm:$0xf] }
 0x5b9   : > { %v7208_v26 = vpop.f32.mrf.mxu0  ;;  %v8838_v46 = vmax.f32 %v8710_v4, 0.0  ;;  %v7684_v63 = vshrl.u32 %v7672_v12, 16  ;;  %v7687_v29 = vshll.u32 %v7672_v12, 16  ;;  %v17284_v12 = vld [vmem:[#allocation109_spill] sm:$0xff] }
 0x5ba   : > { %v7661_v41 = vrot.slane %v7659_v37, 5  ;;  %v7664_v3 = vrot.slane %v7662_v52, 6  ;;  %v7209_v36 = vadd.f32 %v7208_v26, %v7096_v58  ;;  %v8324_v27 = vpop.f32.mrf.mxu2  ;;  %v10448_v37 = vld [vmem:[%s16322_s3 + $0x78] sm:$0xf0]  ;;  %v7677_v32 = vrot.slane %v7675_v39, 6 }
 0x5bb   : > { %v8325_v56 = vadd.f32 %v8324_v27, %v15777_v18  ;;  %v8413_v21 = vpop.f32.mrf.mxu3  ;;  %8966 = vst [vmem:[%s15784_s18] sm:$0xff] %v8838_v46  ;;  %v10451_v49 = vor.u32 %v10835_v10, %v10448_v37  ;;  %v7680_v58 = vrot.slane %v7678_v0, 7  ;;  %v7686_v4 = vrot.slane %v7684_v63, 6  ;;  %v17282_v46 = vld [vmem:[#allocation79_spill] sm:$0xff] }
 0x5bc   : > { %v7665_v62 = vor.u32 %v7664_v3, %v7661_v41  ;;  %v7275_v15 = vmax.f32 %v7209_v36, 0.0  ;;  %v8414_v28 = vadd.f32 %v8413_v21, %v15779_v60  ;;  %v8237_v47 = vpop.f32.mrf.mxu1  ;;  %v7689_v36 = vrot.slane %v7687_v29, 7  ;;  %v8591_v29 = vld [vmem:[%s11268_s17 + $0x48] sm:$0xff] }
 0x5bd   : > { %v8711_v55 = vadd.f32 %v8583_v50, %v8325_v56  ;;  %v8238_v54 = vadd.f32 %v8237_v47, %v15767_v11  ;;  %8497 = vmatpush.bf16.msra.mxu1 %v10451_v49  ;;  %v7681_v59 = vor.u32 %v7680_v58, %v7677_v32  ;;  %v8592_v49 = vld [vmem:[%s11268_s17 + $0x50] sm:$0xff]  ;;  %v8594_v58 = vld [vmem:[%s11268_s17 + $0x60] sm:$0xff] }
 0x5be   : > { %v10928_v44 = vpack.c.bf16 %v7275_v15, %v7274_v30  ;;  %v7666_v53 = vsel %vm13058_vm14, %v7657_v33, %v7665_v62  ;;  %v8712_v8 = vadd.f32 %v8584_v24, %v8414_v28  ;;  %v8588_v62 = vld [vmem:[%s11268_s17 + $0x30] sm:$0xff]  ;;  %v8590_v24 = vld [vmem:[%s11268_s17 + $0x40] sm:$0xff] }
 0x5bf   : > { %v8839_v16 = vmax.f32 %v8711_v55, 0.0  ;;  %v8714_v22 = vadd.f32 %v8586_v48, %v8238_v54  ;;  %7670 = vst [vmem:[#allocation5 + $0x44] sm:$0xf] %v7666_v53  ;;  %v17283_v15 = vld [vmem:[#allocation47_spill] sm:$0xff]  ;;  %v7690_v53 = vor.u32 %v7689_v36, %v7686_v4 }
 0x5c0   : > { %10978 = vst [vmem:[#allocation4 + $0x60] sm:$0xff] %v10928_v44   ;;  %v8840_v43 = vmax.f32 %v8712_v8, 0.0  ;;  %v7099_v27 = vadd.f32 %v17283_v15, %v17282_v46  ;;  %v7101_v44 = vadd.f32 %v17284_v12, %v6988_v9  ;;  %v17289_v12 = vld [vmem:[#allocation101_spill] sm:$0xff] }
 0x5c1   : > { %v7211_v45 = vpop.f32.mrf.mxu0  ;;  %8967 = vst [vmem:[%s15784_s18 + $0x8] sm:$0xff] %v8839_v16  ;;  %v8842_v52 = vmax.f32 %v8714_v22, 0.0  ;;  %v7682_v22 = vrot.slane %v7681_v59, 4 }
 0x5c2   : > { %8968 = vst [vmem:[%s15784_s18 + $0x10] sm:$0xff] %v8840_v43  ;;  %v8326_v26 = vpop.f32.mrf.mxu2  ;;  %v7212_v47 = vadd.f32 %v7211_v45, %v7099_v27  ;;  %v7692_v43 = vrot.slane %v7690_v53, 4 }
 0x5c3   : > { %8970 = vst [vmem:[%s15784_s18 + $0x20] sm:$0xff] %v8842_v52  ;;  %v8327_v41 = vadd.f32 %v8326_v26, %v15777_v18  ;;  %v8415_v3 = vpop.f32.mrf.mxu3 }
 0x5c4   : > { %v8416_v13 = vadd.f32 %v8415_v3, %v15779_v60  ;;  %v8240_v33 = vpop.f32.mrf.mxu1  ;;  %v7276_v10 = vmax.f32 %v7212_v47, 0.0  ;;  %v7691_v3 = vsel %vm13307_vm1, %v7682_v22, %v7690_v53  ;;  %v8595_v47 = vld [vmem:[%s11268_s17 + $0x68] sm:$0xff]  ;;  %v8596_v53 = vld [vmem:[%s11268_s17 + $0x70] sm:$0xff] }
 0x5c5   : > { %v8715_v50 = vadd.f32 %v8587_v1, %v8327_v41  ;;  %v8241_v54 = vadd.f32 %v8240_v33, %v15767_v11  ;;  %7704 = vst [vmem:[#allocation5 + $0x48] sm:$0xf] %v7691_v3  ;;  %v17287_v33 = vld [vmem:[#allocation23_spill] sm:$0xff] }
 0x5c6   : > { %v8716_v55 = vadd.f32 %v8588_v62, %v8416_v13  ;;  %v10814_v14 = vld [vmem:[#allocation5 + $0x40] sm:$0xff] }
 0x5c7   : > { %v7673_v30 = vld [vmem:[#allocation4 + $0x60] sm:$0x7]  ;;  %v8843_v48 = vmax.f32 %v8715_v50, 0.0  ;;  %v8718_v63 = vadd.f32 %v8590_v24, %v8241_v54  ;;  %8274 = vmatmul.bf16.gmra.mxu1 %v10814_v14  ;;  %8363 = vmatmul.bf16.gmra.mxu2 %v10814_v14  ;;  %v17285_v13 = vld [vmem:[#allocation125_spill] sm:$0xff]  ;;  %v17288_v24 = vld [vmem:[#allocation114_spill] sm:$0xff] }
 0x5c8   : > { %v7694_v56 = vshrl.u32 %v7673_v30, 16  ;;  %v7697_v21 = vshll.u32 %v7673_v30, 16  ;;  %v8844_v8 = vmax.f32 %v8716_v55, 0.0  ;;  %8452 = vmatmul.bf16.gmra.mxu3 %v10814_v14  ;;  %v17286_v62 = vld [vmem:[#allocation93_spill] sm:$0xff] }
 0x5c9   : > { %v7213_v28 = vpop.f32.mrf.mxu0  ;;  %8971 = vst [vmem:[%s15784_s18 + $0x28] sm:$0xff] %v8843_v48  ;;  %v8846_v23 = vmax.f32 %v8718_v63, 0.0  ;;  %v6880_v30 = vadd.f32 %v17286_v62, %v17285_v13  ;;  %v7707_v46 = vld [vmem:[#allocation4 + $0x64] sm:$0xf]  ;;  %v17290_v63 = vld [vmem:[#allocation92_spill] sm:$0xff] }
 0x5ca   : > { %v7696_v39 = vrot.slane %v7694_v56, 6  ;;  %v7699_v0 = vrot.slane %v7697_v21, 7  ;;  %v7214_v16 = vadd.f32 %v7213_v28, %v7101_v44  ;;  %8972 = vst [vmem:[%s15784_s18 + $0x30] sm:$0xff] %v8844_v8  ;;  %v8329_v61 = vpop.f32.mrf.mxu2  ;;  %v7715_v21 = vshrl.u32 %v7707_v46, 16 }
 0x5cb   : > { %v8330_v37 = vadd.f32 %v8329_v61, %v15777_v18  ;;  %v8418_v52 = vpop.f32.mrf.mxu3  ;;  %8974 = vst [vmem:[%s15784_s18 + $0x40] sm:$0xff] %v8846_v23  ;;  %v6993_v59 = vadd.f32 %v17287_v33, %v6880_v30  ;;  %v7104_v44 = vadd.f32 %v17289_v12, %v17288_v24  ;;  %v8599_v30 = vld [vmem:[%s11268_s17 + $0x88] sm:$0xff]  ;;  %v8602_v12 = vld [vmem:[%s11268_s17 + $0xa0] sm:$0xff] }
 0x5cc   : > { %v7700_v45 = vor.u32 %v7699_v0, %v7696_v39  ;;  %v7277_v35 = vmax.f32 %v7214_v16, 0.0  ;;  %v8419_v9 = vadd.f32 %v8418_v52, %v15779_v60  ;;  %v8242_v32 = vpop.f32.mrf.mxu1  ;;  %v7706_v39 = vld [vmem:[#allocation4 + $0x60] sm:$0x8] }
 0x5cd   : > { %v8719_v26 = vadd.f32 %v8591_v29, %v8330_v37  ;;  %v8243_v1 = vadd.f32 %v8242_v32, %v15767_v11  ;;  %v7106_v16 = vadd.f32 %v17290_v63, %v6993_v59  ;;  %v8600_v59 = vld [vmem:[%s11268_s17 + $0x90] sm:$0xff] }
 0x5ce   : > { %v10933_v17 = vpack.c.bf16 %v7277_v35, %v7276_v10  ;;  %v7701_v4 = vsel %vm13307_vm1, %v7692_v43, %v7700_v45  ;;  %v8720_v36 = vadd.f32 %v8592_v49, %v8419_v9  ;;  %v7717_v45 = vrot.slane %v7715_v21, 7  ;;  %v8598_v35 = vld [vmem:[%s11268_s17 + $0x80] sm:$0xff] }
 0x5cf   : > { %v8847_v15 = vmax.f32 %v8719_v26, 0.0  ;;  %v8722_v27 = vadd.f32 %v8594_v58, %v8243_v1  ;;  %7705 = vst [vmem:[#allocation5 + $0x4c] sm:$0xf] %v7701_v4  ;;  %v7710_v49 = vshrl.u32 %v7706_v39, 16  ;;  %v17292_v39 = vld [vmem:[#allocation102_spill] sm:$0xff] }
 0x5d0   : > { %10979 = vst [vmem:[#allocation4 + $0x68] sm:$0xff] %v10933_v17   ;;  %v8848_v50 = vmax.f32 %v8720_v36, 0.0  ;;  %v7718_v17 = vshll.u32 %v7707_v46, 16 }
 0x5d1   : > { %v7216_v41 = vpop.f32.mrf.mxu0  ;;  %8975 = vst [vmem:[%s15784_s18 + $0x48] sm:$0xff] %v8847_v15  ;;  %v8850_v56 = vmax.f32 %v8722_v27, 0.0  ;;  %v10322_v46 = vrot.slane %v7710_v49, 11  ;;  %v7722_v15 = vrot.slane %v7717_v45, 4 }
 0x5d2   : > { %8976 = vst [vmem:[%s15784_s18 + $0x50] sm:$0xff] %v8848_v50  ;;  %v8331_v28 = vpop.f32.mrf.mxu2  ;;  %v7217_v54 = vadd.f32 %v7216_v41, %v7104_v44  ;;  %v7720_v3 = vor.u32 %v7718_v17, %v7717_v45  ;;  %v10432_v45 = vld [vmem:[%s16322_s3 + $0x58] sm:$0xf0] }
 0x5d3   : > { %8978 = vst [vmem:[%s15784_s18 + $0x60] sm:$0xff] %v8850_v56  ;;  %v8332_v48 = vadd.f32 %v8331_v28, %v15777_v18  ;;  %v8420_v55 = vpop.f32.mrf.mxu3 }
 0x5d4   : > { %v8421_v14 = vadd.f32 %v8420_v55, %v15779_v60  ;;  %v8245_v23 = vpop.f32.mrf.mxu1  ;;  %v7278_v32 = vmax.f32 %v7217_v54, 0.0 }
 0x5d5   : > { %v8723_v8 = vadd.f32 %v8595_v47, %v8332_v48  ;;  %v8246_v43 = vadd.f32 %v8245_v23, %v15767_v11  ;;  %v7721_v47 = vsel %vm15677_vm5, %v10322_v46, %v7720_v3  ;;  %v17294_v3 = vld [vmem:[#allocation105_spill] sm:$0xff] }
 0x5d6   : > { %v8724_v29 = vadd.f32 %v8596_v53, %v8421_v14  ;;  %v10815_v52 = vld [vmem:[#allocation5 + $0x48] sm:$0xff]  ;;  %7733 = vst [vmem:[#allocation5 + $0x50] sm:$0xf] %v7721_v47  ;;  %v17291_v53 = vld [vmem:[#allocation96_spill] sm:$0xff] }
 0x5d7   : > { %v7708_v0 = vld [vmem:[#allocation4 + $0x68] sm:$0xf]  ;;  %v8851_v61 = vmax.f32 %v8723_v8, 0.0  ;;  %v8726_v1 = vadd.f32 %v8598_v35, %v8246_v43  ;;  %8279 = vmatmul.bf16.gmra.mxu1 %v10815_v52  ;;  %8368 = vmatmul.bf16.gmra.mxu2 %v10815_v52  ;;  %v7735_v27 = vld [vmem:[#allocation4 + $0x6c] sm:$0xf] }
 0x5d8   : > { %v7724_v10 = vshrl.u32 %v7708_v0, 16  ;;  %v7727_v58 = vshll.u32 %v7708_v0, 16  ;;  %v8852_v26 = vmax.f32 %v8724_v29, 0.0  ;;  %8457 = vmatmul.bf16.gmra.mxu3 %v10815_v52  ;;  %v7739_v55 = vshrl.u32 %v7735_v27, 16  ;;  %v8603_v52 = vld [vmem:[%s11268_s17 + $0xa8] sm:$0xff] }
 0x5d9   : > { %v7218_v22 = vpop.f32.mrf.mxu0  ;;  %8979 = vst [vmem:[%s15784_s18 + $0x68] sm:$0xff] %v8851_v61  ;;  %v8854_v36 = vmax.f32 %v8726_v1, 0.0  ;;  %v7742_v54 = vshll.u32 %v7735_v27, 16  ;;  %v6885_v0 = vadd.f32 %v17292_v39, %v17291_v53  ;;  %v17296_v27 = vld [vmem:[#allocation46_spill] sm:$0xff] }
 0x5da   : > { %v7219_v37 = vadd.f32 %v7218_v22, %v7106_v16  ;;  %v7726_v9 = vrot.slane %v7724_v10, 7  ;;  %8980 = vst [vmem:[%s15784_s18 + $0x70] sm:$0xff] %v8852_v26  ;;  %v8334_v62 = vpop.f32.mrf.mxu2  ;;  %v10831_v16 = vld [vmem:[%s16322_s3 + $0x4c] sm:$0xf]  ;;  %v17293_v10 = vld [vmem:[#allocation59_spill] sm:$0xff]  ;;  %v7741_v29 = vrot.slane %v7739_v55, 4 }
 0x5db   : > { %8982 = vst [vmem:[%s15784_s18 + $0x80] sm:$0xff] %v8854_v36  ;;  %v8335_v50 = vadd.f32 %v8334_v62, %v15777_v18  ;;  %v8423_v33 = vpop.f32.mrf.mxu3  ;;  %v6998_v23 = vadd.f32 %v17293_v10, %v6885_v0  ;;  %v10435_v61 = vor.u32 %v10831_v16, %v10432_v45  ;;  %v7744_v43 = vrot.slane %v7742_v54, 5  ;;  %v8606_v62 = vld [vmem:[%s11268_s17 + $0xc0] sm:$0xff] }
 0x5dc   : > { %v7279_v41 = vmax.f32 %v7219_v37, 0.0  ;;  %v7729_v4 = vor.u32 %v7727_v58, %v7726_v9  ;;  %v8424_v21 = vadd.f32 %v8423_v33, %v15779_v60  ;;  %v8247_v24 = vpop.f32.mrf.mxu1 }
 0x5dd   : > { %v8727_v44 = vadd.f32 %v8599_v30, %v8335_v50  ;;  %v8248_v28 = vadd.f32 %v8247_v24, %v15767_v11  ;;  %8498 = vmatpush.bf16.msra.mxu1 %v10435_v61  ;;  %v7111_v50 = vadd.f32 %v17296_v27, %v6998_v23  ;;  %v7745_v33 = vor.u32 %v7744_v43, %v7741_v29  ;;  %v8608_v61 = vld [vmem:[%s11268_s17 + $0xd0] sm:$0xff] }
 0x5de   : > { %v10938_v13 = vpack.c.bf16 %v7279_v41, %v7278_v32  ;;  %v7730_v48 = vsel %vm15677_vm5, %v7722_v15, %v7729_v4  ;;  %v8728_v14 = vadd.f32 %v8600_v59, %v8424_v21  ;;  %v8604_v32 = vld [vmem:[%s11268_s17 + $0xb0] sm:$0xff]  ;;  %v17295_v4 = vld [vmem:[#allocation26_spill] sm:$0xff] }
 0x5df   : > { %v8855_v8 = vmax.f32 %v8727_v44, 0.0  ;;  %v8730_v63 = vadd.f32 %v8602_v12, %v8248_v28  ;;  %7734 = vst [vmem:[#allocation5 + $0x54] sm:$0xf] %v7730_v48  ;;  %v7109_v36 = vadd.f32 %v17295_v4, %v17294_v3  ;;  %v7746_v0 = vrot.slane %v7745_v33, 4 }
 0x5e0   : > { %10980 = vst [vmem:[#allocation4 + $0x70] sm:$0xff] %v10938_v13   ;;  %v8856_v22 = vmax.f32 %v8728_v14, 0.0 }
 0x5e1   : > { %v7221_v56 = vpop.f32.mrf.mxu0  ;;  %8983 = vst [vmem:[%s15784_s18 + $0x88] sm:$0xff] %v8855_v8  ;;  %v8858_v35 = vmax.f32 %v8730_v63, 0.0 }
 0x5e2   : > { %8984 = vst [vmem:[%s15784_s18 + $0x90] sm:$0xff] %v8856_v22  ;;  %v8336_v37 = vpop.f32.mrf.mxu2  ;;  %v7222_v24 = vadd.f32 %v7221_v56, %v7109_v36  ;;  %v8607_v22 = vld [vmem:[%s11268_s17 + $0xc8] sm:$0xff]  ;;  %v17299_v36 = vld [vmem:[#allocation43_spill] sm:$0xff] }
 0x5e3   : > { %v8337_v17 = vadd.f32 %v8336_v37, %v15777_v18  ;;  %v8425_v9 = vpop.f32.mrf.mxu3  ;;  %8986 = vst [vmem:[%s15784_s18 + $0xa0] sm:$0xff] %v8858_v35 }
 0x5e4   : > { %v8426_v46 = vadd.f32 %v8425_v9, %v15779_v60  ;;  %v7280_v8 = vmax.f32 %v7222_v24, 0.0  ;;  %v17301_v24 = vld [vmem:[#allocation49_spill] sm:$0xff] }
 0x5e5   : > { %v8731_v30 = vadd.f32 %v8603_v52, %v8337_v17  ;;  %v8610_v17 = vld [vmem:[%s11268_s17 + $0xe0] sm:$0xff] }
 0x5e6   : > { %v8250_v13 = vpop.f32.mrf.mxu1  ;;  %v10816_v12 = vld [vmem:[#allocation5 + $0x50] sm:$0xff]  ;;  %v8732_v47 = vadd.f32 %v8604_v32, %v8426_v46 }
 0x5e7   : > { %v7736_v49 = vld [vmem:[#allocation4 + $0x70] sm:$0xf]  ;;  %v7737_v26 = vld [vmem:[#allocation4 + $0x74] sm:$0x1]  ;;  %v8251_v15 = vadd.f32 %v8250_v13, %v15767_v11  ;;  %v8859_v28 = vmax.f32 %v8731_v30, 0.0  ;;  %8284 = vmatmul.bf16.gmra.mxu1 %v10816_v12  ;;  %8373 = vmatmul.bf16.gmra.mxu2 %v10816_v12 }
 0x5e8   : > { %v7748_v1 = vshll.u32 %v7736_v49, 16  ;;  %v7752_v41 = vshrl.u32 %v7736_v49, 16  ;;  %v7758_v44 = vshll.u32 %v7737_v26, 16  ;;  %v7766_v54 = vld [vmem:[#allocation4 + $0x74] sm:$0xe]  ;;  %v8860_v53 = vmax.f32 %v8732_v47, 0.0  ;;  %8462 = vmatmul.bf16.gmra.mxu3 %v10816_v12 }
 0x5e9   : > { %v7223_v58 = vpop.f32.mrf.mxu0  ;;  %v8734_v48 = vadd.f32 %v8606_v62, %v8251_v15  ;;  %8987 = vst [vmem:[%s15784_s18 + $0xa8] sm:$0xff] %v8859_v28  ;;  %v7770_v10 = vshrl.u32 %v7766_v54, 16  ;;  %v7773_v43 = vshll.u32 %v7766_v54, 16  ;;  %v17297_v32 = vld [vmem:[#allocation99_spill] sm:$0xff]  ;;  %v17302_v47 = vld [vmem:[#allocation64_spill] sm:$0xff] }
 0x5ea   : > { %v7750_v59 = vrot.slane %v7748_v1, 5  ;;  %v7754_v21 = vrot.slane %v7752_v41, 4  ;;  %v7224_v14 = vadd.f32 %v7223_v58, %v7111_v50  ;;  %v7760_v45 = vrot.slane %v7758_v44, 5  ;;  %8988 = vst [vmem:[%s15784_s18 + $0xb0] sm:$0xff] %v8860_v53  ;;  %v17298_v58 = vld [vmem:[#allocation117_spill] sm:$0xff]  ;;  %v8612_v53 = vld [vmem:[%s11268_s17 + $0xf0] sm:$0xff] }
 0x5eb   : > { %v8862_v39 = vmax.f32 %v8734_v48, 0.0  ;;  %v6890_v26 = vadd.f32 %v17298_v58, %v17297_v32  ;;  %v7772_v46 = vrot.slane %v7770_v10, 5  ;;  %v7775_v15 = vrot.slane %v7773_v43, 6 }
 0x5ec   : > { %v7755_v55 = vor.u32 %v7754_v21, %v7750_v59  ;;  %v7281_v63 = vmax.f32 %v7224_v14, 0.0  ;;  %v8339_v16 = vpop.f32.mrf.mxu2  ;;  %v7751_v9 = vsel %vm11605_vm2, %v7746_v0, %v7750_v59  ;;  %v8611_v59 = vld [vmem:[%s11268_s17 + $0xe8] sm:$0xff]  ;;  %v17300_v21 = vld [vmem:[#allocation60_spill] sm:$0xff] }
 0x5ed   : > { %v8340_v23 = vadd.f32 %v8339_v16, %v15777_v18  ;;  %v8428_v35 = vpop.f32.mrf.mxu3  ;;  %8990 = vst [vmem:[%s15784_s18 + $0xc0] sm:$0xff] %v8862_v39  ;;  %v7003_v13 = vadd.f32 %v17299_v36, %v6890_v26  ;;  %v7114_v12 = vadd.f32 %v17301_v24, %v17300_v21  ;;  %v7776_v54 = vor.u32 %v7775_v15, %v7772_v46  ;;  %v8616_v46 = vld [vmem:[%s11268_s17 + $0x110] sm:$0xff]  ;;  %v10416_v21 = vld [vmem:[%s16322_s3 + $0x38] sm:$0xf0] }
 0x5ee   : > { %v7756_v56 = vrot.slane %v7755_v55, 4  ;;  %v10943_v37 = vpack.c.bf16 %v7281_v63, %v7280_v8  ;;  %v8429_v52 = vadd.f32 %v8428_v35, %v15779_v60  ;;  %v8252_v49 = vpop.f32.mrf.mxu1  ;;  %7764 = vst [vmem:[#allocation5 + $0x58] sm:$0xf] %v7751_v9 }
 0x5ef   : > { %v8735_v1 = vadd.f32 %v8607_v22, %v8340_v23  ;;  %v8253_v41 = vadd.f32 %v8252_v49, %v15767_v11  ;;  %v7116_v48 = vadd.f32 %v17302_v47, %v7003_v13  ;;  %v7777_v58 = vrot.slane %v7776_v54, 4  ;;  %v17304_v54 = vld [vmem:[#allocation127_spill] sm:$0xff] }
 0x5f0   : > { %v7761_v3 = vsel %vm11605_vm2, %v7756_v56, %v7760_v45  ;;  %10981 = vst [vmem:[#allocation4 + $0x78] sm:$0xff] %v10943_v37   ;;  %v8736_v4 = vadd.f32 %v8608_v61, %v8429_v52  ;;  %v8614_v61 = vld [vmem:[%s11268_s17 + $0x100] sm:$0xff] }
 0x5f1   : > { %v7226_v29 = vpop.f32.mrf.mxu0  ;;  %v8863_v62 = vmax.f32 %v8735_v1, 0.0  ;;  %v8738_v30 = vadd.f32 %v8610_v17, %v8253_v41  ;;  %7765 = vst [vmem:[#allocation5 + $0x5c] sm:$0xf] %v7761_v3 }
 0x5f2   : > { %v8864_v27 = vmax.f32 %v8736_v4, 0.0  ;;  %v7227_v8 = vadd.f32 %v7226_v29, %v7114_v12 }
 0x5f3   : > { %8991 = vst [vmem:[%s15784_s18 + $0xc8] sm:$0xff] %v8863_v62  ;;  %v8866_v50 = vmax.f32 %v8738_v30, 0.0  ;;  %v8615_v30 = vld [vmem:[%s11268_s17 + $0x108] sm:$0xff] }
 0x5f4   : > { %8992 = vst [vmem:[%s15784_s18 + $0xd0] sm:$0xff] %v8864_v27  ;;  %v8341_v33 = vpop.f32.mrf.mxu2  ;;  %v7282_v26 = vmax.f32 %v7227_v8, 0.0 }
 0x5f5   : > { %8994 = vst [vmem:[%s15784_s18 + $0xe0] sm:$0xff] %v8866_v50  ;;  %v8342_v44 = vadd.f32 %v8341_v33, %v15777_v18  ;;  %v8430_v28 = vpop.f32.mrf.mxu3 }
 0x5f6   : > { %v8431_v14 = vadd.f32 %v8430_v28, %v15779_v60  ;;  %v8255_v39 = vpop.f32.mrf.mxu1 }
 0x5f7   : > { %v7767_v0 = vld [vmem:[#allocation4 + $0x78] sm:$0xf]  ;;  %v7768_v56 = vld [vmem:[#allocation4 + $0x7c] sm:$0x3]  ;;  %v8739_v63 = vadd.f32 %v8611_v59, %v8342_v44  ;;  %v8256_v16 = vadd.f32 %v8255_v39, %v15767_v11  ;;  %v7801_v37 = vld [vmem:[#allocation4 + $0x7c] sm:$0xc] }
 0x5f8   : > { %v7779_v45 = vshrl.u32 %v7767_v0, 16  ;;  %v7782_v10 = vshll.u32 %v7767_v0, 16  ;;  %v7789_v23 = vshrl.u32 %v7768_v56, 16  ;;  %v7792_v35 = vshll.u32 %v7768_v56, 16  ;;  %v10817_v43 = vld [vmem:[#allocation5 + $0x58] sm:$0xff] }
 0x5f9   : > { %v7228_v55 = vpop.f32.mrf.mxu0  ;;  %v8867_v52 = vmax.f32 %v8739_v63, 0.0  ;;  %v8740_v49 = vadd.f32 %v8612_v53, %v8431_v14  ;;  %8289 = vmatmul.bf16.gmra.mxu1 %v10817_v43  ;;  %8378 = vmatmul.bf16.gmra.mxu2 %v10817_v43  ;;  %v8742_v41 = vadd.f32 %v8614_v61, %v8256_v16  ;;  %v7805_v4 = vshrl.u32 %v7801_v37, 16  ;;  %v10827_v59 = vld [vmem:[%s16322_s3 + $0x2c] sm:$0xf] }
 0x5fa   : > { %v7229_v22 = vadd.f32 %v7228_v55, %v7116_v48  ;;  %v7781_v17 = vrot.slane %v7779_v45, 5  ;;  %v7784_v9 = vrot.slane %v7782_v10, 6  ;;  %v7791_v32 = vrot.slane %v7789_v23, 5  ;;  %8467 = vmatmul.bf16.gmra.mxu3 %v10817_v43  ;;  %v8618_v48 = vld [vmem:[%s11268_s17 + $0x120] sm:$0xff]  ;;  %v17303_v55 = vld [vmem:[#allocation111_spill] sm:$0xff]  ;;  %v8619_v43 = vld [vmem:[%s11268_s17 + $0x128] sm:$0xff] }
 0x5fb   : > { %v7794_v29 = vrot.slane %v7792_v35, 6  ;;  %8995 = vst [vmem:[%s15784_s18 + $0xe8] sm:$0xff] %v8867_v52  ;;  %v8868_v1 = vmax.f32 %v8740_v49, 0.0  ;;  %v7808_v36 = vshll.u32 %v7801_v37, 16  ;;  %v8870_v15 = vmax.f32 %v8742_v41, 0.0  ;;  %v17305_v37 = vld [vmem:[#allocation124_spill] sm:$0xff] }
 0x5fc   : > { %v7785_v3 = vor.u32 %v7784_v9, %v7781_v17  ;;  %v7283_v13 = vmax.f32 %v7229_v22, 0.0  ;;  %v8344_v62 = vpop.f32.mrf.mxu2  ;;  %v6895_v14 = vadd.f32 %v17304_v54, %v17303_v55  ;;  %v10419_v63 = vor.u32 %v10827_v59, %v10416_v21 }
 0x5fd   : > { %8996 = vst [vmem:[%s15784_s18 + $0xf0] sm:$0xff] %v8868_v1  ;;  %v8345_v27 = vadd.f32 %v8344_v62, %v15777_v18  ;;  %v8433_v50 = vpop.f32.mrf.mxu3  ;;  %v7795_v12 = vor.u32 %v7794_v29, %v7791_v32  ;;  %v7807_v10 = vrot.slane %v7805_v4, 6  ;;  %v7810_v23 = vrot.slane %v7808_v36, 7  ;;  %v8622_v1 = vld [vmem:[%s11268_s17 + $0x140] sm:$0xff] }
 0x5fe   : > { %v7787_v24 = vrot.slane %v7785_v3, 4  ;;  %v10948_v44 = vpack.c.bf16 %v7283_v13, %v7282_v26  ;;  %v8434_v28 = vadd.f32 %v8433_v50, %v15779_v60  ;;  %v8257_v47 = vpop.f32.mrf.mxu1  ;;  %8998 = vst [vmem:[%s15784_s18 + $0x100] sm:$0xff] %v8870_v15  ;;  %v7786_v0 = vsel %vm13058_vm14, %v7777_v58, %v7785_v3  ;;  %8499 = vmatpush.bf16.msra.mxu1 %v10419_v63  ;;  %v8620_v58 = vld [vmem:[%s11268_s17 + $0x130] sm:$0xff] }
 0x5ff   : > { %v8743_v53 = vadd.f32 %v8615_v30, %v8345_v27  ;;  %v8258_v39 = vadd.f32 %v8257_v47, %v15767_v11  ;;  %v7008_v16 = vadd.f32 %v15628_v5, %v6895_v14  ;;  %7799 = vst [vmem:[#allocation5 + $0x60] sm:$0xf] %v7786_v0  ;;  %v7119_v52 = vadd.f32 %v17305_v37, %v15591_v19  ;;  %v17307_v0 = vld [vmem:[#allocation134_spill] sm:$0xff] }
 0x600   : > { %10982 = vst [vmem:[#allocation4 + $0x80] sm:$0xff] %v10948_v44   ;;  %v8744_v56 = vadd.f32 %v8616_v46, %v8434_v28  ;;  %v7796_v8 = vsel %vm13058_vm14, %v7787_v24, %v7795_v12  ;;  %v7811_v32 = vor.u32 %v7810_v23, %v7807_v10 }
 0x601   : > { %v7231_v33 = vpop.f32.mrf.mxu0  ;;  %v8871_v22 = vmax.f32 %v8743_v53, 0.0  ;;  %v8746_v45 = vadd.f32 %v8618_v48, %v8258_v39  ;;  %7800 = vst [vmem:[#allocation5 + $0x64] sm:$0xf] %v7796_v8  ;;  %v7121_v17 = vadd.f32 %v15565_v20, %v7008_v16  ;;  %v8623_v53 = vld [vmem:[%s11268_s17 + $0x148] sm:$0xff]  ;;  %v17306_v39 = vld [vmem:[#allocation112_spill] sm:$0xff] }
 0x602   : > { %v8872_v35 = vmax.f32 %v8744_v56, 0.0  ;;  %v7232_v4 = vadd.f32 %v7231_v33, %v7119_v52  ;;  %v7812_v55 = vrot.slane %v7811_v32, 4  ;;  %v6900_v56 = vadd.f32 %v17307_v0, %v17306_v39 }
 0x603   : > { %8999 = vst [vmem:[%s15784_s18 + $0x108] sm:$0xff] %v8871_v22  ;;  %v8874_v61 = vmax.f32 %v8746_v45, 0.0  ;;  %v8624_v22 = vld [vmem:[%s11268_s17 + $0x150] sm:$0xff] }
 0x604   : > { %9000 = vst [vmem:[%s15784_s18 + $0x110] sm:$0xff] %v8872_v35  ;;  %v8346_v57 = vpop.f32.mrf.mxu2  ;;  %v7284_v33 = vmax.f32 %v7232_v4, 0.0 }
 0x605   : > { %9002 = vst [vmem:[%s15784_s18 + $0x120] sm:$0xff] %v8874_v61  ;;  %v8347_v5 = vadd.f32 %v8346_v57, %v15777_v18  ;;  %v8435_v49 = vpop.f32.mrf.mxu3  ;;  %v8626_v57 = vld [vmem:[%s11268_s17 + $0x160] sm:$0xff] }
 0x606   : > { %v8436_v29 = vadd.f32 %v8435_v49, %v15779_v60 }
 0x607   : > { %v8260_v26 = vpop.f32.mrf.mxu1  ;;  %v7802_v41 = vld [vmem:[#allocation4 + $0x80] sm:$0xf]  ;;  %v7803_v3 = vld [vmem:[#allocation4 + $0x84] sm:$0x7]  ;;  %v8747_v36 = vadd.f32 %v8619_v43, %v8347_v5  ;;  %v7013_v5 = vadd.f32 %v15649_v7, %v6900_v56  ;;  %v7836_v49 = vld [vmem:[#allocation4 + $0x84] sm:$0x8] }
 0x608   : > { %v8261_v13 = vadd.f32 %v8260_v26, %v15767_v11  ;;  %v7814_v62 = vshrl.u32 %v7802_v41, 16  ;;  %v7817_v30 = vshll.u32 %v7802_v41, 16  ;;  %v7824_v46 = vshrl.u32 %v7803_v3, 16  ;;  %v10818_v59 = vld [vmem:[#allocation5 + $0x60] sm:$0xff] }
 0x609   : > { %v7233_v9 = vpop.f32.mrf.mxu0  ;;  %v7827_v15 = vshll.u32 %v7803_v3, 16  ;;  %v8875_v20 = vmax.f32 %v8747_v36, 0.0  ;;  %v8748_v27 = vadd.f32 %v8620_v58, %v8436_v29  ;;  %8294 = vmatmul.bf16.gmra.mxu1 %v10818_v59  ;;  %8383 = vmatmul.bf16.gmra.mxu2 %v10818_v59  ;;  %v7124_v58 = vadd.f32 %v15608_v2, %v15647_v31  ;;  %v8627_v36 = vld [vmem:[%s11268_s17 + $0x168] sm:$0xff] }
 0x60a   : > { %v7234_v19 = vadd.f32 %v7233_v9, %v7121_v17  ;;  %v8750_v50 = vadd.f32 %v8622_v1, %v8261_v13  ;;  %v7816_v21 = vrot.slane %v7814_v62, 6  ;;  %v7819_v24 = vrot.slane %v7817_v30, 7  ;;  %8472 = vmatmul.bf16.gmra.mxu3 %v10818_v59 }
 0x60b   : > { %v7826_v12 = vrot.slane %v7824_v46, 6  ;;  %v7829_v44 = vrot.slane %v7827_v15, 7  ;;  %9003 = vst [vmem:[%s15784_s18 + $0x128] sm:$0xff] %v8875_v20  ;;  %v8876_v28 = vmax.f32 %v8748_v27, 0.0  ;;  %v7840_v1 = vshrl.u32 %v7836_v49, 16 }
 0x60c   : > { %v8878_v47 = vmax.f32 %v8750_v50, 0.0  ;;  %v7285_v48 = vmax.f32 %v7234_v19, 0.0  ;;  %v7820_v54 = vor.u32 %v7819_v24, %v7816_v21  ;;  %v7126_v4 = vadd.f32 %v15640_v25, %v7013_v5  ;;  %v8628_v19 = vld [vmem:[%s11268_s17 + $0x170] sm:$0xff]  ;;  %v8630_v21 = vld [vmem:[%s11268_s17 + $0x180] sm:$0xff] }
 0x60d   : > { %v8349_v14 = vpop.f32.mrf.mxu2  ;;  %9004 = vst [vmem:[%s15784_s18 + $0x130] sm:$0xff] %v8876_v28  ;;  %v7830_v23 = vor.u32 %v7829_v44, %v7826_v12  ;;  %v10323_v20 = vrot.slane %v7840_v1, 11  ;;  %v10823_v28 = vld [vmem:[%s16322_s3 + $0xc] sm:$0xf]  ;;  %v17309_v5 = vld [vmem:[#allocation113_spill] sm:$0xff] }
 0x60e   : > { %v10953_v8 = vpack.c.bf16 %v7285_v48, %v7284_v33  ;;  %v8350_v63 = vadd.f32 %v8349_v14, %v15777_v18  ;;  %v8438_v16 = vpop.f32.mrf.mxu3  ;;  %v7822_v10 = vrot.slane %v7820_v54, 4  ;;  %9006 = vst [vmem:[%s15784_s18 + $0x140] sm:$0xff] %v8878_v47  ;;  %v7821_v43 = vsel %vm13307_vm1, %v7812_v55, %v7820_v54  ;;  %v10400_v14 = vld [vmem:[%s16322_s3 + $0x18] sm:$0xf0] }
 0x60f   : > { %v8439_v35 = vadd.f32 %v8438_v16, %v15779_v60  ;;  %v8262_v61 = vpop.f32.mrf.mxu1  ;;  %7834 = vst [vmem:[#allocation5 + $0x68] sm:$0xf] %v7821_v43 }
 0x610   : > { %10983 = vst [vmem:[#allocation4 + $0x88] sm:$0xff] %v10953_v8   ;;  %v8751_v37 = vadd.f32 %v8623_v53, %v8350_v63  ;;  %v8263_v52 = vadd.f32 %v8262_v61, %v15767_v11  ;;  %v7831_v9 = vsel %vm13307_vm1, %v7822_v10, %v7830_v23  ;;  %v8631_v23 = vld [vmem:[%s11268_s17 + $0x188] sm:$0xff] }
 0x611   : > { %v7236_v45 = vpop.f32.mrf.mxu0  ;;  %v8752_v17 = vadd.f32 %v8624_v22, %v8439_v35  ;;  %7835 = vst [vmem:[#allocation5 + $0x6c] sm:$0xf] %v7831_v9  ;;  %v10403_v22 = vor.u32 %v10823_v28, %v10400_v14 }
 0x612   : > { %v8879_v32 = vmax.f32 %v8751_v37, 0.0  ;;  %v8754_v29 = vadd.f32 %v8626_v57, %v8263_v52  ;;  %v7237_v7 = vadd.f32 %v7236_v45, %v7124_v58  ;;  %v8632_v57 = vld [vmem:[%s11268_s17 + $0x190] sm:$0xff]  ;;  %v17308_v52 = vld [vmem:[#allocation24_spill] sm:$0xff] }
 0x613   : > { %v8880_v26 = vmax.f32 %v8752_v17, 0.0  ;;  %8500 = vmatpush.bf16.msra.mxu1 %v10403_v22  ;;  %v6905_v49 = vadd.f32 %v17309_v5, %v17308_v52  ;;  %v8640_v5 = vld [vmem:[%s11268_s17 + $0x1d0] sm:$0xff] }
 0x614   : > { %9007 = vst [vmem:[%s15784_s18 + $0x148] sm:$0xff] %v8879_v32  ;;  %v8882_v41 = vmax.f32 %v8754_v29, 0.0  ;;  %v7286_v59 = vmax.f32 %v7237_v7, 0.0  ;;  %v8634_v32 = vld [vmem:[%s11268_s17 + $0x1a0] sm:$0xff] }
 0x615   : > { %9008 = vst [vmem:[%s15784_s18 + $0x150] sm:$0xff] %v8880_v26  ;;  %v8351_v3 = vpop.f32.mrf.mxu2  ;;  %v7018_v1 = vadd.f32 %v15673_v34, %v6905_v49 }
 0x616   : > { %9010 = vst [vmem:[%s15784_s18 + $0x160] sm:$0xff] %v8882_v41  ;;  %v8352_v6 = vadd.f32 %v8351_v3, %v15777_v18  ;;  %v8440_v13 = vpop.f32.mrf.mxu3 }
 0x617   : > { %v7837_v30 = vld [vmem:[#allocation4 + $0x88] sm:$0xf]  ;;  %v7838_v2 = vld [vmem:[#allocation4 + $0x8c] sm:$0xf]  ;;  %v8441_v31 = vadd.f32 %v8440_v13, %v15779_v60  ;;  %v8265_v46 = vpop.f32.mrf.mxu1  ;;  %v7131_v42 = vadd.f32 %v15655_v40, %v7018_v1 }
 0x618   : > { %v7845_v27 = vshrl.u32 %v7837_v30, 16  ;;  %v7854_v50 = vshrl.u32 %v7838_v2, 16  ;;  %v8755_v25 = vadd.f32 %v8627_v36, %v8352_v6  ;;  %v8266_v12 = vadd.f32 %v8265_v46, %v15767_v11  ;;  %v15967_v33 = vld [vmem:[#allocation5 + $0x68] sm:$0xff] }
 0x619   : > { %v7238_v62 = vpop.f32.mrf.mxu0  ;;  %v8756_v24 = vadd.f32 %v8628_v19, %v8441_v31  ;;  %v7848_v48 = vshll.u32 %v7837_v30, 16  ;;  %v7857_v54 = vshll.u32 %v7838_v2, 16  ;;  %8299 = vmatmul.bf16.gmra.mxu1 %v15967_v33  ;;  %8388 = vmatmul.bf16.gmra.mxu2 %v15967_v33  ;;  %v8636_v30 = vld [vmem:[%s11268_s17 + $0x1b0] sm:$0xff] }
 0x61a   : > { %v7239_v15 = vadd.f32 %v7238_v62, %v7126_v4  ;;  %v7847_v47 = vrot.slane %v7845_v27, 7  ;;  %v7856_v55 = vrot.slane %v7854_v50, 7  ;;  %v8883_v53 = vmax.f32 %v8755_v25, 0.0  ;;  %8477 = vmatmul.bf16.gmra.mxu3 %v15967_v33  ;;  %v8635_v62 = vld [vmem:[%s11268_s17 + $0x1a8] sm:$0xff] }
 0x61b   : > { %v8884_v39 = vmax.f32 %v8756_v24, 0.0  ;;  %v8758_v0 = vadd.f32 %v8630_v21, %v8266_v12 }
 0x61c   : > { %v7287_v44 = vmax.f32 %v7239_v15, 0.0  ;;  %v7850_v8 = vor.u32 %v7848_v48, %v7847_v47  ;;  %v7852_v63 = vrot.slane %v7847_v47, 4  ;;  %v7859_v16 = vor.u32 %v7857_v54, %v7856_v55  ;;  %9011 = vst [vmem:[%s15784_s18 + $0x168] sm:$0xff] %v8883_v53 }
 0x61d   : > { %v8886_v45 = vmax.f32 %v8758_v0, 0.0  ;;  %v8354_v10 = vpop.f32.mrf.mxu2  ;;  %9012 = vst [vmem:[%s15784_s18 + $0x170] sm:$0xff] %v8884_v39 }
 0x61e   : > { %v10958_v56 = vpack.c.bf16 %v7287_v44, %v7286_v59  ;;  %v8355_v35 = vadd.f32 %v8354_v10, %v15777_v18  ;;  %v8443_v61 = vpop.f32.mrf.mxu3  ;;  %v7851_v37 = vsel %vm15677_vm5, %v10323_v20, %v7850_v8  ;;  %v7860_v29 = vsel %vm15677_vm5, %v7852_v63, %v7859_v16  ;;  %v8638_v63 = vld [vmem:[%s11268_s17 + $0x1c0] sm:$0xff] }
 0x61f   : > { %9014 = vst [vmem:[%s15784_s18 + $0x180] sm:$0xff] %v8886_v45  ;;  %v8444_v17 = vadd.f32 %v8443_v61, %v15779_v60  ;;  %v8267_v9 = vpop.f32.mrf.mxu1 }
 0x620   : > { %10984 = vst [vmem:[#allocation4 + $0x90] sm:$0xff] %v10958_v56   ;;  %v8759_v58 = vadd.f32 %v8631_v23, %v8355_v35  ;;  %v8268_v26 = vadd.f32 %v8267_v9, %v15767_v11 }
 0x621   : > { %v7241_v43 = vpop.f32.mrf.mxu0  ;;  %v8760_v41 = vadd.f32 %v8632_v57, %v8444_v17  ;;  %7863 = vst [vmem:[#allocation5 + $0x70] sm:$0xf] %v7851_v37 }
 0x622   : > { %v8887_v7 = vmax.f32 %v8759_v58, 0.0  ;;  %v8762_v3 = vadd.f32 %v8634_v32, %v8268_v26  ;;  %7864 = vst [vmem:[#allocation5 + $0x74] sm:$0xf] %v7860_v29  ;;  %v7242_v36 = vadd.f32 %v7241_v43, %v15669_v38  ;;  %v8639_v43 = vld [vmem:[%s11268_s17 + $0x1c8] sm:$0xff]  ;;  %v8642_v29 = vld [vmem:[%s11268_s17 + $0x1e0] sm:$0xff] }
 0x623   : > { %v8888_v4 = vmax.f32 %v8760_v41, 0.0 }
 0x624   : > { %9015 = vst [vmem:[%s15784_s18 + $0x188] sm:$0xff] %v8887_v7  ;;  %v8890_v6 = vmax.f32 %v8762_v3, 0.0  ;;  %v7288_v40 = vmax.f32 %v7242_v36, 0.0  ;;  %v8643_v36 = vld [vmem:[%s11268_s17 + $0x1e8] sm:$0xff] }
 0x625   : > { %9016 = vst [vmem:[%s15784_s18 + $0x190] sm:$0xff] %v8888_v4  ;;  %v8356_v13 = vpop.f32.mrf.mxu2 }
 0x626   : > { %9018 = vst [vmem:[%s15784_s18 + $0x1a0] sm:$0xff] %v8890_v6  ;;  %v8357_v19 = vadd.f32 %v8356_v13, %v15777_v18  ;;  %v8445_v34 = vpop.f32.mrf.mxu3 }
 0x627   : > { %v7865_v31 = vld [vmem:[#allocation4 + $0x90] sm:$0xf]  ;;  %v7866_v46 = vld [vmem:[#allocation4 + $0x94] sm:$0xf]  ;;  %v8446_v15 = vadd.f32 %v8445_v34, %v15779_v60 }
 0x628   : > { %v7869_v27 = vshrl.u32 %v7865_v31, 16  ;;  %v7872_v50 = vshll.u32 %v7865_v31, 16  ;;  %v8763_v59 = vadd.f32 %v8635_v62, %v8357_v19  ;;  %v7878_v12 = vshll.u32 %v7866_v46, 16  ;;  %v8644_v62 = vld [vmem:[%s11268_s17 + $0x1f0] sm:$0xff] }
 0x629   : > { %v7243_v2 = vpop.f32.mrf.mxu0  ;;  %v8764_v21 = vadd.f32 %v8636_v30, %v8446_v15  ;;  %v16003_v44 = vld [vmem:[#allocation5 + $0x70] sm:$0xff]  ;;  %v7882_v54 = vshrl.u32 %v7866_v46, 16 }
 0x62a   : > { %v7244_v20 = vadd.f32 %v7243_v2, %v7131_v42  ;;  %v7871_v25 = vrot.slane %v7869_v27, 4  ;;  %v7874_v24 = vrot.slane %v7872_v50, 5  ;;  %v8891_v28 = vmax.f32 %v8763_v59, 0.0  ;;  %8304 = vmatmul.bf16.gmra.mxu1 %v16003_v44  ;;  %8393 = vmatmul.bf16.gmra.mxu2 %v16003_v44 }
 0x62b   : > { %v8892_v47 = vmax.f32 %v8764_v21, 0.0  ;;  %8482 = vmatmul.bf16.gmra.mxu3 %v16003_v44  ;;  %v7880_v53 = vrot.slane %v7878_v12, 5  ;;  %v7884_v56 = vrot.slane %v7882_v54, 4  ;;  %v8647_v21 = vld [vmem:[%s11268_s17 + $0x208] sm:$0xff] }
 0x62c   : > { %v7289_v38 = vmax.f32 %v7244_v20, 0.0  ;;  %v7875_v55 = vor.u32 %v7874_v24, %v7871_v25  ;;  %9019 = vst [vmem:[%s15784_s18 + $0x1a8] sm:$0xff] %v8891_v28  ;;  %v8646_v20 = vld [vmem:[%s11268_s17 + $0x200] sm:$0xff]  ;;  %v8648_v24 = vld [vmem:[%s11268_s17 + $0x210] sm:$0xff] }
 0x62d   : > { %9020 = vst [vmem:[%s15784_s18 + $0x1b0] sm:$0xff] %v8892_v47  ;;  %v7885_v45 = vor.u32 %v7884_v56, %v7880_v53  ;;  %v8650_v47 = vld [vmem:[%s11268_s17 + $0x220] sm:$0xff] }
 0x62e   : > { %v10963_v48 = vpack.c.bf16 %v7289_v38, %v7288_v40  ;;  %v7876_v14 = vrot.slane %v7875_v55, 4 }
 0x62f   : > { %v7886_v49 = vrot.slane %v7885_v45, 4  ;;  %v11052_v45 = vld [vmem:[#allocation5] sm:$0xff] }
 0x630   : > { %10985 = vst [vmem:[#allocation4 + $0x98] sm:$0xff] %v10963_v48   ;;  %v7881_v0 = vsel %vm11605_vm2, %v7876_v14, %v7880_v53 }
 0x631   : > { %v7246_v39 = vpop.f32.mrf.mxu0  ;;  %7894 = vst [vmem:[#allocation5 + $0x78] sm:$0xf] %v7881_v0 }
 0x632   : > { %v8270_v8 = vpop.f32.mrf.mxu1 }
 0x633   : > { %v8271_v16 = vadd.f32 %v8270_v8, %v15767_v11  ;;  %v8651_v8 = vld [vmem:[%s11268_s17 + $0x228] sm:$0xff] }
 0x635   : > { %v8766_v22 = vadd.f32 %v8638_v63, %v8271_v16 }
 0x637   : > { %v7867_v10 = vld [vmem:[#allocation4 + $0x98] sm:$0x1]  ;;  %v8894_v23 = vmax.f32 %v8766_v22, 0.0 }
 0x638   : > { %v7888_v61 = vshll.u32 %v7867_v10, 16  ;;  %v8359_v57 = vpop.f32.mrf.mxu2  ;;  %v8652_v22 = vld [vmem:[%s11268_s17 + $0x230] sm:$0xff] }
 0x639   : > { %v7248_v35 = vpop.f32.mrf.mxu0  ;;  %9022 = vst [vmem:[%s15784_s18 + $0x1c0] sm:$0xff] %v8894_v23  ;;  %v8360_v37 = vadd.f32 %v8359_v57, %v15777_v18  ;;  %v8448_v52 = vpop.f32.mrf.mxu3 }
 0x63a   : > { %v7890_v17 = vrot.slane %v7888_v61, 5  ;;  %v8449_v9 = vadd.f32 %v8448_v52, %v15779_v60  ;;  %v8272_v32 = vpop.f32.mrf.mxu1  ;;  %v8654_v61 = vld [vmem:[%s11268_s17 + $0x240] sm:$0xff] }
 0x63b   : > { %v8767_v58 = vadd.f32 %v8639_v43, %v8360_v37  ;;  %v8273_v26 = vadd.f32 %v8272_v32, %v15767_v11 }
 0x63c   : > { %v8768_v1 = vadd.f32 %v8640_v5, %v8449_v9  ;;  %v7891_v41 = vsel %vm11605_vm2, %v7886_v49, %v7890_v17  ;;  %v8655_v9 = vld [vmem:[%s11268_s17 + $0x248] sm:$0xff] }
 0x63d   : > { %v8895_v7 = vmax.f32 %v8767_v58, 0.0  ;;  %v8770_v3 = vadd.f32 %v8642_v29, %v8273_v26  ;;  %7895 = vst [vmem:[#allocation5 + $0x7c] sm:$0xf] %v7891_v41  ;;  %v8656_v58 = vld [vmem:[%s11268_s17 + $0x250] sm:$0xff]  ;;  %v8658_v41 = vld [vmem:[%s11268_s17 + $0x260] sm:$0xff] }
 0x63e   : > { %v8896_v4 = vmax.f32 %v8768_v1, 0.0 }
 0x63f   : > { %9023 = vst [vmem:[%s15784_s18 + $0x1c8] sm:$0xff] %v8895_v7  ;;  %v8898_v6 = vmax.f32 %v8770_v3, 0.0 }
 0x640   : > { %9024 = vst [vmem:[%s15784_s18 + $0x1d0] sm:$0xff] %v8896_v4  ;;  %v8361_v42 = vpop.f32.mrf.mxu2 }
 0x641   : > { %9026 = vst [vmem:[%s15784_s18 + $0x1e0] sm:$0xff] %v8898_v6  ;;  %v8362_v13 = vadd.f32 %v8361_v42, %v15777_v18  ;;  %v8450_v19 = vpop.f32.mrf.mxu3 }
 0x642   : > { %v8451_v51 = vadd.f32 %v8450_v19, %v15779_v60 }
 0x643   : > { %v8771_v34 = vadd.f32 %v8643_v36, %v8362_v13 }
 0x644   : > { %v8772_v30 = vadd.f32 %v8644_v62, %v8451_v51  ;;  %v16030_v2 = vld [vmem:[#allocation5 + $0x78] sm:$0xff]  ;;  %v8275_v15 = vpop.f32.mrf.mxu1  ;;  %v8659_v62 = vld [vmem:[%s11268_s17 + $0x268] sm:$0xff] }
 0x645   : > { %v8899_v31 = vmax.f32 %v8771_v34, 0.0  ;;  %8309 = vmatmul.bf16.gmra.mxu1 %v16030_v2  ;;  %8398 = vmatmul.bf16.gmra.mxu2 %v16030_v2  ;;  %v8276_v27 = vadd.f32 %v8275_v15, %v15767_v11  ;;  %v11053_v51 = vld [vmem:[#allocation5 + $0x8] sm:$0xff] }
 0x646   : > { %v8900_v46 = vmax.f32 %v8772_v30, 0.0  ;;  %8487 = vmatmul.bf16.gmra.mxu3 %v16030_v2 }
 0x647   : > { %9027 = vst [vmem:[%s15784_s18 + $0x1e8] sm:$0xff] %v8899_v31  ;;  %v8774_v50 = vadd.f32 %v8646_v20, %v8276_v27  ;;  %v8660_v31 = vld [vmem:[%s11268_s17 + $0x270] sm:$0xff]  ;;  %v8662_v27 = vld [vmem:[%s11268_s17 + $0x280] sm:$0xff] }
 0x648   : > { %9028 = vst [vmem:[%s15784_s18 + $0x1f0] sm:$0xff] %v8900_v46 }
 0x649   : > { %v8902_v40 = vmax.f32 %v8774_v50, 0.0 }
 0x64a   : > { %v8364_v59 = vpop.f32.mrf.mxu2 }
 0x64b   : > { %9030 = vst [vmem:[%s15784_s18 + $0x200] sm:$0xff] %v8902_v40  ;;  %v8365_v38 = vadd.f32 %v8364_v59, %v15777_v18  ;;  %v8453_v25 = vpop.f32.mrf.mxu3 }
 0x64c   : > { %v8454_v12 = vadd.f32 %v8453_v25, %v15779_v60  ;;  %v8277_v28 = vpop.f32.mrf.mxu1 }
 0x64d   : > { %v8775_v48 = vadd.f32 %v8647_v21, %v8365_v38  ;;  %v8278_v55 = vadd.f32 %v8277_v28, %v15767_v11 }
 0x64e   : > { %v8776_v54 = vadd.f32 %v8648_v24, %v8454_v12  ;;  %v8663_v12 = vld [vmem:[%s11268_s17 + $0x288] sm:$0xff] }
 0x64f   : > { %v8903_v14 = vmax.f32 %v8775_v48, 0.0  ;;  %v8778_v53 = vadd.f32 %v8650_v47, %v8278_v55  ;;  %v8664_v48 = vld [vmem:[%s11268_s17 + $0x290] sm:$0xff] }
 0x650   : > { %v8904_v39 = vmax.f32 %v8776_v54, 0.0 }
 0x651   : > { %9031 = vst [vmem:[%s15784_s18 + $0x208] sm:$0xff] %v8903_v14  ;;  %v8906_v0 = vmax.f32 %v8778_v53, 0.0  ;;  %v8666_v14 = vld [vmem:[%s11268_s17 + $0x2a0] sm:$0xff] }
 0x652   : > { %9032 = vst [vmem:[%s15784_s18 + $0x210] sm:$0xff] %v8904_v39  ;;  %v8366_v56 = vpop.f32.mrf.mxu2 }
 0x653   : > { %9034 = vst [vmem:[%s15784_s18 + $0x220] sm:$0xff] %v8906_v0  ;;  %v8367_v63 = vadd.f32 %v8366_v56, %v15777_v18  ;;  %v8455_v16 = vpop.f32.mrf.mxu3 }
 0x654   : > { %v8456_v10 = vadd.f32 %v8455_v16, %v15779_v60  ;;  %v8280_v35 = vpop.f32.mrf.mxu1 }
 0x655   : > { %8501 = vmatmul.bf16.vlgmr.msra.gmra.mxu1 %v11052_v45  ;;  %v8779_v23 = vadd.f32 %v8651_v8, %v8367_v63  ;;  %v8281_v43 = vadd.f32 %v8280_v35, %v15767_v11 }
 0x656   : > { %v8780_v57 = vadd.f32 %v8652_v22, %v8456_v10  ;;  %v11054_v22 = vld [vmem:[#allocation5 + $0x10] sm:$0xff]  ;;  %v8667_v10 = vld [vmem:[%s11268_s17 + $0x2a8] sm:$0xff] }
 0x657   : > { %v8907_v37 = vmax.f32 %v8779_v23, 0.0  ;;  %v8782_v5 = vadd.f32 %v8654_v61, %v8281_v43  ;;  %v8668_v61 = vld [vmem:[%s11268_s17 + $0x2b0] sm:$0xff] }
 0x658   : > { %v8908_v52 = vmax.f32 %v8780_v57, 0.0 }
 0x659   : > { %9035 = vst [vmem:[%s15784_s18 + $0x228] sm:$0xff] %v8907_v37  ;;  %v8910_v49 = vmax.f32 %v8782_v5, 0.0  ;;  %v8670_v37 = vld [vmem:[%s11268_s17 + $0x2c0] sm:$0xff] }
 0x65a   : > { %9036 = vst [vmem:[%s15784_s18 + $0x230] sm:$0xff] %v8908_v52  ;;  %v8369_v17 = vpop.f32.mrf.mxu2 }
 0x65b   : > { %9038 = vst [vmem:[%s15784_s18 + $0x240] sm:$0xff] %v8910_v49  ;;  %v8370_v32 = vadd.f32 %v8369_v17, %v15777_v18  ;;  %v8458_v29 = vpop.f32.mrf.mxu3 }
 0x65c   : > { %v8459_v26 = vadd.f32 %v8458_v29, %v15779_v60  ;;  %v8282_v1 = vpop.f32.mrf.mxu1 }
 0x65d   : > { %v8783_v7 = vadd.f32 %v8655_v9, %v8370_v32  ;;  %v8283_v3 = vadd.f32 %v8282_v1, %v15767_v11 }
 0x65e   : > { %v8784_v4 = vadd.f32 %v8656_v58, %v8459_v26  ;;  %v8671_v26 = vld [vmem:[%s11268_s17 + $0x2c8] sm:$0xff] }
 0x65f   : > { %v8911_v6 = vmax.f32 %v8783_v7, 0.0  ;;  %v8786_v42 = vadd.f32 %v8658_v41, %v8283_v3  ;;  %v8672_v7 = vld [vmem:[%s11268_s17 + $0x2d0] sm:$0xff] }
 0x660   : > { %v8912_v36 = vmax.f32 %v8784_v4, 0.0 }
 0x661   : > { %9039 = vst [vmem:[%s15784_s18 + $0x248] sm:$0xff] %v8911_v6  ;;  %v8914_v13 = vmax.f32 %v8786_v42, 0.0  ;;  %v8674_v6 = vld [vmem:[%s11268_s17 + $0x2e0] sm:$0xff] }
 0x662   : > { %9040 = vst [vmem:[%s15784_s18 + $0x250] sm:$0xff] %v8912_v36  ;;  %v8371_v19 = vpop.f32.mrf.mxu2 }
 0x663   : > { %9042 = vst [vmem:[%s15784_s18 + $0x260] sm:$0xff] %v8914_v13  ;;  %v8372_v34 = vadd.f32 %v8371_v19, %v15777_v18  ;;  %v8460_v30 = vpop.f32.mrf.mxu3 }
 0x664   : > { %v8461_v46 = vadd.f32 %v8460_v30, %v15779_v60  ;;  %v8285_v20 = vpop.f32.mrf.mxu1  ;;  %v11055_v30 = vld [vmem:[#allocation5 + $0x18] sm:$0xff] }
 0x665   : > { %8506 = vmatmul.bf16.gmra.mxu1 %v11053_v51  ;;  %v8787_v15 = vadd.f32 %v8659_v62, %v8372_v34  ;;  %v8286_v40 = vadd.f32 %v8285_v20, %v15767_v11 }
 0x666   : > { %v8788_v50 = vadd.f32 %v8660_v31, %v8461_v46  ;;  %v8675_v46 = vld [vmem:[%s11268_s17 + $0x2e8] sm:$0xff] }
 0x667   : > { %v8915_v59 = vmax.f32 %v8787_v15, 0.0  ;;  %v8790_v38 = vadd.f32 %v8662_v27, %v8286_v40  ;;  %v8676_v27 = vld [vmem:[%s11268_s17 + $0x2f0] sm:$0xff] }
 0x668   : > { %v8916_v21 = vmax.f32 %v8788_v50, 0.0 }
 0x669   : > { %9043 = vst [vmem:[%s15784_s18 + $0x268] sm:$0xff] %v8915_v59  ;;  %v8918_v25 = vmax.f32 %v8790_v38, 0.0 }
 0x66a   : > { %9044 = vst [vmem:[%s15784_s18 + $0x270] sm:$0xff] %v8916_v21  ;;  %v8374_v24 = vpop.f32.mrf.mxu2  ;;  %v8678_v21 = vld [vmem:[%s11268_s17 + $0x300] sm:$0xff] }
 0x66b   : > { %9046 = vst [vmem:[%s15784_s18 + $0x280] sm:$0xff] %v8918_v25  ;;  %v8375_v28 = vadd.f32 %v8374_v24, %v15777_v18  ;;  %v8463_v47 = vpop.f32.mrf.mxu3 }
 0x66c   : > { %v8464_v55 = vadd.f32 %v8463_v47, %v15779_v60  ;;  %v8287_v54 = vpop.f32.mrf.mxu1 }
 0x66d   : > { %v8791_v53 = vadd.f32 %v8663_v12, %v8375_v28  ;;  %v8288_v39 = vadd.f32 %v8287_v54, %v15767_v11 }
 0x66e   : > { %v8792_v0 = vadd.f32 %v8664_v48, %v8464_v55  ;;  %v8679_v55 = vld [vmem:[%s11268_s17 + $0x308] sm:$0xff] }
 0x66f   : > { %v8919_v56 = vmax.f32 %v8791_v53, 0.0  ;;  %v8794_v8 = vadd.f32 %v8666_v14, %v8288_v39  ;;  %v8680_v53 = vld [vmem:[%s11268_s17 + $0x310] sm:$0xff] }
 0x670   : > { %v8920_v63 = vmax.f32 %v8792_v0, 0.0 }
 0x671   : > { %9047 = vst [vmem:[%s15784_s18 + $0x288] sm:$0xff] %v8919_v56  ;;  %v8922_v16 = vmax.f32 %v8794_v8, 0.0  ;;  %v8682_v56 = vld [vmem:[%s11268_s17 + $0x320] sm:$0xff] }
 0x672   : > { %9048 = vst [vmem:[%s15784_s18 + $0x290] sm:$0xff] %v8920_v63  ;;  %v8376_v45 = vpop.f32.mrf.mxu2 }
 0x673   : > { %9050 = vst [vmem:[%s15784_s18 + $0x2a0] sm:$0xff] %v8922_v16  ;;  %v8377_v23 = vadd.f32 %v8376_v45, %v15777_v18  ;;  %v8465_v35 = vpop.f32.mrf.mxu3 }
 0x674   : > { %v8466_v57 = vadd.f32 %v8465_v35, %v15779_v60 }
 0x675   : > { %8511 = vmatmul.bf16.gmra.mxu1 %v11054_v22  ;;  %v8795_v52 = vadd.f32 %v8667_v10, %v8377_v23  ;;  %v11056_v23 = vld [vmem:[#allocation5 + $0x20] sm:$0xff] }
 0x676   : > { %v8290_v43 = vpop.f32.mrf.mxu1  ;;  %v8796_v49 = vadd.f32 %v8668_v61, %v8466_v57  ;;  %v8683_v57 = vld [vmem:[%s11268_s17 + $0x328] sm:$0xff] }
 0x677   : > { %v8291_v5 = vadd.f32 %v8290_v43, %v15767_v11  ;;  %v8923_v17 = vmax.f32 %v8795_v52, 0.0  ;;  %v8684_v52 = vld [vmem:[%s11268_s17 + $0x330] sm:$0xff] }
 0x678   : > { %v8924_v32 = vmax.f32 %v8796_v49, 0.0 }
 0x679   : > { %v8798_v9 = vadd.f32 %v8670_v37, %v8291_v5  ;;  %9051 = vst [vmem:[%s15784_s18 + $0x2a8] sm:$0xff] %v8923_v17  ;;  %v8686_v17 = vld [vmem:[%s11268_s17 + $0x340] sm:$0xff] }
 0x67a   : > { %9052 = vst [vmem:[%s15784_s18 + $0x2b0] sm:$0xff] %v8924_v32 }
 0x67b   : > { %v8926_v29 = vmax.f32 %v8798_v9, 0.0 }
 0x67c   : > { %v8379_v58 = vpop.f32.mrf.mxu2 }
 0x67d   : > { %9054 = vst [vmem:[%s15784_s18 + $0x2c0] sm:$0xff] %v8926_v29  ;;  %v8380_v1 = vadd.f32 %v8379_v58, %v15777_v18  ;;  %v8468_v41 = vpop.f32.mrf.mxu3 }
 0x67e   : > { %v8469_v3 = vadd.f32 %v8468_v41, %v15779_v60  ;;  %v8292_v4 = vpop.f32.mrf.mxu1 }
 0x67f   : > { %v8799_v42 = vadd.f32 %v8671_v26, %v8380_v1  ;;  %v8293_v36 = vadd.f32 %v8292_v4, %v15767_v11 }
 0x680   : > { %v8800_v13 = vadd.f32 %v8672_v7, %v8469_v3  ;;  %v8687_v3 = vld [vmem:[%s11268_s17 + $0x348] sm:$0xff] }
 0x681   : > { %v8927_v19 = vmax.f32 %v8799_v42, 0.0  ;;  %v8802_v62 = vadd.f32 %v8674_v6, %v8293_v36  ;;  %v8688_v42 = vld [vmem:[%s11268_s17 + $0x350] sm:$0xff] }
 0x682   : > { %v8928_v51 = vmax.f32 %v8800_v13, 0.0 }
 0x683   : > { %9055 = vst [vmem:[%s15784_s18 + $0x2c8] sm:$0xff] %v8927_v19  ;;  %v8930_v34 = vmax.f32 %v8802_v62, 0.0  ;;  %v8690_v19 = vld [vmem:[%s11268_s17 + $0x360] sm:$0xff] }
 0x684   : > { %9056 = vst [vmem:[%s15784_s18 + $0x2d0] sm:$0xff] %v8928_v51  ;;  %v8381_v31 = vpop.f32.mrf.mxu2 }
 0x685   : > { %8516 = vmatmul.bf16.gmra.mxu1 %v11055_v30  ;;  %9058 = vst [vmem:[%s15784_s18 + $0x2e0] sm:$0xff] %v8930_v34  ;;  %v8382_v15 = vadd.f32 %v8381_v31, %v15777_v18  ;;  %v8470_v20 = vpop.f32.mrf.mxu3 }
 0x686   : > { %v8471_v50 = vadd.f32 %v8470_v20, %v15779_v60  ;;  %v8295_v59 = vpop.f32.mrf.mxu1 }
 0x687   : > { %v8803_v40 = vadd.f32 %v8675_v46, %v8382_v15  ;;  %v8296_v25 = vadd.f32 %v8295_v59, %v15767_v11  ;;  %v11057_v15 = vld [vmem:[#allocation5 + $0x28] sm:$0xff] }
 0x688   : > { %v8804_v38 = vadd.f32 %v8676_v27, %v8471_v50  ;;  %v8691_v50 = vld [vmem:[%s11268_s17 + $0x368] sm:$0xff] }
 0x689   : > { %v8931_v24 = vmax.f32 %v8803_v40, 0.0  ;;  %v8806_v28 = vadd.f32 %v8678_v21, %v8296_v25  ;;  %v8692_v21 = vld [vmem:[%s11268_s17 + $0x370] sm:$0xff] }
 0x68a   : > { %v8932_v12 = vmax.f32 %v8804_v38, 0.0 }
 0x68b   : > { %9059 = vst [vmem:[%s15784_s18 + $0x2e8] sm:$0xff] %v8931_v24  ;;  %v8934_v47 = vmax.f32 %v8806_v28, 0.0  ;;  %v8694_v24 = vld [vmem:[%s11268_s17 + $0x380] sm:$0xff] }
 0x68c   : > { %9060 = vst [vmem:[%s15784_s18 + $0x2f0] sm:$0xff] %v8932_v12  ;;  %v8384_v48 = vpop.f32.mrf.mxu2 }
 0x68d   : > { %9062 = vst [vmem:[%s15784_s18 + $0x300] sm:$0xff] %v8934_v47  ;;  %v8385_v54 = vadd.f32 %v8384_v48, %v15777_v18  ;;  %v8473_v14 = vpop.f32.mrf.mxu3 }
 0x68e   : > { %v8474_v39 = vadd.f32 %v8473_v14, %v15779_v60  ;;  %v8297_v0 = vpop.f32.mrf.mxu1 }
 0x68f   : > { %v8807_v8 = vadd.f32 %v8679_v55, %v8385_v54  ;;  %v8298_v63 = vadd.f32 %v8297_v0, %v15767_v11 }
 0x690   : > { %v8808_v16 = vadd.f32 %v8680_v53, %v8474_v39  ;;  %v8695_v39 = vld [vmem:[%s11268_s17 + $0x388] sm:$0xff] }
 0x691   : > { %v8935_v22 = vmax.f32 %v8807_v8, 0.0  ;;  %v8810_v45 = vadd.f32 %v8682_v56, %v8298_v63  ;;  %v8696_v8 = vld [vmem:[%s11268_s17 + $0x390] sm:$0xff] }
 0x692   : > { %v8936_v10 = vmax.f32 %v8808_v16, 0.0 }
 0x693   : > { %9063 = vst [vmem:[%s15784_s18 + $0x308] sm:$0xff] %v8935_v22  ;;  %v8938_v35 = vmax.f32 %v8810_v45, 0.0  ;;  %v8698_v22 = vld [vmem:[%s11268_s17 + $0x3a0] sm:$0xff] }
 0x694   : > { %9064 = vst [vmem:[%s15784_s18 + $0x310] sm:$0xff] %v8936_v10  ;;  %v8386_v61 = vpop.f32.mrf.mxu2 }
 0x695   : > { %8521 = vmatmul.bf16.gmra.mxu1 %v11056_v23  ;;  %9066 = vst [vmem:[%s15784_s18 + $0x320] sm:$0xff] %v8938_v35  ;;  %v8387_v43 = vadd.f32 %v8386_v61, %v15777_v18  ;;  %v8475_v37 = vpop.f32.mrf.mxu3 }
 0x696   : > { %v8476_v5 = vadd.f32 %v8475_v37, %v15779_v60  ;;  %v8300_v49 = vpop.f32.mrf.mxu1 }
 0x697   : > { %v8811_v9 = vadd.f32 %v8683_v57, %v8387_v43  ;;  %v8301_v32 = vadd.f32 %v8300_v49, %v15767_v11  ;;  %v11058_v43 = vld [vmem:[#allocation5 + $0x30] sm:$0xff] }
 0x698   : > { %v8812_v29 = vadd.f32 %v8684_v52, %v8476_v5  ;;  %v8699_v5 = vld [vmem:[%s11268_s17 + $0x3a8] sm:$0xff] }
 0x699   : > { %v8939_v58 = vmax.f32 %v8811_v9, 0.0  ;;  %v8814_v26 = vadd.f32 %v8686_v17, %v8301_v32  ;;  %v8700_v9 = vld [vmem:[%s11268_s17 + $0x3b0] sm:$0xff] }
 0x69a   : > { %v8940_v1 = vmax.f32 %v8812_v29, 0.0 }
 0x69b   : > { %9067 = vst [vmem:[%s15784_s18 + $0x328] sm:$0xff] %v8939_v58  ;;  %v8942_v41 = vmax.f32 %v8814_v26, 0.0 }
 0x69c   : > { %9068 = vst [vmem:[%s15784_s18 + $0x330] sm:$0xff] %v8940_v1  ;;  %v8389_v7 = vpop.f32.mrf.mxu2 }
 0x69d   : > { %9070 = vst [vmem:[%s15784_s18 + $0x340] sm:$0xff] %v8942_v41  ;;  %v8390_v4 = vadd.f32 %v8389_v7, %v15777_v18  ;;  %v8478_v6 = vpop.f32.mrf.mxu3  ;;  %v8702_v7 = vld [vmem:[%s11268_s17 + $0x3c0] sm:$0xff] }
 0x69e   : > { %v8479_v36 = vadd.f32 %v8478_v6, %v15779_v60  ;;  %v8302_v13 = vpop.f32.mrf.mxu1  ;;  %v11059_v6 = vld [vmem:[#allocation5 + $0x38] sm:$0xff] }
 0x69f   : > { %v8815_v62 = vadd.f32 %v8687_v3, %v8390_v4  ;;  %v8303_v51 = vadd.f32 %v8302_v13, %v15767_v11  ;;  %v8703_v13 = vld [vmem:[%s11268_s17 + $0x3c8] sm:$0xff] }
 0x6a0   : > { %v8816_v34 = vadd.f32 %v8688_v42, %v8479_v36 }
 0x6a1   : > { %v8943_v30 = vmax.f32 %v8815_v62, 0.0  ;;  %v8818_v31 = vadd.f32 %v8690_v19, %v8303_v51  ;;  %v8704_v51 = vld [vmem:[%s11268_s17 + $0x3d0] sm:$0xff] }
 0x6a2   : > { %v8944_v46 = vmax.f32 %v8816_v34, 0.0 }
 0x6a3   : > { %9071 = vst [vmem:[%s15784_s18 + $0x348] sm:$0xff] %v8943_v30  ;;  %v8946_v20 = vmax.f32 %v8818_v31, 0.0  ;;  %v8706_v31 = vld [vmem:[%s11268_s17 + $0x3e0] sm:$0xff] }
 0x6a4   : > { %9072 = vst [vmem:[%s15784_s18 + $0x350] sm:$0xff] %v8944_v46  ;;  %v8391_v27 = vpop.f32.mrf.mxu2 }
 0x6a5   : > { %8526 = vmatmul.bf16.gmra.mxu1 %v11057_v15  ;;  %9074 = vst [vmem:[%s15784_s18 + $0x360] sm:$0xff] %v8946_v20  ;;  %v8392_v40 = vadd.f32 %v8391_v27, %v15777_v18  ;;  %v8480_v59 = vpop.f32.mrf.mxu3 }
 0x6a6   : > { %v8481_v38 = vadd.f32 %v8480_v59, %v15779_v60 }
 0x6a7   : > { %v8305_v25 = vpop.f32.mrf.mxu1  ;;  %v8819_v12 = vadd.f32 %v8691_v50, %v8392_v40 }
 0x6a8   : > { %v8306_v28 = vadd.f32 %v8305_v25, %v15767_v11  ;;  %v8820_v47 = vadd.f32 %v8692_v21, %v8481_v38  ;;  %v11060_v21 = vld [vmem:[%s16325_s6] sm:$0xf] }
 0x6a9   : > { %v8947_v48 = vmax.f32 %v8819_v12, 0.0  ;;  %v16176_v38 = vperm.slane %v11060_v21, 3 }
 0x6aa   : > { %v8822_v55 = vadd.f32 %v8694_v24, %v8306_v28  ;;  %v8948_v54 = vmax.f32 %v8820_v47, 0.0  ;;  %v8707_v24 = vld [vmem:[%s11268_s17 + $0x3e8] sm:$0xff]  ;;  %v8708_v28 = vld [vmem:[%s11268_s17 + $0x3f0] sm:$0xff] }
 0x6ab   : > { %9075 = vst [vmem:[%s15784_s18 + $0x368] sm:$0xff] %v8947_v48 }
 0x6ac   : > { %v8950_v14 = vmax.f32 %v8822_v55, 0.0  ;;  %9076 = vst [vmem:[%s15784_s18 + $0x370] sm:$0xff] %v8948_v54  ;;  %v8585_v55 = vld [vmem:[%s11268_s17 + $0x18] sm:$0xff] }
 0x6ad   : > { %v8394_v53 = vpop.f32.mrf.mxu2 }
 0x6ae   : > { %9078 = vst [vmem:[%s15784_s18 + $0x380] sm:$0xff] %v8950_v14  ;;  %v8395_v0 = vadd.f32 %v8394_v53, %v15777_v18  ;;  %v8483_v56 = vpop.f32.mrf.mxu3 }
 0x6af   : > { %v8484_v63 = vadd.f32 %v8483_v56, %v15779_v60  ;;  %v8307_v16 = vpop.f32.mrf.mxu1  ;;  %v11061_v56 = vld [vmem:[#allocation5 + $0x40] sm:$0xff] }
 0x6b0   : > { %v8823_v45 = vadd.f32 %v8695_v39, %v8395_v0  ;;  %v8308_v10 = vadd.f32 %v8307_v16, %v15767_v11 }
 0x6b1   : > { %v8824_v23 = vadd.f32 %v8696_v8, %v8484_v63  ;;  %v8589_v63 = vld [vmem:[%s11268_s17 + $0x38] sm:$0xff] }
 0x6b2   : > { %v8951_v35 = vmax.f32 %v8823_v45, 0.0  ;;  %v8826_v61 = vadd.f32 %v8698_v22, %v8308_v10 }
 0x6b3   : > { %v8952_v57 = vmax.f32 %v8824_v23, 0.0  ;;  %v8593_v23 = vld [vmem:[%s11268_s17 + $0x58] sm:$0xff] }
 0x6b4   : > { %9079 = vst [vmem:[%s15784_s18 + $0x388] sm:$0xff] %v8951_v35  ;;  %v8954_v37 = vmax.f32 %v8826_v61, 0.0 }
 0x6b5   : > { %8531 = vmatmul.bf16.gmra.mxu1 %v11058_v43  ;;  %9080 = vst [vmem:[%s15784_s18 + $0x390] sm:$0xff] %v8952_v57  ;;  %v8396_v52 = vpop.f32.mrf.mxu2  ;;  %v11062_v57 = vld [vmem:[#allocation5 + $0x48] sm:$0xff] }
 0x6b6   : > { %9082 = vst [vmem:[%s15784_s18 + $0x3a0] sm:$0xff] %v8954_v37  ;;  %v8397_v49 = vadd.f32 %v8396_v52, %v15777_v18  ;;  %v8485_v17 = vpop.f32.mrf.mxu3  ;;  %v8597_v52 = vld [vmem:[%s11268_s17 + $0x78] sm:$0xff] }
 0x6b7   : > { %v8486_v32 = vadd.f32 %v8485_v17, %v15779_v60 }
 0x6b8   : > { %v8827_v29 = vadd.f32 %v8699_v5, %v8397_v49 }
 0x6b9   : > { %v8828_v58 = vadd.f32 %v8700_v9, %v8486_v32  ;;  %v8601_v32 = vld [vmem:[%s11268_s17 + $0x98] sm:$0xff] }
 0x6ba   : > { %v8955_v26 = vmax.f32 %v8827_v29, 0.0 }
 0x6bb   : > { %v8956_v1 = vmax.f32 %v8828_v58, 0.0 }
 0x6bc   : > { %9083 = vst [vmem:[%s15784_s18 + $0x3a8] sm:$0xff] %v8955_v26  ;;  %v11063_v26 = vld [vmem:[#allocation5 + $0x50] sm:$0xff] }
 0x6bd   : > { %9084 = vst [vmem:[%s15784_s18 + $0x3b0] sm:$0xff] %v8956_v1 }
 0x6c2   : > { %v8310_v41 = vpop.f32.mrf.mxu1 }
 0x6c3   : > { %v8311_v3 = vadd.f32 %v8310_v41, %v15767_v11 }
 0x6c5   : > { %v8830_v4 = vadd.f32 %v8702_v7, %v8311_v3  ;;  %8536 = vmatmul.bf16.gmra.mxu1 %v11059_v6  ;;  %v8605_v7 = vld [vmem:[%s11268_s17 + $0xb8] sm:$0xff] }
 0x6c7   : > { %v8958_v42 = vmax.f32 %v8830_v4, 0.0 }
 0x6c8   : > { %v8399_v36 = vpop.f32.mrf.mxu2 }
 0x6c9   : > { %9086 = vst [vmem:[%s15784_s18 + $0x3c0] sm:$0xff] %v8958_v42  ;;  %v8400_v19 = vadd.f32 %v8399_v36, %v15777_v18  ;;  %v8488_v62 = vpop.f32.mrf.mxu3  ;;  %v8609_v36 = vld [vmem:[%s11268_s17 + $0xd8] sm:$0xff] }
 0x6ca   : > { %v8489_v34 = vadd.f32 %v8488_v62, %v15779_v60  ;;  %v8312_v30 = vpop.f32.mrf.mxu1  ;;  %v11064_v62 = vld [vmem:[#allocation5 + $0x58] sm:$0xff] }
 0x6cb   : > { %v8831_v46 = vadd.f32 %v8703_v13, %v8400_v19  ;;  %v8313_v15 = vadd.f32 %v8312_v30, %v15767_v11  ;;  %v8613_v30 = vld [vmem:[%s11268_s17 + $0xf8] sm:$0xff] }
 0x6cc   : > { %v8832_v20 = vadd.f32 %v8704_v51, %v8489_v34 }
 0x6cd   : > { %v8959_v27 = vmax.f32 %v8831_v46, 0.0  ;;  %v8834_v50 = vadd.f32 %v8706_v31, %v8313_v15 }
 0x6ce   : > { %v8960_v40 = vmax.f32 %v8832_v20, 0.0 }
 0x6cf   : > { %9087 = vst [vmem:[%s15784_s18 + $0x3c8] sm:$0xff] %v8959_v27  ;;  %v8962_v59 = vmax.f32 %v8834_v50, 0.0  ;;  %v8617_v27 = vld [vmem:[%s11268_s17 + $0x118] sm:$0xff] }
 0x6d0   : > { %9088 = vst [vmem:[%s15784_s18 + $0x3d0] sm:$0xff] %v8960_v40  ;;  %v8401_v25 = vpop.f32.mrf.mxu2 }
 0x6d1   : > { %9090 = vst [vmem:[%s15784_s18 + $0x3e0] sm:$0xff] %v8962_v59  ;;  %v8402_v11 = vadd.f32 %v8401_v25, %v15777_v18  ;;  %v8490_v12 = vpop.f32.mrf.mxu3  ;;  %v11065_v59 = vld [vmem:[#allocation5 + $0x60] sm:$0xff] }
 0x6d2   : > { %v8491_v47 = vadd.f32 %v8490_v12, %v15779_v60  ;;  %v8502_v48 = vpop.f32.mrf.mxu1 }
 0x6d3   : > { %v8835_v54 = vadd.f32 %v8707_v24, %v8402_v11  ;;  %v8503_v14 = vadd.f32 %v8502_v48, %v16176_v38  ;;  %v8621_v24 = vld [vmem:[%s11268_s17 + $0x138] sm:$0xff] }
 0x6d4   : > { %v8836_v53 = vadd.f32 %v8708_v28, %v8491_v47  ;;  %v8625_v48 = vld [vmem:[%s11268_s17 + $0x158] sm:$0xff] }
 0x6d5   : > { %v8963_v39 = vmax.f32 %v8835_v54, 0.0  ;;  %v8713_v0 = vadd.f32 %v8585_v55, %v8503_v14  ;;  %8541 = vmatmul.bf16.gmra.mxu1 %v11061_v56 }
 0x6d6   : > { %v8964_v18 = vmax.f32 %v8836_v53, 0.0 }
 0x6d7   : > { %9091 = vst [vmem:[%s15784_s18 + $0x3e8] sm:$0xff] %v8963_v39  ;;  %v8841_v8 = vmax.f32 %v8713_v0, 0.0  ;;  %v8629_v39 = vld [vmem:[%s11268_s17 + $0x178] sm:$0xff] }
 0x6d8   : > { %9092 = vst [vmem:[%s15784_s18 + $0x3f0] sm:$0xff] %v8964_v18 }
 0x6d9   : > { %8969 = vst [vmem:[%s15784_s18 + $0x18] sm:$0xff] %v8841_v8 }
 0x6da   : > { %v8504_v60 = vpop.f32.mrf.mxu1 }
 0x6db   : > { %v8505_v16 = vadd.f32 %v8504_v60, %v16176_v38  ;;  %v8633_v60 = vld [vmem:[%s11268_s17 + $0x198] sm:$0xff] }
 0x6dd   : > { %v8717_v22 = vadd.f32 %v8589_v63, %v8505_v16 }
 0x6df   : > { %v8845_v45 = vmax.f32 %v8717_v22, 0.0 }
 0x6e1   : > { %8973 = vst [vmem:[%s15784_s18 + $0x38] sm:$0xff] %v8845_v45  ;;  %v8637_v45 = vld [vmem:[%s11268_s17 + $0x1b8] sm:$0xff] }
 0x6e2   : > { %v8507_v10 = vpop.f32.mrf.mxu1 }
 0x6e3   : > { %v8508_v35 = vadd.f32 %v8507_v10, %v16176_v38 }
 0x6e5   : > { %v8721_v61 = vadd.f32 %v8593_v23, %v8508_v35  ;;  %8546 = vmatmul.bf16.gmra.mxu1 %v11062_v57  ;;  %v8641_v57 = vld [vmem:[%s11268_s17 + $0x1d8] sm:$0xff] }
 0x6e7   : > { %v8849_v43 = vmax.f32 %v8721_v61, 0.0 }
 0x6e9   : > { %8977 = vst [vmem:[%s15784_s18 + $0x58] sm:$0xff] %v8849_v43 }
 0x6ea   : > { %v8509_v37 = vpop.f32.mrf.mxu1 }
 0x6eb   : > { %v8510_v5 = vadd.f32 %v8509_v37, %v16176_v38 }
 0x6ed   : > { %v8725_v49 = vadd.f32 %v8597_v52, %v8510_v5  ;;  %v8645_v5 = vld [vmem:[%s11268_s17 + $0x1f8] sm:$0xff] }
 0x6ef   : > { %v8853_v17 = vmax.f32 %v8725_v49, 0.0 }
 0x6f1   : > { %8981 = vst [vmem:[%s15784_s18 + $0x78] sm:$0xff] %v8853_v17 }
 0x6f2   : > { %v8512_v9 = vpop.f32.mrf.mxu1 }
 0x6f3   : > { %v8513_v29 = vadd.f32 %v8512_v9, %v16176_v38 }
 0x6f5   : > { %v8729_v58 = vadd.f32 %v8601_v32, %v8513_v29  ;;  %8551 = vmatmul.bf16.gmra.mxu1 %v11063_v26  ;;  %v8649_v29 = vld [vmem:[%s11268_s17 + $0x218] sm:$0xff] }
 0x6f7   : > { %v8857_v1 = vmax.f32 %v8729_v58, 0.0 }
 0x6f9   : > { %8985 = vst [vmem:[%s15784_s18 + $0x98] sm:$0xff] %v8857_v1 }
 0x6fa   : > { %v8514_v41 = vpop.f32.mrf.mxu1 }
 0x6fb   : > { %v8515_v3 = vadd.f32 %v8514_v41, %v16176_v38  ;;  %v8653_v41 = vld [vmem:[%s11268_s17 + $0x238] sm:$0xff] }
 0x6fd   : > { %v8733_v4 = vadd.f32 %v8605_v7, %v8515_v3 }
 0x6ff   : > { %v8861_v6 = vmax.f32 %v8733_v4, 0.0 }
 0x701   : > { %8989 = vst [vmem:[%s15784_s18 + $0xb8] sm:$0xff] %v8861_v6 }
 0x702   : > { %v8517_v42 = vpop.f32.mrf.mxu1 }
 0x703   : > { %v8518_v13 = vadd.f32 %v8517_v42, %v16176_v38  ;;  %v8657_v42 = vld [vmem:[%s11268_s17 + $0x258] sm:$0xff] }
 0x705   : > { %v8737_v19 = vadd.f32 %v8609_v36, %v8518_v13  ;;  %8556 = vmatmul.bf16.gmra.mxu1 %v11064_v62 }
 0x707   : > { %v8865_v51 = vmax.f32 %v8737_v19, 0.0 }
 0x709   : > { %8993 = vst [vmem:[%s15784_s18 + $0xd8] sm:$0xff] %v8865_v51  ;;  %v8661_v51 = vld [vmem:[%s11268_s17 + $0x278] sm:$0xff] }
 0x70a   : > { %v8519_v34 = vpop.f32.mrf.mxu1 }
 0x70b   : > { %v8520_v31 = vadd.f32 %v8519_v34, %v16176_v38 }
 0x70d   : > { %v8741_v46 = vadd.f32 %v8613_v30, %v8520_v31 }
 0x70f   : > { %v8869_v15 = vmax.f32 %v8741_v46, 0.0 }
 0x711   : > { %8997 = vst [vmem:[%s15784_s18 + $0xf8] sm:$0xff] %v8869_v15  ;;  %v8665_v15 = vld [vmem:[%s11268_s17 + $0x298] sm:$0xff] }
 0x712   : > { %v8522_v20 = vpop.f32.mrf.mxu1 }
 0x713   : > { %v8523_v50 = vadd.f32 %v8522_v20, %v16176_v38 }
 0x715   : > { %v8745_v40 = vadd.f32 %v8617_v27, %v8523_v50  ;;  %8561 = vmatmul.bf16.gmra.mxu1 %v11065_v59  ;;  %v8669_v59 = vld [vmem:[%s11268_s17 + $0x2b8] sm:$0xff] }
 0x717   : > { %v8873_v21 = vmax.f32 %v8745_v40, 0.0 }
 0x719   : > { %9001 = vst [vmem:[%s15784_s18 + $0x118] sm:$0xff] %v8873_v21 }
 0x71a   : > { %v8524_v25 = vpop.f32.mrf.mxu1 }
 0x71b   : > { %v8525_v11 = vadd.f32 %v8524_v25, %v16176_v38 }
 0x71d   : > { %v8749_v12 = vadd.f32 %v8621_v24, %v8525_v11 }
 0x71f   : > { %v8877_v28 = vmax.f32 %v8749_v12, 0.0  ;;  %v8673_v12 = vld [vmem:[%s11268_s17 + $0x2d8] sm:$0xff] }
 0x721   : > { %9005 = vst [vmem:[%s15784_s18 + $0x138] sm:$0xff] %v8877_v28 }
 0x722   : > { %v8527_v47 = vpop.f32.mrf.mxu1 }
 0x723   : > { %v8528_v55 = vadd.f32 %v8527_v47, %v16176_v38 }
 0x725   : > { %v8753_v54 = vadd.f32 %v8625_v48, %v8528_v55  ;;  %8566 = vmatmul.bf16.gmra.mxu1 %v15967_v33 }
 0x727   : > { %v8881_v14 = vmax.f32 %v8753_v54, 0.0  ;;  %v8677_v54 = vld [vmem:[%s11268_s17 + $0x2f8] sm:$0xff] }
 0x729   : > { %9009 = vst [vmem:[%s15784_s18 + $0x158] sm:$0xff] %v8881_v14 }
 0x72a   : > { %v8529_v53 = vpop.f32.mrf.mxu1 }
 0x72b   : > { %v8530_v0 = vadd.f32 %v8529_v53, %v16176_v38 }
 0x72d   : > { %v8757_v56 = vadd.f32 %v8629_v39, %v8530_v0 }
 0x72f   : > { %v8885_v18 = vmax.f32 %v8757_v56, 0.0  ;;  %v8681_v56 = vld [vmem:[%s11268_s17 + $0x318] sm:$0xff] }
 0x731   : > { %9013 = vst [vmem:[%s15784_s18 + $0x178] sm:$0xff] %v8885_v18 }
 0x732   : > { %v8532_v8 = vpop.f32.mrf.mxu1 }
 0x733   : > { %v8533_v63 = vadd.f32 %v8532_v8, %v16176_v38 }
 0x735   : > { %v8761_v16 = vadd.f32 %v8633_v60, %v8533_v63  ;;  %8571 = vmatmul.bf16.gmra.mxu1 %v16003_v44 }
 0x737   : > { %v8889_v33 = vmax.f32 %v8761_v16, 0.0  ;;  %v8685_v16 = vld [vmem:[%s11268_s17 + $0x338] sm:$0xff] }
 0x739   : > { %9017 = vst [vmem:[%s15784_s18 + $0x198] sm:$0xff] %v8889_v33 }
 0x73a   : > { %v8534_v22 = vpop.f32.mrf.mxu1 }
 0x73b   : > { %v8535_v10 = vadd.f32 %v8534_v22, %v16176_v38 }
 0x73d   : > { %v8765_v23 = vadd.f32 %v8637_v45, %v8535_v10 }
 0x73f   : > { %v8893_v35 = vmax.f32 %v8765_v23, 0.0  ;;  %v8689_v23 = vld [vmem:[%s11268_s17 + $0x358] sm:$0xff] }
 0x741   : > { %9021 = vst [vmem:[%s15784_s18 + $0x1b8] sm:$0xff] %v8893_v35 }
 0x742   : > { %v8537_v61 = vpop.f32.mrf.mxu1 }
 0x743   : > { %v8538_v43 = vadd.f32 %v8537_v61, %v16176_v38 }
 0x745   : > { %v8769_v37 = vadd.f32 %v8641_v57, %v8538_v43  ;;  %8576 = vmatmul.bf16.gmra.mxu1 %v16030_v2 }
 0x747   : > { %v8897_v44 = vmax.f32 %v8769_v37, 0.0  ;;  %v8693_v37 = vld [vmem:[%s11268_s17 + $0x378] sm:$0xff] }
 0x749   : > { %9025 = vst [vmem:[%s15784_s18 + $0x1d8] sm:$0xff] %v8897_v44 }
 0x74a   : > { %v8539_v52 = vpop.f32.mrf.mxu1 }
 0x74b   : > { %v8540_v49 = vadd.f32 %v8539_v52, %v16176_v38 }
 0x74d   : > { %v8773_v17 = vadd.f32 %v8645_v5, %v8540_v49 }
 0x74f   : > { %v8901_v9 = vmax.f32 %v8773_v17, 0.0  ;;  %v8697_v17 = vld [vmem:[%s11268_s17 + $0x398] sm:$0xff] }
 0x751   : > { %9029 = vst [vmem:[%s15784_s18 + $0x1f8] sm:$0xff] %v8901_v9 }
 0x752   : > { %v8542_v32 = vpop.f32.mrf.mxu1 }
 0x753   : > { %v8543_v58 = vadd.f32 %v8542_v32, %v16176_v38 }
 0x755   : > { %v8777_v26 = vadd.f32 %v8649_v29, %v8543_v58 }
 0x757   : > { %v8905_v2 = vmax.f32 %v8777_v26, 0.0  ;;  %v8701_v26 = vld [vmem:[%s11268_s17 + $0x3b8] sm:$0xff] }
 0x759   : > { %9033 = vst [vmem:[%s15784_s18 + $0x218] sm:$0xff] %v8905_v2 }
 0x75a   : > { %v8544_v1 = vpop.f32.mrf.mxu1 }
 0x75b   : > { %v8545_v7 = vadd.f32 %v8544_v1, %v16176_v38 }
 0x75d   : > { %v8781_v3 = vadd.f32 %v8653_v41, %v8545_v7 }
 0x75f   : > { %v8909_v4 = vmax.f32 %v8781_v3, 0.0  ;;  %v8705_v3 = vld [vmem:[%s11268_s17 + $0x3d8] sm:$0xff] }
 0x761   : > { %9037 = vst [vmem:[%s15784_s18 + $0x238] sm:$0xff] %v8909_v4 }
 0x762   : > { %v8547_v6 = vpop.f32.mrf.mxu1 }
 0x763   : > { %v8548_v36 = vadd.f32 %v8547_v6, %v16176_v38 }
 0x765   : > { %v8785_v13 = vadd.f32 %v8657_v42, %v8548_v36 }
 0x767   : > { %v8913_v19 = vmax.f32 %v8785_v13, 0.0  ;;  %v8709_v13 = vld [vmem:[%s11268_s17 + $0x3f8] sm:$0xff] }
 0x769   : > { %9041 = vst [vmem:[%s15784_s18 + $0x258] sm:$0xff] %v8913_v19 }
 0x76a   : > { %v8549_v62 = vpop.f32.mrf.mxu1 }
 0x76b   : > { %v8550_v34 = vadd.f32 %v8549_v62, %v16176_v38 }
 0x76d   : > { %v8789_v30 = vadd.f32 %v8661_v51, %v8550_v34 }
 0x76f   : > { %v8917_v31 = vmax.f32 %v8789_v30, 0.0 }
 0x771   : > { %9045 = vst [vmem:[%s15784_s18 + $0x278] sm:$0xff] %v8917_v31 }
 0x772   : > { %v8552_v46 = vpop.f32.mrf.mxu1 }
 0x773   : > { %v8553_v20 = vadd.f32 %v8552_v46, %v16176_v38 }
 0x775   : > { %v8793_v27 = vadd.f32 %v8665_v15, %v8553_v20 }
 0x777   : > { %v8921_v50 = vmax.f32 %v8793_v27, 0.0 }
 0x779   : > { %9049 = vst [vmem:[%s15784_s18 + $0x298] sm:$0xff] %v8921_v50 }
 0x77a   : > { %v8554_v40 = vpop.f32.mrf.mxu1 }
 0x77b   : > { %v8555_v21 = vadd.f32 %v8554_v40, %v16176_v38 }
 0x77d   : > { %v8797_v25 = vadd.f32 %v8669_v59, %v8555_v21 }
 0x77f   : > { %v8925_v24 = vmax.f32 %v8797_v25, 0.0 }
 0x781   : > { %9053 = vst [vmem:[%s15784_s18 + $0x2b8] sm:$0xff] %v8925_v24 }
 0x782   : > { %v8557_v11 = vpop.f32.mrf.mxu1 }
 0x783   : > { %v8558_v28 = vadd.f32 %v8557_v11, %v16176_v38 }
 0x785   : > { %v8801_v47 = vadd.f32 %v8673_v12, %v8558_v28 }
 0x787   : > { %v8929_v48 = vmax.f32 %v8801_v47, 0.0 }
 0x789   : > { %9057 = vst [vmem:[%s15784_s18 + $0x2d8] sm:$0xff] %v8929_v48 }
 0x78a   : > { %v8559_v55 = vpop.f32.mrf.mxu1 }
 0x78b   : > { %v8560_v14 = vadd.f32 %v8559_v55, %v16176_v38 }
 0x78d   : > { %v8805_v53 = vadd.f32 %v8677_v54, %v8560_v14 }
 0x78f   : > { %v8933_v39 = vmax.f32 %v8805_v53, 0.0 }
 0x791   : > { %9061 = vst [vmem:[%s15784_s18 + $0x2f8] sm:$0xff] %v8933_v39 }
 0x792   : > { %v8562_v0 = vpop.f32.mrf.mxu1 }
 0x793   : > { %v8563_v18 = vadd.f32 %v8562_v0, %v16176_v38 }
 0x795   : > { %v8809_v8 = vadd.f32 %v8681_v56, %v8563_v18 }
 0x797   : > { %v8937_v60 = vmax.f32 %v8809_v8, 0.0 }
 0x799   : > { %9065 = vst [vmem:[%s15784_s18 + $0x318] sm:$0xff] %v8937_v60 }
 0x79a   : > { %v8564_v63 = vpop.f32.mrf.mxu1 }
 0x79b   : > { %v8565_v33 = vadd.f32 %v8564_v63, %v16176_v38 }
 0x79d   : > { %v8813_v22 = vadd.f32 %v8685_v16, %v8565_v33 }
 0x79f   : > { %v8941_v45 = vmax.f32 %v8813_v22, 0.0 }
 0x7a1   : > { %9069 = vst [vmem:[%s15784_s18 + $0x338] sm:$0xff] %v8941_v45 }
 0x7a2   : > { %v8567_v10 = vpop.f32.mrf.mxu1 }
 0x7a3   : > { %v8568_v35 = vadd.f32 %v8567_v10, %v16176_v38 }
 0x7a5   : > { %v8817_v61 = vadd.f32 %v8689_v23, %v8568_v35 }
 0x7a7   : > { %v8945_v57 = vmax.f32 %v8817_v61, 0.0 }
 0x7a9   : > { %9073 = vst [vmem:[%s15784_s18 + $0x358] sm:$0xff] %v8945_v57 }
 0x7aa   : > { %v8569_v43 = vpop.f32.mrf.mxu1 }
 0x7ab   : > { %v8570_v44 = vadd.f32 %v8569_v43, %v16176_v38 }
 0x7ad   : > { %v8821_v52 = vadd.f32 %v8693_v37, %v8570_v44 }
 0x7af   : > { %v8949_v5 = vmax.f32 %v8821_v52, 0.0 }
 0x7b1   : > { %9077 = vst [vmem:[%s15784_s18 + $0x378] sm:$0xff] %v8949_v5 }
 0x7b2   : > { %v8572_v49 = vpop.f32.mrf.mxu1 }
 0x7b3   : > { %v8573_v9 = vadd.f32 %v8572_v49, %v16176_v38 }
 0x7b5   : > { %v8825_v32 = vadd.f32 %v8697_v17, %v8573_v9 }
 0x7b7   : > { %v8953_v29 = vmax.f32 %v8825_v32, 0.0 }
 0x7b9   : > { %9081 = vst [vmem:[%s15784_s18 + $0x398] sm:$0xff] %v8953_v29 }
 0x7ba   : > { %v8574_v58 = vpop.f32.mrf.mxu1 }
 0x7bb   : > { %v8575_v2 = vadd.f32 %v8574_v58, %v16176_v38 }
 0x7bd   : > { %v8829_v1 = vadd.f32 %v8701_v26, %v8575_v2 }
 0x7bf   : > { %v8957_v41 = vmax.f32 %v8829_v1, 0.0 }
 0x7c1   : > { %9085 = vst [vmem:[%s15784_s18 + $0x3b8] sm:$0xff] %v8957_v41 }
 0x7c2   : > { %v8577_v7 = vpop.f32.mrf.mxu1 }
 0x7c3   : > { %v8578_v4 = vadd.f32 %v8577_v7, %v16176_v38 }
 0x7c5   : > { %v8833_v6 = vadd.f32 %v8705_v3, %v8578_v4 }
 0x7c7   : > { %v8961_v42 = vmax.f32 %v8833_v6, 0.0 }
 0x7c9   : > { %9089 = vst [vmem:[%s15784_s18 + $0x3d8] sm:$0xff] %v8961_v42 }
 0x7ca   : > { %v8579_v36 = vpop.f32.mrf.mxu1 }
 0x7cb   : > { %v8580_v19 = vadd.f32 %v8579_v36, %v16176_v38 }
 0x7cd   : > { %v8837_v62 = vadd.f32 %v8709_v13, %v8580_v19 }
 0x7cf   : > { %v8965_v51 = vmax.f32 %v8837_v62, 0.0 }
 0x7d1   : > { %9093 = vst [vmem:[%s15784_s18 + $0x3f8] sm:$0xff] %v8965_v51 }
 0x7d2   : > { %11093 = shalt.err (!%p11090_p3)
}
 0x7d3   : > { %s11131_s15 = smov 512   ;;  %s11132_s18 = smov 32  }
 0x7d4   : > { %11002 = dma.vmem_to_hbm [thread:$0]  (%p11211_p5), %s9108_s19, 16384, %s9110_s20, %s9095_s28, %s11131_s15, %s11131_s15, %s11132_s18  }
 0x7d5 PF: > { %p11008_p4 = scmp.ge.s32.totalorder %s11128_s27, 2  ;;  %s9124_s13 = sand.u32 1, %s11116_s24  }
 0x7d6   : > { %s9125_s14 = scalar_lea.sflag [#allocation7], %s9124_s13 }
 0x7d7   : > { %p11005_p7 = pnand %p11008_p4, %p11215_p6 }
 0x7d9   : > { %p11006_p8 = pneg %p11005_p7 }
 0x7db   : > { %11111 = dma.done.wait (%p11006_p8), %s9125_s14, 16384  }
 0x7dc   : > { %11113 = vsyncadd (%p11006_p8), %s9125_s14, 4294950912  ;;  %p17_p9 = scmp.ge.s32.totalorder %s11198_s30, 6   ;;  %s17310_s24 = smov %s11120_s25 }
 0x7dd   : > { %s17311_s25 = smov %s11124_s26  ;;  %s17312_s26 = smov %s11209_s10 }
 0x7de   : > { %s17313_s27 = smov %s11198_s30  ;;  %19 = sbr.rel (!%p17_p9) target bundleno = 3 (0x3), region = 83 }
 0x7e3   :  { %9131 = vsyncpa [#allocation7], 1 }
 0x7e4   :  { %9133 = vsyncpa [#allocation7 + $0x1], 1 }

</bundles_post_ra>
